<compile_context>
chip_gen: v7x
topology: tpu7x:2x2x1
jax: 0.10.0
libtpu: 0.0.40
codegen_flags: <defaults>
</compile_context>

<pallas_src>
import numpy as np
import jax
import jax.numpy as jnp
from jax.experimental import pallas as pl
from jax.experimental.pallas import tpu as pltpu

PAR = {'nodes': [450, 450], 'filters': [16, 8, 8, 16, 16, 16],
       'kernels': [2, 4, 8, 8, 4, 2], 'strides': [2, 2, 4, 4, 2, 2]}
LEAKY_SLOPE = 0.01   # nn.LeakyReLU default
BN_EPS = 1e-5        # nn.BatchNorm default


# ----------------------------- Pallas kernels --------------------------------
def _conv_mm_kernel(x_ref, w_ref, p_ref, o_ref):
    """One M-tile of BN_eval(LeakyReLU(x @ w + b)), BN pre-folded.

    x: [tm, K] bf16, w: [K, N] bf16, p: [3, N] f32 = (bias, bn_scale, bn_shift).
    """
    y = jnp.dot(x_ref[...], w_ref[...], preferred_element_type=jnp.float32)
    p = p_ref[...]
    y = y + p[0:1, :]
    y = jnp.where(y >= 0, y, LEAKY_SLOPE * y)
    y = y * p[1:2, :] + p[2:3, :]
    o_ref[...] = y.astype(o_ref.dtype)


def _head_kernel(x_ref, w1_ref, p1_ref, w2_ref, b2_ref, o_ref):
    """Fused head: h = BN(LeakyReLU(x @ w1 + b1)); out = h @ [w_mu | w_lv] + b.

    h stays on-chip (never round-trips to HBM); w2/b2 are zero-padded to a
    lane-dense 128-column output so the store is unmasked.
    """
    h = jnp.dot(x_ref[...], w1_ref[...], preferred_element_type=jnp.float32)
    p1 = p1_ref[...]
    h = h + p1[0:1, :]
    h = jnp.where(h >= 0, h, LEAKY_SLOPE * h)
    h = h * p1[1:2, :] + p1[2:3, :]
    out = jnp.dot(h.astype(w2_ref.dtype), w2_ref[...],
                  preferred_element_type=jnp.float32)
    o_ref[...] = out + b2_ref[...]


# ------------------------------ wrappers --------------------------------------
def _bn_fold(p):
    """BatchNorm(eval) -> per-channel affine: scale, shift."""
    scale = p['gamma'] * jax.lax.rsqrt(p['var'] + BN_EPS)
    shift = p['beta'] - p['mean'] * scale
    return scale, shift


def _pick_tm(M, K, itemsize=2, max_block_bytes=8 << 20):
    """Cover M in <= 2 grid steps (v7x megacore) unless the block would be huge."""
    if M <= 1024:
        return M                                   # single full-extent block
    tm = pl.cdiv(pl.cdiv(M, 2), 8) * 8             # two sublane-aligned steps
    cap = max(256, (max_block_bytes // (K * itemsize)) // 8 * 8)
    return min(tm, cap)


def fused_conv_mm(patches, w, b, scale, shift, out_dtype=jnp.bfloat16):
    """y = BN_eval(LeakyReLU(patches @ w + b)) on the MXU, tiled along M."""
    M, K = patches.shape
    N = w.shape[1]
    tm = _pick_tm(M, K)
    p = jnp.stack([b, scale, shift]).astype(jnp.float32)          # (3, N)
    return pl.pallas_call(
        _conv_mm_kernel,
        grid=(pl.cdiv(M, tm),),
        in_specs=[
            pl.BlockSpec((tm, K), lambda i: (i, 0)),   # patch tile
            pl.BlockSpec((K, N), lambda i: (0, 0)),    # weight (resident)
            pl.BlockSpec((3, N), lambda i: (0, 0)),    # bias / bn scale / bn shift
        ],
        out_specs=pl.BlockSpec((tm, N), lambda i: (i, 0)),
        out_shape=jax.ShapeDtypeStruct((M, N), out_dtype),
        compiler_params=pltpu.CompilerParams(
            dimension_semantics=("parallel",)),
    )(patches.astype(jnp.bfloat16), w.astype(jnp.bfloat16), p)


def fused_head(flat, params):
    """Linear(200,450)+LeakyReLU+BN1d and the mu/log_var heads in one kernel."""
    B, K1 = flat.shape
    lin = params['lin']
    N1 = lin['w'].shape[1]
    latent = params['mu']['w'].shape[1]
    scale1, shift1 = _bn_fold(lin)
    p1 = jnp.stack([lin['b'], scale1, shift1]).astype(jnp.float32)  # (3, N1)

    # Fuse mu & log_var heads: concat along N, zero-pad to 128 lanes.
    w2 = jnp.concatenate([params['mu']['w'], params['lv']['w']], axis=1)
    b2 = jnp.concatenate([params['mu']['b'], params['lv']['b']])
    n2 = w2.shape[1]
    n2p = pl.cdiv(n2, 128) * 128
    w2 = jnp.pad(w2, ((0, 0), (0, n2p - n2)))
    b2 = jnp.pad(b2, (0, n2p - n2)).reshape(1, n2p).astype(jnp.float32)

    out = pl.pallas_call(
        _head_kernel,
        grid=(1,),
        in_specs=[
            pl.BlockSpec((B, K1), lambda i: (0, 0)),
            pl.BlockSpec((K1, N1), lambda i: (0, 0)),
            pl.BlockSpec((3, N1), lambda i: (0, 0)),
            pl.BlockSpec((N1, n2p), lambda i: (0, 0)),
            pl.BlockSpec((1, n2p), lambda i: (0, 0)),
        ],
        out_specs=pl.BlockSpec((B, n2p), lambda i: (0, 0)),
        out_shape=jax.ShapeDtypeStruct((B, n2p), jnp.float32),
    )(flat.astype(jnp.bfloat16), lin['w'].astype(jnp.bfloat16), p1,
      w2.astype(jnp.bfloat16), b2)
    mu = out[:, :latent]
    log_var = out[:, latent:2 * latent]
    return mu, log_var


# ------------------------------ JAX glue --------------------------------------
def _space_to_depth_conv1(x):
    """[B, 1, H, W] with kernel == stride == 2: pure reshape to patches
    [B*(H/2)*(W/2), 4]; feature order (kh, kw) == PyTorch (c, kh, kw) for c=1."""
    B, _, H, W = x.shape
    oh, ow = H // 2, W // 2
    p = x.reshape(B, oh, 2, ow, 2).transpose(0, 1, 3, 2, 4)
    return p.reshape(B * oh * ow, 4), oh, ow


def _im2col_nhwc(x, k, stride):
    """NHWC -> patches [B*OH*OW, K*K*C], feature order (kh, kw, c)."""
    B, H, W, C = x.shape
    oh = (H - k) // stride + 1
    ow = (W - k) // stride + 1
    cols = []
    for i in range(k):
        for j in range(k):
            cols.append(x[:, i:i + (oh - 1) * stride + 1:stride,
                            j:j + (ow - 1) * stride + 1:stride, :])
    patches = jnp.stack(cols, axis=3)               # [B, OH, OW, K*K, C]
    return patches.reshape(B * oh * ow, k * k * C), oh, ow


def _conv_layer(patches, p):
    scale, shift = _bn_fold(p)
    return fused_conv_mm(patches, p['w'], p['b'], scale, shift)


def encoder_forward(x, params):
    B = x.shape[0]
    # conv1 -> LeakyReLU -> BN   (space-to-depth patches, no strided im2col)
    patches, oh, ow = _space_to_depth_conv1(x)
    h = _conv_layer(patches, params['cnn1']).reshape(B, oh, ow, -1)  # NHWC
    # Dropout2d(0.2) is identity in eval mode.
    # conv2 -> LeakyReLU -> BN
    patches, oh, ow = _im2col_nhwc(h, PAR['kernels'][1], PAR['strides'][1])
    h = _conv_layer(patches, params['cnn2']).reshape(B, oh, ow, -1)
    # conv3 -> LeakyReLU -> BN
    patches, oh, ow = _im2col_nhwc(h, PAR['kernels'][2], PAR['strides'][2])
    h = _conv_layer(patches, params['cnn3']).reshape(B, oh, ow, -1)
    # nn.Flatten(start_dim=1) on NCHW == channel-major flatten (tiny transpose).
    flat = h.transpose(0, 3, 1, 2).reshape(B, -1)
    # Linear + LeakyReLU + BN1d + (mu, log_var) fused in a single kernel.
    mu, log_var = fused_head(flat, params)
    # TODO(synk): training-mode Dropout2d / batch-stat BatchNorm / eps~N(0,1)
    # in reparameterize are stochastic; eval-mode semantics used (z = mu).
    z = mu
    return z, mu, log_var


# --------------------------- parameter init ------------------------------------
def init_params(key, latent, dim=5):
    f, ks = PAR['filters'], PAR['kernels']
    keys = iter(jax.random.split(key, 32))

    def uniform(shape, fan_in):
        bound = 1.0 / float(np.sqrt(fan_in))
        return jax.random.uniform(next(keys), shape, jnp.float32, -bound, bound)

    def bn_block(n):
        return {
            'gamma': 1.0 + 0.1 * jax.random.normal(next(keys), (n,), jnp.float32),
            'beta': 0.1 * jax.random.normal(next(keys), (n,), jnp.float32),
            'mean': 0.05 * jax.random.normal(next(keys), (n,), jnp.float32),
            'var': 1.0 + 0.1 * jax.random.uniform(next(keys), (n,), jnp.float32),
        }

    def conv_block(cin, cout, k):
        # Weight layout [KH*KW*Cin, Cout], rows ordered (kh, kw, cin):
        # equivalent to torch_w.permute(2, 3, 1, 0).reshape(k*k*cin, cout).
        fan_in = cin * k * k
        d = {'w': uniform((k * k * cin, cout), fan_in),
             'b': uniform((cout,), fan_in)}
        d.update(bn_block(cout))
        return d

    def lin_block(fin, fout, with_bn):
        d = {'w': uniform((fin, fout), fin), 'b': uniform((fout,), fin)}
        if with_bn:
            d.update(bn_block(fout))
        return d

    return {
        'cnn1': conv_block(1, f[0], ks[0]),
        'cnn2': conv_block(f[0], f[1], ks[1]),
        'cnn3': conv_block(f[1], f[2], ks[2]),
        'lin': lin_block(f[2] * dim * dim, PAR['nodes'][0], True),
        'mu': lin_block(PAR['nodes'][0], latent, False),
        'lv': lin_block(PAR['nodes'][0], latent, False),
    }


# --------------------------------- main -----------------------------------------
if __name__ == "__main__":
    latent = 10
    B = 2
    key = jax.random.PRNGKey(0)
    kx, kp = jax.random.split(key)
    # 100x100 input -> conv1: 50x50 -> conv2: 24x24 -> conv3: 5x5 (=> 8*5*5=200).
    x = jax.random.normal(kx, (B, 1, 100, 100), dtype=jnp.float32)
    params = init_params(kp, latent)

    z, mu, log_var = jax.jit(encoder_forward)(x, params)
    jax.block_until_ready((z, mu, log_var))

    assert z.shape == (B, latent)
    assert mu.shape == (B, latent)
    assert log_var.shape == (B, latent)
    assert bool(jnp.all(z == mu))  # eval-mode reparameterize
    print("KERNEL_OK")
</pallas_src>

<mosaic_0001>
module attributes {stable_mosaic.version = 11 : i64} {
  func.func @_conv_mm_kernel(%arg0: i32, %arg1: memref<2504x4xbf16, #tpu.memory_space<vmem>>, %arg2: memref<4x16xbf16, #tpu.memory_space<vmem>>, %arg3: memref<3x16xf32, #tpu.memory_space<vmem>>, %arg4: memref<2504x16xbf16, #tpu.memory_space<vmem>>) attributes {dimension_semantics = [#tpu.dimension_semantics<parallel>], iteration_bounds = array<i64: 2>, scalar_prefetch = 0 : i64, scratch_operands = 0 : i64, tpu.core_type = #tpu.core_type<tc>, window_params = [{transform_indices = @transform_0, window_bounds = array<i64: 2504, 4>}, {pipeline_mode = #tpu.pipeline_mode<synchronous>, transform_indices = @transform_1, window_bounds = array<i64: 4, 16>}, {pipeline_mode = #tpu.pipeline_mode<synchronous>, transform_indices = @transform_2, window_bounds = array<i64: 3, 16>}, {transform_indices = @transform_3, window_bounds = array<i64: 2504, 16>}]} {
    %c0 = arith.constant 0 : index
    %c0_0 = arith.constant 0 : index
    %0 = vector.load %arg1[%c0, %c0_0] : memref<2504x4xbf16, #tpu.memory_space<vmem>>, vector<2504x4xbf16>
    %c0_1 = arith.constant 0 : index
    %c0_2 = arith.constant 0 : index
    %1 = vector.load %arg2[%c0_1, %c0_2] : memref<4x16xbf16, #tpu.memory_space<vmem>>, vector<4x16xbf16>
    %cst = arith.constant dense<0.000000e+00> : vector<2504x16xf32>
    %2 = tpu.matmul %0, %1, %cst {dimension_numbers = #tpu.dot_dimension_numbers<[1], [0], [0], [1], [0, 0, 1, 1], [], []>} : vector<2504x4xbf16>, vector<4x16xbf16>, vector<2504x16xf32> -> vector<2504x16xf32>
    %c0_3 = arith.constant 0 : index
    %c0_4 = arith.constant 0 : index
    %3 = vector.load %arg3[%c0_3, %c0_4] : memref<3x16xf32, #tpu.memory_space<vmem>>, vector<3x16xf32>
    %4 = vector.extract_strided_slice %3 {offsets = [0, 0], sizes = [1, 16], strides = [1, 1]} : vector<3x16xf32> to vector<1x16xf32>
    %5 = vector.broadcast %4 : vector<1x16xf32> to vector<2504x16xf32>
    %6 = arith.addf %2, %5 : vector<2504x16xf32>
    %cst_5 = arith.constant 0.000000e+00 : f32
    %7 = vector.broadcast %cst_5 : f32 to vector<2504x16xf32>
    %8 = arith.cmpf oge, %6, %7 : vector<2504x16xf32>
    %cst_6 = arith.constant 0.00999999977 : f32
    %9 = vector.broadcast %cst_6 : f32 to vector<2504x16xf32>
    %10 = arith.mulf %9, %6 : vector<2504x16xf32>
    %11 = arith.select %8, %6, %10 : vector<2504x16xi1>, vector<2504x16xf32>
    %12 = vector.extract_strided_slice %3 {offsets = [1, 0], sizes = [1, 16], strides = [1, 1]} : vector<3x16xf32> to vector<1x16xf32>
    %13 = vector.broadcast %12 : vector<1x16xf32> to vector<2504x16xf32>
    %14 = arith.mulf %11, %13 : vector<2504x16xf32>
    %15 = vector.extract_strided_slice %3 {offsets = [2, 0], sizes = [1, 16], strides = [1, 1]} : vector<3x16xf32> to vector<1x16xf32>
    %16 = vector.broadcast %15 : vector<1x16xf32> to vector<2504x16xf32>
    %17 = arith.addf %14, %16 : vector<2504x16xf32>
    %18 = arith.truncf %17 : vector<2504x16xf32> to vector<2504x16xbf16>
    %c0_7 = arith.constant 0 : index
    %c0_8 = arith.constant 0 : index
    %19 = vector.load %arg4[%c0_7, %c0_8] : memref<2504x16xbf16, #tpu.memory_space<vmem>>, vector<2504x16xbf16>
    tpu.vector_store %arg4[%c0_7, %c0_8], %18 {strides = array<i32>} : memref<2504x16xbf16, #tpu.memory_space<vmem>>, vector<2504x16xbf16>,
    return
  }
  func.func @transform_0(%arg0: i32) -> (i32, i32) {
    %c0_i32 = arith.constant 0 : i32
    %c0_i32_0 = arith.constant 0 : i32
    return %arg0, %c0_i32 : i32, i32
  }
  func.func @transform_1(%arg0: i32) -> (i32, i32) {
    %c0_i32 = arith.constant 0 : i32
    %c0_i32_0 = arith.constant 0 : i32
    %c0_i32_1 = arith.constant 0 : i32
    return %c0_i32, %c0_i32_0 : i32, i32
  }
  func.func @transform_2(%arg0: i32) -> (i32, i32) {
    %c0_i32 = arith.constant 0 : i32
    %c0_i32_0 = arith.constant 0 : i32
    %c0_i32_1 = arith.constant 0 : i32
    return %c0_i32, %c0_i32_0 : i32, i32
  }
  func.func @transform_3(%arg0: i32) -> (i32, i32) {
    %c0_i32 = arith.constant 0 : i32
    %c0_i32_0 = arith.constant 0 : i32
    return %arg0, %c0_i32 : i32, i32
  }
}

module attributes {stable_mosaic.version = 11 : i64} {
  func.func @_conv_mm_kernel(%arg0: i32, %arg1: memref<576x256xbf16, #tpu.memory_space<vmem>>, %arg2: memref<256x8xbf16, #tpu.memory_space<vmem>>, %arg3: memref<3x8xf32, #tpu.memory_space<vmem>>, %arg4: memref<576x8xbf16, #tpu.memory_space<vmem>>) attributes {dimension_semantics = [#tpu.dimension_semantics<parallel>], iteration_bounds = array<i64: 2>, scalar_prefetch = 0 : i64, scratch_operands = 0 : i64, tpu.core_type = #tpu.core_type<tc>, window_params = [{transform_indices = @transform_0, window_bounds = array<i64: 576, 256>}, {pipeline_mode = #tpu.pipeline_mode<synchronous>, transform_indices = @transform_1, window_bounds = array<i64: 256, 8>}, {pipeline_mode = #tpu.pipeline_mode<synchronous>, transform_indices = @transform_2, window_bounds = array<i64: 3, 8>}, {transform_indices = @transform_3, window_bounds = array<i64: 576, 8>}]} {
    %c0 = arith.constant 0 : index
    %c0_0 = arith.constant 0 : index
    %0 = vector.load %arg1[%c0, %c0_0] : memref<576x256xbf16, #tpu.memory_space<vmem>>, vector<576x256xbf16>
    %c0_1 = arith.constant 0 : index
    %c0_2 = arith.constant 0 : index
    %1 = vector.load %arg2[%c0_1, %c0_2] : memref<256x8xbf16, #tpu.memory_space<vmem>>, vector<256x8xbf16>
    %cst = arith.constant dense<0.000000e+00> : vector<576x8xf32>
    %2 = tpu.matmul %0, %1, %cst {dimension_numbers = #tpu.dot_dimension_numbers<[1], [0], [0], [1], [0, 0, 1, 1], [], []>} : vector<576x256xbf16>, vector<256x8xbf16>, vector<576x8xf32> -> vector<576x8xf32>
    %c0_3 = arith.constant 0 : index
    %c0_4 = arith.constant 0 : index
    %3 = vector.load %arg3[%c0_3, %c0_4] : memref<3x8xf32, #tpu.memory_space<vmem>>, vector<3x8xf32>
    %4 = vector.extract_strided_slice %3 {offsets = [0, 0], sizes = [1, 8], strides = [1, 1]} : vector<3x8xf32> to vector<1x8xf32>
    %5 = vector.broadcast %4 : vector<1x8xf32> to vector<576x8xf32>
    %6 = arith.addf %2, %5 : vector<576x8xf32>
    %cst_5 = arith.constant 0.000000e+00 : f32
    %7 = vector.broadcast %cst_5 : f32 to vector<576x8xf32>
    %8 = arith.cmpf oge, %6, %7 : vector<576x8xf32>
    %cst_6 = arith.constant 0.00999999977 : f32
    %9 = vector.broadcast %cst_6 : f32 to vector<576x8xf32>
    %10 = arith.mulf %9, %6 : vector<576x8xf32>
    %11 = arith.select %8, %6, %10 : vector<576x8xi1>, vector<576x8xf32>
    %12 = vector.extract_strided_slice %3 {offsets = [1, 0], sizes = [1, 8], strides = [1, 1]} : vector<3x8xf32> to vector<1x8xf32>
    %13 = vector.broadcast %12 : vector<1x8xf32> to vector<576x8xf32>
    %14 = arith.mulf %11, %13 : vector<576x8xf32>
    %15 = vector.extract_strided_slice %3 {offsets = [2, 0], sizes = [1, 8], strides = [1, 1]} : vector<3x8xf32> to vector<1x8xf32>
    %16 = vector.broadcast %15 : vector<1x8xf32> to vector<576x8xf32>
    %17 = arith.addf %14, %16 : vector<576x8xf32>
    %18 = arith.truncf %17 : vector<576x8xf32> to vector<576x8xbf16>
    %c0_7 = arith.constant 0 : index
    %c0_8 = arith.constant 0 : index
    %19 = vector.load %arg4[%c0_7, %c0_8] : memref<576x8xbf16, #tpu.memory_space<vmem>>, vector<576x8xbf16>
    tpu.vector_store %arg4[%c0_7, %c0_8], %18 {strides = array<i32>} : memref<576x8xbf16, #tpu.memory_space<vmem>>, vector<576x8xbf16>,
    return
  }
  func.func @transform_0(%arg0: i32) -> (i32, i32) {
    %c0_i32 = arith.constant 0 : i32
    %c0_i32_0 = arith.constant 0 : i32
    return %arg0, %c0_i32 : i32, i32
  }
  func.func @transform_1(%arg0: i32) -> (i32, i32) {
    %c0_i32 = arith.constant 0 : i32
    %c0_i32_0 = arith.constant 0 : i32
    %c0_i32_1 = arith.constant 0 : i32
    return %c0_i32, %c0_i32_0 : i32, i32
  }
  func.func @transform_2(%arg0: i32) -> (i32, i32) {
    %c0_i32 = arith.constant 0 : i32
    %c0_i32_0 = arith.constant 0 : i32
    %c0_i32_1 = arith.constant 0 : i32
    return %c0_i32, %c0_i32_0 : i32, i32
  }
  func.func @transform_3(%arg0: i32) -> (i32, i32) {
    %c0_i32 = arith.constant 0 : i32
    %c0_i32_0 = arith.constant 0 : i32
    return %arg0, %c0_i32 : i32, i32
  }
}

module attributes {stable_mosaic.version = 11 : i64} {
  func.func @_conv_mm_kernel(%arg0: i32, %arg1: memref<50x512xbf16, #tpu.memory_space<vmem>>, %arg2: memref<512x8xbf16, #tpu.memory_space<vmem>>, %arg3: memref<3x8xf32, #tpu.memory_space<vmem>>, %arg4: memref<50x8xbf16, #tpu.memory_space<vmem>>) attributes {dimension_semantics = [#tpu.dimension_semantics<parallel>], iteration_bounds = array<i64: 1>, scalar_prefetch = 0 : i64, scratch_operands = 0 : i64, tpu.core_type = #tpu.core_type<tc>, window_params = [{transform_indices = @transform_0, window_bounds = array<i64: 50, 512>}, {pipeline_mode = #tpu.pipeline_mode<synchronous>, transform_indices = @transform_1, window_bounds = array<i64: 512, 8>}, {pipeline_mode = #tpu.pipeline_mode<synchronous>, transform_indices = @transform_2, window_bounds = array<i64: 3, 8>}, {transform_indices = @transform_3, window_bounds = array<i64: 50, 8>}]} {
    %c0 = arith.constant 0 : index
    %c0_0 = arith.constant 0 : index
    %0 = vector.load %arg1[%c0, %c0_0] : memref<50x512xbf16, #tpu.memory_space<vmem>>, vector<50x512xbf16>
    %c0_1 = arith.constant 0 : index
    %c0_2 = arith.constant 0 : index
    %1 = vector.load %arg2[%c0_1, %c0_2] : memref<512x8xbf16, #tpu.memory_space<vmem>>, vector<512x8xbf16>
    %cst = arith.constant dense<0.000000e+00> : vector<50x8xf32>
    %2 = tpu.matmul %0, %1, %cst {dimension_numbers = #tpu.dot_dimension_numbers<[1], [0], [0], [1], [0, 0, 1, 1], [], []>} : vector<50x512xbf16>, vector<512x8xbf16>, vector<50x8xf32> -> vector<50x8xf32>
    %c0_3 = arith.constant 0 : index
    %c0_4 = arith.constant 0 : index
    %3 = vector.load %arg3[%c0_3, %c0_4] : memref<3x8xf32, #tpu.memory_space<vmem>>, vector<3x8xf32>
    %4 = vector.extract_strided_slice %3 {offsets = [0, 0], sizes = [1, 8], strides = [1, 1]} : vector<3x8xf32> to vector<1x8xf32>
    %5 = vector.broadcast %4 : vector<1x8xf32> to vector<50x8xf32>
    %6 = arith.addf %2, %5 : vector<50x8xf32>
    %cst_5 = arith.constant 0.000000e+00 : f32
    %7 = vector.broadcast %cst_5 : f32 to vector<50x8xf32>
    %8 = arith.cmpf oge, %6, %7 : vector<50x8xf32>
    %cst_6 = arith.constant 0.00999999977 : f32
    %9 = vector.broadcast %cst_6 : f32 to vector<50x8xf32>
    %10 = arith.mulf %9, %6 : vector<50x8xf32>
    %11 = arith.select %8, %6, %10 : vector<50x8xi1>, vector<50x8xf32>
    %12 = vector.extract_strided_slice %3 {offsets = [1, 0], sizes = [1, 8], strides = [1, 1]} : vector<3x8xf32> to vector<1x8xf32>
    %13 = vector.broadcast %12 : vector<1x8xf32> to vector<50x8xf32>
    %14 = arith.mulf %11, %13 : vector<50x8xf32>
    %15 = vector.extract_strided_slice %3 {offsets = [2, 0], sizes = [1, 8], strides = [1, 1]} : vector<3x8xf32> to vector<1x8xf32>
    %16 = vector.broadcast %15 : vector<1x8xf32> to vector<50x8xf32>
    %17 = arith.addf %14, %16 : vector<50x8xf32>
    %18 = arith.truncf %17 : vector<50x8xf32> to vector<50x8xbf16>
    %c0_7 = arith.constant 0 : index
    %c0_8 = arith.constant 0 : index
    %19 = vector.load %arg4[%c0_7, %c0_8] : memref<50x8xbf16, #tpu.memory_space<vmem>>, vector<50x8xbf16>
    tpu.vector_store %arg4[%c0_7, %c0_8], %18 {strides = array<i32>} : memref<50x8xbf16, #tpu.memory_space<vmem>>, vector<50x8xbf16>,
    return
  }
  func.func @transform_0(%arg0: i32) -> (i32, i32) {
    %c0_i32 = arith.constant 0 : i32
    %c0_i32_0 = arith.constant 0 : i32
    return %arg0, %c0_i32 : i32, i32
  }
  func.func @transform_1(%arg0: i32) -> (i32, i32) {
    %c0_i32 = arith.constant 0 : i32
    %c0_i32_0 = arith.constant 0 : i32
    %c0_i32_1 = arith.constant 0 : i32
    return %c0_i32, %c0_i32_0 : i32, i32
  }
  func.func @transform_2(%arg0: i32) -> (i32, i32) {
    %c0_i32 = arith.constant 0 : i32
    %c0_i32_0 = arith.constant 0 : i32
    %c0_i32_1 = arith.constant 0 : i32
    return %c0_i32, %c0_i32_0 : i32, i32
  }
  func.func @transform_3(%arg0: i32) -> (i32, i32) {
    %c0_i32 = arith.constant 0 : i32
    %c0_i32_0 = arith.constant 0 : i32
    return %arg0, %c0_i32 : i32, i32
  }
}

module attributes {stable_mosaic.version = 11 : i64} {
  func.func @_head_kernel(%arg0: i32, %arg1: memref<2x200xbf16, #tpu.memory_space<vmem>>, %arg2: memref<200x450xbf16, #tpu.memory_space<vmem>>, %arg3: memref<3x450xf32, #tpu.memory_space<vmem>>, %arg4: memref<450x128xbf16, #tpu.memory_space<vmem>>, %arg5: memref<1x128xf32, #tpu.memory_space<vmem>>, %arg6: memref<2x128xf32, #tpu.memory_space<vmem>>) attributes {dimension_semantics = [#tpu.dimension_semantics<arbitrary>], iteration_bounds = array<i64: 1>, scalar_prefetch = 0 : i64, scratch_operands = 0 : i64, tpu.core_type = #tpu.core_type<tc>, window_params = [{pipeline_mode = #tpu.pipeline_mode<synchronous>, transform_indices = @transform_0, window_bounds = array<i64: 2, 200>}, {pipeline_mode = #tpu.pipeline_mode<synchronous>, transform_indices = @transform_1, window_bounds = array<i64: 200, 450>}, {pipeline_mode = #tpu.pipeline_mode<synchronous>, transform_indices = @transform_2, window_bounds = array<i64: 3, 450>}, {pipeline_mode = #tpu.pipeline_mode<synchronous>, transform_indices = @transform_3, window_bounds = array<i64: 450, 128>}, {pipeline_mode = #tpu.pipeline_mode<synchronous>, transform_indices = @transform_4, window_bounds = array<i64: 1, 128>}, {pipeline_mode = #tpu.pipeline_mode<synchronous>, transform_indices = @transform_5, window_bounds = array<i64: 2, 128>}]} {
    %c0 = arith.constant 0 : index
    %c0_0 = arith.constant 0 : index
    %0 = vector.load %arg1[%c0, %c0_0] : memref<2x200xbf16, #tpu.memory_space<vmem>>, vector<2x200xbf16>
    %c0_1 = arith.constant 0 : index
    %c0_2 = arith.constant 0 : index
    %1 = vector.load %arg2[%c0_1, %c0_2] : memref<200x450xbf16, #tpu.memory_space<vmem>>, vector<200x450xbf16>
    %cst = arith.constant dense<0.000000e+00> : vector<2x450xf32>
    %2 = tpu.matmul %0, %1, %cst {dimension_numbers = #tpu.dot_dimension_numbers<[1], [0], [0], [1], [0, 0, 1, 1], [], []>} : vector<2x200xbf16>, vector<200x450xbf16>, vector<2x450xf32> -> vector<2x450xf32>
    %c0_3 = arith.constant 0 : index
    %c0_4 = arith.constant 0 : index
    %3 = vector.load %arg3[%c0_3, %c0_4] : memref<3x450xf32, #tpu.memory_space<vmem>>, vector<3x450xf32>
    %4 = vector.extract_strided_slice %3 {offsets = [0, 0], sizes = [1, 450], strides = [1, 1]} : vector<3x450xf32> to vector<1x450xf32>
    %5 = vector.broadcast %4 : vector<1x450xf32> to vector<2x450xf32>
    %6 = arith.addf %2, %5 : vector<2x450xf32>
    %cst_5 = arith.constant 0.000000e+00 : f32
    %7 = vector.broadcast %cst_5 : f32 to vector<2x450xf32>
    %8 = arith.cmpf oge, %6, %7 : vector<2x450xf32>
    %cst_6 = arith.constant 0.00999999977 : f32
    %9 = vector.broadcast %cst_6 : f32 to vector<2x450xf32>
    %10 = arith.mulf %9, %6 : vector<2x450xf32>
    %11 = arith.select %8, %6, %10 : vector<2x450xi1>, vector<2x450xf32>
    %12 = vector.extract_strided_slice %3 {offsets = [1, 0], sizes = [1, 450], strides = [1, 1]} : vector<3x450xf32> to vector<1x450xf32>
    %13 = vector.broadcast %12 : vector<1x450xf32> to vector<2x450xf32>
    %14 = arith.mulf %11, %13 : vector<2x450xf32>
    %15 = vector.extract_strided_slice %3 {offsets = [2, 0], sizes = [1, 450], strides = [1, 1]} : vector<3x450xf32> to vector<1x450xf32>
    %16 = vector.broadcast %15 : vector<1x450xf32> to vector<2x450xf32>
    %17 = arith.addf %14, %16 : vector<2x450xf32>
    %18 = arith.truncf %17 : vector<2x450xf32> to vector<2x450xbf16>
    %c0_7 = arith.constant 0 : index
    %c0_8 = arith.constant 0 : index
    %19 = vector.load %arg4[%c0_7, %c0_8] : memref<450x128xbf16, #tpu.memory_space<vmem>>, vector<450x128xbf16>
    %cst_9 = arith.constant dense<0.000000e+00> : vector<2x128xf32>
    %20 = tpu.matmul %18, %19, %cst_9 {dimension_numbers = #tpu.dot_dimension_numbers<[1], [0], [0], [1], [0, 0, 1, 1], [], []>} : vector<2x450xbf16>, vector<450x128xbf16>, vector<2x128xf32> -> vector<2x128xf32>
    %c0_10 = arith.constant 0 : index
    %c0_11 = arith.constant 0 : index
    %21 = vector.load %arg5[%c0_10, %c0_11] : memref<1x128xf32, #tpu.memory_space<vmem>>, vector<1x128xf32>
    %22 = vector.broadcast %21 : vector<1x128xf32> to vector<2x128xf32>
    %23 = arith.addf %20, %22 : vector<2x128xf32>
    %c0_12 = arith.constant 0 : index
    %c0_13 = arith.constant 0 : index
    %24 = vector.load %arg6[%c0_12, %c0_13] : memref<2x128xf32, #tpu.memory_space<vmem>>, vector<2x128xf32>
    tpu.vector_store %arg6[%c0_12, %c0_13], %23 {strides = array<i32>} : memref<2x128xf32, #tpu.memory_space<vmem>>, vector<2x128xf32>,
    return
  }
  func.func @transform_0(%arg0: i32) -> (i32, i32) {
    %c0_i32 = arith.constant 0 : i32
    %c0_i32_0 = arith.constant 0 : i32
    %c0_i32_1 = arith.constant 0 : i32
    return %c0_i32, %c0_i32_0 : i32, i32
  }
  func.func @transform_1(%arg0: i32) -> (i32, i32) {
    %c0_i32 = arith.constant 0 : i32
    %c0_i32_0 = arith.constant 0 : i32
    %c0_i32_1 = arith.constant 0 : i32
    return %c0_i32, %c0_i32_0 : i32, i32
  }
  func.func @transform_2(%arg0: i32) -> (i32, i32) {
    %c0_i32 = arith.constant 0 : i32
    %c0_i32_0 = arith.constant 0 : i32
    %c0_i32_1 = arith.constant 0 : i32
    return %c0_i32, %c0_i32_0 : i32, i32
  }
  func.func @transform_3(%arg0: i32) -> (i32, i32) {
    %c0_i32 = arith.constant 0 : i32
    %c0_i32_0 = arith.constant 0 : i32
    %c0_i32_1 = arith.constant 0 : i32
    return %c0_i32, %c0_i32_0 : i32, i32
  }
  func.func @transform_4(%arg0: i32) -> (i32, i32) {
    %c0_i32 = arith.constant 0 : i32
    %c0_i32_0 = arith.constant 0 : i32
    %c0_i32_1 = arith.constant 0 : i32
    return %c0_i32, %c0_i32_0 : i32, i32
  }
  func.func @transform_5(%arg0: i32) -> (i32, i32) {
    %c0_i32 = arith.constant 0 : i32
    %c0_i32_0 = arith.constant 0 : i32
    %c0_i32_1 = arith.constant 0 : i32
    return %c0_i32, %c0_i32_0 : i32, i32
  }
}

</mosaic_0001>

<bundles_post_ra>
// kernel: encoder_forward.4
= control target key start
LH: loop header
LB: loop body
LE: loop exit
PB: predicated region body
PF: predicated region fallthrough
CT: control target
= control target key end

     0   :  { %s8776_s12 = smov 0   ;;  %s8778_s13 = smov 0   ;;  %s11227_s0 = inlined_call_operand.vmem [shape: bf16[5000,4], index: 0, kind: input, shape index: {}]   ;;  %s11228_s1 = inlined_call_operand.vmem [shape: bf16[4,16], index: 1, kind: input, shape index: {}]   ;;  %s11229_s2 = inlined_call_operand.vmem [shape: f32[3,16], index: 2, kind: input, shape index: {}]   ;;  %s11230_s3 = inlined_call_operand.vmem [shape: bf16[5000,16], index: 3, kind: output, shape index: {}]  }
   0x1   :  { %s8780_s14 = smov 0  }
   0x2 LB: > { %s8789_s15 = sadd.s32 4294967295, %s8720_s14   ;;  %s8791_s16 = sadd.s32 1, %s8720_s14   ;;  %s8720_s14 = sphi %s8780_s14, %s11237_s14   ;;  %s8716_s13 = sphi %s8778_s13, %s11236_s13   ;;  %s8712_s12 = sphi %s8776_s12, %s11235_s12  }
   0x3   : > { %s85_s17 = ssub.s32 %s8720_s14, %s8791_s16  ;;  %s88_s18 = sadd.s32 1, %s8716_s13 }
   0x4   : > { %p86_p0 = scmp.eq.s32.totalorder %s85_s17, 0  ;;  %p98_p1 = scmp.ne.s32.totalorder %s8716_s13, %s8712_s12 }
   0x5   : > { %p99_p2 = scmp.eq.s32.totalorder %s8789_s15, 1  ;;  %p6668_p3 = scmp.ge.s32.totalorder %s8720_s14, 1 }
   0x6   : > { %s8799_s19 = scalar_select %p86_p0, %s8716_s13, %s88_s18  }
   0x7   : > { %p8801_p4 = por %p99_p2, %p98_p1  ;;  %p146_p5 = scmp.lt.s32.totalorder %s8720_s14, 3 }
   0x9   : > { %p147_p6 = pnand %p6668_p3, %p146_p5 }
   0xa   : > { %v506_v0 = vld [vmem:[%s11228_s1] sm:$0x3] (!%p147_p6)  ;;  %vm1767_vm0 = vcmask (!%p147_p6), 1041408   ;;  %s8809_s23 = smul.u32 (!%p147_p6), 313, %s8789_s15  ;;  %v8754_v1 = vmov (!%p147_p6), 0.0   ;;  %vm8755_vm1 = vmmov (!%p147_p6), 0   ;;  %v508_v54 = vlaneseq (!%p147_p6) }
   0xb   : > { %150 = sbr.rel (%p147_p6) target bundleno = 965 (0x3c5), region = 32  ;;  %7786 = vmatprep.subr.bf16.mxu0 (!%p147_p6), %v8754_v1  ;;  %v1769_v2 = vsel (!%p147_p6), %vm1767_vm0, %v506_v0, 0  ;;  %7788 = vmatprep.mubr.msk.bf16.mxu0 (!%p147_p6), %vm8755_vm1, %v8754_v1  ;;  %vm1295_vm2 = vcmask (!%p147_p6), 31744   ;;  %v507_v59 = vld [vmem:[%s11229_s2] sm:$0x7] (!%p147_p6)  ;;  %s170_s4 = sand.u32 (!%p147_p6), 1, %s8712_s12  }
   0xc   : > { %7787 = vmatpush3.bf16.msra.mxu0 (!%p147_p6), %v1769_v2  ;;  %p178_p7 = scmp.lt.s32.totalorder (!%p147_p6), %s8809_s23, 624  ;;  %8416 = vmatprep.subr.bf16.mxu1 (!%p147_p6), %v8754_v1  ;;  %v509_v56 = vshrl.u32 (!%p147_p6), %v508_v54, 7  ;;  %s9056_s5 = smul.u32 (!%p147_p6), 1252, %s170_s4  ;;  %vm5885_vm7 = vcmask (!%p147_p6), 125952  }
   0xd   : > { %8417 = vmatpush3.bf16.msra.mxu1 (!%p147_p6), %v1769_v2  ;;  %8104 = vmatprep.mubr.msk.bf16.mxu1 (!%p147_p6), %vm8755_vm1, %v8754_v1 }
   0xe   : > { %v510_v58 = vsub.s32 (!%p147_p6), 0, %v509_v56  ;;  %v4000_v62 = vsub.s32 (!%p147_p6), 1, %v509_v56  ;;  %v4317_v0 = vsub.s32 (!%p147_p6), 2, %v509_v56  ;;  %s9077_s6 = scalar_lea.vmem (!%p147_p6), [#allocation2], %s9056_s5  }
  0x10   : > { %v9038_v61 = vrot.slane (!%p147_p6), %v507_v59, %v510_v58 }
  0x12   : > { %s179_s24 = scalar_select %p178_p7, %s8809_s23, 624 }
  0x13   : > { %s6207_s7 = ssub.s32 (%p8801_p4), 625, %s8809_s23  ;;  %s7625_s8 = smul.u32 (%p8801_p4), 1252, %s8789_s15 }
  0x14   : > { %s6669_s25 = sshll.u32 %s179_s24, 2  ;;  %p6208_p8 = scmp.lt.s32.totalorder (%p8801_p4), %s6207_s7, 313 }
  0x15   : > { %s8822_s28 = scalar_lea.vmem %s11227_s0, %s6669_s25  ;;  %s11035_s11 = scalar_lea.vmem (%p8801_p4), %s11230_s3, %s7625_s8  }
  0x16   : > { %v8509_v3 = vld [vmem:[%s8822_s28] sm:$0xff]   ;;  %v8510_v4 = vld [vmem:[%s8822_s28 + $0x278] sm:$0xff]   ;;  %v8511_v5 = vld [vmem:[%s8822_s28 + $0x8] sm:$0xff]  }
  0x17   : > { %7789 = vmatmul.mubr.msk.bf16.vlgmr.msra.gmra.mrb[0].mxu0 %vm1295_vm2, %v8509_v3  ;;  %8105 = vmatmul.mubr.msk.bf16.vlgmr.msra.gmra.mrb[0].mxu1 %vm1295_vm2, %v8510_v4  ;;  %v8512_v6 = vld [vmem:[%s8822_s28 + $0x280] sm:$0xff]   ;;  %v8513_v7 = vld [vmem:[%s8822_s28 + $0x10] sm:$0xff]   ;;  %v8514_v8 = vld [vmem:[%s8822_s28 + $0x288] sm:$0xff]  }
  0x18   : > { %7792 = vmatprep.mubr.msk.bf16.mxu0 %vm8755_vm1, %v8754_v1  ;;  %8108 = vmatprep.mubr.msk.bf16.mxu1 %vm8755_vm1, %v8754_v1  ;;  %v8515_v9 = vld [vmem:[%s8822_s28 + $0x18] sm:$0xff]   ;;  %v8516_v10 = vld [vmem:[%s8822_s28 + $0x290] sm:$0xff]   ;;  %v8517_v11 = vld [vmem:[%s8822_s28 + $0x20] sm:$0xff]  }
  0x19   : > { %v8518_v12 = vld [vmem:[%s8822_s28 + $0x298] sm:$0xff]   ;;  %v8519_v13 = vld [vmem:[%s8822_s28 + $0x28] sm:$0xff]   ;;  %v8520_v14 = vld [vmem:[%s8822_s28 + $0x2a0] sm:$0xff]  }
  0x1a   : > { %v8521_v15 = vld [vmem:[%s8822_s28 + $0x30] sm:$0xff]   ;;  %v8522_v16 = vld [vmem:[%s8822_s28 + $0x2a8] sm:$0xff]   ;;  %v8523_v17 = vld [vmem:[%s8822_s28 + $0x38] sm:$0xff]  }
  0x1b   : > { %v8524_v18 = vld [vmem:[%s8822_s28 + $0x2b0] sm:$0xff]   ;;  %v8525_v19 = vld [vmem:[%s8822_s28 + $0x40] sm:$0xff]   ;;  %v8526_v20 = vld [vmem:[%s8822_s28 + $0x2b8] sm:$0xff]  }
  0x1c   : > { %v8527_v21 = vld [vmem:[%s8822_s28 + $0x48] sm:$0xff]   ;;  %v8528_v22 = vld [vmem:[%s8822_s28 + $0x2c0] sm:$0xff]   ;;  %v8529_v23 = vld [vmem:[%s8822_s28 + $0x50] sm:$0xff]  }
  0x1d   : > { %v8530_v24 = vld [vmem:[%s8822_s28 + $0x2c8] sm:$0xff]   ;;  %v8531_v25 = vld [vmem:[%s8822_s28 + $0x58] sm:$0xff]   ;;  %v8532_v26 = vld [vmem:[%s8822_s28 + $0x2d0] sm:$0xff]  }
  0x1e   : > { %v8533_v27 = vld [vmem:[%s8822_s28 + $0x60] sm:$0xff]   ;;  %v8534_v28 = vld [vmem:[%s8822_s28 + $0x2d8] sm:$0xff]   ;;  %v8535_v29 = vld [vmem:[%s8822_s28 + $0x68] sm:$0xff]  }
  0x1f   : > { %7793 = vmatmul.mubr.msk.bf16.gmra.mrb[4].mxu0 %vm1295_vm2, %v8511_v5  ;;  %8109 = vmatmul.mubr.msk.bf16.gmra.mrb[4].mxu1 %vm1295_vm2, %v8512_v6  ;;  %v8536_v30 = vld [vmem:[%s8822_s28 + $0x2e0] sm:$0xff]   ;;  %v8537_v31 = vld [vmem:[%s8822_s28 + $0x70] sm:$0xff]   ;;  %v8538_v32 = vld [vmem:[%s8822_s28 + $0x2e8] sm:$0xff]   ;;  %v9048_v6 = vrot.slane %v507_v59, %v4000_v62 }
  0x20   : > { %7796 = vmatprep.mubr.msk.bf16.mxu0 %vm8755_vm1, %v8754_v1  ;;  %8112 = vmatprep.mubr.msk.bf16.mxu1 %vm8755_vm1, %v8754_v1  ;;  %v8539_v33 = vld [vmem:[%s8822_s28 + $0x78] sm:$0xff]   ;;  %v8540_v34 = vld [vmem:[%s8822_s28 + $0x2f0] sm:$0xff]   ;;  %v8541_v35 = vld [vmem:[%s8822_s28 + $0x80] sm:$0xff]  }
  0x21   : > { %v8542_v36 = vld [vmem:[%s8822_s28 + $0x2f8] sm:$0xff]   ;;  %v8543_v37 = vld [vmem:[%s8822_s28 + $0x88] sm:$0xff]   ;;  %v8544_v38 = vld [vmem:[%s8822_s28 + $0x300] sm:$0xff]  }
  0x22   : > { %v8545_v39 = vld [vmem:[%s8822_s28 + $0x90] sm:$0xff]   ;;  %v8546_v40 = vld [vmem:[%s8822_s28 + $0x308] sm:$0xff]   ;;  %v8547_v41 = vld [vmem:[%s8822_s28 + $0x98] sm:$0xff]  }
  0x23   : > { %v8548_v42 = vld [vmem:[%s8822_s28 + $0x310] sm:$0xff]   ;;  %v8549_v43 = vld [vmem:[%s8822_s28 + $0xa0] sm:$0xff]   ;;  %v8550_v44 = vld [vmem:[%s8822_s28 + $0x318] sm:$0xff]  }
  0x24   : > { %v8551_v45 = vld [vmem:[%s8822_s28 + $0xa8] sm:$0xff]   ;;  %v8552_v46 = vld [vmem:[%s8822_s28 + $0x320] sm:$0xff]   ;;  %v8553_v47 = vld [vmem:[%s8822_s28 + $0xb0] sm:$0xff]  }
  0x25   : > { %v8554_v48 = vld [vmem:[%s8822_s28 + $0x328] sm:$0xff]   ;;  %v8555_v49 = vld [vmem:[%s8822_s28 + $0xb8] sm:$0xff]   ;;  %v8556_v50 = vld [vmem:[%s8822_s28 + $0x330] sm:$0xff]  }
  0x26   : > { %v8557_v51 = vld [vmem:[%s8822_s28 + $0xc0] sm:$0xff]   ;;  %v8558_v52 = vld [vmem:[%s8822_s28 + $0x338] sm:$0xff]   ;;  %v8559_v53 = vld [vmem:[%s8822_s28 + $0xc8] sm:$0xff]  }
  0x27   : > { %7797 = vmatmul.mubr.msk.bf16.gmra.mrb[8].mxu0 %vm1295_vm2, %v8513_v7  ;;  %8113 = vmatmul.mubr.msk.bf16.gmra.mrb[8].mxu1 %vm1295_vm2, %v8514_v8  ;;  %v8560_v55 = vld [vmem:[%s8822_s28 + $0x340] sm:$0xff]   ;;  %v8561_v57 = vld [vmem:[%s8822_s28 + $0xd0] sm:$0xff]   ;;  %v8562_v60 = vld [vmem:[%s8822_s28 + $0x348] sm:$0xff]  }
  0x28   : > { %7800 = vmatprep.mubr.msk.bf16.mxu0 %vm8755_vm1, %v8754_v1  ;;  %8116 = vmatprep.mubr.msk.bf16.mxu1 %vm8755_vm1, %v8754_v1  ;;  %v8563_v4 = vld [vmem:[%s8822_s28 + $0xd8] sm:$0xff]  }
  0x2f   : > { %7801 = vmatmul.mubr.msk.bf16.gmra.mrb[12].mxu0 %vm1295_vm2, %v8515_v9  ;;  %8117 = vmatmul.mubr.msk.bf16.gmra.mrb[12].mxu1 %vm1295_vm2, %v8516_v10  ;;  %v8564_v10 = vld [vmem:[%s8822_s28 + $0x350] sm:$0xff]  }
  0x30   : > { %7804 = vmatprep.mubr.msk.bf16.mxu0 %vm8755_vm1, %v8754_v1  ;;  %8120 = vmatprep.mubr.msk.bf16.mxu1 %vm8755_vm1, %v8754_v1 }
  0x37   : > { %7805 = vmatmul.mubr.msk.bf16.gmra.mrb[16].mxu0 %vm1295_vm2, %v8517_v11  ;;  %8121 = vmatmul.mubr.msk.bf16.gmra.mrb[16].mxu1 %vm1295_vm2, %v8518_v12 }
  0x38   : > { %7808 = vmatprep.mubr.msk.bf16.mxu0 %vm8755_vm1, %v8754_v1  ;;  %8124 = vmatprep.mubr.msk.bf16.mxu1 %vm8755_vm1, %v8754_v1 }
  0x3f   : > { %7809 = vmatmul.mubr.msk.bf16.gmra.mrb[20].mxu0 %vm1295_vm2, %v8519_v13  ;;  %8125 = vmatmul.mubr.msk.bf16.gmra.mrb[20].mxu1 %vm1295_vm2, %v8520_v14 }
  0x40   : > { %7812 = vmatprep.mubr.msk.bf16.mxu0 %vm8755_vm1, %v8754_v1  ;;  %8128 = vmatprep.mubr.msk.bf16.mxu1 %vm8755_vm1, %v8754_v1 }
  0x47   : > { %7813 = vmatmul.mubr.msk.bf16.gmra.mrb[24].mxu0 %vm1295_vm2, %v8521_v15  ;;  %8129 = vmatmul.mubr.msk.bf16.gmra.mrb[24].mxu1 %vm1295_vm2, %v8522_v16  ;;  %v9053_v15 = vrot.slane %v507_v59, %v4317_v0 }
  0x48   : > { %7816 = vmatprep.mubr.msk.bf16.mxu0 %vm8755_vm1, %v8754_v1  ;;  %8132 = vmatprep.mubr.msk.bf16.mxu1 %vm8755_vm1, %v8754_v1 }
  0x4f   : > { %7817 = vmatmul.mubr.msk.bf16.gmra.mrb[28].mxu0 %vm1295_vm2, %v8523_v17  ;;  %8133 = vmatmul.mubr.msk.bf16.gmra.mrb[28].mxu1 %vm1295_vm2, %v8524_v18 }
  0x50   : > { %7820 = vmatprep.mubr.msk.bf16.mxu0 %vm8755_vm1, %v8754_v1  ;;  %8136 = vmatprep.mubr.msk.bf16.mxu1 %vm8755_vm1, %v8754_v1 }
  0x57   : > { %7821 = vmatmul.mubr.msk.bf16.gmra.mrb[32].mxu0 %vm1295_vm2, %v8525_v19  ;;  %8137 = vmatmul.mubr.msk.bf16.gmra.mrb[32].mxu1 %vm1295_vm2, %v8526_v20 }
  0x58   : > { %7824 = vmatprep.mubr.msk.bf16.mxu0 %vm8755_vm1, %v8754_v1  ;;  %8140 = vmatprep.mubr.msk.bf16.mxu1 %vm8755_vm1, %v8754_v1 }
  0x5f   : > { %7825 = vmatmul.mubr.msk.bf16.gmra.mrb[36].mxu0 %vm1295_vm2, %v8527_v21  ;;  %8141 = vmatmul.mubr.msk.bf16.gmra.mrb[36].mxu1 %vm1295_vm2, %v8528_v22 }
  0x60   : > { %7828 = vmatprep.mubr.msk.bf16.mxu0 %vm8755_vm1, %v8754_v1  ;;  %8144 = vmatprep.mubr.msk.bf16.mxu1 %vm8755_vm1, %v8754_v1 }
  0x67   : > { %7829 = vmatmul.mubr.msk.bf16.gmra.mrb[40].mxu0 %vm1295_vm2, %v8529_v23  ;;  %8145 = vmatmul.mubr.msk.bf16.gmra.mrb[40].mxu1 %vm1295_vm2, %v8530_v24 }
  0x68   : > { %7832 = vmatprep.mubr.msk.bf16.mxu0 %vm8755_vm1, %v8754_v1  ;;  %8148 = vmatprep.mubr.msk.bf16.mxu1 %vm8755_vm1, %v8754_v1 }
  0x6f   : > { %7833 = vmatmul.mubr.msk.bf16.gmra.mrb[44].mxu0 %vm1295_vm2, %v8531_v25  ;;  %8149 = vmatmul.mubr.msk.bf16.gmra.mrb[44].mxu1 %vm1295_vm2, %v8532_v26 }
  0x70   : > { %7836 = vmatprep.mubr.msk.bf16.mxu0 %vm8755_vm1, %v8754_v1  ;;  %8152 = vmatprep.mubr.msk.bf16.mxu1 %vm8755_vm1, %v8754_v1 }
  0x77   : > { %7837 = vmatmul.mubr.msk.bf16.gmra.mrb[48].mxu0 %vm1295_vm2, %v8533_v27  ;;  %8153 = vmatmul.mubr.msk.bf16.gmra.mrb[48].mxu1 %vm1295_vm2, %v8534_v28 }
  0x78   : > { %7840 = vmatprep.mubr.msk.bf16.mxu0 %vm8755_vm1, %v8754_v1  ;;  %8156 = vmatprep.mubr.msk.bf16.mxu1 %vm8755_vm1, %v8754_v1 }
  0x7f   : > { %7841 = vmatmul.mubr.msk.bf16.gmra.mrb[52].mxu0 %vm1295_vm2, %v8535_v29  ;;  %8157 = vmatmul.mubr.msk.bf16.gmra.mrb[52].mxu1 %vm1295_vm2, %v8536_v30 }
  0x80   : > { %7844 = vmatprep.mubr.msk.bf16.mxu0 %vm8755_vm1, %v8754_v1  ;;  %8160 = vmatprep.mubr.msk.bf16.mxu1 %vm8755_vm1, %v8754_v1 }
  0x87   : > { %7845 = vmatmul.mubr.msk.bf16.gmra.mrb[56].mxu0 %vm1295_vm2, %v8537_v31  ;;  %8161 = vmatmul.mubr.msk.bf16.gmra.mrb[56].mxu1 %vm1295_vm2, %v8538_v32 }
  0x88   : > { %7848 = vmatprep.mubr.msk.bf16.mxu0 %vm8755_vm1, %v8754_v1  ;;  %8164 = vmatprep.mubr.msk.bf16.mxu1 %vm8755_vm1, %v8754_v1 }
  0x8f   : > { %7849 = vmatmul.mubr.msk.bf16.gmra.mrb[60].mxu0 %vm1295_vm2, %v8539_v33  ;;  %8165 = vmatmul.mubr.msk.bf16.gmra.mrb[60].mxu1 %vm1295_vm2, %v8540_v34  ;;  %v8565_v34 = vld [vmem:[%s8822_s28 + $0xe0] sm:$0xff]  }
  0x90   : > { %7852 = vmatprep.mubr.msk.bf16.mxu0 %vm8755_vm1, %v8754_v1  ;;  %8168 = vmatprep.mubr.msk.bf16.mxu1 %vm8755_vm1, %v8754_v1 }
  0x97   : > { %7853 = vmatmul.mubr.msk.bf16.gmra.mrb[64].mxu0 %vm1295_vm2, %v8541_v35  ;;  %8169 = vmatmul.mubr.msk.bf16.gmra.mrb[64].mxu1 %vm1295_vm2, %v8542_v36 }
  0x98   : > { %7856 = vmatprep.mubr.msk.bf16.mxu0 %vm8755_vm1, %v8754_v1  ;;  %8172 = vmatprep.mubr.msk.bf16.mxu1 %vm8755_vm1, %v8754_v1 }
  0x9f   : > { %7857 = vmatmul.mubr.msk.bf16.gmra.mrb[68].mxu0 %vm1295_vm2, %v8543_v37  ;;  %8173 = vmatmul.mubr.msk.bf16.gmra.mrb[68].mxu1 %vm1295_vm2, %v8544_v38 }
  0xa0   : > { %7860 = vmatprep.mubr.msk.bf16.mxu0 %vm8755_vm1, %v8754_v1  ;;  %8176 = vmatprep.mubr.msk.bf16.mxu1 %vm8755_vm1, %v8754_v1 }
  0xa7   : > { %7861 = vmatmul.mubr.msk.bf16.gmra.mrb[72].mxu0 %vm1295_vm2, %v8545_v39  ;;  %8177 = vmatmul.mubr.msk.bf16.gmra.mrb[72].mxu1 %vm1295_vm2, %v8546_v40 }
  0xa8   : > { %7864 = vmatprep.mubr.msk.bf16.mxu0 %vm8755_vm1, %v8754_v1  ;;  %8180 = vmatprep.mubr.msk.bf16.mxu1 %vm8755_vm1, %v8754_v1 }
  0xaf   : > { %7865 = vmatmul.mubr.msk.bf16.gmra.mrb[76].mxu0 %vm1295_vm2, %v8547_v41  ;;  %8181 = vmatmul.mubr.msk.bf16.gmra.mrb[76].mxu1 %vm1295_vm2, %v8548_v42  ;;  %v8566_v41 = vld [vmem:[%s8822_s28 + $0x358] sm:$0xff]  }
  0xb0   : > { %7868 = vmatprep.mubr.msk.bf16.mxu0 %vm8755_vm1, %v8754_v1  ;;  %8184 = vmatprep.mubr.msk.bf16.mxu1 %vm8755_vm1, %v8754_v1 }
  0xb7   : > { %7869 = vmatmul.mubr.msk.bf16.gmra.mrb[80].mxu0 %vm1295_vm2, %v8549_v43  ;;  %8185 = vmatmul.mubr.msk.bf16.gmra.mrb[80].mxu1 %vm1295_vm2, %v8550_v44 }
  0xb8   : > { %7872 = vmatprep.mubr.msk.bf16.mxu0 %vm8755_vm1, %v8754_v1  ;;  %8188 = vmatprep.mubr.msk.bf16.mxu1 %vm8755_vm1, %v8754_v1 }
  0xbf   : > { %7873 = vmatmul.mubr.msk.bf16.gmra.mrb[84].mxu0 %vm1295_vm2, %v8551_v45  ;;  %8189 = vmatmul.mubr.msk.bf16.gmra.mrb[84].mxu1 %vm1295_vm2, %v8552_v46 }
  0xc0   : > { %7876 = vmatprep.mubr.msk.bf16.mxu0 %vm8755_vm1, %v8754_v1  ;;  %8192 = vmatprep.mubr.msk.bf16.mxu1 %vm8755_vm1, %v8754_v1 }
  0xc7   : > { %7877 = vmatmul.mubr.msk.bf16.gmra.mrb[88].mxu0 %vm1295_vm2, %v8553_v47  ;;  %8193 = vmatmul.mubr.msk.bf16.gmra.mrb[88].mxu1 %vm1295_vm2, %v8554_v48 }
  0xc8   : > { %7880 = vmatprep.mubr.msk.bf16.mxu0 %vm8755_vm1, %v8754_v1  ;;  %8196 = vmatprep.mubr.msk.bf16.mxu1 %vm8755_vm1, %v8754_v1 }
  0xcf   : > { %7881 = vmatmul.mubr.msk.bf16.gmra.mrb[92].mxu0 %vm1295_vm2, %v8555_v49  ;;  %8197 = vmatmul.mubr.msk.bf16.gmra.mrb[92].mxu1 %vm1295_vm2, %v8556_v50 }
  0xd0   : > { %7884 = vmatprep.mubr.msk.bf16.mxu0 %vm8755_vm1, %v8754_v1  ;;  %8200 = vmatprep.mubr.msk.bf16.mxu1 %vm8755_vm1, %v8754_v1 }
  0xd7   : > { %7885 = vmatmul.mubr.msk.bf16.gmra.mrb[96].mxu0 %vm1295_vm2, %v8557_v51  ;;  %8201 = vmatmul.mubr.msk.bf16.gmra.mrb[96].mxu1 %vm1295_vm2, %v8558_v52 }
  0xd8   : > { %7888 = vmatprep.mubr.msk.bf16.mxu0 %vm8755_vm1, %v8754_v1  ;;  %8204 = vmatprep.mubr.msk.bf16.mxu1 %vm8755_vm1, %v8754_v1 }
  0xdf   : > { %7889 = vmatmul.mubr.msk.bf16.gmra.mrb[100].mxu0 %vm1295_vm2, %v8559_v53  ;;  %8205 = vmatmul.mubr.msk.bf16.gmra.mrb[100].mxu1 %vm1295_vm2, %v8560_v55 }
  0xe0   : > { %7892 = vmatprep.mubr.msk.bf16.mxu0 %vm8755_vm1, %v8754_v1  ;;  %8208 = vmatprep.mubr.msk.bf16.mxu1 %vm8755_vm1, %v8754_v1 }
  0xe7   : > { %7893 = vmatmul.mubr.msk.bf16.gmra.mrb[104].mxu0 %vm1295_vm2, %v8561_v57  ;;  %8209 = vmatmul.mubr.msk.bf16.gmra.mrb[104].mxu1 %vm1295_vm2, %v8562_v60 }
  0xe8   : > { %7896 = vmatprep.mubr.msk.bf16.mxu0 %vm8755_vm1, %v8754_v1  ;;  %8212 = vmatprep.mubr.msk.bf16.mxu1 %vm8755_vm1, %v8754_v1 }
  0xea   : > { %v1805_v63 = vpop.f32.mrb[0].mxu0  ;;  %v2437_v5 = vpop.f32.mrb[0].mxu1 }
  0xeb   : > { %v1806_v2 = vadd.f32 %v1805_v63, %v9038_v61  ;;  %v7790_v3 = vpop.f32.mrb[1].mxu0  ;;  %v2438_v8 = vadd.f32 %v2437_v5, %v9038_v61  ;;  %v8106_v9 = vpop.f32.mrb[1].mxu1  ;;  %v8567_v5 = vld [vmem:[%s8822_s28 + $0xe8] sm:$0xff]  }
  0xec   : > { %v1808_v7 = vpop.f32.mrb[2].mxu0  ;;  %v2440_v14 = vpop.f32.mrb[2].mxu1 }
  0xed   : > { %vm3059_vm3 = vcmp.ge.f32.partialorder %v1806_v2, 0.0  ;;  %v3372_v11 = vmul.f32 0.01, %v1806_v2  ;;  %v1809_v12 = vadd.f32 %v1808_v7, %v9038_v61  ;;  %v7791_v13 = vpop.f32.mrb[3].mxu0  ;;  %vm3217_vm4 = vcmp.ge.f32.partialorder %v2438_v8, 0.0  ;;  %v8107_v18 = vpop.f32.mrb[3].mxu1 }
  0xee   : > { %v3530_v16 = vmul.f32 0.01, %v2438_v8  ;;  %v2441_v17 = vadd.f32 %v2440_v14, %v9038_v61  ;;  %v8568_v13 = vld [vmem:[%s8822_s28 + $0x360] sm:$0xff]  }
  0xef   : > { %v3685_v19 = vsel %vm3059_vm3, %v1806_v2, %v3372_v11  ;;  %vm3060_vm5 = vcmp.ge.f32.partialorder %v1809_v12, 0.0  ;;  %v3373_v20 = vmul.f32 0.01, %v1809_v12  ;;  %7897 = vmatmul.mubr.msk.bf16.gmra.mrb[108].mxu0 %vm1295_vm2, %v8563_v4  ;;  %8213 = vmatmul.mubr.msk.bf16.gmra.mrb[108].mxu1 %vm1295_vm2, %v8564_v10 }
  0xf0   : > { %v4002_v21 = vmul.f32 %v9048_v6, %v3685_v19  ;;  %v3843_v22 = vsel %vm3217_vm4, %v2438_v8, %v3530_v16  ;;  %vm3218_vm6 = vcmp.ge.f32.partialorder %v2441_v17, 0.0  ;;  %v3531_v23 = vmul.f32 0.01, %v2441_v17  ;;  %7900 = vmatprep.mubr.msk.bf16.mxu0 %vm8755_vm1, %v8754_v1  ;;  %8216 = vmatprep.mubr.msk.bf16.mxu1 %vm8755_vm1, %v8754_v1 }
  0xf1   : > { %v3686_v24 = vsel %vm3060_vm5, %v1809_v12, %v3373_v20  ;;  %v4160_v25 = vmul.f32 %v9048_v6, %v3843_v22 }
  0xf2   : > { %v4319_v26 = vadd.f32 %v9053_v15, %v4002_v21  ;;  %v4003_v27 = vmul.f32 %v9048_v6, %v3686_v24  ;;  %v1813_v28 = vpop.f32.mrb[4].mxu0  ;;  %v3844_v29 = vsel %vm3218_vm6, %v2441_v17, %v3531_v23  ;;  %v2445_v35 = vpop.f32.mrb[4].mxu1 }
  0xf3   : > { %v4477_v30 = vadd.f32 %v9053_v15, %v4160_v25  ;;  %v1814_v31 = vadd.f32 %v1813_v28, %v9038_v61  ;;  %v4161_v32 = vmul.f32 %v9048_v6, %v3844_v29  ;;  %v7794_v33 = vpop.f32.mrb[5].mxu0  ;;  %v2446_v39 = vadd.f32 %v2445_v35, %v9038_v61  ;;  %v8110_v40 = vpop.f32.mrb[5].mxu1 }
  0xf4   : > { %v7312_v36 = vpack.c.bf16 %v4319_v26, %v4319_v26  ;;  %v4320_v37 = vadd.f32 %v9053_v15, %v4003_v27  ;;  %v1816_v38 = vpop.f32.mrb[6].mxu0  ;;  %v2448_v46 = vpop.f32.mrb[6].mxu1  ;;  %v8569_v40 = vld [vmem:[%s8822_s28 + $0xf0] sm:$0xff]  }
  0xf5   : > { %v7470_v42 = vpack.c.bf16 %v4477_v30, %v4477_v30  ;;  %vm3061_vm8 = vcmp.ge.f32.partialorder %v1814_v31, 0.0  ;;  %v3374_v43 = vmul.f32 0.01, %v1814_v31  ;;  %v4478_v44 = vadd.f32 %v9053_v15, %v4161_v32  ;;  %v7795_v45 = vpop.f32.mrb[7].mxu0  ;;  %v8111_v50 = vpop.f32.mrb[7].mxu1 }
  0xf6   : > { %5886 = vst.msk [vmem:[%s9077_s6] sm:$0xf] %vm5885_vm7, %v7312_v36  ;;  %v7313_v47 = vpack.c.bf16 %v4320_v37, %v4320_v37  ;;  %v1817_v48 = vadd.f32 %v1816_v38, %v9038_v61  ;;  %vm3219_vm9 = vcmp.ge.f32.partialorder %v2446_v39, 0.0  ;;  %v3532_v49 = vmul.f32 0.01, %v2446_v39 }
  0xf7   : > { %6044 = vst.msk [vmem:[%s9077_s6 + $0x278] sm:$0xf] %vm5885_vm7, %v7470_v42  ;;  %v3687_v51 = vsel %vm3061_vm8, %v1814_v31, %v3374_v43  ;;  %v7471_v52 = vpack.c.bf16 %v4478_v44, %v4478_v44  ;;  %7901 = vmatmul.mubr.msk.bf16.gmra.mrb[112].mxu0 %vm1295_vm2, %v8565_v34  ;;  %v2449_v53 = vadd.f32 %v2448_v46, %v9038_v61 }
  0xf8   : > { %5887 = vst.msk [vmem:[%s9077_s6 + $0x4] sm:$0xf] %vm5885_vm7, %v7313_v47  ;;  %v4004_v54 = vmul.f32 %v9048_v6, %v3687_v51  ;;  %vm3062_vm10 = vcmp.ge.f32.partialorder %v1817_v48, 0.0  ;;  %v3375_v55 = vmul.f32 0.01, %v1817_v48  ;;  %v3845_v56 = vsel %vm3219_vm9, %v2446_v39, %v3532_v49  ;;  %8217 = vmatmul.mubr.msk.bf16.gmra.mrb[112].mxu1 %vm1295_vm2, %v8566_v41  ;;  %7904 = vmatprep.mubr.msk.bf16.mxu0 %vm8755_vm1, %v8754_v1 }
  0xf9   : > { %6045 = vst.msk [vmem:[%s9077_s6 + $0x27c] sm:$0xf] %vm5885_vm7, %v7471_v52  ;;  %v4162_v57 = vmul.f32 %v9048_v6, %v3845_v56  ;;  %vm3220_vm11 = vcmp.ge.f32.partialorder %v2449_v53, 0.0  ;;  %v3533_v58 = vmul.f32 0.01, %v2449_v53  ;;  %8220 = vmatprep.mubr.msk.bf16.mxu1 %vm8755_vm1, %v8754_v1 }
  0xfa   : > { %v4321_v59 = vadd.f32 %v9053_v15, %v4004_v54  ;;  %v3688_v60 = vsel %vm3062_vm10, %v1817_v48, %v3375_v55  ;;  %v1821_v62 = vpop.f32.mrb[8].mxu0  ;;  %v2453_v7 = vpop.f32.mrb[8].mxu1  ;;  %v8570_v48 = vld [vmem:[%s8822_s28 + $0x368] sm:$0xff]  }
  0xfb   : > { %v4005_v63 = vmul.f32 %v9048_v6, %v3688_v60  ;;  %v4479_v0 = vadd.f32 %v9053_v15, %v4162_v57  ;;  %v1822_v2 = vadd.f32 %v1821_v62, %v9038_v61  ;;  %v3846_v3 = vsel %vm3220_vm11, %v2449_v53, %v3533_v58  ;;  %v7798_v4 = vpop.f32.mrb[9].mxu0  ;;  %v8114_v12 = vpop.f32.mrb[9].mxu1 }
  0xfc   : > { %v7314_v8 = vpack.c.bf16 %v4321_v59, %v4321_v59  ;;  %v4163_v9 = vmul.f32 %v9048_v6, %v3846_v3  ;;  %v1824_v10 = vpop.f32.mrb[10].mxu0  ;;  %v2454_v11 = vadd.f32 %v2453_v7, %v9038_v61  ;;  %v2456_v19 = vpop.f32.mrb[10].mxu1 }
  0xfd   : > { %v4322_v14 = vadd.f32 %v9053_v15, %v4005_v63  ;;  %v7472_v16 = vpack.c.bf16 %v4479_v0, %v4479_v0  ;;  %vm3063_vm12 = vcmp.ge.f32.partialorder %v1822_v2, 0.0  ;;  %v3376_v17 = vmul.f32 0.01, %v1822_v2  ;;  %v7799_v18 = vpop.f32.mrb[11].mxu0  ;;  %v8115_v23 = vpop.f32.mrb[11].mxu1 }
  0xfe   : > { %5888 = vst.msk [vmem:[%s9077_s6 + $0x8] sm:$0xf] %vm5885_vm7, %v7314_v8  ;;  %v4480_v20 = vadd.f32 %v9053_v15, %v4163_v9  ;;  %v1825_v21 = vadd.f32 %v1824_v10, %v9038_v61  ;;  %vm3221_vm13 = vcmp.ge.f32.partialorder %v2454_v11, 0.0  ;;  %v3534_v22 = vmul.f32 0.01, %v2454_v11 }
  0xff   : > { %v7315_v24 = vpack.c.bf16 %v4322_v14, %v4322_v14  ;;  %6046 = vst.msk [vmem:[%s9077_s6 + $0x280] sm:$0xf] %vm5885_vm7, %v7472_v16  ;;  %v3689_v25 = vsel %vm3063_vm12, %v1822_v2, %v3376_v17  ;;  %7905 = vmatmul.mubr.msk.bf16.gmra.mrb[116].mxu0 %vm1295_vm2, %v8567_v5  ;;  %v2457_v26 = vadd.f32 %v2456_v19, %v9038_v61 }
 0x100   : > { %v4006_v27 = vmul.f32 %v9048_v6, %v3689_v25  ;;  %v7473_v28 = vpack.c.bf16 %v4480_v20, %v4480_v20  ;;  %vm3064_vm14 = vcmp.ge.f32.partialorder %v1825_v21, 0.0  ;;  %v3377_v29 = vmul.f32 0.01, %v1825_v21  ;;  %8221 = vmatmul.mubr.msk.bf16.gmra.mrb[116].mxu1 %vm1295_vm2, %v8568_v13  ;;  %7908 = vmatprep.mubr.msk.bf16.mxu0 %vm8755_vm1, %v8754_v1  ;;  %v8571_v13 = vld [vmem:[%s8822_s28 + $0xf8] sm:$0xff]  }
 0x101   : > { %5889 = vst.msk [vmem:[%s9077_s6 + $0xc] sm:$0xf] %vm5885_vm7, %v7315_v24  ;;  %v3847_v30 = vsel %vm3221_vm13, %v2454_v11, %v3534_v22  ;;  %vm3222_vm15 = vcmp.ge.f32.partialorder %v2457_v26, 0.0  ;;  %v3535_v31 = vmul.f32 0.01, %v2457_v26  ;;  %8224 = vmatprep.mubr.msk.bf16.mxu1 %vm8755_vm1, %v8754_v1  ;;  %v8572_v22 = vld [vmem:[%s8822_s28 + $0x370] sm:$0xff]  }
 0x102   : > { %v4323_v32 = vadd.f32 %v9053_v15, %v4006_v27  ;;  %6047 = vst.msk [vmem:[%s9077_s6 + $0x284] sm:$0xf] %vm5885_vm7, %v7473_v28  ;;  %v3690_v33 = vsel %vm3064_vm14, %v1825_v21, %v3377_v29  ;;  %v4164_v34 = vmul.f32 %v9048_v6, %v3847_v30  ;;  %v1829_v35 = vpop.f32.mrb[12].mxu0  ;;  %v2461_v41 = vpop.f32.mrb[12].mxu1 }
 0x103   : > { %v4007_v36 = vmul.f32 %v9048_v6, %v3690_v33  ;;  %v1830_v37 = vadd.f32 %v1829_v35, %v9038_v61  ;;  %v3848_v38 = vsel %vm3222_vm15, %v2457_v26, %v3535_v31  ;;  %v7802_v39 = vpop.f32.mrb[13].mxu0  ;;  %v2462_v46 = vadd.f32 %v2461_v41, %v9038_v61  ;;  %v8118_v47 = vpop.f32.mrb[13].mxu1 }
 0x104   : > { %v7316_v42 = vpack.c.bf16 %v4323_v32, %v4323_v32  ;;  %v4481_v43 = vadd.f32 %v9053_v15, %v4164_v34  ;;  %v4165_v44 = vmul.f32 %v9048_v6, %v3848_v38  ;;  %v1832_v45 = vpop.f32.mrb[14].mxu0  ;;  %v2464_v53 = vpop.f32.mrb[14].mxu1 }
 0x105   : > { %v4324_v49 = vadd.f32 %v9053_v15, %v4007_v36  ;;  %vm3065_vm0 = vcmp.ge.f32.partialorder %v1830_v37, 0.0  ;;  %v3378_v50 = vmul.f32 0.01, %v1830_v37  ;;  %v1833_v51 = vadd.f32 %v1832_v45, %v9038_v61  ;;  %v7803_v52 = vpop.f32.mrb[15].mxu0  ;;  %v8119_v57 = vpop.f32.mrb[15].mxu1 }
 0x106   : > { %5890 = vst.msk [vmem:[%s9077_s6 + $0x10] sm:$0xf] %vm5885_vm7, %v7316_v42  ;;  %v7474_v54 = vpack.c.bf16 %v4481_v43, %v4481_v43  ;;  %v4482_v55 = vadd.f32 %v9053_v15, %v4165_v44  ;;  %vm3223_vm3 = vcmp.ge.f32.partialorder %v2462_v46, 0.0  ;;  %v3536_v56 = vmul.f32 0.01, %v2462_v46 }
 0x107   : > { %v7317_v58 = vpack.c.bf16 %v4324_v49, %v4324_v49  ;;  %v3691_v59 = vsel %vm3065_vm0, %v1830_v37, %v3378_v50  ;;  %vm3066_vm4 = vcmp.ge.f32.partialorder %v1833_v51, 0.0  ;;  %v3379_v60 = vmul.f32 0.01, %v1833_v51  ;;  %7909 = vmatmul.mubr.msk.bf16.gmra.mrb[120].mxu0 %vm1295_vm2, %v8569_v40  ;;  %v8573_v49 = vld [vmem:[%s8822_s28 + $0x100] sm:$0xff]  }
 0x108   : > { %6048 = vst.msk [vmem:[%s9077_s6 + $0x288] sm:$0xf] %vm5885_vm7, %v7474_v54  ;;  %v4008_v62 = vmul.f32 %v9048_v6, %v3691_v59  ;;  %v7475_v63 = vpack.c.bf16 %v4482_v55, %v4482_v55  ;;  %v3849_v0 = vsel %vm3223_vm3, %v2462_v46, %v3536_v56  ;;  %v2465_v2 = vadd.f32 %v2464_v53, %v9038_v61  ;;  %v8574_v56 = vld [vmem:[%s8822_s28 + $0x378] sm:$0xff]  }
 0x109   : > { %8225 = vmatmul.mubr.msk.bf16.gmra.mrb[120].mxu1 %vm1295_vm2, %v8570_v48  ;;  %5891 = vst.msk [vmem:[%s9077_s6 + $0x14] sm:$0xf] %vm5885_vm7, %v7317_v58  ;;  %v3692_v3 = vsel %vm3066_vm4, %v1833_v51, %v3379_v60  ;;  %v4166_v4 = vmul.f32 %v9048_v6, %v3849_v0  ;;  %7912 = vmatprep.mubr.msk.bf16.mxu0 %vm8755_vm1, %v8754_v1 }
 0x10a   : > { %8228 = vmatprep.mubr.msk.bf16.mxu1 %vm8755_vm1, %v8754_v1  ;;  %v4325_v5 = vadd.f32 %v9053_v15, %v4008_v62  ;;  %6049 = vst.msk [vmem:[%s9077_s6 + $0x28c] sm:$0xf] %vm5885_vm7, %v7475_v63  ;;  %v4009_v7 = vmul.f32 %v9048_v6, %v3692_v3  ;;  %v1837_v8 = vpop.f32.mrb[16].mxu0  ;;  %vm3224_vm5 = vcmp.ge.f32.partialorder %v2465_v2, 0.0  ;;  %v3537_v9 = vmul.f32 0.01, %v2465_v2 }
 0x10b   : > { %v4483_v10 = vadd.f32 %v9053_v15, %v4166_v4  ;;  %v1838_v11 = vadd.f32 %v1837_v8, %v9038_v61  ;;  %v7806_v12 = vpop.f32.mrb[17].mxu0  ;;  %v2469_v14 = vpop.f32.mrb[16].mxu1 }
 0x10c   : > { %v7318_v16 = vpack.c.bf16 %v4325_v5, %v4325_v5  ;;  %v4326_v17 = vadd.f32 %v9053_v15, %v4009_v7  ;;  %v3850_v18 = vsel %vm3224_vm5, %v2465_v2, %v3537_v9  ;;  %v1840_v19 = vpop.f32.mrb[18].mxu0  ;;  %v2470_v20 = vadd.f32 %v2469_v14, %v9038_v61  ;;  %v8122_v21 = vpop.f32.mrb[17].mxu1 }
 0x10d   : > { %v7476_v23 = vpack.c.bf16 %v4483_v10, %v4483_v10  ;;  %vm3067_vm6 = vcmp.ge.f32.partialorder %v1838_v11, 0.0  ;;  %v3380_v24 = vmul.f32 0.01, %v1838_v11  ;;  %v4167_v25 = vmul.f32 %v9048_v6, %v3850_v18  ;;  %v7807_v26 = vpop.f32.mrb[19].mxu0  ;;  %v2472_v27 = vpop.f32.mrb[18].mxu1 }
 0x10e   : > { %5892 = vst.msk [vmem:[%s9077_s6 + $0x18] sm:$0xf] %vm5885_vm7, %v7318_v16  ;;  %v7319_v28 = vpack.c.bf16 %v4326_v17, %v4326_v17  ;;  %v1841_v29 = vadd.f32 %v1840_v19, %v9038_v61  ;;  %vm3225_vm8 = vcmp.ge.f32.partialorder %v2470_v20, 0.0  ;;  %v3538_v30 = vmul.f32 0.01, %v2470_v20  ;;  %v8123_v31 = vpop.f32.mrb[19].mxu1 }
 0x10f   : > { %6050 = vst.msk [vmem:[%s9077_s6 + $0x290] sm:$0xf] %vm5885_vm7, %v7476_v23  ;;  %v3693_v32 = vsel %vm3067_vm6, %v1838_v11, %v3380_v24  ;;  %v4484_v33 = vadd.f32 %v9053_v15, %v4167_v25  ;;  %7913 = vmatmul.mubr.msk.bf16.gmra.mrb[124].mxu0 %vm1295_vm2, %v8571_v13  ;;  %v2473_v34 = vadd.f32 %v2472_v27, %v9038_v61 }
 0x110   : > { %5893 = vst.msk [vmem:[%s9077_s6 + $0x1c] sm:$0xf] %vm5885_vm7, %v7319_v28  ;;  %v4010_v35 = vmul.f32 %v9048_v6, %v3693_v32  ;;  %vm3068_vm9 = vcmp.ge.f32.partialorder %v1841_v29, 0.0  ;;  %v3381_v36 = vmul.f32 0.01, %v1841_v29  ;;  %v3851_v37 = vsel %vm3225_vm8, %v2470_v20, %v3538_v30  ;;  %7916 = vmatprep.mubr.msk.bf16.mxu0 %vm8755_vm1, %v8754_v1  ;;  %v8576_v30 = vld [vmem:[%s8822_s28 + $0x380] sm:$0xff]  }
 0x111   : > { %8229 = vmatmul.mubr.msk.bf16.gmra.mrb[124].mxu1 %vm1295_vm2, %v8572_v22  ;;  %v7477_v38 = vpack.c.bf16 %v4484_v33, %v4484_v33  ;;  %v4168_v39 = vmul.f32 %v9048_v6, %v3851_v37  ;;  %vm3226_vm10 = vcmp.ge.f32.partialorder %v2473_v34, 0.0  ;;  %v3539_v40 = vmul.f32 0.01, %v2473_v34  ;;  %v8575_v22 = vld [vmem:[%s8822_s28 + $0x108] sm:$0xff]  }
 0x112   : > { %8232 = vmatprep.mubr.msk.bf16.mxu1 %vm8755_vm1, %v8754_v1  ;;  %v4327_v41 = vadd.f32 %v9053_v15, %v4010_v35  ;;  %v3694_v42 = vsel %vm3068_vm9, %v1841_v29, %v3381_v36  ;;  %v1845_v43 = vpop.f32.mrb[20].mxu0  ;;  %v2477_v50 = vpop.f32.mrb[20].mxu1 }
 0x113   : > { %6051 = vst.msk [vmem:[%s9077_s6 + $0x294] sm:$0xf] %vm5885_vm7, %v7477_v38  ;;  %v4011_v44 = vmul.f32 %v9048_v6, %v3694_v42  ;;  %v4485_v45 = vadd.f32 %v9053_v15, %v4168_v39  ;;  %v1846_v46 = vadd.f32 %v1845_v43, %v9038_v61  ;;  %v3852_v47 = vsel %vm3226_vm10, %v2473_v34, %v3539_v40  ;;  %v7810_v48 = vpop.f32.mrb[21].mxu0  ;;  %v8126_v55 = vpop.f32.mrb[21].mxu1 }
 0x114   : > { %v7320_v51 = vpack.c.bf16 %v4327_v41, %v4327_v41  ;;  %v4169_v52 = vmul.f32 %v9048_v6, %v3852_v47  ;;  %v1848_v53 = vpop.f32.mrb[22].mxu0  ;;  %v2478_v54 = vadd.f32 %v2477_v50, %v9038_v61  ;;  %v2480_v62 = vpop.f32.mrb[22].mxu1 }
 0x115   : > { %v4328_v57 = vadd.f32 %v9053_v15, %v4011_v44  ;;  %v7478_v58 = vpack.c.bf16 %v4485_v45, %v4485_v45  ;;  %vm3069_vm11 = vcmp.ge.f32.partialorder %v1846_v46, 0.0  ;;  %v3382_v59 = vmul.f32 0.01, %v1846_v46  ;;  %v7811_v60 = vpop.f32.mrb[23].mxu0  ;;  %v8127_v3 = vpop.f32.mrb[23].mxu1 }
 0x116   : > { %5894 = vst.msk [vmem:[%s9077_s6 + $0x20] sm:$0xf] %vm5885_vm7, %v7320_v51  ;;  %v4486_v63 = vadd.f32 %v9053_v15, %v4169_v52  ;;  %v1849_v0 = vadd.f32 %v1848_v53, %v9038_v61  ;;  %vm3227_vm12 = vcmp.ge.f32.partialorder %v2478_v54, 0.0  ;;  %v3540_v2 = vmul.f32 0.01, %v2478_v54 }
 0x117   : > { %v7321_v4 = vpack.c.bf16 %v4328_v57, %v4328_v57  ;;  %6052 = vst.msk [vmem:[%s9077_s6 + $0x298] sm:$0xf] %vm5885_vm7, %v7478_v58  ;;  %v3695_v5 = vsel %vm3069_vm11, %v1846_v46, %v3382_v59  ;;  %7917 = vmatmul.mubr.msk.bf16.gmra.mrb[128].mxu0 %vm1295_vm2, %v8573_v49  ;;  %v2481_v7 = vadd.f32 %v2480_v62, %v9038_v61 }
 0x118   : > { %v4012_v8 = vmul.f32 %v9048_v6, %v3695_v5  ;;  %v7479_v9 = vpack.c.bf16 %v4486_v63, %v4486_v63  ;;  %vm3070_vm13 = vcmp.ge.f32.partialorder %v1849_v0, 0.0  ;;  %v3383_v10 = vmul.f32 0.01, %v1849_v0  ;;  %7920 = vmatprep.mubr.msk.bf16.mxu0 %vm8755_vm1, %v8754_v1 }
 0x119   : > { %8233 = vmatmul.mubr.msk.bf16.gmra.mrb[128].mxu1 %vm1295_vm2, %v8574_v56  ;;  %5895 = vst.msk [vmem:[%s9077_s6 + $0x24] sm:$0xf] %vm5885_vm7, %v7321_v4  ;;  %v3853_v11 = vsel %vm3227_vm12, %v2478_v54, %v3540_v2  ;;  %vm3228_vm14 = vcmp.ge.f32.partialorder %v2481_v7, 0.0  ;;  %v3541_v12 = vmul.f32 0.01, %v2481_v7  ;;  %v8577_v56 = vld [vmem:[%s8822_s28 + $0x110] sm:$0xff]  }
 0x11a   : > { %8236 = vmatprep.mubr.msk.bf16.mxu1 %vm8755_vm1, %v8754_v1  ;;  %v4329_v13 = vadd.f32 %v9053_v15, %v4012_v8  ;;  %6053 = vst.msk [vmem:[%s9077_s6 + $0x29c] sm:$0xf] %vm5885_vm7, %v7479_v9  ;;  %v3696_v14 = vsel %vm3070_vm13, %v1849_v0, %v3383_v10  ;;  %v4170_v16 = vmul.f32 %v9048_v6, %v3853_v11  ;;  %v1853_v17 = vpop.f32.mrb[24].mxu0  ;;  %v2485_v23 = vpop.f32.mrb[24].mxu1  ;;  %v8578_v2 = vld [vmem:[%s8822_s28 + $0x388] sm:$0xff]  }
 0x11b   : > { %v4013_v18 = vmul.f32 %v9048_v6, %v3696_v14  ;;  %v1854_v19 = vadd.f32 %v1853_v17, %v9038_v61  ;;  %v3854_v20 = vsel %vm3228_vm14, %v2481_v7, %v3541_v12  ;;  %v7814_v21 = vpop.f32.mrb[25].mxu0  ;;  %v2486_v28 = vadd.f32 %v2485_v23, %v9038_v61  ;;  %v8130_v29 = vpop.f32.mrb[25].mxu1 }
 0x11c   : > { %v7322_v24 = vpack.c.bf16 %v4329_v13, %v4329_v13  ;;  %v4487_v25 = vadd.f32 %v9053_v15, %v4170_v16  ;;  %v4171_v26 = vmul.f32 %v9048_v6, %v3854_v20  ;;  %v1856_v27 = vpop.f32.mrb[26].mxu0  ;;  %v2488_v35 = vpop.f32.mrb[26].mxu1 }
 0x11d   : > { %v4330_v31 = vadd.f32 %v9053_v15, %v4013_v18  ;;  %vm3071_vm15 = vcmp.ge.f32.partialorder %v1854_v19, 0.0  ;;  %v3384_v32 = vmul.f32 0.01, %v1854_v19  ;;  %v1857_v33 = vadd.f32 %v1856_v27, %v9038_v61  ;;  %v7815_v34 = vpop.f32.mrb[27].mxu0  ;;  %v8131_v39 = vpop.f32.mrb[27].mxu1 }
 0x11e   : > { %5896 = vst.msk [vmem:[%s9077_s6 + $0x28] sm:$0xf] %vm5885_vm7, %v7322_v24  ;;  %v7480_v36 = vpack.c.bf16 %v4487_v25, %v4487_v25  ;;  %v4488_v37 = vadd.f32 %v9053_v15, %v4171_v26  ;;  %vm3229_vm0 = vcmp.ge.f32.partialorder %v2486_v28, 0.0  ;;  %v3542_v38 = vmul.f32 0.01, %v2486_v28 }
 0x11f   : > { %v7323_v40 = vpack.c.bf16 %v4330_v31, %v4330_v31  ;;  %v3697_v41 = vsel %vm3071_vm15, %v1854_v19, %v3384_v32  ;;  %vm3072_vm3 = vcmp.ge.f32.partialorder %v1857_v33, 0.0  ;;  %v3385_v42 = vmul.f32 0.01, %v1857_v33  ;;  %7921 = vmatmul.mubr.msk.bf16.gmra.mrb[132].mxu0 %vm1295_vm2, %v8575_v22  ;;  %v8579_v31 = vld [vmem:[%s8822_s28 + $0x118] sm:$0xff]  }
 0x120   : > { %6054 = vst.msk [vmem:[%s9077_s6 + $0x2a0] sm:$0xf] %vm5885_vm7, %v7480_v36  ;;  %v4014_v43 = vmul.f32 %v9048_v6, %v3697_v41  ;;  %v7481_v44 = vpack.c.bf16 %v4488_v37, %v4488_v37  ;;  %v3855_v45 = vsel %vm3229_vm0, %v2486_v28, %v3542_v38  ;;  %v2489_v46 = vadd.f32 %v2488_v35, %v9038_v61  ;;  %v8580_v38 = vld [vmem:[%s8822_s28 + $0x390] sm:$0xff]  }
 0x121   : > { %8237 = vmatmul.mubr.msk.bf16.gmra.mrb[132].mxu1 %vm1295_vm2, %v8576_v30  ;;  %5897 = vst.msk [vmem:[%s9077_s6 + $0x2c] sm:$0xf] %vm5885_vm7, %v7323_v40  ;;  %v3698_v47 = vsel %vm3072_vm3, %v1857_v33, %v3385_v42  ;;  %v4172_v48 = vmul.f32 %v9048_v6, %v3855_v45  ;;  %7924 = vmatprep.mubr.msk.bf16.mxu0 %vm8755_vm1, %v8754_v1 }
 0x122   : > { %8240 = vmatprep.mubr.msk.bf16.mxu1 %vm8755_vm1, %v8754_v1  ;;  %v4331_v49 = vadd.f32 %v9053_v15, %v4014_v43  ;;  %6055 = vst.msk [vmem:[%s9077_s6 + $0x2a4] sm:$0xf] %vm5885_vm7, %v7481_v44  ;;  %v4015_v50 = vmul.f32 %v9048_v6, %v3698_v47  ;;  %v1861_v51 = vpop.f32.mrb[28].mxu0  ;;  %vm3230_vm4 = vcmp.ge.f32.partialorder %v2489_v46, 0.0  ;;  %v3543_v52 = vmul.f32 0.01, %v2489_v46 }
 0x123   : > { %v4489_v53 = vadd.f32 %v9053_v15, %v4172_v48  ;;  %v1862_v54 = vadd.f32 %v1861_v51, %v9038_v61  ;;  %v7818_v55 = vpop.f32.mrb[29].mxu0  ;;  %v2493_v57 = vpop.f32.mrb[28].mxu1 }
 0x124   : > { %v7324_v58 = vpack.c.bf16 %v4331_v49, %v4331_v49  ;;  %v4332_v59 = vadd.f32 %v9053_v15, %v4015_v50  ;;  %v3856_v60 = vsel %vm3230_vm4, %v2489_v46, %v3543_v52  ;;  %v1864_v62 = vpop.f32.mrb[30].mxu0  ;;  %v2494_v63 = vadd.f32 %v2493_v57, %v9038_v61  ;;  %v8134_v0 = vpop.f32.mrb[29].mxu1 }
 0x125   : > { %v7482_v3 = vpack.c.bf16 %v4489_v53, %v4489_v53  ;;  %vm3073_vm5 = vcmp.ge.f32.partialorder %v1862_v54, 0.0  ;;  %v3386_v4 = vmul.f32 0.01, %v1862_v54  ;;  %v4173_v5 = vmul.f32 %v9048_v6, %v3856_v60  ;;  %v7819_v7 = vpop.f32.mrb[31].mxu0  ;;  %v2496_v8 = vpop.f32.mrb[30].mxu1 }
 0x126   : > { %5898 = vst.msk [vmem:[%s9077_s6 + $0x30] sm:$0xf] %vm5885_vm7, %v7324_v58  ;;  %v7325_v9 = vpack.c.bf16 %v4332_v59, %v4332_v59  ;;  %v1865_v10 = vadd.f32 %v1864_v62, %v9038_v61  ;;  %vm3231_vm6 = vcmp.ge.f32.partialorder %v2494_v63, 0.0  ;;  %v3544_v11 = vmul.f32 0.01, %v2494_v63  ;;  %v8135_v12 = vpop.f32.mrb[31].mxu1 }
 0x127   : > { %6056 = vst.msk [vmem:[%s9077_s6 + $0x2a8] sm:$0xf] %vm5885_vm7, %v7482_v3  ;;  %v3699_v13 = vsel %vm3073_vm5, %v1862_v54, %v3386_v4  ;;  %v4490_v14 = vadd.f32 %v9053_v15, %v4173_v5  ;;  %7925 = vmatmul.mubr.msk.bf16.gmra.mrb[136].mxu0 %vm1295_vm2, %v8577_v56  ;;  %v2497_v16 = vadd.f32 %v2496_v8, %v9038_v61 }
 0x128   : > { %5899 = vst.msk [vmem:[%s9077_s6 + $0x34] sm:$0xf] %vm5885_vm7, %v7325_v9  ;;  %v4016_v17 = vmul.f32 %v9048_v6, %v3699_v13  ;;  %vm3074_vm8 = vcmp.ge.f32.partialorder %v1865_v10, 0.0  ;;  %v3387_v18 = vmul.f32 0.01, %v1865_v10  ;;  %v3857_v19 = vsel %vm3231_vm6, %v2494_v63, %v3544_v11  ;;  %7928 = vmatprep.mubr.msk.bf16.mxu0 %vm8755_vm1, %v8754_v1  ;;  %v8582_v11 = vld [vmem:[%s8822_s28 + $0x398] sm:$0xff]  }
 0x129   : > { %8241 = vmatmul.mubr.msk.bf16.gmra.mrb[136].mxu1 %vm1295_vm2, %v8578_v2  ;;  %v7483_v20 = vpack.c.bf16 %v4490_v14, %v4490_v14  ;;  %v4174_v21 = vmul.f32 %v9048_v6, %v3857_v19  ;;  %vm3232_vm9 = vcmp.ge.f32.partialorder %v2497_v16, 0.0  ;;  %v3545_v22 = vmul.f32 0.01, %v2497_v16  ;;  %v8581_v2 = vld [vmem:[%s8822_s28 + $0x120] sm:$0xff]  }
 0x12a   : > { %8244 = vmatprep.mubr.msk.bf16.mxu1 %vm8755_vm1, %v8754_v1  ;;  %v4333_v23 = vadd.f32 %v9053_v15, %v4016_v17  ;;  %v3700_v24 = vsel %vm3074_vm8, %v1865_v10, %v3387_v18  ;;  %v1869_v25 = vpop.f32.mrb[32].mxu0  ;;  %v2501_v32 = vpop.f32.mrb[32].mxu1 }
 0x12b   : > { %6057 = vst.msk [vmem:[%s9077_s6 + $0x2ac] sm:$0xf] %vm5885_vm7, %v7483_v20  ;;  %v4017_v26 = vmul.f32 %v9048_v6, %v3700_v24  ;;  %v4491_v27 = vadd.f32 %v9053_v15, %v4174_v21  ;;  %v1870_v28 = vadd.f32 %v1869_v25, %v9038_v61  ;;  %v3858_v29 = vsel %vm3232_vm9, %v2497_v16, %v3545_v22  ;;  %v7822_v30 = vpop.f32.mrb[33].mxu0  ;;  %v8138_v37 = vpop.f32.mrb[33].mxu1 }
 0x12c   : > { %v7326_v33 = vpack.c.bf16 %v4333_v23, %v4333_v23  ;;  %v4175_v34 = vmul.f32 %v9048_v6, %v3858_v29  ;;  %v1872_v35 = vpop.f32.mrb[34].mxu0  ;;  %v2502_v36 = vadd.f32 %v2501_v32, %v9038_v61  ;;  %v2504_v43 = vpop.f32.mrb[34].mxu1 }
 0x12d   : > { %v4334_v39 = vadd.f32 %v9053_v15, %v4017_v26  ;;  %v7484_v40 = vpack.c.bf16 %v4491_v27, %v4491_v27  ;;  %vm3075_vm10 = vcmp.ge.f32.partialorder %v1870_v28, 0.0  ;;  %v3388_v41 = vmul.f32 0.01, %v1870_v28  ;;  %v7823_v42 = vpop.f32.mrb[35].mxu0  ;;  %v8139_v47 = vpop.f32.mrb[35].mxu1 }
 0x12e   : > { %5900 = vst.msk [vmem:[%s9077_s6 + $0x38] sm:$0xf] %vm5885_vm7, %v7326_v33  ;;  %v4492_v44 = vadd.f32 %v9053_v15, %v4175_v34  ;;  %v1873_v45 = vadd.f32 %v1872_v35, %v9038_v61  ;;  %vm3233_vm11 = vcmp.ge.f32.partialorder %v2502_v36, 0.0  ;;  %v3546_v46 = vmul.f32 0.01, %v2502_v36 }
 0x12f   : > { %v7327_v48 = vpack.c.bf16 %v4334_v39, %v4334_v39  ;;  %6058 = vst.msk [vmem:[%s9077_s6 + $0x2b0] sm:$0xf] %vm5885_vm7, %v7484_v40  ;;  %v3701_v49 = vsel %vm3075_vm10, %v1870_v28, %v3388_v41  ;;  %7929 = vmatmul.mubr.msk.bf16.gmra.mrb[140].mxu0 %vm1295_vm2, %v8579_v31  ;;  %v2505_v50 = vadd.f32 %v2504_v43, %v9038_v61 }
 0x130   : > { %v4018_v51 = vmul.f32 %v9048_v6, %v3701_v49  ;;  %v7485_v52 = vpack.c.bf16 %v4492_v44, %v4492_v44  ;;  %vm3076_vm12 = vcmp.ge.f32.partialorder %v1873_v45, 0.0  ;;  %v3389_v53 = vmul.f32 0.01, %v1873_v45  ;;  %7932 = vmatprep.mubr.msk.bf16.mxu0 %vm8755_vm1, %v8754_v1 }
 0x131   : > { %8245 = vmatmul.mubr.msk.bf16.gmra.mrb[140].mxu1 %vm1295_vm2, %v8580_v38  ;;  %5901 = vst.msk [vmem:[%s9077_s6 + $0x3c] sm:$0xf] %vm5885_vm7, %v7327_v48  ;;  %v3859_v54 = vsel %vm3233_vm11, %v2502_v36, %v3546_v46  ;;  %vm3234_vm13 = vcmp.ge.f32.partialorder %v2505_v50, 0.0  ;;  %v3547_v55 = vmul.f32 0.01, %v2505_v50  ;;  %v8583_v38 = vld [vmem:[%s8822_s28 + $0x128] sm:$0xff]  }
 0x132   : > { %8248 = vmatprep.mubr.msk.bf16.mxu1 %vm8755_vm1, %v8754_v1  ;;  %v4335_v56 = vadd.f32 %v9053_v15, %v4018_v51  ;;  %6059 = vst.msk [vmem:[%s9077_s6 + $0x2b4] sm:$0xf] %vm5885_vm7, %v7485_v52  ;;  %v3702_v57 = vsel %vm3076_vm12, %v1873_v45, %v3389_v53  ;;  %v4176_v58 = vmul.f32 %v9048_v6, %v3859_v54  ;;  %v1877_v59 = vpop.f32.mrb[36].mxu0  ;;  %v2509_v3 = vpop.f32.mrb[36].mxu1  ;;  %v8584_v46 = vld [vmem:[%s8822_s28 + $0x3a0] sm:$0xff]  }
 0x133   : > { %v4019_v60 = vmul.f32 %v9048_v6, %v3702_v57  ;;  %v1878_v62 = vadd.f32 %v1877_v59, %v9038_v61  ;;  %v3860_v63 = vsel %vm3234_vm13, %v2505_v50, %v3547_v55  ;;  %v7826_v0 = vpop.f32.mrb[37].mxu0  ;;  %v2510_v9 = vadd.f32 %v2509_v3, %v9038_v61  ;;  %v8142_v10 = vpop.f32.mrb[37].mxu1 }
 0x134   : > { %v7328_v4 = vpack.c.bf16 %v4335_v56, %v4335_v56  ;;  %v4493_v5 = vadd.f32 %v9053_v15, %v4176_v58  ;;  %v4177_v7 = vmul.f32 %v9048_v6, %v3860_v63  ;;  %v1880_v8 = vpop.f32.mrb[38].mxu0  ;;  %v2512_v17 = vpop.f32.mrb[38].mxu1 }
 0x135   : > { %v4336_v12 = vadd.f32 %v9053_v15, %v4019_v60  ;;  %vm3077_vm14 = vcmp.ge.f32.partialorder %v1878_v62, 0.0  ;;  %v3390_v13 = vmul.f32 0.01, %v1878_v62  ;;  %v1881_v14 = vadd.f32 %v1880_v8, %v9038_v61  ;;  %v7827_v16 = vpop.f32.mrb[39].mxu0  ;;  %v8143_v21 = vpop.f32.mrb[39].mxu1 }
 0x136   : > { %5902 = vst.msk [vmem:[%s9077_s6 + $0x40] sm:$0xf] %vm5885_vm7, %v7328_v4  ;;  %v7486_v18 = vpack.c.bf16 %v4493_v5, %v4493_v5  ;;  %v4494_v19 = vadd.f32 %v9053_v15, %v4177_v7  ;;  %vm3235_vm15 = vcmp.ge.f32.partialorder %v2510_v9, 0.0  ;;  %v3548_v20 = vmul.f32 0.01, %v2510_v9 }
 0x137   : > { %v7329_v22 = vpack.c.bf16 %v4336_v12, %v4336_v12  ;;  %v3703_v23 = vsel %vm3077_vm14, %v1878_v62, %v3390_v13  ;;  %vm3078_vm0 = vcmp.ge.f32.partialorder %v1881_v14, 0.0  ;;  %v3391_v24 = vmul.f32 0.01, %v1881_v14  ;;  %7933 = vmatmul.mubr.msk.bf16.gmra.mrb[144].mxu0 %vm1295_vm2, %v8581_v2  ;;  %v8585_v12 = vld [vmem:[%s8822_s28 + $0x130] sm:$0xff]  }
 0x138   : > { %6060 = vst.msk [vmem:[%s9077_s6 + $0x2b8] sm:$0xf] %vm5885_vm7, %v7486_v18  ;;  %v4020_v25 = vmul.f32 %v9048_v6, %v3703_v23  ;;  %v7487_v26 = vpack.c.bf16 %v4494_v19, %v4494_v19  ;;  %v3861_v27 = vsel %vm3235_vm15, %v2510_v9, %v3548_v20  ;;  %v2513_v28 = vadd.f32 %v2512_v17, %v9038_v61  ;;  %v8586_v20 = vld [vmem:[%s8822_s28 + $0x3a8] sm:$0xff]  }
 0x139   : > { %8249 = vmatmul.mubr.msk.bf16.gmra.mrb[144].mxu1 %vm1295_vm2, %v8582_v11  ;;  %5903 = vst.msk [vmem:[%s9077_s6 + $0x44] sm:$0xf] %vm5885_vm7, %v7329_v22  ;;  %v3704_v29 = vsel %vm3078_vm0, %v1881_v14, %v3391_v24  ;;  %v4178_v30 = vmul.f32 %v9048_v6, %v3861_v27  ;;  %7936 = vmatprep.mubr.msk.bf16.mxu0 %vm8755_vm1, %v8754_v1 }
 0x13a   : > { %8252 = vmatprep.mubr.msk.bf16.mxu1 %vm8755_vm1, %v8754_v1  ;;  %v4337_v31 = vadd.f32 %v9053_v15, %v4020_v25  ;;  %6061 = vst.msk [vmem:[%s9077_s6 + $0x2bc] sm:$0xf] %vm5885_vm7, %v7487_v26  ;;  %v4021_v32 = vmul.f32 %v9048_v6, %v3704_v29  ;;  %v1885_v33 = vpop.f32.mrb[40].mxu0  ;;  %vm3236_vm3 = vcmp.ge.f32.partialorder %v2513_v28, 0.0  ;;  %v3549_v34 = vmul.f32 0.01, %v2513_v28 }
 0x13b   : > { %v4495_v35 = vadd.f32 %v9053_v15, %v4178_v30  ;;  %v1886_v36 = vadd.f32 %v1885_v33, %v9038_v61  ;;  %v7830_v37 = vpop.f32.mrb[41].mxu0  ;;  %v2517_v39 = vpop.f32.mrb[40].mxu1 }
 0x13c   : > { %v7330_v40 = vpack.c.bf16 %v4337_v31, %v4337_v31  ;;  %v4338_v41 = vadd.f32 %v9053_v15, %v4021_v32  ;;  %v3862_v42 = vsel %vm3236_vm3, %v2513_v28, %v3549_v34  ;;  %v1888_v43 = vpop.f32.mrb[42].mxu0  ;;  %v2518_v44 = vadd.f32 %v2517_v39, %v9038_v61  ;;  %v8146_v45 = vpop.f32.mrb[41].mxu1 }
 0x13d   : > { %v7488_v47 = vpack.c.bf16 %v4495_v35, %v4495_v35  ;;  %vm3079_vm4 = vcmp.ge.f32.partialorder %v1886_v36, 0.0  ;;  %v3392_v48 = vmul.f32 0.01, %v1886_v36  ;;  %v4179_v49 = vmul.f32 %v9048_v6, %v3862_v42  ;;  %v7831_v50 = vpop.f32.mrb[43].mxu0  ;;  %v2520_v51 = vpop.f32.mrb[42].mxu1 }
 0x13e   : > { %5904 = vst.msk [vmem:[%s9077_s6 + $0x48] sm:$0xf] %vm5885_vm7, %v7330_v40  ;;  %v7331_v52 = vpack.c.bf16 %v4338_v41, %v4338_v41  ;;  %v1889_v53 = vadd.f32 %v1888_v43, %v9038_v61  ;;  %vm3237_vm5 = vcmp.ge.f32.partialorder %v2518_v44, 0.0  ;;  %v3550_v54 = vmul.f32 0.01, %v2518_v44  ;;  %v8147_v55 = vpop.f32.mrb[43].mxu1 }
 0x13f   : > { %6062 = vst.msk [vmem:[%s9077_s6 + $0x2c0] sm:$0xf] %vm5885_vm7, %v7488_v47  ;;  %v3705_v56 = vsel %vm3079_vm4, %v1886_v36, %v3392_v48  ;;  %v4496_v57 = vadd.f32 %v9053_v15, %v4179_v49  ;;  %7937 = vmatmul.mubr.msk.bf16.gmra.mrb[148].mxu0 %vm1295_vm2, %v8583_v38  ;;  %v2521_v58 = vadd.f32 %v2520_v51, %v9038_v61 }
 0x140   : > { %5905 = vst.msk [vmem:[%s9077_s6 + $0x4c] sm:$0xf] %vm5885_vm7, %v7331_v52  ;;  %v4022_v59 = vmul.f32 %v9048_v6, %v3705_v56  ;;  %vm3080_vm6 = vcmp.ge.f32.partialorder %v1889_v53, 0.0  ;;  %v3393_v60 = vmul.f32 0.01, %v1889_v53  ;;  %v3863_v62 = vsel %vm3237_vm5, %v2518_v44, %v3550_v54  ;;  %7940 = vmatprep.mubr.msk.bf16.mxu0 %vm8755_vm1, %v8754_v1  ;;  %v8588_v54 = vld [vmem:[%s8822_s28 + $0x3b0] sm:$0xff]  }
 0x141   : > { %8253 = vmatmul.mubr.msk.bf16.gmra.mrb[148].mxu1 %vm1295_vm2, %v8584_v46  ;;  %v7489_v63 = vpack.c.bf16 %v4496_v57, %v4496_v57  ;;  %v4180_v0 = vmul.f32 %v9048_v6, %v3863_v62  ;;  %vm3238_vm8 = vcmp.ge.f32.partialorder %v2521_v58, 0.0  ;;  %v3551_v2 = vmul.f32 0.01, %v2521_v58  ;;  %v8587_v46 = vld [vmem:[%s8822_s28 + $0x138] sm:$0xff]  }
 0x142   : > { %8256 = vmatprep.mubr.msk.bf16.mxu1 %vm8755_vm1, %v8754_v1  ;;  %v4339_v3 = vadd.f32 %v9053_v15, %v4022_v59  ;;  %v3706_v4 = vsel %vm3080_vm6, %v1889_v53, %v3393_v60  ;;  %v1893_v5 = vpop.f32.mrb[44].mxu0  ;;  %v2525_v13 = vpop.f32.mrb[44].mxu1 }
 0x143   : > { %6063 = vst.msk [vmem:[%s9077_s6 + $0x2c4] sm:$0xf] %vm5885_vm7, %v7489_v63  ;;  %v4023_v7 = vmul.f32 %v9048_v6, %v3706_v4  ;;  %v4497_v8 = vadd.f32 %v9053_v15, %v4180_v0  ;;  %v1894_v9 = vadd.f32 %v1893_v5, %v9038_v61  ;;  %v3864_v10 = vsel %vm3238_vm8, %v2521_v58, %v3551_v2  ;;  %v7834_v11 = vpop.f32.mrb[45].mxu0  ;;  %v8150_v19 = vpop.f32.mrb[45].mxu1 }
 0x144   : > { %v7332_v14 = vpack.c.bf16 %v4339_v3, %v4339_v3  ;;  %v4181_v16 = vmul.f32 %v9048_v6, %v3864_v10  ;;  %v1896_v17 = vpop.f32.mrb[46].mxu0  ;;  %v2526_v18 = vadd.f32 %v2525_v13, %v9038_v61  ;;  %v2528_v25 = vpop.f32.mrb[46].mxu1 }
 0x145   : > { %v4340_v21 = vadd.f32 %v9053_v15, %v4023_v7  ;;  %v7490_v22 = vpack.c.bf16 %v4497_v8, %v4497_v8  ;;  %vm3081_vm9 = vcmp.ge.f32.partialorder %v1894_v9, 0.0  ;;  %v3394_v23 = vmul.f32 0.01, %v1894_v9  ;;  %v7835_v24 = vpop.f32.mrb[47].mxu0  ;;  %v8151_v29 = vpop.f32.mrb[47].mxu1 }
 0x146   : > { %5906 = vst.msk [vmem:[%s9077_s6 + $0x50] sm:$0xf] %vm5885_vm7, %v7332_v14  ;;  %v4498_v26 = vadd.f32 %v9053_v15, %v4181_v16  ;;  %v1897_v27 = vadd.f32 %v1896_v17, %v9038_v61  ;;  %vm3239_vm10 = vcmp.ge.f32.partialorder %v2526_v18, 0.0  ;;  %v3552_v28 = vmul.f32 0.01, %v2526_v18 }
 0x147   : > { %v7333_v30 = vpack.c.bf16 %v4340_v21, %v4340_v21  ;;  %6064 = vst.msk [vmem:[%s9077_s6 + $0x2c8] sm:$0xf] %vm5885_vm7, %v7490_v22  ;;  %v3707_v31 = vsel %vm3081_vm9, %v1894_v9, %v3394_v23  ;;  %7941 = vmatmul.mubr.msk.bf16.gmra.mrb[152].mxu0 %vm1295_vm2, %v8585_v12  ;;  %v2529_v32 = vadd.f32 %v2528_v25, %v9038_v61 }
 0x148   : > { %v4024_v33 = vmul.f32 %v9048_v6, %v3707_v31  ;;  %v7491_v34 = vpack.c.bf16 %v4498_v26, %v4498_v26  ;;  %vm3082_vm11 = vcmp.ge.f32.partialorder %v1897_v27, 0.0  ;;  %v3395_v35 = vmul.f32 0.01, %v1897_v27  ;;  %7944 = vmatprep.mubr.msk.bf16.mxu0 %vm8755_vm1, %v8754_v1 }
 0x149   : > { %8257 = vmatmul.mubr.msk.bf16.gmra.mrb[152].mxu1 %vm1295_vm2, %v8586_v20  ;;  %5907 = vst.msk [vmem:[%s9077_s6 + $0x54] sm:$0xf] %vm5885_vm7, %v7333_v30  ;;  %v3865_v36 = vsel %vm3239_vm10, %v2526_v18, %v3552_v28  ;;  %vm3240_vm12 = vcmp.ge.f32.partialorder %v2529_v32, 0.0  ;;  %v3553_v37 = vmul.f32 0.01, %v2529_v32  ;;  %v8589_v20 = vld [vmem:[%s8822_s28 + $0x140] sm:$0xff]  }
 0x14a   : > { %8260 = vmatprep.mubr.msk.bf16.mxu1 %vm8755_vm1, %v8754_v1  ;;  %v4341_v38 = vadd.f32 %v9053_v15, %v4024_v33  ;;  %6065 = vst.msk [vmem:[%s9077_s6 + $0x2cc] sm:$0xf] %vm5885_vm7, %v7491_v34  ;;  %v3708_v39 = vsel %vm3082_vm11, %v1897_v27, %v3395_v35  ;;  %v4182_v40 = vmul.f32 %v9048_v6, %v3865_v36  ;;  %v1901_v41 = vpop.f32.mrb[48].mxu0  ;;  %v2533_v47 = vpop.f32.mrb[48].mxu1  ;;  %v8590_v28 = vld [vmem:[%s8822_s28 + $0x3b8] sm:$0xff]  }
 0x14b   : > { %v4025_v42 = vmul.f32 %v9048_v6, %v3708_v39  ;;  %v1902_v43 = vadd.f32 %v1901_v41, %v9038_v61  ;;  %v3866_v44 = vsel %vm3240_vm12, %v2529_v32, %v3553_v37  ;;  %v7838_v45 = vpop.f32.mrb[49].mxu0  ;;  %v2534_v52 = vadd.f32 %v2533_v47, %v9038_v61  ;;  %v8154_v53 = vpop.f32.mrb[49].mxu1 }
 0x14c   : > { %v7334_v48 = vpack.c.bf16 %v4341_v38, %v4341_v38  ;;  %v4499_v49 = vadd.f32 %v9053_v15, %v4182_v40  ;;  %v4183_v50 = vmul.f32 %v9048_v6, %v3866_v44  ;;  %v1904_v51 = vpop.f32.mrb[50].mxu0  ;;  %v2536_v59 = vpop.f32.mrb[50].mxu1 }
 0x14d   : > { %v4342_v55 = vadd.f32 %v9053_v15, %v4025_v42  ;;  %vm3083_vm13 = vcmp.ge.f32.partialorder %v1902_v43, 0.0  ;;  %v3396_v56 = vmul.f32 0.01, %v1902_v43  ;;  %v1905_v57 = vadd.f32 %v1904_v51, %v9038_v61  ;;  %v7839_v58 = vpop.f32.mrb[51].mxu0  ;;  %v8155_v0 = vpop.f32.mrb[51].mxu1 }
 0x14e   : > { %5908 = vst.msk [vmem:[%s9077_s6 + $0x58] sm:$0xf] %vm5885_vm7, %v7334_v48  ;;  %v7492_v60 = vpack.c.bf16 %v4499_v49, %v4499_v49  ;;  %v4500_v62 = vadd.f32 %v9053_v15, %v4183_v50  ;;  %vm3241_vm14 = vcmp.ge.f32.partialorder %v2534_v52, 0.0  ;;  %v3554_v63 = vmul.f32 0.01, %v2534_v52 }
 0x14f   : > { %v7335_v2 = vpack.c.bf16 %v4342_v55, %v4342_v55  ;;  %v3709_v3 = vsel %vm3083_vm13, %v1902_v43, %v3396_v56  ;;  %vm3084_vm15 = vcmp.ge.f32.partialorder %v1905_v57, 0.0  ;;  %v3397_v4 = vmul.f32 0.01, %v1905_v57  ;;  %7945 = vmatmul.mubr.msk.bf16.gmra.mrb[156].mxu0 %vm1295_vm2, %v8587_v46  ;;  %v8591_v55 = vld [vmem:[%s8822_s28 + $0x148] sm:$0xff]  }
 0x150   : > { %6066 = vst.msk [vmem:[%s9077_s6 + $0x2d0] sm:$0xf] %vm5885_vm7, %v7492_v60  ;;  %v4026_v5 = vmul.f32 %v9048_v6, %v3709_v3  ;;  %v7493_v7 = vpack.c.bf16 %v4500_v62, %v4500_v62  ;;  %v3867_v8 = vsel %vm3241_vm14, %v2534_v52, %v3554_v63  ;;  %v2537_v9 = vadd.f32 %v2536_v59, %v9038_v61  ;;  %v8592_v63 = vld [vmem:[%s8822_s28 + $0x3c0] sm:$0xff]  }
 0x151   : > { %8261 = vmatmul.mubr.msk.bf16.gmra.mrb[156].mxu1 %vm1295_vm2, %v8588_v54  ;;  %5909 = vst.msk [vmem:[%s9077_s6 + $0x5c] sm:$0xf] %vm5885_vm7, %v7335_v2  ;;  %v3710_v10 = vsel %vm3084_vm15, %v1905_v57, %v3397_v4  ;;  %v4184_v11 = vmul.f32 %v9048_v6, %v3867_v8  ;;  %7948 = vmatprep.mubr.msk.bf16.mxu0 %vm8755_vm1, %v8754_v1 }
 0x152   : > { %8264 = vmatprep.mubr.msk.bf16.mxu1 %vm8755_vm1, %v8754_v1  ;;  %v4343_v12 = vadd.f32 %v9053_v15, %v4026_v5  ;;  %6067 = vst.msk [vmem:[%s9077_s6 + $0x2d4] sm:$0xf] %vm5885_vm7, %v7493_v7  ;;  %v4027_v13 = vmul.f32 %v9048_v6, %v3710_v10  ;;  %v1909_v14 = vpop.f32.mrb[52].mxu0  ;;  %vm3242_vm0 = vcmp.ge.f32.partialorder %v2537_v9, 0.0  ;;  %v3555_v16 = vmul.f32 0.01, %v2537_v9 }
 0x153   : > { %v4501_v17 = vadd.f32 %v9053_v15, %v4184_v11  ;;  %v1910_v18 = vadd.f32 %v1909_v14, %v9038_v61  ;;  %v7842_v19 = vpop.f32.mrb[53].mxu0  ;;  %v2541_v21 = vpop.f32.mrb[52].mxu1 }
 0x154   : > { %v7336_v22 = vpack.c.bf16 %v4343_v12, %v4343_v12  ;;  %v4344_v23 = vadd.f32 %v9053_v15, %v4027_v13  ;;  %v3868_v24 = vsel %vm3242_vm0, %v2537_v9, %v3555_v16  ;;  %v1912_v25 = vpop.f32.mrb[54].mxu0  ;;  %v2542_v26 = vadd.f32 %v2541_v21, %v9038_v61  ;;  %v8158_v27 = vpop.f32.mrb[53].mxu1 }
 0x155   : > { %v7494_v29 = vpack.c.bf16 %v4501_v17, %v4501_v17  ;;  %vm3085_vm3 = vcmp.ge.f32.partialorder %v1910_v18, 0.0  ;;  %v3398_v30 = vmul.f32 0.01, %v1910_v18  ;;  %v4185_v31 = vmul.f32 %v9048_v6, %v3868_v24  ;;  %v7843_v32 = vpop.f32.mrb[55].mxu0  ;;  %v2544_v33 = vpop.f32.mrb[54].mxu1 }
 0x156   : > { %5910 = vst.msk [vmem:[%s9077_s6 + $0x60] sm:$0xf] %vm5885_vm7, %v7336_v22  ;;  %v7337_v34 = vpack.c.bf16 %v4344_v23, %v4344_v23  ;;  %v1913_v35 = vadd.f32 %v1912_v25, %v9038_v61  ;;  %vm3243_vm4 = vcmp.ge.f32.partialorder %v2542_v26, 0.0  ;;  %v3556_v36 = vmul.f32 0.01, %v2542_v26  ;;  %v8159_v37 = vpop.f32.mrb[55].mxu1 }
 0x157   : > { %6068 = vst.msk [vmem:[%s9077_s6 + $0x2d8] sm:$0xf] %vm5885_vm7, %v7494_v29  ;;  %v3711_v38 = vsel %vm3085_vm3, %v1910_v18, %v3398_v30  ;;  %v4502_v39 = vadd.f32 %v9053_v15, %v4185_v31  ;;  %7949 = vmatmul.mubr.msk.bf16.gmra.mrb[160].mxu0 %vm1295_vm2, %v8589_v20  ;;  %v2545_v40 = vadd.f32 %v2544_v33, %v9038_v61 }
 0x158   : > { %5911 = vst.msk [vmem:[%s9077_s6 + $0x64] sm:$0xf] %vm5885_vm7, %v7337_v34  ;;  %v4028_v41 = vmul.f32 %v9048_v6, %v3711_v38  ;;  %vm3086_vm5 = vcmp.ge.f32.partialorder %v1913_v35, 0.0  ;;  %v3399_v42 = vmul.f32 0.01, %v1913_v35  ;;  %v3869_v43 = vsel %vm3243_vm4, %v2542_v26, %v3556_v36  ;;  %7952 = vmatprep.mubr.msk.bf16.mxu0 %vm8755_vm1, %v8754_v1  ;;  %v8594_v36 = vld [vmem:[%s8822_s28 + $0x3c8] sm:$0xff]  }
 0x159   : > { %8265 = vmatmul.mubr.msk.bf16.gmra.mrb[160].mxu1 %vm1295_vm2, %v8590_v28  ;;  %v7495_v44 = vpack.c.bf16 %v4502_v39, %v4502_v39  ;;  %v4186_v45 = vmul.f32 %v9048_v6, %v3869_v43  ;;  %vm3244_vm6 = vcmp.ge.f32.partialorder %v2545_v40, 0.0  ;;  %v3557_v46 = vmul.f32 0.01, %v2545_v40  ;;  %v8593_v28 = vld [vmem:[%s8822_s28 + $0x150] sm:$0xff]  }
 0x15a   : > { %8268 = vmatprep.mubr.msk.bf16.mxu1 %vm8755_vm1, %v8754_v1  ;;  %v4345_v47 = vadd.f32 %v9053_v15, %v4028_v41  ;;  %v3712_v48 = vsel %vm3086_vm5, %v1913_v35, %v3399_v42  ;;  %v1917_v49 = vpop.f32.mrb[56].mxu0  ;;  %v2549_v56 = vpop.f32.mrb[56].mxu1 }
 0x15b   : > { %6069 = vst.msk [vmem:[%s9077_s6 + $0x2dc] sm:$0xf] %vm5885_vm7, %v7495_v44  ;;  %v4029_v50 = vmul.f32 %v9048_v6, %v3712_v48  ;;  %v4503_v51 = vadd.f32 %v9053_v15, %v4186_v45  ;;  %v1918_v52 = vadd.f32 %v1917_v49, %v9038_v61  ;;  %v3870_v53 = vsel %vm3244_vm6, %v2545_v40, %v3557_v46  ;;  %v7846_v54 = vpop.f32.mrb[57].mxu0  ;;  %v8162_v62 = vpop.f32.mrb[57].mxu1 }
 0x15c   : > { %v7338_v57 = vpack.c.bf16 %v4345_v47, %v4345_v47  ;;  %v4187_v58 = vmul.f32 %v9048_v6, %v3870_v53  ;;  %v1920_v59 = vpop.f32.mrb[58].mxu0  ;;  %v2550_v60 = vadd.f32 %v2549_v56, %v9038_v61  ;;  %v2552_v5 = vpop.f32.mrb[58].mxu1 }
 0x15d   : > { %v4346_v0 = vadd.f32 %v9053_v15, %v4029_v50  ;;  %v7496_v2 = vpack.c.bf16 %v4503_v51, %v4503_v51  ;;  %vm3087_vm8 = vcmp.ge.f32.partialorder %v1918_v52, 0.0  ;;  %v3400_v3 = vmul.f32 0.01, %v1918_v52  ;;  %v7847_v4 = vpop.f32.mrb[59].mxu0  ;;  %v8163_v10 = vpop.f32.mrb[59].mxu1 }
 0x15e   : > { %5912 = vst.msk [vmem:[%s9077_s6 + $0x68] sm:$0xf] %vm5885_vm7, %v7338_v57  ;;  %v4504_v7 = vadd.f32 %v9053_v15, %v4187_v58  ;;  %v1921_v8 = vadd.f32 %v1920_v59, %v9038_v61  ;;  %vm3245_vm9 = vcmp.ge.f32.partialorder %v2550_v60, 0.0  ;;  %v3558_v9 = vmul.f32 0.01, %v2550_v60 }
 0x15f   : > { %v7339_v11 = vpack.c.bf16 %v4346_v0, %v4346_v0  ;;  %6070 = vst.msk [vmem:[%s9077_s6 + $0x2e0] sm:$0xf] %vm5885_vm7, %v7496_v2  ;;  %v3713_v12 = vsel %vm3087_vm8, %v1918_v52, %v3400_v3  ;;  %7953 = vmatmul.mubr.msk.bf16.gmra.mrb[164].mxu0 %vm1295_vm2, %v8591_v55  ;;  %v2553_v13 = vadd.f32 %v2552_v5, %v9038_v61 }
 0x160   : > { %v4030_v14 = vmul.f32 %v9048_v6, %v3713_v12  ;;  %v7497_v16 = vpack.c.bf16 %v4504_v7, %v4504_v7  ;;  %vm3088_vm10 = vcmp.ge.f32.partialorder %v1921_v8, 0.0  ;;  %v3401_v17 = vmul.f32 0.01, %v1921_v8  ;;  %7956 = vmatprep.mubr.msk.bf16.mxu0 %vm8755_vm1, %v8754_v1 }
 0x161   : > { %8269 = vmatmul.mubr.msk.bf16.gmra.mrb[164].mxu1 %vm1295_vm2, %v8592_v63  ;;  %5913 = vst.msk [vmem:[%s9077_s6 + $0x6c] sm:$0xf] %vm5885_vm7, %v7339_v11  ;;  %v3871_v18 = vsel %vm3245_vm9, %v2550_v60, %v3558_v9  ;;  %vm3246_vm11 = vcmp.ge.f32.partialorder %v2553_v13, 0.0  ;;  %v3559_v19 = vmul.f32 0.01, %v2553_v13  ;;  %v8595_v63 = vld [vmem:[%s8822_s28 + $0x158] sm:$0xff]  }
 0x162   : > { %8272 = vmatprep.mubr.msk.bf16.mxu1 %vm8755_vm1, %v8754_v1  ;;  %v4347_v20 = vadd.f32 %v9053_v15, %v4030_v14  ;;  %6071 = vst.msk [vmem:[%s9077_s6 + $0x2e4] sm:$0xf] %vm5885_vm7, %v7497_v16  ;;  %v3714_v21 = vsel %vm3088_vm10, %v1921_v8, %v3401_v17  ;;  %v4188_v22 = vmul.f32 %v9048_v6, %v3871_v18  ;;  %v1925_v23 = vpop.f32.mrb[60].mxu0  ;;  %v2557_v29 = vpop.f32.mrb[60].mxu1  ;;  %v8596_v9 = vld [vmem:[%s8822_s28 + $0x3d0] sm:$0xff]  }
 0x163   : > { %v4031_v24 = vmul.f32 %v9048_v6, %v3714_v21  ;;  %v1926_v25 = vadd.f32 %v1925_v23, %v9038_v61  ;;  %v3872_v26 = vsel %vm3246_vm11, %v2553_v13, %v3559_v19  ;;  %v7850_v27 = vpop.f32.mrb[61].mxu0  ;;  %v2558_v34 = vadd.f32 %v2557_v29, %v9038_v61  ;;  %v8166_v35 = vpop.f32.mrb[61].mxu1 }
 0x164   : > { %v7340_v30 = vpack.c.bf16 %v4347_v20, %v4347_v20  ;;  %v4505_v31 = vadd.f32 %v9053_v15, %v4188_v22  ;;  %v4189_v32 = vmul.f32 %v9048_v6, %v3872_v26  ;;  %v1928_v33 = vpop.f32.mrb[62].mxu0  ;;  %v2560_v41 = vpop.f32.mrb[62].mxu1 }
 0x165   : > { %v4348_v37 = vadd.f32 %v9053_v15, %v4031_v24  ;;  %vm3089_vm12 = vcmp.ge.f32.partialorder %v1926_v25, 0.0  ;;  %v3402_v38 = vmul.f32 0.01, %v1926_v25  ;;  %v1929_v39 = vadd.f32 %v1928_v33, %v9038_v61  ;;  %v7851_v40 = vpop.f32.mrb[63].mxu0  ;;  %v8167_v45 = vpop.f32.mrb[63].mxu1 }
 0x166   : > { %5914 = vst.msk [vmem:[%s9077_s6 + $0x70] sm:$0xf] %vm5885_vm7, %v7340_v30  ;;  %v7498_v42 = vpack.c.bf16 %v4505_v31, %v4505_v31  ;;  %v4506_v43 = vadd.f32 %v9053_v15, %v4189_v32  ;;  %vm3247_vm13 = vcmp.ge.f32.partialorder %v2558_v34, 0.0  ;;  %v3560_v44 = vmul.f32 0.01, %v2558_v34 }
 0x167   : > { %v7341_v46 = vpack.c.bf16 %v4348_v37, %v4348_v37  ;;  %v3715_v47 = vsel %vm3089_vm12, %v1926_v25, %v3402_v38  ;;  %vm3090_vm14 = vcmp.ge.f32.partialorder %v1929_v39, 0.0  ;;  %v3403_v48 = vmul.f32 0.01, %v1929_v39  ;;  %7957 = vmatmul.mubr.msk.bf16.gmra.mrb[168].mxu0 %vm1295_vm2, %v8593_v28  ;;  %v8597_v37 = vld [vmem:[%s8822_s28 + $0x160] sm:$0xff]  }
 0x168   : > { %6072 = vst.msk [vmem:[%s9077_s6 + $0x2e8] sm:$0xf] %vm5885_vm7, %v7498_v42  ;;  %v4032_v49 = vmul.f32 %v9048_v6, %v3715_v47  ;;  %v7499_v50 = vpack.c.bf16 %v4506_v43, %v4506_v43  ;;  %v3873_v51 = vsel %vm3247_vm13, %v2558_v34, %v3560_v44  ;;  %v2561_v52 = vadd.f32 %v2560_v41, %v9038_v61  ;;  %v8598_v44 = vld [vmem:[%s8822_s28 + $0x3d8] sm:$0xff]  }
 0x169   : > { %8273 = vmatmul.mubr.msk.bf16.gmra.mrb[168].mxu1 %vm1295_vm2, %v8594_v36  ;;  %5915 = vst.msk [vmem:[%s9077_s6 + $0x74] sm:$0xf] %vm5885_vm7, %v7341_v46  ;;  %v3716_v53 = vsel %vm3090_vm14, %v1929_v39, %v3403_v48  ;;  %v4190_v54 = vmul.f32 %v9048_v6, %v3873_v51  ;;  %7960 = vmatprep.mubr.msk.bf16.mxu0 %vm8755_vm1, %v8754_v1 }
 0x16a   : > { %8276 = vmatprep.mubr.msk.bf16.mxu1 %vm8755_vm1, %v8754_v1  ;;  %v4349_v55 = vadd.f32 %v9053_v15, %v4032_v49  ;;  %6073 = vst.msk [vmem:[%s9077_s6 + $0x2ec] sm:$0xf] %vm5885_vm7, %v7499_v50  ;;  %v4033_v56 = vmul.f32 %v9048_v6, %v3716_v53  ;;  %v1933_v57 = vpop.f32.mrb[64].mxu0  ;;  %vm3248_vm15 = vcmp.ge.f32.partialorder %v2561_v52, 0.0  ;;  %v3561_v58 = vmul.f32 0.01, %v2561_v52 }
 0x16b   : > { %v4507_v59 = vadd.f32 %v9053_v15, %v4190_v54  ;;  %v1934_v60 = vadd.f32 %v1933_v57, %v9038_v61  ;;  %v7854_v62 = vpop.f32.mrb[65].mxu0  ;;  %v2565_v0 = vpop.f32.mrb[64].mxu1 }
 0x16c   : > { %v7342_v2 = vpack.c.bf16 %v4349_v55, %v4349_v55  ;;  %v4350_v3 = vadd.f32 %v9053_v15, %v4033_v56  ;;  %v3874_v4 = vsel %vm3248_vm15, %v2561_v52, %v3561_v58  ;;  %v1936_v5 = vpop.f32.mrb[66].mxu0  ;;  %v2566_v7 = vadd.f32 %v2565_v0, %v9038_v61  ;;  %v8170_v8 = vpop.f32.mrb[65].mxu1 }
 0x16d   : > { %v7500_v10 = vpack.c.bf16 %v4507_v59, %v4507_v59  ;;  %vm3091_vm0 = vcmp.ge.f32.partialorder %v1934_v60, 0.0  ;;  %v3404_v11 = vmul.f32 0.01, %v1934_v60  ;;  %v4191_v12 = vmul.f32 %v9048_v6, %v3874_v4  ;;  %v7855_v13 = vpop.f32.mrb[67].mxu0  ;;  %v2568_v14 = vpop.f32.mrb[66].mxu1 }
 0x16e   : > { %5916 = vst.msk [vmem:[%s9077_s6 + $0x78] sm:$0xf] %vm5885_vm7, %v7342_v2  ;;  %v7343_v16 = vpack.c.bf16 %v4350_v3, %v4350_v3  ;;  %v1937_v17 = vadd.f32 %v1936_v5, %v9038_v61  ;;  %vm3249_vm3 = vcmp.ge.f32.partialorder %v2566_v7, 0.0  ;;  %v3562_v18 = vmul.f32 0.01, %v2566_v7  ;;  %v8171_v19 = vpop.f32.mrb[67].mxu1 }
 0x16f   : > { %6074 = vst.msk [vmem:[%s9077_s6 + $0x2f0] sm:$0xf] %vm5885_vm7, %v7500_v10  ;;  %v3717_v20 = vsel %vm3091_vm0, %v1934_v60, %v3404_v11  ;;  %v4508_v21 = vadd.f32 %v9053_v15, %v4191_v12  ;;  %7961 = vmatmul.mubr.msk.bf16.gmra.mrb[172].mxu0 %vm1295_vm2, %v8595_v63  ;;  %v2569_v22 = vadd.f32 %v2568_v14, %v9038_v61 }
 0x170   : > { %5917 = vst.msk [vmem:[%s9077_s6 + $0x7c] sm:$0xf] %vm5885_vm7, %v7343_v16  ;;  %v4034_v23 = vmul.f32 %v9048_v6, %v3717_v20  ;;  %vm3092_vm4 = vcmp.ge.f32.partialorder %v1937_v17, 0.0  ;;  %v3405_v24 = vmul.f32 0.01, %v1937_v17  ;;  %v3875_v25 = vsel %vm3249_vm3, %v2566_v7, %v3562_v18  ;;  %7964 = vmatprep.mubr.msk.bf16.mxu0 %vm8755_vm1, %v8754_v1  ;;  %v8600_v18 = vld [vmem:[%s8822_s28 + $0x3e0] sm:$0xff]  }
 0x171   : > { %8277 = vmatmul.mubr.msk.bf16.gmra.mrb[172].mxu1 %vm1295_vm2, %v8596_v9  ;;  %v7501_v26 = vpack.c.bf16 %v4508_v21, %v4508_v21  ;;  %v4192_v27 = vmul.f32 %v9048_v6, %v3875_v25  ;;  %vm3250_vm5 = vcmp.ge.f32.partialorder %v2569_v22, 0.0  ;;  %v3563_v28 = vmul.f32 0.01, %v2569_v22  ;;  %v8599_v9 = vld [vmem:[%s8822_s28 + $0x168] sm:$0xff]  }
 0x172   : > { %8280 = vmatprep.mubr.msk.bf16.mxu1 %vm8755_vm1, %v8754_v1  ;;  %v4351_v29 = vadd.f32 %v9053_v15, %v4034_v23  ;;  %v3718_v30 = vsel %vm3092_vm4, %v1937_v17, %v3405_v24  ;;  %v1941_v31 = vpop.f32.mrb[68].mxu0  ;;  %v2573_v38 = vpop.f32.mrb[68].mxu1 }
 0x173   : > { %6075 = vst.msk [vmem:[%s9077_s6 + $0x2f4] sm:$0xf] %vm5885_vm7, %v7501_v26  ;;  %v4035_v32 = vmul.f32 %v9048_v6, %v3718_v30  ;;  %v4509_v33 = vadd.f32 %v9053_v15, %v4192_v27  ;;  %v1942_v34 = vadd.f32 %v1941_v31, %v9038_v61  ;;  %v3876_v35 = vsel %vm3250_vm5, %v2569_v22, %v3563_v28  ;;  %v7858_v36 = vpop.f32.mrb[69].mxu0  ;;  %v8174_v43 = vpop.f32.mrb[69].mxu1 }
 0x174   : > { %v7344_v39 = vpack.c.bf16 %v4351_v29, %v4351_v29  ;;  %v4193_v40 = vmul.f32 %v9048_v6, %v3876_v35  ;;  %v1944_v41 = vpop.f32.mrb[70].mxu0  ;;  %v2574_v42 = vadd.f32 %v2573_v38, %v9038_v61  ;;  %v2576_v49 = vpop.f32.mrb[70].mxu1 }
 0x175   : > { %v4352_v45 = vadd.f32 %v9053_v15, %v4035_v32  ;;  %v7502_v46 = vpack.c.bf16 %v4509_v33, %v4509_v33  ;;  %vm3093_vm6 = vcmp.ge.f32.partialorder %v1942_v34, 0.0  ;;  %v3406_v47 = vmul.f32 0.01, %v1942_v34  ;;  %v7859_v48 = vpop.f32.mrb[71].mxu0  ;;  %v8175_v53 = vpop.f32.mrb[71].mxu1 }
 0x176   : > { %5918 = vst.msk [vmem:[%s9077_s6 + $0x80] sm:$0xf] %vm5885_vm7, %v7344_v39  ;;  %v4510_v50 = vadd.f32 %v9053_v15, %v4193_v40  ;;  %v1945_v51 = vadd.f32 %v1944_v41, %v9038_v61  ;;  %vm3251_vm8 = vcmp.ge.f32.partialorder %v2574_v42, 0.0  ;;  %v3564_v52 = vmul.f32 0.01, %v2574_v42 }
 0x177   : > { %v7345_v54 = vpack.c.bf16 %v4352_v45, %v4352_v45  ;;  %6076 = vst.msk [vmem:[%s9077_s6 + $0x2f8] sm:$0xf] %vm5885_vm7, %v7502_v46  ;;  %v3719_v55 = vsel %vm3093_vm6, %v1942_v34, %v3406_v47  ;;  %7965 = vmatmul.mubr.msk.bf16.gmra.mrb[176].mxu0 %vm1295_vm2, %v8597_v37  ;;  %v2577_v56 = vadd.f32 %v2576_v49, %v9038_v61 }
 0x178   : > { %v4036_v57 = vmul.f32 %v9048_v6, %v3719_v55  ;;  %v7503_v58 = vpack.c.bf16 %v4510_v50, %v4510_v50  ;;  %vm3094_vm9 = vcmp.ge.f32.partialorder %v1945_v51, 0.0  ;;  %v3407_v59 = vmul.f32 0.01, %v1945_v51  ;;  %7968 = vmatprep.mubr.msk.bf16.mxu0 %vm8755_vm1, %v8754_v1 }
 0x179   : > { %8281 = vmatmul.mubr.msk.bf16.gmra.mrb[176].mxu1 %vm1295_vm2, %v8598_v44  ;;  %5919 = vst.msk [vmem:[%s9077_s6 + $0x84] sm:$0xf] %vm5885_vm7, %v7345_v54  ;;  %v3877_v60 = vsel %vm3251_vm8, %v2574_v42, %v3564_v52  ;;  %vm3252_vm10 = vcmp.ge.f32.partialorder %v2577_v56, 0.0  ;;  %v3565_v62 = vmul.f32 0.01, %v2577_v56  ;;  %v8601_v44 = vld [vmem:[%s8822_s28 + $0x170] sm:$0xff]  }
 0x17a   : > { %8284 = vmatprep.mubr.msk.bf16.mxu1 %vm8755_vm1, %v8754_v1  ;;  %v4353_v63 = vadd.f32 %v9053_v15, %v4036_v57  ;;  %6077 = vst.msk [vmem:[%s9077_s6 + $0x2fc] sm:$0xf] %vm5885_vm7, %v7503_v58  ;;  %v3720_v0 = vsel %vm3094_vm9, %v1945_v51, %v3407_v59  ;;  %v4194_v2 = vmul.f32 %v9048_v6, %v3877_v60  ;;  %v1949_v3 = vpop.f32.mrb[72].mxu0  ;;  %v2581_v10 = vpop.f32.mrb[72].mxu1  ;;  %v8602_v52 = vld [vmem:[%s8822_s28 + $0x3e8] sm:$0xff]  }
 0x17b   : > { %v4037_v4 = vmul.f32 %v9048_v6, %v3720_v0  ;;  %v1950_v5 = vadd.f32 %v1949_v3, %v9038_v61  ;;  %v3878_v7 = vsel %vm3252_vm10, %v2577_v56, %v3565_v62  ;;  %v7862_v8 = vpop.f32.mrb[73].mxu0  ;;  %v2582_v16 = vadd.f32 %v2581_v10, %v9038_v61  ;;  %v8178_v17 = vpop.f32.mrb[73].mxu1 }
 0x17c   : > { %v7346_v11 = vpack.c.bf16 %v4353_v63, %v4353_v63  ;;  %v4511_v12 = vadd.f32 %v9053_v15, %v4194_v2  ;;  %v4195_v13 = vmul.f32 %v9048_v6, %v3878_v7  ;;  %v1952_v14 = vpop.f32.mrb[74].mxu0  ;;  %v2584_v23 = vpop.f32.mrb[74].mxu1 }
 0x17d   : > { %v4354_v19 = vadd.f32 %v9053_v15, %v4037_v4  ;;  %vm3095_vm11 = vcmp.ge.f32.partialorder %v1950_v5, 0.0  ;;  %v3408_v20 = vmul.f32 0.01, %v1950_v5  ;;  %v1953_v21 = vadd.f32 %v1952_v14, %v9038_v61  ;;  %v7863_v22 = vpop.f32.mrb[75].mxu0  ;;  %v8179_v27 = vpop.f32.mrb[75].mxu1 }
 0x17e   : > { %5920 = vst.msk [vmem:[%s9077_s6 + $0x88] sm:$0xf] %vm5885_vm7, %v7346_v11  ;;  %v7504_v24 = vpack.c.bf16 %v4511_v12, %v4511_v12  ;;  %v4512_v25 = vadd.f32 %v9053_v15, %v4195_v13  ;;  %vm3253_vm12 = vcmp.ge.f32.partialorder %v2582_v16, 0.0  ;;  %v3566_v26 = vmul.f32 0.01, %v2582_v16 }
 0x17f   : > { %v7347_v28 = vpack.c.bf16 %v4354_v19, %v4354_v19  ;;  %v3721_v29 = vsel %vm3095_vm11, %v1950_v5, %v3408_v20  ;;  %vm3096_vm13 = vcmp.ge.f32.partialorder %v1953_v21, 0.0  ;;  %v3409_v30 = vmul.f32 0.01, %v1953_v21  ;;  %7969 = vmatmul.mubr.msk.bf16.gmra.mrb[180].mxu0 %vm1295_vm2, %v8599_v9  ;;  %v8603_v19 = vld [vmem:[%s8822_s28 + $0x178] sm:$0xff]  }
 0x180   : > { %6078 = vst.msk [vmem:[%s9077_s6 + $0x300] sm:$0xf] %vm5885_vm7, %v7504_v24  ;;  %v4038_v31 = vmul.f32 %v9048_v6, %v3721_v29  ;;  %v7505_v32 = vpack.c.bf16 %v4512_v25, %v4512_v25  ;;  %v3879_v33 = vsel %vm3253_vm12, %v2582_v16, %v3566_v26  ;;  %v2585_v34 = vadd.f32 %v2584_v23, %v9038_v61  ;;  %v8604_v26 = vld [vmem:[%s8822_s28 + $0x3f0] sm:$0xff]  }
 0x181   : > { %8285 = vmatmul.mubr.msk.bf16.gmra.mrb[180].mxu1 %vm1295_vm2, %v8600_v18  ;;  %5921 = vst.msk [vmem:[%s9077_s6 + $0x8c] sm:$0xf] %vm5885_vm7, %v7347_v28  ;;  %v3722_v35 = vsel %vm3096_vm13, %v1953_v21, %v3409_v30  ;;  %v4196_v36 = vmul.f32 %v9048_v6, %v3879_v33  ;;  %7972 = vmatprep.mubr.msk.bf16.mxu0 %vm8755_vm1, %v8754_v1 }
 0x182   : > { %8288 = vmatprep.mubr.msk.bf16.mxu1 %vm8755_vm1, %v8754_v1  ;;  %v4355_v37 = vadd.f32 %v9053_v15, %v4038_v31  ;;  %6079 = vst.msk [vmem:[%s9077_s6 + $0x304] sm:$0xf] %vm5885_vm7, %v7505_v32  ;;  %v4039_v38 = vmul.f32 %v9048_v6, %v3722_v35  ;;  %v1957_v39 = vpop.f32.mrb[76].mxu0  ;;  %vm3254_vm14 = vcmp.ge.f32.partialorder %v2585_v34, 0.0  ;;  %v3567_v40 = vmul.f32 0.01, %v2585_v34 }
 0x183   : > { %v4513_v41 = vadd.f32 %v9053_v15, %v4196_v36  ;;  %v1958_v42 = vadd.f32 %v1957_v39, %v9038_v61  ;;  %v7866_v43 = vpop.f32.mrb[77].mxu0  ;;  %v2589_v45 = vpop.f32.mrb[76].mxu1 }
 0x184   : > { %v7348_v46 = vpack.c.bf16 %v4355_v37, %v4355_v37  ;;  %v4356_v47 = vadd.f32 %v9053_v15, %v4039_v38  ;;  %v3880_v48 = vsel %vm3254_vm14, %v2585_v34, %v3567_v40  ;;  %v1960_v49 = vpop.f32.mrb[78].mxu0  ;;  %v2590_v50 = vadd.f32 %v2589_v45, %v9038_v61  ;;  %v8182_v51 = vpop.f32.mrb[77].mxu1 }
 0x185   : > { %v7506_v53 = vpack.c.bf16 %v4513_v41, %v4513_v41  ;;  %vm3097_vm15 = vcmp.ge.f32.partialorder %v1958_v42, 0.0  ;;  %v3410_v54 = vmul.f32 0.01, %v1958_v42  ;;  %v4197_v55 = vmul.f32 %v9048_v6, %v3880_v48  ;;  %v7867_v56 = vpop.f32.mrb[79].mxu0  ;;  %v2592_v57 = vpop.f32.mrb[78].mxu1 }
 0x186   : > { %5922 = vst.msk [vmem:[%s9077_s6 + $0x90] sm:$0xf] %vm5885_vm7, %v7348_v46  ;;  %v7349_v58 = vpack.c.bf16 %v4356_v47, %v4356_v47  ;;  %v1961_v59 = vadd.f32 %v1960_v49, %v9038_v61  ;;  %vm3255_vm0 = vcmp.ge.f32.partialorder %v2590_v50, 0.0  ;;  %v3568_v60 = vmul.f32 0.01, %v2590_v50  ;;  %v8183_v62 = vpop.f32.mrb[79].mxu1 }
 0x187   : > { %6080 = vst.msk [vmem:[%s9077_s6 + $0x308] sm:$0xf] %vm5885_vm7, %v7506_v53  ;;  %v3723_v63 = vsel %vm3097_vm15, %v1958_v42, %v3410_v54  ;;  %v4514_v0 = vadd.f32 %v9053_v15, %v4197_v55  ;;  %7973 = vmatmul.mubr.msk.bf16.gmra.mrb[184].mxu0 %vm1295_vm2, %v8601_v44  ;;  %v2593_v2 = vadd.f32 %v2592_v57, %v9038_v61 }
 0x188   : > { %5923 = vst.msk [vmem:[%s9077_s6 + $0x94] sm:$0xf] %vm5885_vm7, %v7349_v58  ;;  %v4040_v3 = vmul.f32 %v9048_v6, %v3723_v63  ;;  %vm3098_vm3 = vcmp.ge.f32.partialorder %v1961_v59, 0.0  ;;  %v3411_v4 = vmul.f32 0.01, %v1961_v59  ;;  %v3881_v5 = vsel %vm3255_vm0, %v2590_v50, %v3568_v60  ;;  %7976 = vmatprep.mubr.msk.bf16.mxu0 %vm8755_vm1, %v8754_v1  ;;  %v8606_v60 = vld [vmem:[%s8822_s28 + $0x3f8] sm:$0xff]  }
 0x189   : > { %8289 = vmatmul.mubr.msk.bf16.gmra.mrb[184].mxu1 %vm1295_vm2, %v8602_v52  ;;  %v7507_v7 = vpack.c.bf16 %v4514_v0, %v4514_v0  ;;  %v4198_v8 = vmul.f32 %v9048_v6, %v3881_v5  ;;  %vm3256_vm4 = vcmp.ge.f32.partialorder %v2593_v2, 0.0  ;;  %v3569_v9 = vmul.f32 0.01, %v2593_v2  ;;  %v8605_v52 = vld [vmem:[%s8822_s28 + $0x180] sm:$0xff]  }
 0x18a   : > { %8292 = vmatprep.mubr.msk.bf16.mxu1 %vm8755_vm1, %v8754_v1  ;;  %v4357_v10 = vadd.f32 %v9053_v15, %v4040_v3  ;;  %v3724_v11 = vsel %vm3098_vm3, %v1961_v59, %v3411_v4  ;;  %v1965_v12 = vpop.f32.mrb[80].mxu0  ;;  %v2597_v20 = vpop.f32.mrb[80].mxu1 }
 0x18b   : > { %6081 = vst.msk [vmem:[%s9077_s6 + $0x30c] sm:$0xf] %vm5885_vm7, %v7507_v7  ;;  %v4041_v13 = vmul.f32 %v9048_v6, %v3724_v11  ;;  %v4515_v14 = vadd.f32 %v9053_v15, %v4198_v8  ;;  %v1966_v16 = vadd.f32 %v1965_v12, %v9038_v61  ;;  %v3882_v17 = vsel %vm3256_vm4, %v2593_v2, %v3569_v9  ;;  %v7870_v18 = vpop.f32.mrb[81].mxu0  ;;  %v8186_v25 = vpop.f32.mrb[81].mxu1 }
 0x18c   : > { %v7350_v21 = vpack.c.bf16 %v4357_v10, %v4357_v10  ;;  %v4199_v22 = vmul.f32 %v9048_v6, %v3882_v17  ;;  %v1968_v23 = vpop.f32.mrb[82].mxu0  ;;  %v2598_v24 = vadd.f32 %v2597_v20, %v9038_v61  ;;  %v2600_v31 = vpop.f32.mrb[82].mxu1 }
 0x18d   : > { %v4358_v27 = vadd.f32 %v9053_v15, %v4041_v13  ;;  %v7508_v28 = vpack.c.bf16 %v4515_v14, %v4515_v14  ;;  %vm3099_vm5 = vcmp.ge.f32.partialorder %v1966_v16, 0.0  ;;  %v3412_v29 = vmul.f32 0.01, %v1966_v16  ;;  %v7871_v30 = vpop.f32.mrb[83].mxu0  ;;  %v8187_v35 = vpop.f32.mrb[83].mxu1 }
 0x18e   : > { %5924 = vst.msk [vmem:[%s9077_s6 + $0x98] sm:$0xf] %vm5885_vm7, %v7350_v21  ;;  %v4516_v32 = vadd.f32 %v9053_v15, %v4199_v22  ;;  %v1969_v33 = vadd.f32 %v1968_v23, %v9038_v61  ;;  %vm3257_vm6 = vcmp.ge.f32.partialorder %v2598_v24, 0.0  ;;  %v3570_v34 = vmul.f32 0.01, %v2598_v24 }
 0x18f   : > { %v7351_v36 = vpack.c.bf16 %v4358_v27, %v4358_v27  ;;  %6082 = vst.msk [vmem:[%s9077_s6 + $0x310] sm:$0xf] %vm5885_vm7, %v7508_v28  ;;  %v3725_v37 = vsel %vm3099_vm5, %v1966_v16, %v3412_v29  ;;  %7977 = vmatmul.mubr.msk.bf16.gmra.mrb[188].mxu0 %vm1295_vm2, %v8603_v19  ;;  %v2601_v38 = vadd.f32 %v2600_v31, %v9038_v61 }
 0x190   : > { %v4042_v39 = vmul.f32 %v9048_v6, %v3725_v37  ;;  %v7509_v40 = vpack.c.bf16 %v4516_v32, %v4516_v32  ;;  %vm3100_vm8 = vcmp.ge.f32.partialorder %v1969_v33, 0.0  ;;  %v3413_v41 = vmul.f32 0.01, %v1969_v33  ;;  %7980 = vmatprep.mubr.msk.bf16.mxu0 %vm8755_vm1, %v8754_v1 }
 0x191   : > { %8293 = vmatmul.mubr.msk.bf16.gmra.mrb[188].mxu1 %vm1295_vm2, %v8604_v26  ;;  %5925 = vst.msk [vmem:[%s9077_s6 + $0x9c] sm:$0xf] %vm5885_vm7, %v7351_v36  ;;  %v3883_v42 = vsel %vm3257_vm6, %v2598_v24, %v3570_v34  ;;  %vm3258_vm9 = vcmp.ge.f32.partialorder %v2601_v38, 0.0  ;;  %v3571_v43 = vmul.f32 0.01, %v2601_v38  ;;  %v8607_v26 = vld [vmem:[%s8822_s28 + $0x188] sm:$0xff]  }
 0x192   : > { %8296 = vmatprep.mubr.msk.bf16.mxu1 %vm8755_vm1, %v8754_v1  ;;  %v4359_v44 = vadd.f32 %v9053_v15, %v4042_v39  ;;  %6083 = vst.msk [vmem:[%s9077_s6 + $0x314] sm:$0xf] %vm5885_vm7, %v7509_v40  ;;  %v3726_v45 = vsel %vm3100_vm8, %v1969_v33, %v3413_v41  ;;  %v4200_v46 = vmul.f32 %v9048_v6, %v3883_v42  ;;  %v1973_v47 = vpop.f32.mrb[84].mxu0  ;;  %v2605_v53 = vpop.f32.mrb[84].mxu1  ;;  %v8608_v34 = vld [vmem:[%s8822_s28 + $0x400] sm:$0xff]  }
 0x193   : > { %v4043_v48 = vmul.f32 %v9048_v6, %v3726_v45  ;;  %v1974_v49 = vadd.f32 %v1973_v47, %v9038_v61  ;;  %v3884_v50 = vsel %vm3258_vm9, %v2601_v38, %v3571_v43  ;;  %v7874_v51 = vpop.f32.mrb[85].mxu0  ;;  %v2606_v58 = vadd.f32 %v2605_v53, %v9038_v61  ;;  %v8190_v59 = vpop.f32.mrb[85].mxu1 }
 0x194   : > { %v7352_v54 = vpack.c.bf16 %v4359_v44, %v4359_v44  ;;  %v4517_v55 = vadd.f32 %v9053_v15, %v4200_v46  ;;  %v4201_v56 = vmul.f32 %v9048_v6, %v3884_v50  ;;  %v1976_v57 = vpop.f32.mrb[86].mxu0  ;;  %v2608_v3 = vpop.f32.mrb[86].mxu1 }
 0x195   : > { %v4360_v62 = vadd.f32 %v9053_v15, %v4043_v48  ;;  %vm3101_vm10 = vcmp.ge.f32.partialorder %v1974_v49, 0.0  ;;  %v3414_v63 = vmul.f32 0.01, %v1974_v49  ;;  %v1977_v0 = vadd.f32 %v1976_v57, %v9038_v61  ;;  %v7875_v2 = vpop.f32.mrb[87].mxu0  ;;  %v8191_v8 = vpop.f32.mrb[87].mxu1 }
 0x196   : > { %5926 = vst.msk [vmem:[%s9077_s6 + $0xa0] sm:$0xf] %vm5885_vm7, %v7352_v54  ;;  %v7510_v4 = vpack.c.bf16 %v4517_v55, %v4517_v55  ;;  %v4518_v5 = vadd.f32 %v9053_v15, %v4201_v56  ;;  %vm3259_vm11 = vcmp.ge.f32.partialorder %v2606_v58, 0.0  ;;  %v3572_v7 = vmul.f32 0.01, %v2606_v58 }
 0x197   : > { %v7353_v9 = vpack.c.bf16 %v4360_v62, %v4360_v62  ;;  %v3727_v10 = vsel %vm3101_vm10, %v1974_v49, %v3414_v63  ;;  %vm3102_vm12 = vcmp.ge.f32.partialorder %v1977_v0, 0.0  ;;  %v3415_v11 = vmul.f32 0.01, %v1977_v0  ;;  %7981 = vmatmul.mubr.msk.bf16.gmra.mrb[192].mxu0 %vm1295_vm2, %v8605_v52  ;;  %v8609_v62 = vld [vmem:[%s8822_s28 + $0x190] sm:$0xff]  }
 0x198   : > { %6084 = vst.msk [vmem:[%s9077_s6 + $0x318] sm:$0xf] %vm5885_vm7, %v7510_v4  ;;  %v4044_v12 = vmul.f32 %v9048_v6, %v3727_v10  ;;  %v7511_v13 = vpack.c.bf16 %v4518_v5, %v4518_v5  ;;  %v3885_v14 = vsel %vm3259_vm11, %v2606_v58, %v3572_v7  ;;  %v2609_v16 = vadd.f32 %v2608_v3, %v9038_v61  ;;  %v8610_v7 = vld [vmem:[%s8822_s28 + $0x408] sm:$0xff]  }
 0x199   : > { %8297 = vmatmul.mubr.msk.bf16.gmra.mrb[192].mxu1 %vm1295_vm2, %v8606_v60  ;;  %5927 = vst.msk [vmem:[%s9077_s6 + $0xa4] sm:$0xf] %vm5885_vm7, %v7353_v9  ;;  %v3728_v17 = vsel %vm3102_vm12, %v1977_v0, %v3415_v11  ;;  %v4202_v18 = vmul.f32 %v9048_v6, %v3885_v14  ;;  %7984 = vmatprep.mubr.msk.bf16.mxu0 %vm8755_vm1, %v8754_v1 }
 0x19a   : > { %8300 = vmatprep.mubr.msk.bf16.mxu1 %vm8755_vm1, %v8754_v1  ;;  %v4361_v19 = vadd.f32 %v9053_v15, %v4044_v12  ;;  %6085 = vst.msk [vmem:[%s9077_s6 + $0x31c] sm:$0xf] %vm5885_vm7, %v7511_v13  ;;  %v4045_v20 = vmul.f32 %v9048_v6, %v3728_v17  ;;  %v1981_v21 = vpop.f32.mrb[88].mxu0  ;;  %vm3260_vm13 = vcmp.ge.f32.partialorder %v2609_v16, 0.0  ;;  %v3573_v22 = vmul.f32 0.01, %v2609_v16 }
 0x19b   : > { %v4519_v23 = vadd.f32 %v9053_v15, %v4202_v18  ;;  %v1982_v24 = vadd.f32 %v1981_v21, %v9038_v61  ;;  %v7878_v25 = vpop.f32.mrb[89].mxu0  ;;  %v2613_v27 = vpop.f32.mrb[88].mxu1 }
 0x19c   : > { %v7354_v28 = vpack.c.bf16 %v4361_v19, %v4361_v19  ;;  %v4362_v29 = vadd.f32 %v9053_v15, %v4045_v20  ;;  %v3886_v30 = vsel %vm3260_vm13, %v2609_v16, %v3573_v22  ;;  %v1984_v31 = vpop.f32.mrb[90].mxu0  ;;  %v2614_v32 = vadd.f32 %v2613_v27, %v9038_v61  ;;  %v8194_v33 = vpop.f32.mrb[89].mxu1 }
 0x19d   : > { %v7512_v35 = vpack.c.bf16 %v4519_v23, %v4519_v23  ;;  %vm3103_vm14 = vcmp.ge.f32.partialorder %v1982_v24, 0.0  ;;  %v3416_v36 = vmul.f32 0.01, %v1982_v24  ;;  %v4203_v37 = vmul.f32 %v9048_v6, %v3886_v30  ;;  %v7879_v38 = vpop.f32.mrb[91].mxu0  ;;  %v2616_v39 = vpop.f32.mrb[90].mxu1 }
 0x19e   : > { %5928 = vst.msk [vmem:[%s9077_s6 + $0xa8] sm:$0xf] %vm5885_vm7, %v7354_v28  ;;  %v7355_v40 = vpack.c.bf16 %v4362_v29, %v4362_v29  ;;  %v1985_v41 = vadd.f32 %v1984_v31, %v9038_v61  ;;  %vm3261_vm15 = vcmp.ge.f32.partialorder %v2614_v32, 0.0  ;;  %v3574_v42 = vmul.f32 0.01, %v2614_v32  ;;  %v8195_v43 = vpop.f32.mrb[91].mxu1 }
 0x19f   : > { %6086 = vst.msk [vmem:[%s9077_s6 + $0x320] sm:$0xf] %vm5885_vm7, %v7512_v35  ;;  %v3729_v44 = vsel %vm3103_vm14, %v1982_v24, %v3416_v36  ;;  %v4520_v45 = vadd.f32 %v9053_v15, %v4203_v37  ;;  %7985 = vmatmul.mubr.msk.bf16.gmra.mrb[196].mxu0 %vm1295_vm2, %v8607_v26  ;;  %v2617_v46 = vadd.f32 %v2616_v39, %v9038_v61 }
 0x1a0   : > { %5929 = vst.msk [vmem:[%s9077_s6 + $0xac] sm:$0xf] %vm5885_vm7, %v7355_v40  ;;  %v4046_v47 = vmul.f32 %v9048_v6, %v3729_v44  ;;  %vm3104_vm0 = vcmp.ge.f32.partialorder %v1985_v41, 0.0  ;;  %v3417_v48 = vmul.f32 0.01, %v1985_v41  ;;  %v3887_v49 = vsel %vm3261_vm15, %v2614_v32, %v3574_v42  ;;  %7988 = vmatprep.mubr.msk.bf16.mxu0 %vm8755_vm1, %v8754_v1  ;;  %v8612_v42 = vld [vmem:[%s8822_s28 + $0x410] sm:$0xff]  }
 0x1a1   : > { %8301 = vmatmul.mubr.msk.bf16.gmra.mrb[196].mxu1 %vm1295_vm2, %v8608_v34  ;;  %v7513_v50 = vpack.c.bf16 %v4520_v45, %v4520_v45  ;;  %v4204_v51 = vmul.f32 %v9048_v6, %v3887_v49  ;;  %vm3262_vm3 = vcmp.ge.f32.partialorder %v2617_v46, 0.0  ;;  %v3575_v52 = vmul.f32 0.01, %v2617_v46  ;;  %v8611_v34 = vld [vmem:[%s8822_s28 + $0x198] sm:$0xff]  }
 0x1a2   : > { %8304 = vmatprep.mubr.msk.bf16.mxu1 %vm8755_vm1, %v8754_v1  ;;  %v4363_v53 = vadd.f32 %v9053_v15, %v4046_v47  ;;  %v3730_v54 = vsel %vm3104_vm0, %v1985_v41, %v3417_v48  ;;  %v1989_v55 = vpop.f32.mrb[92].mxu0  ;;  %v2621_v63 = vpop.f32.mrb[92].mxu1 }
 0x1a3   : > { %6087 = vst.msk [vmem:[%s9077_s6 + $0x324] sm:$0xf] %vm5885_vm7, %v7513_v50  ;;  %v4047_v56 = vmul.f32 %v9048_v6, %v3730_v54  ;;  %v4521_v57 = vadd.f32 %v9053_v15, %v4204_v51  ;;  %v1990_v58 = vadd.f32 %v1989_v55, %v9038_v61  ;;  %v3888_v59 = vsel %vm3262_vm3, %v2617_v46, %v3575_v52  ;;  %v7882_v60 = vpop.f32.mrb[93].mxu0  ;;  %v8198_v5 = vpop.f32.mrb[93].mxu1 }
 0x1a4   : > { %v7356_v0 = vpack.c.bf16 %v4363_v53, %v4363_v53  ;;  %v4205_v2 = vmul.f32 %v9048_v6, %v3888_v59  ;;  %v1992_v3 = vpop.f32.mrb[94].mxu0  ;;  %v2622_v4 = vadd.f32 %v2621_v63, %v9038_v61  ;;  %v2624_v12 = vpop.f32.mrb[94].mxu1 }
 0x1a5   : > { %v4364_v8 = vadd.f32 %v9053_v15, %v4047_v56  ;;  %v7514_v9 = vpack.c.bf16 %v4521_v57, %v4521_v57  ;;  %vm3105_vm4 = vcmp.ge.f32.partialorder %v1990_v58, 0.0  ;;  %v3418_v10 = vmul.f32 0.01, %v1990_v58  ;;  %v7883_v11 = vpop.f32.mrb[95].mxu0  ;;  %v8199_v17 = vpop.f32.mrb[95].mxu1 }
 0x1a6   : > { %5930 = vst.msk [vmem:[%s9077_s6 + $0xb0] sm:$0xf] %vm5885_vm7, %v7356_v0  ;;  %v4522_v13 = vadd.f32 %v9053_v15, %v4205_v2  ;;  %v1993_v14 = vadd.f32 %v1992_v3, %v9038_v61  ;;  %vm3263_vm5 = vcmp.ge.f32.partialorder %v2622_v4, 0.0  ;;  %v3576_v16 = vmul.f32 0.01, %v2622_v4 }
 0x1a7   : > { %v7357_v18 = vpack.c.bf16 %v4364_v8, %v4364_v8  ;;  %6088 = vst.msk [vmem:[%s9077_s6 + $0x328] sm:$0xf] %vm5885_vm7, %v7514_v9  ;;  %v3731_v19 = vsel %vm3105_vm4, %v1990_v58, %v3418_v10  ;;  %7989 = vmatmul.mubr.msk.bf16.gmra.mrb[200].mxu0 %vm1295_vm2, %v8609_v62  ;;  %v2625_v20 = vadd.f32 %v2624_v12, %v9038_v61 }
 0x1a8   : > { %v4048_v21 = vmul.f32 %v9048_v6, %v3731_v19  ;;  %v7515_v22 = vpack.c.bf16 %v4522_v13, %v4522_v13  ;;  %vm3106_vm6 = vcmp.ge.f32.partialorder %v1993_v14, 0.0  ;;  %v3419_v23 = vmul.f32 0.01, %v1993_v14  ;;  %7992 = vmatprep.mubr.msk.bf16.mxu0 %vm8755_vm1, %v8754_v1 }
 0x1a9   : > { %8305 = vmatmul.mubr.msk.bf16.gmra.mrb[200].mxu1 %vm1295_vm2, %v8610_v7  ;;  %5931 = vst.msk [vmem:[%s9077_s6 + $0xb4] sm:$0xf] %vm5885_vm7, %v7357_v18  ;;  %v3889_v24 = vsel %vm3263_vm5, %v2622_v4, %v3576_v16  ;;  %vm3264_vm8 = vcmp.ge.f32.partialorder %v2625_v20, 0.0  ;;  %v3577_v25 = vmul.f32 0.01, %v2625_v20  ;;  %v8613_v7 = vld [vmem:[%s8822_s28 + $0x1a0] sm:$0xff]  }
 0x1aa   : > { %8308 = vmatprep.mubr.msk.bf16.mxu1 %vm8755_vm1, %v8754_v1  ;;  %v4365_v26 = vadd.f32 %v9053_v15, %v4048_v21  ;;  %6089 = vst.msk [vmem:[%s9077_s6 + $0x32c] sm:$0xf] %vm5885_vm7, %v7515_v22  ;;  %v3732_v27 = vsel %vm3106_vm6, %v1993_v14, %v3419_v23  ;;  %v4206_v28 = vmul.f32 %v9048_v6, %v3889_v24  ;;  %v1997_v29 = vpop.f32.mrb[96].mxu0  ;;  %v2629_v35 = vpop.f32.mrb[96].mxu1  ;;  %v8614_v16 = vld [vmem:[%s8822_s28 + $0x418] sm:$0xff]  }
 0x1ab   : > { %v4049_v30 = vmul.f32 %v9048_v6, %v3732_v27  ;;  %v1998_v31 = vadd.f32 %v1997_v29, %v9038_v61  ;;  %v3890_v32 = vsel %vm3264_vm8, %v2625_v20, %v3577_v25  ;;  %v7886_v33 = vpop.f32.mrb[97].mxu0  ;;  %v2630_v40 = vadd.f32 %v2629_v35, %v9038_v61  ;;  %v8202_v41 = vpop.f32.mrb[97].mxu1 }
 0x1ac   : > { %v7358_v36 = vpack.c.bf16 %v4365_v26, %v4365_v26  ;;  %v4523_v37 = vadd.f32 %v9053_v15, %v4206_v28  ;;  %v4207_v38 = vmul.f32 %v9048_v6, %v3890_v32  ;;  %v2000_v39 = vpop.f32.mrb[98].mxu0  ;;  %v2632_v47 = vpop.f32.mrb[98].mxu1 }
 0x1ad   : > { %v4366_v43 = vadd.f32 %v9053_v15, %v4049_v30  ;;  %vm3107_vm9 = vcmp.ge.f32.partialorder %v1998_v31, 0.0  ;;  %v3420_v44 = vmul.f32 0.01, %v1998_v31  ;;  %v2001_v45 = vadd.f32 %v2000_v39, %v9038_v61  ;;  %v7887_v46 = vpop.f32.mrb[99].mxu0  ;;  %v8203_v51 = vpop.f32.mrb[99].mxu1 }
 0x1ae   : > { %5932 = vst.msk [vmem:[%s9077_s6 + $0xb8] sm:$0xf] %vm5885_vm7, %v7358_v36  ;;  %v7516_v48 = vpack.c.bf16 %v4523_v37, %v4523_v37  ;;  %v4524_v49 = vadd.f32 %v9053_v15, %v4207_v38  ;;  %vm3265_vm10 = vcmp.ge.f32.partialorder %v2630_v40, 0.0  ;;  %v3578_v50 = vmul.f32 0.01, %v2630_v40 }
 0x1af   : > { %v7359_v52 = vpack.c.bf16 %v4366_v43, %v4366_v43  ;;  %v3733_v53 = vsel %vm3107_vm9, %v1998_v31, %v3420_v44  ;;  %vm3108_vm11 = vcmp.ge.f32.partialorder %v2001_v45, 0.0  ;;  %v3421_v54 = vmul.f32 0.01, %v2001_v45  ;;  %7993 = vmatmul.mubr.msk.bf16.gmra.mrb[204].mxu0 %vm1295_vm2, %v8611_v34  ;;  %v8615_v43 = vld [vmem:[%s8822_s28 + $0x1a8] sm:$0xff]  }
 0x1b0   : > { %6090 = vst.msk [vmem:[%s9077_s6 + $0x330] sm:$0xf] %vm5885_vm7, %v7516_v48  ;;  %v4050_v55 = vmul.f32 %v9048_v6, %v3733_v53  ;;  %v7517_v56 = vpack.c.bf16 %v4524_v49, %v4524_v49  ;;  %v3891_v57 = vsel %vm3265_vm10, %v2630_v40, %v3578_v50  ;;  %v2633_v58 = vadd.f32 %v2632_v47, %v9038_v61  ;;  %v8616_v50 = vld [vmem:[%s8822_s28 + $0x420] sm:$0xff]  }
 0x1b1   : > { %8309 = vmatmul.mubr.msk.bf16.gmra.mrb[204].mxu1 %vm1295_vm2, %v8612_v42  ;;  %5933 = vst.msk [vmem:[%s9077_s6 + $0xbc] sm:$0xf] %vm5885_vm7, %v7359_v52  ;;  %v3734_v59 = vsel %vm3108_vm11, %v2001_v45, %v3421_v54  ;;  %v4208_v60 = vmul.f32 %v9048_v6, %v3891_v57  ;;  %7996 = vmatprep.mubr.msk.bf16.mxu0 %vm8755_vm1, %v8754_v1 }
 0x1b2   : > { %8312 = vmatprep.mubr.msk.bf16.mxu1 %vm8755_vm1, %v8754_v1  ;;  %v4367_v62 = vadd.f32 %v9053_v15, %v4050_v55  ;;  %6091 = vst.msk [vmem:[%s9077_s6 + $0x334] sm:$0xf] %vm5885_vm7, %v7517_v56  ;;  %v4051_v63 = vmul.f32 %v9048_v6, %v3734_v59  ;;  %v2005_v0 = vpop.f32.mrb[100].mxu0  ;;  %vm3266_vm12 = vcmp.ge.f32.partialorder %v2633_v58, 0.0  ;;  %v3579_v2 = vmul.f32 0.01, %v2633_v58 }
 0x1b3   : > { %v4525_v3 = vadd.f32 %v9053_v15, %v4208_v60  ;;  %v2006_v4 = vadd.f32 %v2005_v0, %v9038_v61  ;;  %v7890_v5 = vpop.f32.mrb[101].mxu0  ;;  %v2637_v8 = vpop.f32.mrb[100].mxu1 }
 0x1b4   : > { %v7360_v9 = vpack.c.bf16 %v4367_v62, %v4367_v62  ;;  %v4368_v10 = vadd.f32 %v9053_v15, %v4051_v63  ;;  %v3892_v11 = vsel %vm3266_vm12, %v2633_v58, %v3579_v2  ;;  %v2008_v12 = vpop.f32.mrb[102].mxu0  ;;  %v2638_v13 = vadd.f32 %v2637_v8, %v9038_v61  ;;  %v8206_v14 = vpop.f32.mrb[101].mxu1 }
 0x1b5   : > { %v7518_v17 = vpack.c.bf16 %v4525_v3, %v4525_v3  ;;  %vm3109_vm13 = vcmp.ge.f32.partialorder %v2006_v4, 0.0  ;;  %v3422_v18 = vmul.f32 0.01, %v2006_v4  ;;  %v4209_v19 = vmul.f32 %v9048_v6, %v3892_v11  ;;  %v7891_v20 = vpop.f32.mrb[103].mxu0  ;;  %v2640_v21 = vpop.f32.mrb[102].mxu1 }
 0x1b6   : > { %5934 = vst.msk [vmem:[%s9077_s6 + $0xc0] sm:$0xf] %vm5885_vm7, %v7360_v9  ;;  %v7361_v22 = vpack.c.bf16 %v4368_v10, %v4368_v10  ;;  %v2009_v23 = vadd.f32 %v2008_v12, %v9038_v61  ;;  %vm3267_vm14 = vcmp.ge.f32.partialorder %v2638_v13, 0.0  ;;  %v3580_v24 = vmul.f32 0.01, %v2638_v13  ;;  %v8207_v25 = vpop.f32.mrb[103].mxu1 }
 0x1b7   : > { %6092 = vst.msk [vmem:[%s9077_s6 + $0x338] sm:$0xf] %vm5885_vm7, %v7518_v17  ;;  %v3735_v26 = vsel %vm3109_vm13, %v2006_v4, %v3422_v18  ;;  %v4526_v27 = vadd.f32 %v9053_v15, %v4209_v19  ;;  %7997 = vmatmul.mubr.msk.bf16.gmra.mrb[208].mxu0 %vm1295_vm2, %v8613_v7  ;;  %v2641_v28 = vadd.f32 %v2640_v21, %v9038_v61 }
 0x1b8   : > { %5935 = vst.msk [vmem:[%s9077_s6 + $0xc4] sm:$0xf] %vm5885_vm7, %v7361_v22  ;;  %v4052_v29 = vmul.f32 %v9048_v6, %v3735_v26  ;;  %vm3110_vm15 = vcmp.ge.f32.partialorder %v2009_v23, 0.0  ;;  %v3423_v30 = vmul.f32 0.01, %v2009_v23  ;;  %v3893_v31 = vsel %vm3267_vm14, %v2638_v13, %v3580_v24  ;;  %8000 = vmatprep.mubr.msk.bf16.mxu0 %vm8755_vm1, %v8754_v1  ;;  %v8618_v24 = vld [vmem:[%s8822_s28 + $0x428] sm:$0xff]  }
 0x1b9   : > { %8313 = vmatmul.mubr.msk.bf16.gmra.mrb[208].mxu1 %vm1295_vm2, %v8614_v16  ;;  %v7519_v32 = vpack.c.bf16 %v4526_v27, %v4526_v27  ;;  %v4210_v33 = vmul.f32 %v9048_v6, %v3893_v31  ;;  %vm3268_vm0 = vcmp.ge.f32.partialorder %v2641_v28, 0.0  ;;  %v3581_v34 = vmul.f32 0.01, %v2641_v28  ;;  %v8617_v16 = vld [vmem:[%s8822_s28 + $0x1b0] sm:$0xff]  }
 0x1ba   : > { %8316 = vmatprep.mubr.msk.bf16.mxu1 %vm8755_vm1, %v8754_v1  ;;  %v4369_v35 = vadd.f32 %v9053_v15, %v4052_v29  ;;  %v3736_v36 = vsel %vm3110_vm15, %v2009_v23, %v3423_v30  ;;  %v2013_v37 = vpop.f32.mrb[104].mxu0  ;;  %v2645_v44 = vpop.f32.mrb[104].mxu1 }
 0x1bb   : > { %6093 = vst.msk [vmem:[%s9077_s6 + $0x33c] sm:$0xf] %vm5885_vm7, %v7519_v32  ;;  %v4053_v38 = vmul.f32 %v9048_v6, %v3736_v36  ;;  %v4527_v39 = vadd.f32 %v9053_v15, %v4210_v33  ;;  %v2014_v40 = vadd.f32 %v2013_v37, %v9038_v61  ;;  %v3894_v41 = vsel %vm3268_vm0, %v2641_v28, %v3581_v34  ;;  %v7894_v42 = vpop.f32.mrb[105].mxu0  ;;  %v8210_v49 = vpop.f32.mrb[105].mxu1 }
 0x1bc   : > { %v7362_v45 = vpack.c.bf16 %v4369_v35, %v4369_v35  ;;  %v4211_v46 = vmul.f32 %v9048_v6, %v3894_v41  ;;  %v2016_v47 = vpop.f32.mrb[106].mxu0  ;;  %v2646_v48 = vadd.f32 %v2645_v44, %v9038_v61  ;;  %v2648_v55 = vpop.f32.mrb[106].mxu1 }
 0x1bd   : > { %v4370_v51 = vadd.f32 %v9053_v15, %v4053_v38  ;;  %v7520_v52 = vpack.c.bf16 %v4527_v39, %v4527_v39  ;;  %vm3111_vm3 = vcmp.ge.f32.partialorder %v2014_v40, 0.0  ;;  %v3424_v53 = vmul.f32 0.01, %v2014_v40  ;;  %v7895_v54 = vpop.f32.mrb[107].mxu0  ;;  %v8211_v59 = vpop.f32.mrb[107].mxu1 }
 0x1be   : > { %5936 = vst.msk [vmem:[%s9077_s6 + $0xc8] sm:$0xf] %vm5885_vm7, %v7362_v45  ;;  %v4528_v56 = vadd.f32 %v9053_v15, %v4211_v46  ;;  %v2017_v57 = vadd.f32 %v2016_v47, %v9038_v61  ;;  %vm3269_vm4 = vcmp.ge.f32.partialorder %v2646_v48, 0.0  ;;  %v3582_v58 = vmul.f32 0.01, %v2646_v48 }
 0x1bf   : > { %v7363_v60 = vpack.c.bf16 %v4370_v51, %v4370_v51  ;;  %6094 = vst.msk [vmem:[%s9077_s6 + $0x340] sm:$0xf] %vm5885_vm7, %v7520_v52  ;;  %v3737_v62 = vsel %vm3111_vm3, %v2014_v40, %v3424_v53  ;;  %8001 = vmatmul.mubr.msk.bf16.gmra.mrb[212].mxu0 %vm1295_vm2, %v8615_v43  ;;  %v2649_v63 = vadd.f32 %v2648_v55, %v9038_v61 }
 0x1c0   : > { %v4054_v0 = vmul.f32 %v9048_v6, %v3737_v62  ;;  %v7521_v2 = vpack.c.bf16 %v4528_v56, %v4528_v56  ;;  %vm3112_vm5 = vcmp.ge.f32.partialorder %v2017_v57, 0.0  ;;  %v3425_v3 = vmul.f32 0.01, %v2017_v57  ;;  %8004 = vmatprep.mubr.msk.bf16.mxu0 %vm8755_vm1, %v8754_v1 }
 0x1c1   : > { %8317 = vmatmul.mubr.msk.bf16.gmra.mrb[212].mxu1 %vm1295_vm2, %v8616_v50  ;;  %5937 = vst.msk [vmem:[%s9077_s6 + $0xcc] sm:$0xf] %vm5885_vm7, %v7363_v60  ;;  %v3895_v4 = vsel %vm3269_vm4, %v2646_v48, %v3582_v58  ;;  %vm3270_vm6 = vcmp.ge.f32.partialorder %v2649_v63, 0.0  ;;  %v3583_v5 = vmul.f32 0.01, %v2649_v63  ;;  %v8619_v50 = vld [vmem:[%s8822_s28 + $0x1b8] sm:$0xff]  }
 0x1c2   : > { %8320 = vmatprep.mubr.msk.bf16.mxu1 %vm8755_vm1, %v8754_v1  ;;  %v4371_v7 = vadd.f32 %v9053_v15, %v4054_v0  ;;  %6095 = vst.msk [vmem:[%s9077_s6 + $0x344] sm:$0xf] %vm5885_vm7, %v7521_v2  ;;  %v3738_v8 = vsel %vm3112_vm5, %v2017_v57, %v3425_v3  ;;  %v4212_v9 = vmul.f32 %v9048_v6, %v3895_v4  ;;  %v2021_v10 = vpop.f32.mrb[108].mxu0  ;;  %v2653_v17 = vpop.f32.mrb[108].mxu1  ;;  %v8620_v58 = vld [vmem:[%s8822_s28 + $0x430] sm:$0xff]  }
 0x1c3   : > { %v4055_v11 = vmul.f32 %v9048_v6, %v3738_v8  ;;  %v2022_v12 = vadd.f32 %v2021_v10, %v9038_v61  ;;  %v3896_v13 = vsel %vm3270_vm6, %v2649_v63, %v3583_v5  ;;  %v7898_v14 = vpop.f32.mrb[109].mxu0  ;;  %v2654_v22 = vadd.f32 %v2653_v17, %v9038_v61  ;;  %v8214_v23 = vpop.f32.mrb[109].mxu1 }
 0x1c4   : > { %v7364_v18 = vpack.c.bf16 %v4371_v7, %v4371_v7  ;;  %v4529_v19 = vadd.f32 %v9053_v15, %v4212_v9  ;;  %v4213_v20 = vmul.f32 %v9048_v6, %v3896_v13  ;;  %v2024_v21 = vpop.f32.mrb[110].mxu0  ;;  %v2656_v29 = vpop.f32.mrb[110].mxu1 }
 0x1c5   : > { %v4372_v25 = vadd.f32 %v9053_v15, %v4055_v11  ;;  %vm3113_vm8 = vcmp.ge.f32.partialorder %v2022_v12, 0.0  ;;  %v3426_v26 = vmul.f32 0.01, %v2022_v12  ;;  %v2025_v27 = vadd.f32 %v2024_v21, %v9038_v61  ;;  %v7899_v28 = vpop.f32.mrb[111].mxu0  ;;  %v8215_v33 = vpop.f32.mrb[111].mxu1 }
 0x1c6   : > { %5938 = vst.msk [vmem:[%s9077_s6 + $0xd0] sm:$0xf] %vm5885_vm7, %v7364_v18  ;;  %v7522_v30 = vpack.c.bf16 %v4529_v19, %v4529_v19  ;;  %v4530_v31 = vadd.f32 %v9053_v15, %v4213_v20  ;;  %vm3271_vm9 = vcmp.ge.f32.partialorder %v2654_v22, 0.0  ;;  %v3584_v32 = vmul.f32 0.01, %v2654_v22 }
 0x1c7   : > { %v7365_v34 = vpack.c.bf16 %v4372_v25, %v4372_v25  ;;  %v3739_v35 = vsel %vm3113_vm8, %v2022_v12, %v3426_v26  ;;  %vm3114_vm10 = vcmp.ge.f32.partialorder %v2025_v27, 0.0  ;;  %v3427_v36 = vmul.f32 0.01, %v2025_v27  ;;  %8005 = vmatmul.mubr.msk.bf16.gmra.mrb[216].mxu0 %vm1295_vm2, %v8617_v16  ;;  %v8621_v25 = vld [vmem:[%s8822_s28 + $0x1c0] sm:$0xff]  }
 0x1c8   : > { %6096 = vst.msk [vmem:[%s9077_s6 + $0x348] sm:$0xf] %vm5885_vm7, %v7522_v30  ;;  %v4056_v37 = vmul.f32 %v9048_v6, %v3739_v35  ;;  %v7523_v38 = vpack.c.bf16 %v4530_v31, %v4530_v31  ;;  %v3897_v39 = vsel %vm3271_vm9, %v2654_v22, %v3584_v32  ;;  %v2657_v40 = vadd.f32 %v2656_v29, %v9038_v61  ;;  %v8622_v32 = vld [vmem:[%s8822_s28 + $0x438] sm:$0xff]  }
 0x1c9   : > { %8321 = vmatmul.mubr.msk.bf16.gmra.mrb[216].mxu1 %vm1295_vm2, %v8618_v24  ;;  %5939 = vst.msk [vmem:[%s9077_s6 + $0xd4] sm:$0xf] %vm5885_vm7, %v7365_v34  ;;  %v3740_v41 = vsel %vm3114_vm10, %v2025_v27, %v3427_v36  ;;  %v4214_v42 = vmul.f32 %v9048_v6, %v3897_v39  ;;  %8008 = vmatprep.mubr.msk.bf16.mxu0 %vm8755_vm1, %v8754_v1 }
 0x1ca   : > { %8324 = vmatprep.mubr.msk.bf16.mxu1 %vm8755_vm1, %v8754_v1  ;;  %v4373_v43 = vadd.f32 %v9053_v15, %v4056_v37  ;;  %6097 = vst.msk [vmem:[%s9077_s6 + $0x34c] sm:$0xf] %vm5885_vm7, %v7523_v38  ;;  %v4057_v44 = vmul.f32 %v9048_v6, %v3740_v41  ;;  %v2029_v45 = vpop.f32.mrb[112].mxu0  ;;  %vm3272_vm11 = vcmp.ge.f32.partialorder %v2657_v40, 0.0  ;;  %v3585_v46 = vmul.f32 0.01, %v2657_v40 }
 0x1cb   : > { %v4531_v47 = vadd.f32 %v9053_v15, %v4214_v42  ;;  %v2030_v48 = vadd.f32 %v2029_v45, %v9038_v61  ;;  %v7902_v49 = vpop.f32.mrb[113].mxu0  ;;  %v2661_v51 = vpop.f32.mrb[112].mxu1 }
 0x1cc   : > { %v7366_v52 = vpack.c.bf16 %v4373_v43, %v4373_v43  ;;  %v4374_v53 = vadd.f32 %v9053_v15, %v4057_v44  ;;  %v3898_v54 = vsel %vm3272_vm11, %v2657_v40, %v3585_v46  ;;  %v2032_v55 = vpop.f32.mrb[114].mxu0  ;;  %v2662_v56 = vadd.f32 %v2661_v51, %v9038_v61  ;;  %v8218_v57 = vpop.f32.mrb[113].mxu1 }
 0x1cd   : > { %v7524_v59 = vpack.c.bf16 %v4531_v47, %v4531_v47  ;;  %vm3115_vm12 = vcmp.ge.f32.partialorder %v2030_v48, 0.0  ;;  %v3428_v60 = vmul.f32 0.01, %v2030_v48  ;;  %v4215_v62 = vmul.f32 %v9048_v6, %v3898_v54  ;;  %v7903_v63 = vpop.f32.mrb[115].mxu0  ;;  %v2664_v0 = vpop.f32.mrb[114].mxu1 }
 0x1ce   : > { %5940 = vst.msk [vmem:[%s9077_s6 + $0xd8] sm:$0xf] %vm5885_vm7, %v7366_v52  ;;  %v7367_v2 = vpack.c.bf16 %v4374_v53, %v4374_v53  ;;  %v2033_v3 = vadd.f32 %v2032_v55, %v9038_v61  ;;  %vm3273_vm13 = vcmp.ge.f32.partialorder %v2662_v56, 0.0  ;;  %v3586_v4 = vmul.f32 0.01, %v2662_v56  ;;  %v8219_v5 = vpop.f32.mrb[115].mxu1 }
 0x1cf   : > { %6098 = vst.msk [vmem:[%s9077_s6 + $0x350] sm:$0xf] %vm5885_vm7, %v7524_v59  ;;  %v3741_v7 = vsel %vm3115_vm12, %v2030_v48, %v3428_v60  ;;  %v4532_v8 = vadd.f32 %v9053_v15, %v4215_v62  ;;  %8009 = vmatmul.mubr.msk.bf16.gmra.mrb[220].mxu0 %vm1295_vm2, %v8619_v50  ;;  %v2665_v9 = vadd.f32 %v2664_v0, %v9038_v61 }
 0x1d0   : > { %5941 = vst.msk [vmem:[%s9077_s6 + $0xdc] sm:$0xf] %vm5885_vm7, %v7367_v2  ;;  %v4058_v10 = vmul.f32 %v9048_v6, %v3741_v7  ;;  %vm3116_vm14 = vcmp.ge.f32.partialorder %v2033_v3, 0.0  ;;  %v3429_v11 = vmul.f32 0.01, %v2033_v3  ;;  %v3899_v12 = vsel %vm3273_vm13, %v2662_v56, %v3586_v4  ;;  %8012 = vmatprep.mubr.msk.bf16.mxu0 %vm8755_vm1, %v8754_v1  ;;  %v8624_v4 = vld [vmem:[%s8822_s28 + $0x440] sm:$0xff]  }
 0x1d1   : > { %8325 = vmatmul.mubr.msk.bf16.gmra.mrb[220].mxu1 %vm1295_vm2, %v8620_v58  ;;  %v7525_v13 = vpack.c.bf16 %v4532_v8, %v4532_v8  ;;  %v4216_v14 = vmul.f32 %v9048_v6, %v3899_v12  ;;  %vm3274_vm15 = vcmp.ge.f32.partialorder %v2665_v9, 0.0  ;;  %v3587_v16 = vmul.f32 0.01, %v2665_v9  ;;  %v8623_v58 = vld [vmem:[%s8822_s28 + $0x1c8] sm:$0xff]  }
 0x1d2   : > { %8328 = vmatprep.mubr.msk.bf16.mxu1 %vm8755_vm1, %v8754_v1  ;;  %v4375_v17 = vadd.f32 %v9053_v15, %v4058_v10  ;;  %v3742_v18 = vsel %vm3116_vm14, %v2033_v3, %v3429_v11  ;;  %v2037_v19 = vpop.f32.mrb[116].mxu0 }
 0x1d3   : > { %6099 = vst.msk [vmem:[%s9077_s6 + $0x354] sm:$0xf] %vm5885_vm7, %v7525_v13  ;;  %v4059_v20 = vmul.f32 %v9048_v6, %v3742_v18  ;;  %v4533_v21 = vadd.f32 %v9053_v15, %v4216_v14  ;;  %v2038_v22 = vadd.f32 %v2037_v19, %v9038_v61  ;;  %v3900_v23 = vsel %vm3274_vm15, %v2665_v9, %v3587_v16  ;;  %v7906_v24 = vpop.f32.mrb[117].mxu0  ;;  %v2669_v26 = vpop.f32.mrb[116].mxu1 }
 0x1d4   : > { %v7368_v27 = vpack.c.bf16 %v4375_v17, %v4375_v17  ;;  %v4217_v28 = vmul.f32 %v9048_v6, %v3900_v23  ;;  %v2040_v29 = vpop.f32.mrb[118].mxu0  ;;  %v2670_v30 = vadd.f32 %v2669_v26, %v9038_v61  ;;  %v8222_v31 = vpop.f32.mrb[117].mxu1 }
 0x1d5   : > { %v4376_v33 = vadd.f32 %v9053_v15, %v4059_v20  ;;  %v7526_v34 = vpack.c.bf16 %v4533_v21, %v4533_v21  ;;  %vm3117_vm0 = vcmp.ge.f32.partialorder %v2038_v22, 0.0  ;;  %v3430_v35 = vmul.f32 0.01, %v2038_v22  ;;  %v7907_v36 = vpop.f32.mrb[119].mxu0  ;;  %v2672_v37 = vpop.f32.mrb[118].mxu1 }
 0x1d6   : > { %5942 = vst.msk [vmem:[%s9077_s6 + $0xe0] sm:$0xf] %vm5885_vm7, %v7368_v27  ;;  %v4534_v38 = vadd.f32 %v9053_v15, %v4217_v28  ;;  %v2041_v39 = vadd.f32 %v2040_v29, %v9038_v61  ;;  %vm3275_vm3 = vcmp.ge.f32.partialorder %v2670_v30, 0.0  ;;  %v3588_v40 = vmul.f32 0.01, %v2670_v30  ;;  %v8223_v41 = vpop.f32.mrb[119].mxu1 }
 0x1d7   : > { %v7369_v42 = vpack.c.bf16 %v4376_v33, %v4376_v33  ;;  %6100 = vst.msk [vmem:[%s9077_s6 + $0x358] sm:$0xf] %vm5885_vm7, %v7526_v34  ;;  %v3743_v43 = vsel %vm3117_vm0, %v2038_v22, %v3430_v35  ;;  %8013 = vmatmul.mubr.msk.bf16.gmra.mrb[224].mxu0 %vm1295_vm2, %v8621_v25  ;;  %v2673_v44 = vadd.f32 %v2672_v37, %v9038_v61 }
 0x1d8   : > { %v4060_v45 = vmul.f32 %v9048_v6, %v3743_v43  ;;  %v7527_v46 = vpack.c.bf16 %v4534_v38, %v4534_v38  ;;  %vm3118_vm4 = vcmp.ge.f32.partialorder %v2041_v39, 0.0  ;;  %v3431_v47 = vmul.f32 0.01, %v2041_v39  ;;  %8016 = vmatprep.mubr.msk.bf16.mxu0 %vm8755_vm1, %v8754_v1 }
 0x1d9   : > { %8329 = vmatmul.mubr.msk.bf16.gmra.mrb[224].mxu1 %vm1295_vm2, %v8622_v32  ;;  %5943 = vst.msk [vmem:[%s9077_s6 + $0xe4] sm:$0xf] %vm5885_vm7, %v7369_v42  ;;  %v3901_v48 = vsel %vm3275_vm3, %v2670_v30, %v3588_v40  ;;  %vm3276_vm5 = vcmp.ge.f32.partialorder %v2673_v44, 0.0  ;;  %v3589_v49 = vmul.f32 0.01, %v2673_v44  ;;  %v8625_v32 = vld [vmem:[%s8822_s28 + $0x1d0] sm:$0xff]  }
 0x1da   : > { %8332 = vmatprep.mubr.msk.bf16.mxu1 %vm8755_vm1, %v8754_v1  ;;  %v4377_v50 = vadd.f32 %v9053_v15, %v4060_v45  ;;  %6101 = vst.msk [vmem:[%s9077_s6 + $0x35c] sm:$0xf] %vm5885_vm7, %v7527_v46  ;;  %v3744_v51 = vsel %vm3118_vm4, %v2041_v39, %v3431_v47  ;;  %v4218_v52 = vmul.f32 %v9048_v6, %v3901_v48  ;;  %v2045_v53 = vpop.f32.mrb[120].mxu0  ;;  %v8626_v40 = vld [vmem:[%s8822_s28 + $0x448] sm:$0xff]  }
 0x1db   : > { %v4061_v54 = vmul.f32 %v9048_v6, %v3744_v51  ;;  %v2046_v55 = vadd.f32 %v2045_v53, %v9038_v61  ;;  %v3902_v56 = vsel %vm3276_vm5, %v2673_v44, %v3589_v49  ;;  %v7910_v57 = vpop.f32.mrb[121].mxu0 }
 0x1dc   : > { %v2677_v59 = vpop.f32.mrb[120].mxu1  ;;  %v7370_v60 = vpack.c.bf16 %v4377_v50, %v4377_v50  ;;  %v4535_v62 = vadd.f32 %v9053_v15, %v4218_v52  ;;  %v4219_v63 = vmul.f32 %v9048_v6, %v3902_v56  ;;  %v2048_v0 = vpop.f32.mrb[122].mxu0 }
 0x1dd   : > { %v2678_v2 = vadd.f32 %v2677_v59, %v9038_v61  ;;  %v8226_v3 = vpop.f32.mrb[121].mxu1  ;;  %v4378_v5 = vadd.f32 %v9053_v15, %v4061_v54  ;;  %vm3119_vm6 = vcmp.ge.f32.partialorder %v2046_v55, 0.0  ;;  %v3432_v7 = vmul.f32 0.01, %v2046_v55  ;;  %v7911_v9 = vpop.f32.mrb[123].mxu0 }
 0x1de   : > { %v2049_v8 = vadd.f32 %v2048_v0, %v9038_v61  ;;  %v2680_v10 = vpop.f32.mrb[122].mxu1  ;;  %5944 = vst.msk [vmem:[%s9077_s6 + $0xe8] sm:$0xf] %vm5885_vm7, %v7370_v60  ;;  %v7528_v11 = vpack.c.bf16 %v4535_v62, %v4535_v62  ;;  %v4536_v12 = vadd.f32 %v9053_v15, %v4219_v63 }
 0x1df   : > { %vm3277_vm8 = vcmp.ge.f32.partialorder %v2678_v2, 0.0  ;;  %v3590_v13 = vmul.f32 0.01, %v2678_v2  ;;  %v8227_v14 = vpop.f32.mrb[123].mxu1  ;;  %v7371_v16 = vpack.c.bf16 %v4378_v5, %v4378_v5  ;;  %v3745_v17 = vsel %vm3119_vm6, %v2046_v55, %v3432_v7  ;;  %8017 = vmatmul.mubr.msk.bf16.gmra.mrb[228].mxu0 %vm1295_vm2, %v8623_v58  ;;  %v8627_v5 = vld [vmem:[%s8822_s28 + $0x1d8] sm:$0xff]  }
 0x1e0   : > { %vm3120_vm9 = vcmp.ge.f32.partialorder %v2049_v8, 0.0  ;;  %v3433_v18 = vmul.f32 0.01, %v2049_v8  ;;  %6102 = vst.msk [vmem:[%s9077_s6 + $0x360] sm:$0xf] %vm5885_vm7, %v7528_v11  ;;  %v4062_v19 = vmul.f32 %v9048_v6, %v3745_v17  ;;  %v7529_v20 = vpack.c.bf16 %v4536_v12, %v4536_v12  ;;  %8020 = vmatprep.mubr.msk.bf16.mxu0 %vm8755_vm1, %v8754_v1 }
 0x1e1   : > { %v3903_v21 = vsel %vm3277_vm8, %v2678_v2, %v3590_v13  ;;  %v2681_v22 = vadd.f32 %v2680_v10, %v9038_v61  ;;  %8333 = vmatmul.mubr.msk.bf16.gmra.mrb[228].mxu1 %vm1295_vm2, %v8624_v4  ;;  %5945 = vst.msk [vmem:[%s9077_s6 + $0xec] sm:$0xf] %vm5885_vm7, %v7371_v16  ;;  %v8628_v13 = vld [vmem:[%s8822_s28 + $0x450] sm:$0xff]  }
 0x1e2   : > { %v3746_v23 = vsel %vm3120_vm9, %v2049_v8, %v3433_v18  ;;  %v4220_v24 = vmul.f32 %v9048_v6, %v3903_v21  ;;  %8336 = vmatprep.mubr.msk.bf16.mxu1 %vm8755_vm1, %v8754_v1  ;;  %v4379_v25 = vadd.f32 %v9053_v15, %v4062_v19  ;;  %6103 = vst.msk [vmem:[%s9077_s6 + $0x364] sm:$0xf] %vm5885_vm7, %v7529_v20  ;;  %v2053_v27 = vpop.f32.mrb[124].mxu0 }
 0x1e3   : > { %v4063_v26 = vmul.f32 %v9048_v6, %v3746_v23  ;;  %vm3278_vm10 = vcmp.ge.f32.partialorder %v2681_v22, 0.0  ;;  %v3591_v28 = vmul.f32 0.01, %v2681_v22  ;;  %v2054_v30 = vadd.f32 %v2053_v27, %v9038_v61  ;;  %v7914_v31 = vpop.f32.mrb[125].mxu0 }
 0x1e4   : > { %v4537_v29 = vadd.f32 %v9053_v15, %v4220_v24  ;;  %v2685_v33 = vpop.f32.mrb[124].mxu1  ;;  %v7372_v34 = vpack.c.bf16 %v4379_v25, %v4379_v25  ;;  %v2056_v37 = vpop.f32.mrb[126].mxu0 }
 0x1e5   : > { %v4380_v35 = vadd.f32 %v9053_v15, %v4063_v26  ;;  %v3904_v36 = vsel %vm3278_vm10, %v2681_v22, %v3591_v28  ;;  %v2686_v38 = vadd.f32 %v2685_v33, %v9038_v61  ;;  %v8230_v39 = vpop.f32.mrb[125].mxu1  ;;  %vm3121_vm11 = vcmp.ge.f32.partialorder %v2054_v30, 0.0  ;;  %v7915_v44 = vpop.f32.mrb[127].mxu0 }
 0x1e6   : > { %v7530_v41 = vpack.c.bf16 %v4537_v29, %v4537_v29  ;;  %v3434_v42 = vmul.f32 0.01, %v2054_v30  ;;  %v4221_v43 = vmul.f32 %v9048_v6, %v3904_v36  ;;  %v2688_v45 = vpop.f32.mrb[126].mxu1  ;;  %5946 = vst.msk [vmem:[%s9077_s6 + $0xf0] sm:$0xf] %vm5885_vm7, %v7372_v34  ;;  %v2057_v47 = vadd.f32 %v2056_v37, %v9038_v61 }
 0x1e7   : > { %v7373_v46 = vpack.c.bf16 %v4380_v35, %v4380_v35  ;;  %vm3279_vm12 = vcmp.ge.f32.partialorder %v2686_v38, 0.0  ;;  %v3592_v48 = vmul.f32 0.01, %v2686_v38  ;;  %v8231_v49 = vpop.f32.mrb[127].mxu1  ;;  %8021 = vmatmul.mubr.msk.bf16.gmra.mrb[232].mxu0 %vm1295_vm2, %v8625_v32  ;;  %v2689_v52 = vadd.f32 %v2688_v45, %v9038_v61 }
 0x1e8   : > { %6104 = vst.msk [vmem:[%s9077_s6 + $0x368] sm:$0xf] %vm5885_vm7, %v7530_v41  ;;  %v3747_v50 = vsel %vm3121_vm11, %v2054_v30, %v3434_v42  ;;  %v4538_v51 = vadd.f32 %v9053_v15, %v4221_v43  ;;  %vm3122_vm13 = vcmp.ge.f32.partialorder %v2057_v47, 0.0  ;;  %v3435_v54 = vmul.f32 0.01, %v2057_v47  ;;  %8024 = vmatprep.mubr.msk.bf16.mxu0 %vm8755_vm1, %v8754_v1 }
 0x1e9   : > { %5947 = vst.msk [vmem:[%s9077_s6 + $0xf4] sm:$0xf] %vm5885_vm7, %v7373_v46  ;;  %v4064_v53 = vmul.f32 %v9048_v6, %v3747_v50  ;;  %v3905_v55 = vsel %vm3279_vm12, %v2686_v38, %v3592_v48  ;;  %8337 = vmatmul.mubr.msk.bf16.gmra.mrb[232].mxu1 %vm1295_vm2, %v8626_v40  ;;  %vm3280_vm14 = vcmp.ge.f32.partialorder %v2689_v52, 0.0  ;;  %v3593_v58 = vmul.f32 0.01, %v2689_v52  ;;  %v8629_v40 = vld [vmem:[%s8822_s28 + $0x1e0] sm:$0xff]  }
 0x1ea   : > { %v7531_v56 = vpack.c.bf16 %v4538_v51, %v4538_v51  ;;  %v4222_v57 = vmul.f32 %v9048_v6, %v3905_v55  ;;  %8340 = vmatprep.mubr.msk.bf16.mxu1 %vm8755_vm1, %v8754_v1  ;;  %v3748_v60 = vsel %vm3122_vm13, %v2057_v47, %v3435_v54  ;;  %v2061_v62 = vpop.f32.mrb[128].mxu0  ;;  %v8630_v48 = vld [vmem:[%s8822_s28 + $0x458] sm:$0xff]  }
 0x1eb   : > { %v4381_v59 = vadd.f32 %v9053_v15, %v4064_v53  ;;  %v4065_v63 = vmul.f32 %v9048_v6, %v3748_v60  ;;  %v2062_v2 = vadd.f32 %v2061_v62, %v9038_v61  ;;  %v3906_v3 = vsel %vm3280_vm14, %v2689_v52, %v3593_v58  ;;  %v7918_v4 = vpop.f32.mrb[129].mxu0 }
 0x1ec   : > { %6105 = vst.msk [vmem:[%s9077_s6 + $0x36c] sm:$0xf] %vm5885_vm7, %v7531_v56  ;;  %v4539_v0 = vadd.f32 %v9053_v15, %v4222_v57  ;;  %v2693_v7 = vpop.f32.mrb[128].mxu1  ;;  %v4223_v9 = vmul.f32 %v9048_v6, %v3906_v3  ;;  %v2064_v10 = vpop.f32.mrb[130].mxu0 }
 0x1ed   : > { %v7374_v8 = vpack.c.bf16 %v4381_v59, %v4381_v59  ;;  %v2694_v11 = vadd.f32 %v2693_v7, %v9038_v61  ;;  %v8234_v12 = vpop.f32.mrb[129].mxu1  ;;  %v4382_v14 = vadd.f32 %v9053_v15, %v4065_v63  ;;  %vm3123_vm15 = vcmp.ge.f32.partialorder %v2062_v2, 0.0  ;;  %v7919_v18 = vpop.f32.mrb[131].mxu0 }
 0x1ee   : > { %v7532_v16 = vpack.c.bf16 %v4539_v0, %v4539_v0  ;;  %v3436_v17 = vmul.f32 0.01, %v2062_v2  ;;  %v2696_v19 = vpop.f32.mrb[130].mxu1  ;;  %v4540_v20 = vadd.f32 %v9053_v15, %v4223_v9  ;;  %v2065_v21 = vadd.f32 %v2064_v10, %v9038_v61 }
 0x1ef   : > { %5948 = vst.msk [vmem:[%s9077_s6 + $0xf8] sm:$0xf] %vm5885_vm7, %v7374_v8  ;;  %vm3281_vm0 = vcmp.ge.f32.partialorder %v2694_v11, 0.0  ;;  %v3594_v22 = vmul.f32 0.01, %v2694_v11  ;;  %v8235_v23 = vpop.f32.mrb[131].mxu1  ;;  %v7375_v24 = vpack.c.bf16 %v4382_v14, %v4382_v14  ;;  %8025 = vmatmul.mubr.msk.bf16.gmra.mrb[236].mxu0 %vm1295_vm2, %v8627_v5  ;;  %v2697_v26 = vadd.f32 %v2696_v19, %v9038_v61 }
 0x1f0   : > { %6106 = vst.msk [vmem:[%s9077_s6 + $0x370] sm:$0xf] %vm5885_vm7, %v7532_v16  ;;  %v3749_v25 = vsel %vm3123_vm15, %v2062_v2, %v3436_v17  ;;  %v7533_v28 = vpack.c.bf16 %v4540_v20, %v4540_v20  ;;  %vm3124_vm3 = vcmp.ge.f32.partialorder %v2065_v21, 0.0  ;;  %v3437_v29 = vmul.f32 0.01, %v2065_v21  ;;  %8028 = vmatprep.mubr.msk.bf16.mxu0 %vm8755_vm1, %v8754_v1 }
 0x1f1   : > { %v4066_v27 = vmul.f32 %v9048_v6, %v3749_v25  ;;  %8341 = vmatmul.mubr.msk.bf16.gmra.mrb[236].mxu1 %vm1295_vm2, %v8628_v13  ;;  %5949 = vst.msk [vmem:[%s9077_s6 + $0xfc] sm:$0xf] %vm5885_vm7, %v7375_v24  ;;  %v3907_v30 = vsel %vm3281_vm0, %v2694_v11, %v3594_v22  ;;  %vm3282_vm4 = vcmp.ge.f32.partialorder %v2697_v26, 0.0  ;;  %v3595_v31 = vmul.f32 0.01, %v2697_v26  ;;  %v8631_v13 = vld [vmem:[%s8822_s28 + $0x1e8] sm:$0xff]  }
 0x1f2   : > { %8344 = vmatprep.mubr.msk.bf16.mxu1 %vm8755_vm1, %v8754_v1  ;;  %6107 = vst.msk [vmem:[%s9077_s6 + $0x374] sm:$0xf] %vm5885_vm7, %v7533_v28  ;;  %v3750_v33 = vsel %vm3124_vm3, %v2065_v21, %v3437_v29  ;;  %v4224_v34 = vmul.f32 %v9048_v6, %v3907_v30  ;;  %v2069_v35 = vpop.f32.mrb[132].mxu0  ;;  %v8632_v22 = vld [vmem:[%s8822_s28 + $0x460] sm:$0xff]  }
 0x1f3   : > { %v4383_v32 = vadd.f32 %v9053_v15, %v4066_v27  ;;  %v4067_v36 = vmul.f32 %v9048_v6, %v3750_v33  ;;  %v2070_v37 = vadd.f32 %v2069_v35, %v9038_v61  ;;  %v3908_v38 = vsel %vm3282_vm4, %v2697_v26, %v3595_v31  ;;  %v7922_v39 = vpop.f32.mrb[133].mxu0 }
 0x1f4   : > { %v2701_v41 = vpop.f32.mrb[132].mxu1  ;;  %v4541_v43 = vadd.f32 %v9053_v15, %v4224_v34  ;;  %v4225_v44 = vmul.f32 %v9048_v6, %v3908_v38  ;;  %v2072_v45 = vpop.f32.mrb[134].mxu0 }
 0x1f5   : > { %v7376_v42 = vpack.c.bf16 %v4383_v32, %v4383_v32  ;;  %v2702_v46 = vadd.f32 %v2701_v41, %v9038_v61  ;;  %v8238_v47 = vpop.f32.mrb[133].mxu1  ;;  %v4384_v49 = vadd.f32 %v9053_v15, %v4067_v36  ;;  %vm3125_vm5 = vcmp.ge.f32.partialorder %v2070_v37, 0.0  ;;  %v7923_v52 = vpop.f32.mrb[135].mxu0 }
 0x1f6   : > { %v3438_v50 = vmul.f32 0.01, %v2070_v37  ;;  %v2073_v51 = vadd.f32 %v2072_v45, %v9038_v61  ;;  %v2704_v53 = vpop.f32.mrb[134].mxu1  ;;  %v7534_v54 = vpack.c.bf16 %v4541_v43, %v4541_v43  ;;  %v4542_v55 = vadd.f32 %v9053_v15, %v4225_v44 }
 0x1f7   : > { %5950 = vst.msk [vmem:[%s9077_s6 + $0x100] sm:$0xf] %vm5885_vm7, %v7376_v42  ;;  %vm3283_vm6 = vcmp.ge.f32.partialorder %v2702_v46, 0.0  ;;  %v3596_v56 = vmul.f32 0.01, %v2702_v46  ;;  %v8239_v57 = vpop.f32.mrb[135].mxu1  ;;  %v7377_v58 = vpack.c.bf16 %v4384_v49, %v4384_v49  ;;  %8029 = vmatmul.mubr.msk.bf16.gmra.mrb[240].mxu0 %vm1295_vm2, %v8629_v40  ;;  %v2705_v2 = vadd.f32 %v2704_v53, %v9038_v61 }
 0x1f8   : > { %v3751_v59 = vsel %vm3125_vm5, %v2070_v37, %v3438_v50  ;;  %vm3126_vm8 = vcmp.ge.f32.partialorder %v2073_v51, 0.0  ;;  %v3439_v60 = vmul.f32 0.01, %v2073_v51  ;;  %6108 = vst.msk [vmem:[%s9077_s6 + $0x378] sm:$0xf] %vm5885_vm7, %v7534_v54  ;;  %v7535_v63 = vpack.c.bf16 %v4542_v55, %v4542_v55  ;;  %8032 = vmatprep.mubr.msk.bf16.mxu0 %vm8755_vm1, %v8754_v1  ;;  %v8633_v49 = vld [vmem:[%s8822_s28 + $0x1f0] sm:$0xff]  }
 0x1f9   : > { %v4068_v62 = vmul.f32 %v9048_v6, %v3751_v59  ;;  %v3909_v0 = vsel %vm3283_vm6, %v2702_v46, %v3596_v56  ;;  %8345 = vmatmul.mubr.msk.bf16.gmra.mrb[240].mxu1 %vm1295_vm2, %v8630_v48  ;;  %5951 = vst.msk [vmem:[%s9077_s6 + $0x104] sm:$0xf] %vm5885_vm7, %v7377_v58  ;;  %vm3284_vm9 = vcmp.ge.f32.partialorder %v2705_v2, 0.0  ;;  %v3597_v9 = vmul.f32 0.01, %v2705_v2  ;;  %v8634_v56 = vld [vmem:[%s8822_s28 + $0x468] sm:$0xff]  }
 0x1fa   : > { %v3752_v3 = vsel %vm3126_vm8, %v2073_v51, %v3439_v60  ;;  %v4226_v4 = vmul.f32 %v9048_v6, %v3909_v0  ;;  %8348 = vmatprep.mubr.msk.bf16.mxu1 %vm8755_vm1, %v8754_v1  ;;  %6109 = vst.msk [vmem:[%s9077_s6 + $0x37c] sm:$0xf] %vm5885_vm7, %v7535_v63  ;;  %v2077_v8 = vpop.f32.mrb[136].mxu0 }
 0x1fb   : > { %v4385_v5 = vadd.f32 %v9053_v15, %v4068_v62  ;;  %v4069_v7 = vmul.f32 %v9048_v6, %v3752_v3  ;;  %v2078_v11 = vadd.f32 %v2077_v8, %v9038_v61  ;;  %v7926_v12 = vpop.f32.mrb[137].mxu0  ;;  %v3910_v18 = vsel %vm3284_vm9, %v2705_v2, %v3597_v9 }
 0x1fc   : > { %v4543_v10 = vadd.f32 %v9053_v15, %v4226_v4  ;;  %v2709_v14 = vpop.f32.mrb[136].mxu1  ;;  %v2080_v19 = vpop.f32.mrb[138].mxu0  ;;  %v4227_v25 = vmul.f32 %v9048_v6, %v3910_v18 }
 0x1fd   : > { %v7378_v16 = vpack.c.bf16 %v4385_v5, %v4385_v5  ;;  %v4386_v17 = vadd.f32 %v9053_v15, %v4069_v7  ;;  %v2710_v20 = vadd.f32 %v2709_v14, %v9038_v61  ;;  %v8242_v21 = vpop.f32.mrb[137].mxu1  ;;  %vm3127_vm10 = vcmp.ge.f32.partialorder %v2078_v11, 0.0  ;;  %v7927_v26 = vpop.f32.mrb[139].mxu0 }
 0x1fe   : > { %v7536_v23 = vpack.c.bf16 %v4543_v10, %v4543_v10  ;;  %v3440_v24 = vmul.f32 0.01, %v2078_v11  ;;  %v2712_v27 = vpop.f32.mrb[138].mxu1  ;;  %v2081_v29 = vadd.f32 %v2080_v19, %v9038_v61  ;;  %v4544_v33 = vadd.f32 %v9053_v15, %v4227_v25 }
 0x1ff   : > { %5952 = vst.msk [vmem:[%s9077_s6 + $0x108] sm:$0xf] %vm5885_vm7, %v7378_v16  ;;  %v7379_v28 = vpack.c.bf16 %v4386_v17, %v4386_v17  ;;  %vm3285_vm11 = vcmp.ge.f32.partialorder %v2710_v20, 0.0  ;;  %v3598_v30 = vmul.f32 0.01, %v2710_v20  ;;  %v8243_v31 = vpop.f32.mrb[139].mxu1  ;;  %8033 = vmatmul.mubr.msk.bf16.gmra.mrb[244].mxu0 %vm1295_vm2, %v8631_v13  ;;  %v2713_v34 = vadd.f32 %v2712_v27, %v9038_v61 }
 0x200   : > { %6110 = vst.msk [vmem:[%s9077_s6 + $0x380] sm:$0xf] %vm5885_vm7, %v7536_v23  ;;  %v3753_v32 = vsel %vm3127_vm10, %v2078_v11, %v3440_v24  ;;  %vm3128_vm12 = vcmp.ge.f32.partialorder %v2081_v29, 0.0  ;;  %v3441_v36 = vmul.f32 0.01, %v2081_v29  ;;  %8036 = vmatprep.mubr.msk.bf16.mxu0 %vm8755_vm1, %v8754_v1  ;;  %v7537_v38 = vpack.c.bf16 %v4544_v33, %v4544_v33 }
 0x201   : > { %5953 = vst.msk [vmem:[%s9077_s6 + $0x10c] sm:$0xf] %vm5885_vm7, %v7379_v28  ;;  %v4070_v35 = vmul.f32 %v9048_v6, %v3753_v32  ;;  %v3911_v37 = vsel %vm3285_vm11, %v2710_v20, %v3598_v30  ;;  %8349 = vmatmul.mubr.msk.bf16.gmra.mrb[244].mxu1 %vm1295_vm2, %v8632_v22  ;;  %vm3286_vm13 = vcmp.ge.f32.partialorder %v2713_v34, 0.0  ;;  %v3599_v40 = vmul.f32 0.01, %v2713_v34  ;;  %v8635_v22 = vld [vmem:[%s8822_s28 + $0x1f8] sm:$0xff]  }
 0x202   : > { %v4228_v39 = vmul.f32 %v9048_v6, %v3911_v37  ;;  %8352 = vmatprep.mubr.msk.bf16.mxu1 %vm8755_vm1, %v8754_v1  ;;  %v3754_v42 = vsel %vm3128_vm12, %v2081_v29, %v3441_v36  ;;  %v2085_v43 = vpop.f32.mrb[140].mxu0  ;;  %6111 = vst.msk [vmem:[%s9077_s6 + $0x384] sm:$0xf] %vm5885_vm7, %v7537_v38  ;;  %v8636_v30 = vld [vmem:[%s8822_s28 + $0x470] sm:$0xff]  }
 0x203   : > { %v4387_v41 = vadd.f32 %v9053_v15, %v4070_v35  ;;  %v4071_v44 = vmul.f32 %v9048_v6, %v3754_v42  ;;  %v2086_v46 = vadd.f32 %v2085_v43, %v9038_v61  ;;  %v3912_v47 = vsel %vm3286_vm13, %v2713_v34, %v3599_v40  ;;  %v7930_v48 = vpop.f32.mrb[141].mxu0 }
 0x204   : > { %v4545_v45 = vadd.f32 %v9053_v15, %v4228_v39  ;;  %v2717_v50 = vpop.f32.mrb[140].mxu1  ;;  %v4229_v52 = vmul.f32 %v9048_v6, %v3912_v47  ;;  %v2088_v53 = vpop.f32.mrb[142].mxu0 }
 0x205   : > { %v7380_v51 = vpack.c.bf16 %v4387_v41, %v4387_v41  ;;  %v2718_v54 = vadd.f32 %v2717_v50, %v9038_v61  ;;  %v8246_v55 = vpop.f32.mrb[141].mxu1  ;;  %v4388_v57 = vadd.f32 %v9053_v15, %v4071_v44  ;;  %vm3129_vm14 = vcmp.ge.f32.partialorder %v2086_v46, 0.0  ;;  %v7931_v60 = vpop.f32.mrb[143].mxu0 }
 0x206   : > { %v7538_v58 = vpack.c.bf16 %v4545_v45, %v4545_v45  ;;  %v3442_v59 = vmul.f32 0.01, %v2086_v46  ;;  %v2720_v62 = vpop.f32.mrb[142].mxu1  ;;  %v4546_v63 = vadd.f32 %v9053_v15, %v4229_v52  ;;  %v2089_v0 = vadd.f32 %v2088_v53, %v9038_v61 }
 0x207   : > { %5954 = vst.msk [vmem:[%s9077_s6 + $0x110] sm:$0xf] %vm5885_vm7, %v7380_v51  ;;  %vm3287_vm15 = vcmp.ge.f32.partialorder %v2718_v54, 0.0  ;;  %v3600_v2 = vmul.f32 0.01, %v2718_v54  ;;  %v8247_v3 = vpop.f32.mrb[143].mxu1  ;;  %v7381_v4 = vpack.c.bf16 %v4388_v57, %v4388_v57  ;;  %8037 = vmatmul.mubr.msk.bf16.gmra.mrb[248].mxu0 %vm1295_vm2, %v8633_v49  ;;  %v2721_v7 = vadd.f32 %v2720_v62, %v9038_v61 }
 0x208   : > { %6112 = vst.msk [vmem:[%s9077_s6 + $0x388] sm:$0xf] %vm5885_vm7, %v7538_v58  ;;  %v3755_v5 = vsel %vm3129_vm14, %v2086_v46, %v3442_v59  ;;  %v7539_v9 = vpack.c.bf16 %v4546_v63, %v4546_v63  ;;  %vm3130_vm0 = vcmp.ge.f32.partialorder %v2089_v0, 0.0  ;;  %v3443_v10 = vmul.f32 0.01, %v2089_v0  ;;  %8040 = vmatprep.mubr.msk.bf16.mxu0 %vm8755_vm1, %v8754_v1 }
 0x209   : > { %v4072_v8 = vmul.f32 %v9048_v6, %v3755_v5  ;;  %8353 = vmatmul.mubr.msk.bf16.gmra.mrb[248].mxu1 %vm1295_vm2, %v8634_v56  ;;  %5955 = vst.msk [vmem:[%s9077_s6 + $0x114] sm:$0xf] %vm5885_vm7, %v7381_v4  ;;  %v3913_v11 = vsel %vm3287_vm15, %v2718_v54, %v3600_v2  ;;  %vm3288_vm3 = vcmp.ge.f32.partialorder %v2721_v7, 0.0  ;;  %v3601_v12 = vmul.f32 0.01, %v2721_v7  ;;  %v8637_v56 = vld [vmem:[%s8822_s28 + $0x200] sm:$0xff]  }
 0x20a   : > { %8356 = vmatprep.mubr.msk.bf16.mxu1 %vm8755_vm1, %v8754_v1  ;;  %6113 = vst.msk [vmem:[%s9077_s6 + $0x38c] sm:$0xf] %vm5885_vm7, %v7539_v9  ;;  %v3756_v14 = vsel %vm3130_vm0, %v2089_v0, %v3443_v10  ;;  %v4230_v16 = vmul.f32 %v9048_v6, %v3913_v11  ;;  %v2093_v17 = vpop.f32.mrb[144].mxu0  ;;  %v8638_v2 = vld [vmem:[%s8822_s28 + $0x478] sm:$0xff]  }
 0x20b   : > { %v4389_v13 = vadd.f32 %v9053_v15, %v4072_v8  ;;  %v4073_v18 = vmul.f32 %v9048_v6, %v3756_v14  ;;  %v2094_v19 = vadd.f32 %v2093_v17, %v9038_v61  ;;  %v3914_v20 = vsel %vm3288_vm3, %v2721_v7, %v3601_v12  ;;  %v7934_v21 = vpop.f32.mrb[145].mxu0 }
 0x20c   : > { %v2725_v23 = vpop.f32.mrb[144].mxu1  ;;  %v4547_v25 = vadd.f32 %v9053_v15, %v4230_v16  ;;  %v4231_v26 = vmul.f32 %v9048_v6, %v3914_v20  ;;  %v2096_v27 = vpop.f32.mrb[146].mxu0 }
 0x20d   : > { %v7382_v24 = vpack.c.bf16 %v4389_v13, %v4389_v13  ;;  %v2726_v28 = vadd.f32 %v2725_v23, %v9038_v61  ;;  %v8250_v29 = vpop.f32.mrb[145].mxu1  ;;  %v4390_v31 = vadd.f32 %v9053_v15, %v4073_v18  ;;  %vm3131_vm4 = vcmp.ge.f32.partialorder %v2094_v19, 0.0  ;;  %v7935_v34 = vpop.f32.mrb[147].mxu0 }
 0x20e   : > { %v3444_v32 = vmul.f32 0.01, %v2094_v19  ;;  %v2097_v33 = vadd.f32 %v2096_v27, %v9038_v61  ;;  %v2728_v35 = vpop.f32.mrb[146].mxu1  ;;  %v7540_v36 = vpack.c.bf16 %v4547_v25, %v4547_v25  ;;  %v4548_v37 = vadd.f32 %v9053_v15, %v4231_v26 }
 0x20f   : > { %5956 = vst.msk [vmem:[%s9077_s6 + $0x118] sm:$0xf] %vm5885_vm7, %v7382_v24  ;;  %vm3289_vm5 = vcmp.ge.f32.partialorder %v2726_v28, 0.0  ;;  %v3602_v38 = vmul.f32 0.01, %v2726_v28  ;;  %v8251_v39 = vpop.f32.mrb[147].mxu1  ;;  %v7383_v40 = vpack.c.bf16 %v4390_v31, %v4390_v31  ;;  %8041 = vmatmul.mubr.msk.bf16.gmra.mrb[252].mxu0 %vm1295_vm2, %v8635_v22  ;;  %v2729_v46 = vadd.f32 %v2728_v35, %v9038_v61 }
 0x210   : > { %v3757_v41 = vsel %vm3131_vm4, %v2094_v19, %v3444_v32  ;;  %vm3132_vm6 = vcmp.ge.f32.partialorder %v2097_v33, 0.0  ;;  %v3445_v42 = vmul.f32 0.01, %v2097_v33  ;;  %6114 = vst.msk [vmem:[%s9077_s6 + $0x390] sm:$0xf] %vm5885_vm7, %v7540_v36  ;;  %v7541_v44 = vpack.c.bf16 %v4548_v37, %v4548_v37  ;;  %8044 = vmatprep.mubr.msk.bf16.mxu0 %vm8755_vm1, %v8754_v1  ;;  %v8639_v31 = vld [vmem:[%s8822_s28 + $0x208] sm:$0xff]  }
 0x211   : > { %v4074_v43 = vmul.f32 %v9048_v6, %v3757_v41  ;;  %v3915_v45 = vsel %vm3289_vm5, %v2726_v28, %v3602_v38  ;;  %8357 = vmatmul.mubr.msk.bf16.gmra.mrb[252].mxu1 %vm1295_vm2, %v8636_v30  ;;  %5957 = vst.msk [vmem:[%s9077_s6 + $0x11c] sm:$0xf] %vm5885_vm7, %v7383_v40  ;;  %vm3290_vm8 = vcmp.ge.f32.partialorder %v2729_v46, 0.0  ;;  %v3603_v52 = vmul.f32 0.01, %v2729_v46  ;;  %v8640_v38 = vld [vmem:[%s8822_s28 + $0x480] sm:$0xff]  }
 0x212   : > { %v3758_v47 = vsel %vm3132_vm6, %v2097_v33, %v3445_v42  ;;  %v4232_v48 = vmul.f32 %v9048_v6, %v3915_v45  ;;  %8360 = vmatprep.mubr.msk.bf16.mxu1 %vm8755_vm1, %v8754_v1  ;;  %6115 = vst.msk [vmem:[%s9077_s6 + $0x394] sm:$0xf] %vm5885_vm7, %v7541_v44  ;;  %v2101_v51 = vpop.f32.mrb[148].mxu0 }
 0x213   : > { %v4391_v49 = vadd.f32 %v9053_v15, %v4074_v43  ;;  %v4075_v50 = vmul.f32 %v9048_v6, %v3758_v47  ;;  %v2102_v54 = vadd.f32 %v2101_v51, %v9038_v61  ;;  %v7938_v55 = vpop.f32.mrb[149].mxu0  ;;  %v3916_v60 = vsel %vm3290_vm8, %v2729_v46, %v3603_v52 }
 0x214   : > { %v4549_v53 = vadd.f32 %v9053_v15, %v4232_v48  ;;  %v2733_v57 = vpop.f32.mrb[148].mxu1  ;;  %v2104_v62 = vpop.f32.mrb[150].mxu0  ;;  %v4233_v5 = vmul.f32 %v9048_v6, %v3916_v60 }
 0x215   : > { %v7384_v58 = vpack.c.bf16 %v4391_v49, %v4391_v49  ;;  %v4392_v59 = vadd.f32 %v9053_v15, %v4075_v50  ;;  %v2734_v63 = vadd.f32 %v2733_v57, %v9038_v61  ;;  %v8254_v0 = vpop.f32.mrb[149].mxu1  ;;  %vm3133_vm9 = vcmp.ge.f32.partialorder %v2102_v54, 0.0  ;;  %v7939_v7 = vpop.f32.mrb[151].mxu0 }
 0x216   : > { %v7542_v3 = vpack.c.bf16 %v4549_v53, %v4549_v53  ;;  %v3446_v4 = vmul.f32 0.01, %v2102_v54  ;;  %v2736_v8 = vpop.f32.mrb[150].mxu1  ;;  %v2105_v10 = vadd.f32 %v2104_v62, %v9038_v61  ;;  %v4550_v14 = vadd.f32 %v9053_v15, %v4233_v5 }
 0x217   : > { %5958 = vst.msk [vmem:[%s9077_s6 + $0x120] sm:$0xf] %vm5885_vm7, %v7384_v58  ;;  %v7385_v9 = vpack.c.bf16 %v4392_v59, %v4392_v59  ;;  %vm3291_vm10 = vcmp.ge.f32.partialorder %v2734_v63, 0.0  ;;  %v3604_v11 = vmul.f32 0.01, %v2734_v63  ;;  %v8255_v12 = vpop.f32.mrb[151].mxu1  ;;  %8045 = vmatmul.mubr.msk.bf16.gmra.mrb[0].mxu0 %vm1295_vm2, %v8637_v56  ;;  %v2737_v16 = vadd.f32 %v2736_v8, %v9038_v61 }
 0x218   : > { %6116 = vst.msk [vmem:[%s9077_s6 + $0x398] sm:$0xf] %vm5885_vm7, %v7542_v3  ;;  %v3759_v13 = vsel %vm3133_vm9, %v2102_v54, %v3446_v4  ;;  %vm3134_vm11 = vcmp.ge.f32.partialorder %v2105_v10, 0.0  ;;  %v3447_v18 = vmul.f32 0.01, %v2105_v10  ;;  %8048 = vmatprep.mubr.msk.bf16.mxu0 %vm8755_vm1, %v8754_v1  ;;  %v7543_v20 = vpack.c.bf16 %v4550_v14, %v4550_v14 }
 0x219   : > { %5959 = vst.msk [vmem:[%s9077_s6 + $0x124] sm:$0xf] %vm5885_vm7, %v7385_v9  ;;  %v4076_v17 = vmul.f32 %v9048_v6, %v3759_v13  ;;  %v3917_v19 = vsel %vm3291_vm10, %v2734_v63, %v3604_v11  ;;  %8361 = vmatmul.mubr.msk.bf16.gmra.mrb[0].mxu1 %vm1295_vm2, %v8638_v2  ;;  %vm3292_vm12 = vcmp.ge.f32.partialorder %v2737_v16, 0.0  ;;  %v3605_v22 = vmul.f32 0.01, %v2737_v16  ;;  %v8641_v2 = vld [vmem:[%s8822_s28 + $0x210] sm:$0xff]  }
 0x21a   : > { %v4234_v21 = vmul.f32 %v9048_v6, %v3917_v19  ;;  %8364 = vmatprep.mubr.msk.bf16.mxu1 %vm8755_vm1, %v8754_v1  ;;  %v3760_v24 = vsel %vm3134_vm11, %v2105_v10, %v3447_v18  ;;  %v2109_v25 = vpop.f32.mrb[152].mxu0  ;;  %6117 = vst.msk [vmem:[%s9077_s6 + $0x39c] sm:$0xf] %vm5885_vm7, %v7543_v20  ;;  %v8642_v11 = vld [vmem:[%s8822_s28 + $0x488] sm:$0xff]  }
 0x21b   : > { %v4393_v23 = vadd.f32 %v9053_v15, %v4076_v17  ;;  %v4077_v26 = vmul.f32 %v9048_v6, %v3760_v24  ;;  %v2110_v28 = vadd.f32 %v2109_v25, %v9038_v61  ;;  %v3918_v29 = vsel %vm3292_vm12, %v2737_v16, %v3605_v22  ;;  %v7942_v30 = vpop.f32.mrb[153].mxu0 }
 0x21c   : > { %v4551_v27 = vadd.f32 %v9053_v15, %v4234_v21  ;;  %v2741_v32 = vpop.f32.mrb[152].mxu1  ;;  %v4235_v34 = vmul.f32 %v9048_v6, %v3918_v29  ;;  %v2112_v35 = vpop.f32.mrb[154].mxu0 }
 0x21d   : > { %v7386_v33 = vpack.c.bf16 %v4393_v23, %v4393_v23  ;;  %v2742_v36 = vadd.f32 %v2741_v32, %v9038_v61  ;;  %v8258_v37 = vpop.f32.mrb[153].mxu1  ;;  %v4394_v39 = vadd.f32 %v9053_v15, %v4077_v26  ;;  %vm3135_vm13 = vcmp.ge.f32.partialorder %v2110_v28, 0.0  ;;  %v7943_v42 = vpop.f32.mrb[155].mxu0 }
 0x21e   : > { %v7544_v40 = vpack.c.bf16 %v4551_v27, %v4551_v27  ;;  %v3448_v41 = vmul.f32 0.01, %v2110_v28  ;;  %v2744_v43 = vpop.f32.mrb[154].mxu1  ;;  %v4552_v44 = vadd.f32 %v9053_v15, %v4235_v34  ;;  %v2113_v45 = vadd.f32 %v2112_v35, %v9038_v61 }
 0x21f   : > { %5960 = vst.msk [vmem:[%s9077_s6 + $0x128] sm:$0xf] %vm5885_vm7, %v7386_v33  ;;  %vm3293_vm14 = vcmp.ge.f32.partialorder %v2742_v36, 0.0  ;;  %v3606_v46 = vmul.f32 0.01, %v2742_v36  ;;  %v8259_v47 = vpop.f32.mrb[155].mxu1  ;;  %v7387_v48 = vpack.c.bf16 %v4394_v39, %v4394_v39  ;;  %8049 = vmatmul.mubr.msk.bf16.gmra.mrb[4].mxu0 %vm1295_vm2, %v8639_v31  ;;  %v2745_v50 = vadd.f32 %v2744_v43, %v9038_v61 }
 0x220   : > { %6118 = vst.msk [vmem:[%s9077_s6 + $0x3a0] sm:$0xf] %vm5885_vm7, %v7544_v40  ;;  %v3761_v49 = vsel %vm3135_vm13, %v2110_v28, %v3448_v41  ;;  %v7545_v52 = vpack.c.bf16 %v4552_v44, %v4552_v44  ;;  %vm3136_vm15 = vcmp.ge.f32.partialorder %v2113_v45, 0.0  ;;  %v3449_v53 = vmul.f32 0.01, %v2113_v45  ;;  %8052 = vmatprep.mubr.msk.bf16.mxu0 %vm8755_vm1, %v8754_v1 }
 0x221   : > { %v4078_v51 = vmul.f32 %v9048_v6, %v3761_v49  ;;  %8365 = vmatmul.mubr.msk.bf16.gmra.mrb[4].mxu1 %vm1295_vm2, %v8640_v38  ;;  %5961 = vst.msk [vmem:[%s9077_s6 + $0x12c] sm:$0xf] %vm5885_vm7, %v7387_v48  ;;  %v3919_v54 = vsel %vm3293_vm14, %v2742_v36, %v3606_v46  ;;  %vm3294_vm0 = vcmp.ge.f32.partialorder %v2745_v50, 0.0  ;;  %v3607_v55 = vmul.f32 0.01, %v2745_v50  ;;  %v8643_v38 = vld [vmem:[%s8822_s28 + $0x218] sm:$0xff]  }
 0x222   : > { %8368 = vmatprep.mubr.msk.bf16.mxu1 %vm8755_vm1, %v8754_v1  ;;  %6119 = vst.msk [vmem:[%s9077_s6 + $0x3a4] sm:$0xf] %vm5885_vm7, %v7545_v52  ;;  %v3762_v57 = vsel %vm3136_vm15, %v2113_v45, %v3449_v53  ;;  %v4236_v58 = vmul.f32 %v9048_v6, %v3919_v54  ;;  %v2117_v59 = vpop.f32.mrb[156].mxu0  ;;  %v8644_v46 = vld [vmem:[%s8822_s28 + $0x490] sm:$0xff]  }
 0x223   : > { %v4395_v56 = vadd.f32 %v9053_v15, %v4078_v51  ;;  %v4079_v60 = vmul.f32 %v9048_v6, %v3762_v57  ;;  %v2118_v62 = vadd.f32 %v2117_v59, %v9038_v61  ;;  %v3920_v63 = vsel %vm3294_vm0, %v2745_v50, %v3607_v55  ;;  %v7946_v0 = vpop.f32.mrb[157].mxu0 }
 0x224   : > { %v2749_v3 = vpop.f32.mrb[156].mxu1  ;;  %v4553_v5 = vadd.f32 %v9053_v15, %v4236_v58  ;;  %v4237_v7 = vmul.f32 %v9048_v6, %v3920_v63  ;;  %v2120_v8 = vpop.f32.mrb[158].mxu0 }
 0x225   : > { %v7388_v4 = vpack.c.bf16 %v4395_v56, %v4395_v56  ;;  %v2750_v9 = vadd.f32 %v2749_v3, %v9038_v61  ;;  %v8262_v10 = vpop.f32.mrb[157].mxu1  ;;  %v4396_v12 = vadd.f32 %v9053_v15, %v4079_v60  ;;  %vm3137_vm3 = vcmp.ge.f32.partialorder %v2118_v62, 0.0  ;;  %v7947_v16 = vpop.f32.mrb[159].mxu0 }
 0x226   : > { %v3450_v13 = vmul.f32 0.01, %v2118_v62  ;;  %v2121_v14 = vadd.f32 %v2120_v8, %v9038_v61  ;;  %v2752_v17 = vpop.f32.mrb[158].mxu1  ;;  %v7546_v18 = vpack.c.bf16 %v4553_v5, %v4553_v5  ;;  %v4554_v19 = vadd.f32 %v9053_v15, %v4237_v7 }
 0x227   : > { %5962 = vst.msk [vmem:[%s9077_s6 + $0x130] sm:$0xf] %vm5885_vm7, %v7388_v4  ;;  %vm3295_vm4 = vcmp.ge.f32.partialorder %v2750_v9, 0.0  ;;  %v3608_v20 = vmul.f32 0.01, %v2750_v9  ;;  %v8263_v21 = vpop.f32.mrb[159].mxu1  ;;  %v7389_v22 = vpack.c.bf16 %v4396_v12, %v4396_v12  ;;  %8053 = vmatmul.mubr.msk.bf16.gmra.mrb[8].mxu0 %vm1295_vm2, %v8641_v2  ;;  %v2753_v28 = vadd.f32 %v2752_v17, %v9038_v61 }
 0x228   : > { %v3763_v23 = vsel %vm3137_vm3, %v2118_v62, %v3450_v13  ;;  %vm3138_vm5 = vcmp.ge.f32.partialorder %v2121_v14, 0.0  ;;  %v3451_v24 = vmul.f32 0.01, %v2121_v14  ;;  %6120 = vst.msk [vmem:[%s9077_s6 + $0x3a8] sm:$0xf] %vm5885_vm7, %v7546_v18  ;;  %v7547_v26 = vpack.c.bf16 %v4554_v19, %v4554_v19  ;;  %8056 = vmatprep.mubr.msk.bf16.mxu0 %vm8755_vm1, %v8754_v1  ;;  %v8645_v12 = vld [vmem:[%s8822_s28 + $0x220] sm:$0xff]  }
 0x229   : > { %v4080_v25 = vmul.f32 %v9048_v6, %v3763_v23  ;;  %v3921_v27 = vsel %vm3295_vm4, %v2750_v9, %v3608_v20  ;;  %8369 = vmatmul.mubr.msk.bf16.gmra.mrb[8].mxu1 %vm1295_vm2, %v8642_v11  ;;  %5963 = vst.msk [vmem:[%s9077_s6 + $0x134] sm:$0xf] %vm5885_vm7, %v7389_v22  ;;  %vm3296_vm6 = vcmp.ge.f32.partialorder %v2753_v28, 0.0  ;;  %v3609_v34 = vmul.f32 0.01, %v2753_v28  ;;  %v8646_v20 = vld [vmem:[%s8822_s28 + $0x498] sm:$0xff]  }
 0x22a   : > { %v3764_v29 = vsel %vm3138_vm5, %v2121_v14, %v3451_v24  ;;  %v4238_v30 = vmul.f32 %v9048_v6, %v3921_v27  ;;  %8372 = vmatprep.mubr.msk.bf16.mxu1 %vm8755_vm1, %v8754_v1  ;;  %6121 = vst.msk [vmem:[%s9077_s6 + $0x3ac] sm:$0xf] %vm5885_vm7, %v7547_v26  ;;  %v2125_v33 = vpop.f32.mrb[160].mxu0 }
 0x22b   : > { %v4397_v31 = vadd.f32 %v9053_v15, %v4080_v25  ;;  %v4081_v32 = vmul.f32 %v9048_v6, %v3764_v29  ;;  %v2126_v36 = vadd.f32 %v2125_v33, %v9038_v61  ;;  %v7950_v37 = vpop.f32.mrb[161].mxu0  ;;  %v3922_v42 = vsel %vm3296_vm6, %v2753_v28, %v3609_v34 }
 0x22c   : > { %v4555_v35 = vadd.f32 %v9053_v15, %v4238_v30  ;;  %v2757_v39 = vpop.f32.mrb[160].mxu1  ;;  %v2128_v43 = vpop.f32.mrb[162].mxu0  ;;  %v4239_v49 = vmul.f32 %v9048_v6, %v3922_v42 }
 0x22d   : > { %v7390_v40 = vpack.c.bf16 %v4397_v31, %v4397_v31  ;;  %v4398_v41 = vadd.f32 %v9053_v15, %v4081_v32  ;;  %v2758_v44 = vadd.f32 %v2757_v39, %v9038_v61  ;;  %v8266_v45 = vpop.f32.mrb[161].mxu1  ;;  %vm3139_vm8 = vcmp.ge.f32.partialorder %v2126_v36, 0.0  ;;  %v7951_v50 = vpop.f32.mrb[163].mxu0 }
 0x22e   : > { %v7548_v47 = vpack.c.bf16 %v4555_v35, %v4555_v35  ;;  %v3452_v48 = vmul.f32 0.01, %v2126_v36  ;;  %v2760_v51 = vpop.f32.mrb[162].mxu1  ;;  %v2129_v53 = vadd.f32 %v2128_v43, %v9038_v61  ;;  %v4556_v57 = vadd.f32 %v9053_v15, %v4239_v49 }
 0x22f   : > { %5964 = vst.msk [vmem:[%s9077_s6 + $0x138] sm:$0xf] %vm5885_vm7, %v7390_v40  ;;  %v7391_v52 = vpack.c.bf16 %v4398_v41, %v4398_v41  ;;  %vm3297_vm9 = vcmp.ge.f32.partialorder %v2758_v44, 0.0  ;;  %v3610_v54 = vmul.f32 0.01, %v2758_v44  ;;  %v8267_v55 = vpop.f32.mrb[163].mxu1  ;;  %8057 = vmatmul.mubr.msk.bf16.gmra.mrb[12].mxu0 %vm1295_vm2, %v8643_v38  ;;  %v2761_v58 = vadd.f32 %v2760_v51, %v9038_v61 }
 0x230   : > { %6122 = vst.msk [vmem:[%s9077_s6 + $0x3b0] sm:$0xf] %vm5885_vm7, %v7548_v47  ;;  %v3765_v56 = vsel %vm3139_vm8, %v2126_v36, %v3452_v48  ;;  %vm3140_vm10 = vcmp.ge.f32.partialorder %v2129_v53, 0.0  ;;  %v3453_v60 = vmul.f32 0.01, %v2129_v53  ;;  %8060 = vmatprep.mubr.msk.bf16.mxu0 %vm8755_vm1, %v8754_v1  ;;  %v7549_v63 = vpack.c.bf16 %v4556_v57, %v4556_v57 }
 0x231   : > { %5965 = vst.msk [vmem:[%s9077_s6 + $0x13c] sm:$0xf] %vm5885_vm7, %v7391_v52  ;;  %v4082_v59 = vmul.f32 %v9048_v6, %v3765_v56  ;;  %v3923_v62 = vsel %vm3297_vm9, %v2758_v44, %v3610_v54  ;;  %8373 = vmatmul.mubr.msk.bf16.gmra.mrb[12].mxu1 %vm1295_vm2, %v8644_v46  ;;  %vm3298_vm11 = vcmp.ge.f32.partialorder %v2761_v58, 0.0  ;;  %v3611_v2 = vmul.f32 0.01, %v2761_v58  ;;  %v8647_v46 = vld [vmem:[%s8822_s28 + $0x228] sm:$0xff]  }
 0x232   : > { %v4240_v0 = vmul.f32 %v9048_v6, %v3923_v62  ;;  %8376 = vmatprep.mubr.msk.bf16.mxu1 %vm8755_vm1, %v8754_v1  ;;  %v3766_v4 = vsel %vm3140_vm10, %v2129_v53, %v3453_v60  ;;  %v2133_v5 = vpop.f32.mrb[164].mxu0  ;;  %6123 = vst.msk [vmem:[%s9077_s6 + $0x3b4] sm:$0xf] %vm5885_vm7, %v7549_v63  ;;  %v8648_v54 = vld [vmem:[%s8822_s28 + $0x4a0] sm:$0xff]  }
 0x233   : > { %v4399_v3 = vadd.f32 %v9053_v15, %v4082_v59  ;;  %v4083_v7 = vmul.f32 %v9048_v6, %v3766_v4  ;;  %v2134_v9 = vadd.f32 %v2133_v5, %v9038_v61  ;;  %v3924_v10 = vsel %vm3298_vm11, %v2761_v58, %v3611_v2  ;;  %v7954_v11 = vpop.f32.mrb[165].mxu0 }
 0x234   : > { %v4557_v8 = vadd.f32 %v9053_v15, %v4240_v0  ;;  %v2765_v13 = vpop.f32.mrb[164].mxu1  ;;  %v4241_v16 = vmul.f32 %v9048_v6, %v3924_v10  ;;  %v2136_v17 = vpop.f32.mrb[166].mxu0 }
 0x235   : > { %v7392_v14 = vpack.c.bf16 %v4399_v3, %v4399_v3  ;;  %v2766_v18 = vadd.f32 %v2765_v13, %v9038_v61  ;;  %v8270_v19 = vpop.f32.mrb[165].mxu1  ;;  %v4400_v21 = vadd.f32 %v9053_v15, %v4083_v7  ;;  %vm3141_vm12 = vcmp.ge.f32.partialorder %v2134_v9, 0.0  ;;  %v7955_v24 = vpop.f32.mrb[167].mxu0 }
 0x236   : > { %v7550_v22 = vpack.c.bf16 %v4557_v8, %v4557_v8  ;;  %v3454_v23 = vmul.f32 0.01, %v2134_v9  ;;  %v2768_v25 = vpop.f32.mrb[166].mxu1  ;;  %v4558_v26 = vadd.f32 %v9053_v15, %v4241_v16  ;;  %v2137_v27 = vadd.f32 %v2136_v17, %v9038_v61 }
 0x237   : > { %5966 = vst.msk [vmem:[%s9077_s6 + $0x140] sm:$0xf] %vm5885_vm7, %v7392_v14  ;;  %vm3299_vm13 = vcmp.ge.f32.partialorder %v2766_v18, 0.0  ;;  %v3612_v28 = vmul.f32 0.01, %v2766_v18  ;;  %v8271_v29 = vpop.f32.mrb[167].mxu1  ;;  %v7393_v30 = vpack.c.bf16 %v4400_v21, %v4400_v21  ;;  %8061 = vmatmul.mubr.msk.bf16.gmra.mrb[16].mxu0 %vm1295_vm2, %v8645_v12  ;;  %v2769_v32 = vadd.f32 %v2768_v25, %v9038_v61 }
 0x238   : > { %6124 = vst.msk [vmem:[%s9077_s6 + $0x3b8] sm:$0xf] %vm5885_vm7, %v7550_v22  ;;  %v3767_v31 = vsel %vm3141_vm12, %v2134_v9, %v3454_v23  ;;  %v7551_v34 = vpack.c.bf16 %v4558_v26, %v4558_v26  ;;  %vm3142_vm14 = vcmp.ge.f32.partialorder %v2137_v27, 0.0  ;;  %v3455_v35 = vmul.f32 0.01, %v2137_v27  ;;  %8064 = vmatprep.mubr.msk.bf16.mxu0 %vm8755_vm1, %v8754_v1 }
 0x239   : > { %v4084_v33 = vmul.f32 %v9048_v6, %v3767_v31  ;;  %8377 = vmatmul.mubr.msk.bf16.gmra.mrb[16].mxu1 %vm1295_vm2, %v8646_v20  ;;  %5967 = vst.msk [vmem:[%s9077_s6 + $0x144] sm:$0xf] %vm5885_vm7, %v7393_v30  ;;  %v3925_v36 = vsel %vm3299_vm13, %v2766_v18, %v3612_v28  ;;  %vm3300_vm15 = vcmp.ge.f32.partialorder %v2769_v32, 0.0  ;;  %v3613_v37 = vmul.f32 0.01, %v2769_v32  ;;  %v8649_v20 = vld [vmem:[%s8822_s28 + $0x230] sm:$0xff]  }
 0x23a   : > { %8380 = vmatprep.mubr.msk.bf16.mxu1 %vm8755_vm1, %v8754_v1  ;;  %6125 = vst.msk [vmem:[%s9077_s6 + $0x3bc] sm:$0xf] %vm5885_vm7, %v7551_v34  ;;  %v3768_v39 = vsel %vm3142_vm14, %v2137_v27, %v3455_v35  ;;  %v4242_v40 = vmul.f32 %v9048_v6, %v3925_v36  ;;  %v2141_v41 = vpop.f32.mrb[168].mxu0  ;;  %v8650_v28 = vld [vmem:[%s8822_s28 + $0x4a8] sm:$0xff]  }
 0x23b   : > { %v4401_v38 = vadd.f32 %v9053_v15, %v4084_v33  ;;  %v4085_v42 = vmul.f32 %v9048_v6, %v3768_v39  ;;  %v2142_v43 = vadd.f32 %v2141_v41, %v9038_v61  ;;  %v3926_v44 = vsel %vm3300_vm15, %v2769_v32, %v3613_v37  ;;  %v7958_v45 = vpop.f32.mrb[169].mxu0 }
 0x23c   : > { %v2773_v47 = vpop.f32.mrb[168].mxu1  ;;  %v4559_v49 = vadd.f32 %v9053_v15, %v4242_v40  ;;  %v4243_v50 = vmul.f32 %v9048_v6, %v3926_v44  ;;  %v2144_v51 = vpop.f32.mrb[170].mxu0 }
 0x23d   : > { %v7394_v48 = vpack.c.bf16 %v4401_v38, %v4401_v38  ;;  %v2774_v52 = vadd.f32 %v2773_v47, %v9038_v61  ;;  %v8274_v53 = vpop.f32.mrb[169].mxu1  ;;  %v4402_v55 = vadd.f32 %v9053_v15, %v4085_v42  ;;  %vm3143_vm0 = vcmp.ge.f32.partialorder %v2142_v43, 0.0  ;;  %v7959_v58 = vpop.f32.mrb[171].mxu0 }
 0x23e   : > { %v3456_v56 = vmul.f32 0.01, %v2142_v43  ;;  %v2145_v57 = vadd.f32 %v2144_v51, %v9038_v61  ;;  %v2776_v59 = vpop.f32.mrb[170].mxu1  ;;  %v7552_v60 = vpack.c.bf16 %v4559_v49, %v4559_v49  ;;  %v4560_v62 = vadd.f32 %v9053_v15, %v4243_v50 }
 0x23f   : > { %5968 = vst.msk [vmem:[%s9077_s6 + $0x148] sm:$0xf] %vm5885_vm7, %v7394_v48  ;;  %vm3301_vm3 = vcmp.ge.f32.partialorder %v2774_v52, 0.0  ;;  %v3614_v63 = vmul.f32 0.01, %v2774_v52  ;;  %v8275_v0 = vpop.f32.mrb[171].mxu1  ;;  %v7395_v2 = vpack.c.bf16 %v4402_v55, %v4402_v55  ;;  %8065 = vmatmul.mubr.msk.bf16.gmra.mrb[20].mxu0 %vm1295_vm2, %v8647_v46  ;;  %v2777_v9 = vadd.f32 %v2776_v59, %v9038_v61 }
 0x240   : > { %v3769_v3 = vsel %vm3143_vm0, %v2142_v43, %v3456_v56  ;;  %vm3144_vm4 = vcmp.ge.f32.partialorder %v2145_v57, 0.0  ;;  %v3457_v4 = vmul.f32 0.01, %v2145_v57  ;;  %6126 = vst.msk [vmem:[%s9077_s6 + $0x3c0] sm:$0xf] %vm5885_vm7, %v7552_v60  ;;  %v7553_v7 = vpack.c.bf16 %v4560_v62, %v4560_v62  ;;  %8068 = vmatprep.mubr.msk.bf16.mxu0 %vm8755_vm1, %v8754_v1  ;;  %v8651_v55 = vld [vmem:[%s8822_s28 + $0x238] sm:$0xff]  }
 0x241   : > { %v4086_v5 = vmul.f32 %v9048_v6, %v3769_v3  ;;  %v3927_v8 = vsel %vm3301_vm3, %v2774_v52, %v3614_v63  ;;  %8381 = vmatmul.mubr.msk.bf16.gmra.mrb[20].mxu1 %vm1295_vm2, %v8648_v54  ;;  %5969 = vst.msk [vmem:[%s9077_s6 + $0x14c] sm:$0xf] %vm5885_vm7, %v7395_v2  ;;  %vm3302_vm5 = vcmp.ge.f32.partialorder %v2777_v9, 0.0  ;;  %v3615_v16 = vmul.f32 0.01, %v2777_v9  ;;  %v8652_v63 = vld [vmem:[%s8822_s28 + $0x4b0] sm:$0xff]  }
 0x242   : > { %v3770_v10 = vsel %vm3144_vm4, %v2145_v57, %v3457_v4  ;;  %v4244_v11 = vmul.f32 %v9048_v6, %v3927_v8  ;;  %8384 = vmatprep.mubr.msk.bf16.mxu1 %vm8755_vm1, %v8754_v1  ;;  %6127 = vst.msk [vmem:[%s9077_s6 + $0x3c4] sm:$0xf] %vm5885_vm7, %v7553_v7  ;;  %v2149_v14 = vpop.f32.mrb[172].mxu0 }
 0x243   : > { %v4403_v12 = vadd.f32 %v9053_v15, %v4086_v5  ;;  %v4087_v13 = vmul.f32 %v9048_v6, %v3770_v10  ;;  %v2150_v18 = vadd.f32 %v2149_v14, %v9038_v61  ;;  %v7962_v19 = vpop.f32.mrb[173].mxu0  ;;  %v3928_v24 = vsel %vm3302_vm5, %v2777_v9, %v3615_v16 }
 0x244   : > { %v4561_v17 = vadd.f32 %v9053_v15, %v4244_v11  ;;  %v2781_v21 = vpop.f32.mrb[172].mxu1  ;;  %v2152_v25 = vpop.f32.mrb[174].mxu0  ;;  %v4245_v31 = vmul.f32 %v9048_v6, %v3928_v24 }
 0x245   : > { %v7396_v22 = vpack.c.bf16 %v4403_v12, %v4403_v12  ;;  %v4404_v23 = vadd.f32 %v9053_v15, %v4087_v13  ;;  %v2782_v26 = vadd.f32 %v2781_v21, %v9038_v61  ;;  %v8278_v27 = vpop.f32.mrb[173].mxu1  ;;  %vm3145_vm6 = vcmp.ge.f32.partialorder %v2150_v18, 0.0  ;;  %v7963_v32 = vpop.f32.mrb[175].mxu0 }
 0x246   : > { %v7554_v29 = vpack.c.bf16 %v4561_v17, %v4561_v17  ;;  %v3458_v30 = vmul.f32 0.01, %v2150_v18  ;;  %v2784_v33 = vpop.f32.mrb[174].mxu1  ;;  %v2153_v35 = vadd.f32 %v2152_v25, %v9038_v61  ;;  %v4562_v39 = vadd.f32 %v9053_v15, %v4245_v31 }
 0x247   : > { %5970 = vst.msk [vmem:[%s9077_s6 + $0x150] sm:$0xf] %vm5885_vm7, %v7396_v22  ;;  %v7397_v34 = vpack.c.bf16 %v4404_v23, %v4404_v23  ;;  %vm3303_vm8 = vcmp.ge.f32.partialorder %v2782_v26, 0.0  ;;  %v3616_v36 = vmul.f32 0.01, %v2782_v26  ;;  %v8279_v37 = vpop.f32.mrb[175].mxu1  ;;  %8069 = vmatmul.mubr.msk.bf16.gmra.mrb[24].mxu0 %vm1295_vm2, %v8649_v20  ;;  %v2785_v40 = vadd.f32 %v2784_v33, %v9038_v61 }
 0x248   : > { %6128 = vst.msk [vmem:[%s9077_s6 + $0x3c8] sm:$0xf] %vm5885_vm7, %v7554_v29  ;;  %v3771_v38 = vsel %vm3145_vm6, %v2150_v18, %v3458_v30  ;;  %vm3146_vm9 = vcmp.ge.f32.partialorder %v2153_v35, 0.0  ;;  %v3459_v42 = vmul.f32 0.01, %v2153_v35  ;;  %8072 = vmatprep.mubr.msk.bf16.mxu0 %vm8755_vm1, %v8754_v1  ;;  %v7555_v44 = vpack.c.bf16 %v4562_v39, %v4562_v39 }
 0x249   : > { %5971 = vst.msk [vmem:[%s9077_s6 + $0x154] sm:$0xf] %vm5885_vm7, %v7397_v34  ;;  %v4088_v41 = vmul.f32 %v9048_v6, %v3771_v38  ;;  %v3929_v43 = vsel %vm3303_vm8, %v2782_v26, %v3616_v36  ;;  %8385 = vmatmul.mubr.msk.bf16.gmra.mrb[24].mxu1 %vm1295_vm2, %v8650_v28  ;;  %vm3304_vm10 = vcmp.ge.f32.partialorder %v2785_v40, 0.0  ;;  %v3617_v46 = vmul.f32 0.01, %v2785_v40  ;;  %v8653_v28 = vld [vmem:[%s8822_s28 + $0x240] sm:$0xff]  }
 0x24a   : > { %v4246_v45 = vmul.f32 %v9048_v6, %v3929_v43  ;;  %8388 = vmatprep.mubr.msk.bf16.mxu1 %vm8755_vm1, %v8754_v1  ;;  %v3772_v48 = vsel %vm3146_vm9, %v2153_v35, %v3459_v42  ;;  %v2157_v49 = vpop.f32.mrb[176].mxu0  ;;  %6129 = vst.msk [vmem:[%s9077_s6 + $0x3cc] sm:$0xf] %vm5885_vm7, %v7555_v44  ;;  %v8654_v36 = vld [vmem:[%s8822_s28 + $0x4b8] sm:$0xff]  }
 0x24b   : > { %v4405_v47 = vadd.f32 %v9053_v15, %v4088_v41  ;;  %v4089_v50 = vmul.f32 %v9048_v6, %v3772_v48  ;;  %v2158_v52 = vadd.f32 %v2157_v49, %v9038_v61  ;;  %v3930_v53 = vsel %vm3304_vm10, %v2785_v40, %v3617_v46  ;;  %v7966_v54 = vpop.f32.mrb[177].mxu0 }
 0x24c   : > { %v4563_v51 = vadd.f32 %v9053_v15, %v4246_v45  ;;  %v2789_v56 = vpop.f32.mrb[176].mxu1  ;;  %v4247_v58 = vmul.f32 %v9048_v6, %v3930_v53  ;;  %v2160_v59 = vpop.f32.mrb[178].mxu0 }
 0x24d   : > { %v7398_v57 = vpack.c.bf16 %v4405_v47, %v4405_v47  ;;  %v2790_v60 = vadd.f32 %v2789_v56, %v9038_v61  ;;  %v8282_v62 = vpop.f32.mrb[177].mxu1  ;;  %v4406_v0 = vadd.f32 %v9053_v15, %v4089_v50  ;;  %vm3147_vm11 = vcmp.ge.f32.partialorder %v2158_v52, 0.0  ;;  %v7967_v4 = vpop.f32.mrb[179].mxu0 }
 0x24e   : > { %v7556_v2 = vpack.c.bf16 %v4563_v51, %v4563_v51  ;;  %v3460_v3 = vmul.f32 0.01, %v2158_v52  ;;  %v2792_v5 = vpop.f32.mrb[178].mxu1  ;;  %v4564_v7 = vadd.f32 %v9053_v15, %v4247_v58  ;;  %v2161_v8 = vadd.f32 %v2160_v59, %v9038_v61 }
 0x24f   : > { %5972 = vst.msk [vmem:[%s9077_s6 + $0x158] sm:$0xf] %vm5885_vm7, %v7398_v57  ;;  %vm3305_vm12 = vcmp.ge.f32.partialorder %v2790_v60, 0.0  ;;  %v3618_v9 = vmul.f32 0.01, %v2790_v60  ;;  %v8283_v10 = vpop.f32.mrb[179].mxu1  ;;  %v7399_v11 = vpack.c.bf16 %v4406_v0, %v4406_v0  ;;  %8073 = vmatmul.mubr.msk.bf16.gmra.mrb[28].mxu0 %vm1295_vm2, %v8651_v55  ;;  %v2793_v13 = vadd.f32 %v2792_v5, %v9038_v61 }
 0x250   : > { %6130 = vst.msk [vmem:[%s9077_s6 + $0x3d0] sm:$0xf] %vm5885_vm7, %v7556_v2  ;;  %v3773_v12 = vsel %vm3147_vm11, %v2158_v52, %v3460_v3  ;;  %v7557_v16 = vpack.c.bf16 %v4564_v7, %v4564_v7  ;;  %vm3148_vm13 = vcmp.ge.f32.partialorder %v2161_v8, 0.0  ;;  %v3461_v17 = vmul.f32 0.01, %v2161_v8  ;;  %8076 = vmatprep.mubr.msk.bf16.mxu0 %vm8755_vm1, %v8754_v1 }
 0x251   : > { %v4090_v14 = vmul.f32 %v9048_v6, %v3773_v12  ;;  %8389 = vmatmul.mubr.msk.bf16.gmra.mrb[28].mxu1 %vm1295_vm2, %v8652_v63  ;;  %5973 = vst.msk [vmem:[%s9077_s6 + $0x15c] sm:$0xf] %vm5885_vm7, %v7399_v11  ;;  %v3931_v18 = vsel %vm3305_vm12, %v2790_v60, %v3618_v9  ;;  %vm3306_vm14 = vcmp.ge.f32.partialorder %v2793_v13, 0.0  ;;  %v3619_v19 = vmul.f32 0.01, %v2793_v13  ;;  %v8655_v63 = vld [vmem:[%s8822_s28 + $0x248] sm:$0xff]  }
 0x252   : > { %8392 = vmatprep.mubr.msk.bf16.mxu1 %vm8755_vm1, %v8754_v1  ;;  %6131 = vst.msk [vmem:[%s9077_s6 + $0x3d4] sm:$0xf] %vm5885_vm7, %v7557_v16  ;;  %v3774_v21 = vsel %vm3148_vm13, %v2161_v8, %v3461_v17  ;;  %v4248_v22 = vmul.f32 %v9048_v6, %v3931_v18  ;;  %v2165_v23 = vpop.f32.mrb[180].mxu0  ;;  %v8656_v9 = vld [vmem:[%s8822_s28 + $0x4c0] sm:$0xff]  }
 0x253   : > { %v4407_v20 = vadd.f32 %v9053_v15, %v4090_v14  ;;  %v4091_v24 = vmul.f32 %v9048_v6, %v3774_v21  ;;  %v2166_v25 = vadd.f32 %v2165_v23, %v9038_v61  ;;  %v3932_v26 = vsel %vm3306_vm14, %v2793_v13, %v3619_v19  ;;  %v7970_v27 = vpop.f32.mrb[181].mxu0 }
 0x254   : > { %v2797_v29 = vpop.f32.mrb[180].mxu1  ;;  %v4565_v31 = vadd.f32 %v9053_v15, %v4248_v22  ;;  %v4249_v32 = vmul.f32 %v9048_v6, %v3932_v26  ;;  %v2168_v33 = vpop.f32.mrb[182].mxu0 }
 0x255   : > { %v7400_v30 = vpack.c.bf16 %v4407_v20, %v4407_v20  ;;  %v2798_v34 = vadd.f32 %v2797_v29, %v9038_v61  ;;  %v8286_v35 = vpop.f32.mrb[181].mxu1  ;;  %v4408_v37 = vadd.f32 %v9053_v15, %v4091_v24  ;;  %vm3149_vm15 = vcmp.ge.f32.partialorder %v2166_v25, 0.0  ;;  %v7971_v40 = vpop.f32.mrb[183].mxu0 }
 0x256   : > { %v3462_v38 = vmul.f32 0.01, %v2166_v25  ;;  %v2169_v39 = vadd.f32 %v2168_v33, %v9038_v61  ;;  %v2800_v41 = vpop.f32.mrb[182].mxu1  ;;  %v7558_v42 = vpack.c.bf16 %v4565_v31, %v4565_v31  ;;  %v4566_v43 = vadd.f32 %v9053_v15, %v4249_v32 }
 0x257   : > { %5974 = vst.msk [vmem:[%s9077_s6 + $0x160] sm:$0xf] %vm5885_vm7, %v7400_v30  ;;  %vm3307_vm0 = vcmp.ge.f32.partialorder %v2798_v34, 0.0  ;;  %v3620_v44 = vmul.f32 0.01, %v2798_v34  ;;  %v8287_v45 = vpop.f32.mrb[183].mxu1  ;;  %v7401_v46 = vpack.c.bf16 %v4408_v37, %v4408_v37  ;;  %8077 = vmatmul.mubr.msk.bf16.gmra.mrb[32].mxu0 %vm1295_vm2, %v8653_v28  ;;  %v2801_v52 = vadd.f32 %v2800_v41, %v9038_v61 }
 0x258   : > { %v3775_v47 = vsel %vm3149_vm15, %v2166_v25, %v3462_v38  ;;  %vm3150_vm3 = vcmp.ge.f32.partialorder %v2169_v39, 0.0  ;;  %v3463_v48 = vmul.f32 0.01, %v2169_v39  ;;  %6132 = vst.msk [vmem:[%s9077_s6 + $0x3d8] sm:$0xf] %vm5885_vm7, %v7558_v42  ;;  %v7559_v50 = vpack.c.bf16 %v4566_v43, %v4566_v43  ;;  %8080 = vmatprep.mubr.msk.bf16.mxu0 %vm8755_vm1, %v8754_v1  ;;  %v8657_v37 = vld [vmem:[%s8822_s28 + $0x250] sm:$0xff]  }
 0x259   : > { %v4092_v49 = vmul.f32 %v9048_v6, %v3775_v47  ;;  %v3933_v51 = vsel %vm3307_vm0, %v2798_v34, %v3620_v44  ;;  %8393 = vmatmul.mubr.msk.bf16.gmra.mrb[32].mxu1 %vm1295_vm2, %v8654_v36  ;;  %5975 = vst.msk [vmem:[%s9077_s6 + $0x164] sm:$0xf] %vm5885_vm7, %v7401_v46  ;;  %vm3308_vm4 = vcmp.ge.f32.partialorder %v2801_v52, 0.0  ;;  %v3621_v58 = vmul.f32 0.01, %v2801_v52  ;;  %v8658_v44 = vld [vmem:[%s8822_s28 + $0x4c8] sm:$0xff]  }
 0x25a   : > { %v3776_v53 = vsel %vm3150_vm3, %v2169_v39, %v3463_v48  ;;  %v4250_v54 = vmul.f32 %v9048_v6, %v3933_v51  ;;  %8396 = vmatprep.mubr.msk.bf16.mxu1 %vm8755_vm1, %v8754_v1  ;;  %6133 = vst.msk [vmem:[%s9077_s6 + $0x3dc] sm:$0xf] %vm5885_vm7, %v7559_v50  ;;  %v2173_v57 = vpop.f32.mrb[184].mxu0 }
 0x25b   : > { %v4409_v55 = vadd.f32 %v9053_v15, %v4092_v49  ;;  %v4093_v56 = vmul.f32 %v9048_v6, %v3776_v53  ;;  %v2174_v60 = vadd.f32 %v2173_v57, %v9038_v61  ;;  %v7974_v62 = vpop.f32.mrb[185].mxu0  ;;  %v3934_v4 = vsel %vm3308_vm4, %v2801_v52, %v3621_v58 }
 0x25c   : > { %v4567_v59 = vadd.f32 %v9053_v15, %v4250_v54  ;;  %v2805_v0 = vpop.f32.mrb[184].mxu1  ;;  %v2176_v5 = vpop.f32.mrb[186].mxu0  ;;  %v4251_v12 = vmul.f32 %v9048_v6, %v3934_v4 }
 0x25d   : > { %v7402_v2 = vpack.c.bf16 %v4409_v55, %v4409_v55  ;;  %v4410_v3 = vadd.f32 %v9053_v15, %v4093_v56  ;;  %v2806_v7 = vadd.f32 %v2805_v0, %v9038_v61  ;;  %v8290_v8 = vpop.f32.mrb[185].mxu1  ;;  %vm3151_vm5 = vcmp.ge.f32.partialorder %v2174_v60, 0.0  ;;  %v7975_v13 = vpop.f32.mrb[187].mxu0 }
 0x25e   : > { %v7560_v10 = vpack.c.bf16 %v4567_v59, %v4567_v59  ;;  %v3464_v11 = vmul.f32 0.01, %v2174_v60  ;;  %v2808_v14 = vpop.f32.mrb[186].mxu1  ;;  %v2177_v17 = vadd.f32 %v2176_v5, %v9038_v61  ;;  %v4568_v21 = vadd.f32 %v9053_v15, %v4251_v12 }
 0x25f   : > { %5976 = vst.msk [vmem:[%s9077_s6 + $0x168] sm:$0xf] %vm5885_vm7, %v7402_v2  ;;  %v7403_v16 = vpack.c.bf16 %v4410_v3, %v4410_v3  ;;  %vm3309_vm6 = vcmp.ge.f32.partialorder %v2806_v7, 0.0  ;;  %v3622_v18 = vmul.f32 0.01, %v2806_v7  ;;  %v8291_v19 = vpop.f32.mrb[187].mxu1  ;;  %8081 = vmatmul.mubr.msk.bf16.gmra.mrb[36].mxu0 %vm1295_vm2, %v8655_v63  ;;  %v2809_v22 = vadd.f32 %v2808_v14, %v9038_v61 }
 0x260   : > { %6134 = vst.msk [vmem:[%s9077_s6 + $0x3e0] sm:$0xf] %vm5885_vm7, %v7560_v10  ;;  %v3777_v20 = vsel %vm3151_vm5, %v2174_v60, %v3464_v11  ;;  %vm3152_vm8 = vcmp.ge.f32.partialorder %v2177_v17, 0.0  ;;  %v3465_v24 = vmul.f32 0.01, %v2177_v17  ;;  %8084 = vmatprep.mubr.msk.bf16.mxu0 %vm8755_vm1, %v8754_v1  ;;  %v7561_v26 = vpack.c.bf16 %v4568_v21, %v4568_v21 }
 0x261   : > { %5977 = vst.msk [vmem:[%s9077_s6 + $0x16c] sm:$0xf] %vm5885_vm7, %v7403_v16  ;;  %v4094_v23 = vmul.f32 %v9048_v6, %v3777_v20  ;;  %v3935_v25 = vsel %vm3309_vm6, %v2806_v7, %v3622_v18  ;;  %8397 = vmatmul.mubr.msk.bf16.gmra.mrb[36].mxu1 %vm1295_vm2, %v8656_v9  ;;  %vm3310_vm9 = vcmp.ge.f32.partialorder %v2809_v22, 0.0  ;;  %v3623_v28 = vmul.f32 0.01, %v2809_v22  ;;  %v8659_v9 = vld [vmem:[%s8822_s28 + $0x258] sm:$0xff]  }
 0x262   : > { %v4252_v27 = vmul.f32 %v9048_v6, %v3935_v25  ;;  %8400 = vmatprep.mubr.msk.bf16.mxu1 %vm8755_vm1, %v8754_v1  ;;  %v3778_v30 = vsel %vm3152_vm8, %v2177_v17, %v3465_v24  ;;  %v2181_v31 = vpop.f32.mrb[188].mxu0  ;;  %6135 = vst.msk [vmem:[%s9077_s6 + $0x3e4] sm:$0xf] %vm5885_vm7, %v7561_v26  ;;  %v8660_v18 = vld [vmem:[%s8822_s28 + $0x4d0] sm:$0xff]  }
 0x263   : > { %v4411_v29 = vadd.f32 %v9053_v15, %v4094_v23  ;;  %v4095_v32 = vmul.f32 %v9048_v6, %v3778_v30  ;;  %v2182_v34 = vadd.f32 %v2181_v31, %v9038_v61  ;;  %v3936_v35 = vsel %vm3310_vm9, %v2809_v22, %v3623_v28  ;;  %v7978_v36 = vpop.f32.mrb[189].mxu0 }
 0x264   : > { %v4569_v33 = vadd.f32 %v9053_v15, %v4252_v27  ;;  %v2813_v38 = vpop.f32.mrb[188].mxu1  ;;  %v4253_v40 = vmul.f32 %v9048_v6, %v3936_v35  ;;  %v2184_v41 = vpop.f32.mrb[190].mxu0 }
 0x265   : > { %v7404_v39 = vpack.c.bf16 %v4411_v29, %v4411_v29  ;;  %v2814_v42 = vadd.f32 %v2813_v38, %v9038_v61  ;;  %v8294_v43 = vpop.f32.mrb[189].mxu1  ;;  %v4412_v45 = vadd.f32 %v9053_v15, %v4095_v32  ;;  %vm3153_vm10 = vcmp.ge.f32.partialorder %v2182_v34, 0.0  ;;  %v7979_v48 = vpop.f32.mrb[191].mxu0 }
 0x266   : > { %v7562_v46 = vpack.c.bf16 %v4569_v33, %v4569_v33  ;;  %v3466_v47 = vmul.f32 0.01, %v2182_v34  ;;  %v2816_v49 = vpop.f32.mrb[190].mxu1  ;;  %v4570_v50 = vadd.f32 %v9053_v15, %v4253_v40  ;;  %v2185_v51 = vadd.f32 %v2184_v41, %v9038_v61 }
 0x267   : > { %5978 = vst.msk [vmem:[%s9077_s6 + $0x170] sm:$0xf] %vm5885_vm7, %v7404_v39  ;;  %vm3311_vm11 = vcmp.ge.f32.partialorder %v2814_v42, 0.0  ;;  %v3624_v52 = vmul.f32 0.01, %v2814_v42  ;;  %v8295_v53 = vpop.f32.mrb[191].mxu1  ;;  %v7405_v54 = vpack.c.bf16 %v4412_v45, %v4412_v45  ;;  %8085 = vmatmul.mubr.msk.bf16.gmra.mrb[40].mxu0 %vm1295_vm2, %v8657_v37  ;;  %v2817_v56 = vadd.f32 %v2816_v49, %v9038_v61 }
 0x268   : > { %6136 = vst.msk [vmem:[%s9077_s6 + $0x3e8] sm:$0xf] %vm5885_vm7, %v7562_v46  ;;  %v3779_v55 = vsel %vm3153_vm10, %v2182_v34, %v3466_v47  ;;  %v7563_v58 = vpack.c.bf16 %v4570_v50, %v4570_v50  ;;  %vm3154_vm12 = vcmp.ge.f32.partialorder %v2185_v51, 0.0  ;;  %v3467_v59 = vmul.f32 0.01, %v2185_v51  ;;  %8088 = vmatprep.mubr.msk.bf16.mxu0 %vm8755_vm1, %v8754_v1 }
 0x269   : > { %v4096_v57 = vmul.f32 %v9048_v6, %v3779_v55  ;;  %8401 = vmatmul.mubr.msk.bf16.gmra.mrb[40].mxu1 %vm1295_vm2, %v8658_v44  ;;  %5979 = vst.msk [vmem:[%s9077_s6 + $0x174] sm:$0xf] %vm5885_vm7, %v7405_v54  ;;  %v3937_v60 = vsel %vm3311_vm11, %v2814_v42, %v3624_v52  ;;  %vm3312_vm13 = vcmp.ge.f32.partialorder %v2817_v56, 0.0  ;;  %v3625_v62 = vmul.f32 0.01, %v2817_v56  ;;  %v8661_v44 = vld [vmem:[%s8822_s28 + $0x260] sm:$0xff]  }
 0x26a   : > { %8404 = vmatprep.mubr.msk.bf16.mxu1 %vm8755_vm1, %v8754_v1  ;;  %6137 = vst.msk [vmem:[%s9077_s6 + $0x3ec] sm:$0xf] %vm5885_vm7, %v7563_v58  ;;  %v3780_v0 = vsel %vm3154_vm12, %v2185_v51, %v3467_v59  ;;  %v4254_v2 = vmul.f32 %v9048_v6, %v3937_v60  ;;  %v2189_v3 = vpop.f32.mrb[192].mxu0  ;;  %v8662_v52 = vld [vmem:[%s8822_s28 + $0x4d8] sm:$0xff]  }
 0x26b   : > { %v4413_v63 = vadd.f32 %v9053_v15, %v4096_v57  ;;  %v4097_v4 = vmul.f32 %v9048_v6, %v3780_v0  ;;  %v2190_v5 = vadd.f32 %v2189_v3, %v9038_v61  ;;  %v3938_v7 = vsel %vm3312_vm13, %v2817_v56, %v3625_v62  ;;  %v7982_v8 = vpop.f32.mrb[193].mxu0 }
 0x26c   : > { %v2821_v10 = vpop.f32.mrb[192].mxu1  ;;  %v4571_v12 = vadd.f32 %v9053_v15, %v4254_v2  ;;  %v4255_v13 = vmul.f32 %v9048_v6, %v3938_v7  ;;  %v2192_v14 = vpop.f32.mrb[194].mxu0 }
 0x26d   : > { %v7406_v11 = vpack.c.bf16 %v4413_v63, %v4413_v63  ;;  %v2822_v16 = vadd.f32 %v2821_v10, %v9038_v61  ;;  %v8298_v17 = vpop.f32.mrb[193].mxu1  ;;  %v4414_v19 = vadd.f32 %v9053_v15, %v4097_v4  ;;  %vm3155_vm14 = vcmp.ge.f32.partialorder %v2190_v5, 0.0  ;;  %v7983_v22 = vpop.f32.mrb[195].mxu0 }
 0x26e   : > { %v3468_v20 = vmul.f32 0.01, %v2190_v5  ;;  %v2193_v21 = vadd.f32 %v2192_v14, %v9038_v61  ;;  %v2824_v23 = vpop.f32.mrb[194].mxu1  ;;  %v7564_v24 = vpack.c.bf16 %v4571_v12, %v4571_v12  ;;  %v4572_v25 = vadd.f32 %v9053_v15, %v4255_v13 }
 0x26f   : > { %5980 = vst.msk [vmem:[%s9077_s6 + $0x178] sm:$0xf] %vm5885_vm7, %v7406_v11  ;;  %vm3313_vm15 = vcmp.ge.f32.partialorder %v2822_v16, 0.0  ;;  %v3626_v26 = vmul.f32 0.01, %v2822_v16  ;;  %v8299_v27 = vpop.f32.mrb[195].mxu1  ;;  %v7407_v28 = vpack.c.bf16 %v4414_v19, %v4414_v19  ;;  %8089 = vmatmul.mubr.msk.bf16.gmra.mrb[44].mxu0 %vm1295_vm2, %v8659_v9  ;;  %v2825_v34 = vadd.f32 %v2824_v23, %v9038_v61 }
 0x270   : > { %v3781_v29 = vsel %vm3155_vm14, %v2190_v5, %v3468_v20  ;;  %vm3156_vm0 = vcmp.ge.f32.partialorder %v2193_v21, 0.0  ;;  %v3469_v30 = vmul.f32 0.01, %v2193_v21  ;;  %6138 = vst.msk [vmem:[%s9077_s6 + $0x3f0] sm:$0xf] %vm5885_vm7, %v7564_v24  ;;  %v7565_v32 = vpack.c.bf16 %v4572_v25, %v4572_v25  ;;  %8092 = vmatprep.mubr.msk.bf16.mxu0 %vm8755_vm1, %v8754_v1  ;;  %v8663_v19 = vld [vmem:[%s8822_s28 + $0x268] sm:$0xff]  }
 0x271   : > { %v4098_v31 = vmul.f32 %v9048_v6, %v3781_v29  ;;  %v3939_v33 = vsel %vm3313_vm15, %v2822_v16, %v3626_v26  ;;  %8405 = vmatmul.mubr.msk.bf16.gmra.mrb[44].mxu1 %vm1295_vm2, %v8660_v18  ;;  %5981 = vst.msk [vmem:[%s9077_s6 + $0x17c] sm:$0xf] %vm5885_vm7, %v7407_v28  ;;  %vm3314_vm3 = vcmp.ge.f32.partialorder %v2825_v34, 0.0  ;;  %v3627_v40 = vmul.f32 0.01, %v2825_v34 }
 0x272   : > { %v3782_v35 = vsel %vm3156_vm0, %v2193_v21, %v3469_v30  ;;  %v4256_v36 = vmul.f32 %v9048_v6, %v3939_v33  ;;  %8408 = vmatprep.mubr.msk.bf16.mxu1 %vm8755_vm1, %v8754_v1  ;;  %6139 = vst.msk [vmem:[%s9077_s6 + $0x3f4] sm:$0xf] %vm5885_vm7, %v7565_v32  ;;  %v2197_v39 = vpop.f32.mrb[196].mxu0  ;;  %v8664_v26 = vld [vmem:[%s8822_s28 + $0x4e0] ss:$0 sps:$4 sm:$0xff]  }
 0x273   : > { %v4415_v37 = vadd.f32 %v9053_v15, %v4098_v31  ;;  %v4099_v38 = vmul.f32 %v9048_v6, %v3782_v35  ;;  %v2198_v42 = vadd.f32 %v2197_v39, %v9038_v61  ;;  %v7986_v43 = vpop.f32.mrb[197].mxu0  ;;  %v3940_v48 = vsel %vm3314_vm3, %v2825_v34, %v3627_v40 }
 0x274   : > { %v4573_v41 = vadd.f32 %v9053_v15, %v4256_v36  ;;  %v2829_v45 = vpop.f32.mrb[196].mxu1  ;;  %v2200_v49 = vpop.f32.mrb[198].mxu0  ;;  %v4257_v55 = vmul.f32 %v9048_v6, %v3940_v48 }
 0x275   : > { %v7408_v46 = vpack.c.bf16 %v4415_v37, %v4415_v37  ;;  %v4416_v47 = vadd.f32 %v9053_v15, %v4099_v38  ;;  %v2830_v50 = vadd.f32 %v2829_v45, %v9038_v61  ;;  %v8302_v51 = vpop.f32.mrb[197].mxu1  ;;  %vm3157_vm4 = vcmp.ge.f32.partialorder %v2198_v42, 0.0  ;;  %v7987_v56 = vpop.f32.mrb[199].mxu0 }
 0x276   : > { %v7566_v53 = vpack.c.bf16 %v4573_v41, %v4573_v41  ;;  %v3470_v54 = vmul.f32 0.01, %v2198_v42  ;;  %v2832_v57 = vpop.f32.mrb[198].mxu1  ;;  %v2201_v59 = vadd.f32 %v2200_v49, %v9038_v61  ;;  %v4574_v0 = vadd.f32 %v9053_v15, %v4257_v55  ;;  %v8665_v51 = vld [vmem:[%s8822_s28 + $0x270] sm:$0xff]  }
 0x277   : > { %5982 = vst.msk [vmem:[%s9077_s6 + $0x180] sm:$0xf] %vm5885_vm7, %v7408_v46  ;;  %v7409_v58 = vpack.c.bf16 %v4416_v47, %v4416_v47  ;;  %vm3315_vm5 = vcmp.ge.f32.partialorder %v2830_v50, 0.0  ;;  %v3628_v60 = vmul.f32 0.01, %v2830_v50  ;;  %v8303_v62 = vpop.f32.mrb[199].mxu1  ;;  %8093 = vmatmul.mubr.msk.bf16.gmra.mrb[48].mxu0 %vm1295_vm2, %v8661_v44  ;;  %v2833_v2 = vadd.f32 %v2832_v57, %v9038_v61 }
 0x278   : > { %6140 = vst.msk [vmem:[%s9077_s6 + $0x3f8] sm:$0xf] %vm5885_vm7, %v7566_v53  ;;  %v3783_v63 = vsel %vm3157_vm4, %v2198_v42, %v3470_v54  ;;  %vm3158_vm6 = vcmp.ge.f32.partialorder %v2201_v59, 0.0  ;;  %v3471_v4 = vmul.f32 0.01, %v2201_v59  ;;  %8096 = vmatprep.mubr.msk.bf16.mxu0 %vm8755_vm1, %v8754_v1  ;;  %v7567_v7 = vpack.c.bf16 %v4574_v0, %v4574_v0 }
 0x279   : > { %5983 = vst.msk [vmem:[%s9077_s6 + $0x184] sm:$0xf] %vm5885_vm7, %v7409_v58  ;;  %v4100_v3 = vmul.f32 %v9048_v6, %v3783_v63  ;;  %v3941_v5 = vsel %vm3315_vm5, %v2830_v50, %v3628_v60  ;;  %8409 = vmatmul.mubr.msk.bf16.gmra.mrb[48].mxu1 %vm1295_vm2, %v8662_v52  ;;  %vm3316_vm8 = vcmp.ge.f32.partialorder %v2833_v2, 0.0  ;;  %v3629_v9 = vmul.f32 0.01, %v2833_v2 }
 0x27a   : > { %v4258_v8 = vmul.f32 %v9048_v6, %v3941_v5  ;;  %8412 = vmatprep.mubr.msk.bf16.mxu1 %vm8755_vm1, %v8754_v1  ;;  %v3784_v11 = vsel %vm3158_vm6, %v2201_v59, %v3471_v4  ;;  %v2205_v12 = vpop.f32.mrb[200].mxu0  ;;  %6141 = vst.msk [vmem:[%s9077_s6 + $0x3fc] sm:$0xf] %vm5885_vm7, %v7567_v7 }
 0x27b   : > { %v4417_v10 = vadd.f32 %v9053_v15, %v4100_v3  ;;  %v4101_v13 = vmul.f32 %v9048_v6, %v3784_v11  ;;  %v2206_v16 = vadd.f32 %v2205_v12, %v9038_v61  ;;  %v3942_v17 = vsel %vm3316_vm8, %v2833_v2, %v3629_v9  ;;  %v7990_v18 = vpop.f32.mrb[201].mxu0 }
 0x27c   : > { %v4575_v14 = vadd.f32 %v9053_v15, %v4258_v8  ;;  %v2837_v20 = vpop.f32.mrb[200].mxu1  ;;  %v4259_v22 = vmul.f32 %v9048_v6, %v3942_v17  ;;  %v2208_v23 = vpop.f32.mrb[202].mxu0 }
 0x27d   : > { %v7410_v21 = vpack.c.bf16 %v4417_v10, %v4417_v10  ;;  %v2838_v24 = vadd.f32 %v2837_v20, %v9038_v61  ;;  %v8306_v25 = vpop.f32.mrb[201].mxu1  ;;  %v4418_v27 = vadd.f32 %v9053_v15, %v4101_v13  ;;  %vm3159_vm9 = vcmp.ge.f32.partialorder %v2206_v16, 0.0  ;;  %v7991_v30 = vpop.f32.mrb[203].mxu0 }
 0x27e   : > { %v7568_v28 = vpack.c.bf16 %v4575_v14, %v4575_v14  ;;  %v3472_v29 = vmul.f32 0.01, %v2206_v16  ;;  %v2840_v31 = vpop.f32.mrb[202].mxu1  ;;  %v4576_v32 = vadd.f32 %v9053_v15, %v4259_v22  ;;  %v2209_v33 = vadd.f32 %v2208_v23, %v9038_v61 }
 0x27f   : > { %5984 = vst.msk [vmem:[%s9077_s6 + $0x188] sm:$0xf] %vm5885_vm7, %v7410_v21  ;;  %vm3317_vm10 = vcmp.ge.f32.partialorder %v2838_v24, 0.0  ;;  %v3630_v34 = vmul.f32 0.01, %v2838_v24  ;;  %v8307_v35 = vpop.f32.mrb[203].mxu1  ;;  %v7411_v36 = vpack.c.bf16 %v4418_v27, %v4418_v27  ;;  %8097 = vmatmul.mubr.msk.bf16.gmra.mrb[52].mxu0 %vm1295_vm2, %v8663_v19  ;;  %v2841_v38 = vadd.f32 %v2840_v31, %v9038_v61 }
 0x280   : > { %6142 = vst.msk [vmem:[%s9077_s6 + $0x400] sm:$0xf] %vm5885_vm7, %v7568_v28  ;;  %v3785_v37 = vsel %vm3159_vm9, %v2206_v16, %v3472_v29  ;;  %v7569_v40 = vpack.c.bf16 %v4576_v32, %v4576_v32  ;;  %vm3160_vm11 = vcmp.ge.f32.partialorder %v2209_v33, 0.0  ;;  %v3473_v41 = vmul.f32 0.01, %v2209_v33  ;;  %8100 = vmatprep.mubr.msk.bf16.mxu0 %vm8755_vm1, %v8754_v1 }
 0x281   : > { %v4102_v39 = vmul.f32 %v9048_v6, %v3785_v37  ;;  %8413 = vmatmul.mubr.msk.bf16.gmra.mrb[52].mxu1 %vm1295_vm2, %v8664_v26  ;;  %5985 = vst.msk [vmem:[%s9077_s6 + $0x18c] sm:$0xf] %vm5885_vm7, %v7411_v36  ;;  %v3943_v42 = vsel %vm3317_vm10, %v2838_v24, %v3630_v34  ;;  %vm3318_vm12 = vcmp.ge.f32.partialorder %v2841_v38, 0.0  ;;  %v3631_v43 = vmul.f32 0.01, %v2841_v38 }
 0x282   : > { %6143 = vst.msk [vmem:[%s9077_s6 + $0x404] sm:$0xf] %vm5885_vm7, %v7569_v40  ;;  %v3786_v45 = vsel %vm3160_vm11, %v2209_v33, %v3473_v41  ;;  %v4260_v46 = vmul.f32 %v9048_v6, %v3943_v42  ;;  %v2213_v47 = vpop.f32.mrb[204].mxu0 }
 0x283   : > { %v4419_v44 = vadd.f32 %v9053_v15, %v4102_v39  ;;  %v4103_v48 = vmul.f32 %v9048_v6, %v3786_v45  ;;  %v2214_v49 = vadd.f32 %v2213_v47, %v9038_v61  ;;  %v3944_v1 = vsel %vm3318_vm12, %v2841_v38, %v3631_v43  ;;  %v7994_v50 = vpop.f32.mrb[205].mxu0 }
 0x284   : > { %v2845_v52 = vpop.f32.mrb[204].mxu1  ;;  %v4577_v54 = vadd.f32 %v9053_v15, %v4260_v46  ;;  %v4261_v55 = vmul.f32 %v9048_v6, %v3944_v1  ;;  %v2216_v56 = vpop.f32.mrb[206].mxu0 }
 0x285   : > { %v7412_v53 = vpack.c.bf16 %v4419_v44, %v4419_v44  ;;  %v2846_v57 = vadd.f32 %v2845_v52, %v9038_v61  ;;  %v8310_v58 = vpop.f32.mrb[205].mxu1  ;;  %v4420_v59 = vadd.f32 %v9053_v15, %v4103_v48  ;;  %vm3161_vm1 = vcmp.ge.f32.partialorder %v2214_v49, 0.0  ;;  %v7995_v63 = vpop.f32.mrb[207].mxu0 }
 0x286   : > { %v3474_v60 = vmul.f32 0.01, %v2214_v49  ;;  %v2217_v62 = vadd.f32 %v2216_v56, %v9038_v61  ;;  %v2848_v0 = vpop.f32.mrb[206].mxu1  ;;  %v7570_v2 = vpack.c.bf16 %v4577_v54, %v4577_v54  ;;  %v4578_v3 = vadd.f32 %v9053_v15, %v4261_v55 }
 0x287   : > { %5986 = vst.msk [vmem:[%s9077_s6 + $0x190] sm:$0xf] %vm5885_vm7, %v7412_v53  ;;  %vm3319_vm13 = vcmp.ge.f32.partialorder %v2846_v57, 0.0  ;;  %v3632_v4 = vmul.f32 0.01, %v2846_v57  ;;  %v8311_v5 = vpop.f32.mrb[207].mxu1  ;;  %v7413_v7 = vpack.c.bf16 %v4420_v59, %v4420_v59  ;;  %8101 = vmatmul.mubr.msk.bf16.gmra.mrb[56].mxu0 %vm1295_vm2, %v8665_v51  ;;  %v2849_v13 = vadd.f32 %v2848_v0, %v9038_v61 }
 0x288   : > { %v3787_v8 = vsel %vm3161_vm1, %v2214_v49, %v3474_v60  ;;  %vm3162_vm14 = vcmp.ge.f32.partialorder %v2217_v62, 0.0  ;;  %v3475_v9 = vmul.f32 0.01, %v2217_v62  ;;  %6144 = vst.msk [vmem:[%s9077_s6 + $0x408] sm:$0xf] %vm5885_vm7, %v7570_v2  ;;  %v7571_v11 = vpack.c.bf16 %v4578_v3, %v4578_v3 }
 0x289   : > { %v4104_v10 = vmul.f32 %v9048_v6, %v3787_v8  ;;  %v3945_v12 = vsel %vm3319_vm13, %v2846_v57, %v3632_v4  ;;  %5987 = vst.msk [vmem:[%s9077_s6 + $0x194] sm:$0xf] %vm5885_vm7, %v7413_v7  ;;  %vm3320_vm2 = vcmp.ge.f32.partialorder %v2849_v13, 0.0  ;;  %v3633_v20 = vmul.f32 0.01, %v2849_v13 }
 0x28a   : > { %v3788_v14 = vsel %vm3162_vm14, %v2217_v62, %v3475_v9  ;;  %v4262_v16 = vmul.f32 %v9048_v6, %v3945_v12  ;;  %6145 = vst.msk [vmem:[%s9077_s6 + $0x40c] sm:$0xf] %vm5885_vm7, %v7571_v11  ;;  %v2221_v19 = vpop.f32.mrb[208].mxu0 }
 0x28b   : > { %v4421_v17 = vadd.f32 %v9053_v15, %v4104_v10  ;;  %v4105_v18 = vmul.f32 %v9048_v6, %v3788_v14  ;;  %v2222_v22 = vadd.f32 %v2221_v19, %v9038_v61  ;;  %v7998_v23 = vpop.f32.mrb[209].mxu0  ;;  %v3946_v27 = vsel %vm3320_vm2, %v2849_v13, %v3633_v20 }
 0x28c   : > { %v4579_v21 = vadd.f32 %v9053_v15, %v4262_v16  ;;  %v2853_v24 = vpop.f32.mrb[208].mxu1  ;;  %v2224_v28 = vpop.f32.mrb[210].mxu0  ;;  %v4263_v33 = vmul.f32 %v9048_v6, %v3946_v27 }
 0x28d   : > { %v7414_v25 = vpack.c.bf16 %v4421_v17, %v4421_v17  ;;  %v4422_v26 = vadd.f32 %v9053_v15, %v4105_v18  ;;  %v2854_v29 = vadd.f32 %v2853_v24, %v9038_v61  ;;  %v8314_v30 = vpop.f32.mrb[209].mxu1  ;;  %vm3163_vm15 = vcmp.ge.f32.partialorder %v2222_v22, 0.0  ;;  %v7999_v34 = vpop.f32.mrb[211].mxu0 }
 0x28e   : > { %v7572_v31 = vpack.c.bf16 %v4579_v21, %v4579_v21  ;;  %v3476_v32 = vmul.f32 0.01, %v2222_v22  ;;  %v2856_v35 = vpop.f32.mrb[210].mxu1  ;;  %v2225_v37 = vadd.f32 %v2224_v28, %v9038_v61  ;;  %v4580_v41 = vadd.f32 %v9053_v15, %v4263_v33 }
 0x28f   : > { %5988 = vst.msk [vmem:[%s9077_s6 + $0x198] sm:$0xf] %vm5885_vm7, %v7414_v25  ;;  %v7415_v36 = vpack.c.bf16 %v4422_v26, %v4422_v26  ;;  %vm3321_vm0 = vcmp.ge.f32.partialorder %v2854_v29, 0.0  ;;  %v3634_v38 = vmul.f32 0.01, %v2854_v29  ;;  %v8315_v39 = vpop.f32.mrb[211].mxu1  ;;  %v2857_v42 = vadd.f32 %v2856_v35, %v9038_v61 }
 0x290   : > { %6146 = vst.msk [vmem:[%s9077_s6 + $0x410] sm:$0xf] %vm5885_vm7, %v7572_v31  ;;  %v3789_v40 = vsel %vm3163_vm15, %v2222_v22, %v3476_v32  ;;  %vm3164_vm3 = vcmp.ge.f32.partialorder %v2225_v37, 0.0  ;;  %v3477_v44 = vmul.f32 0.01, %v2225_v37  ;;  %v7573_v46 = vpack.c.bf16 %v4580_v41, %v4580_v41 }
 0x291   : > { %5989 = vst.msk [vmem:[%s9077_s6 + $0x19c] sm:$0xf] %vm5885_vm7, %v7415_v36  ;;  %v4106_v43 = vmul.f32 %v9048_v6, %v3789_v40  ;;  %v3947_v45 = vsel %vm3321_vm0, %v2854_v29, %v3634_v38  ;;  %vm3322_vm4 = vcmp.ge.f32.partialorder %v2857_v42, 0.0  ;;  %v3635_v48 = vmul.f32 0.01, %v2857_v42 }
 0x292   : > { %v4264_v47 = vmul.f32 %v9048_v6, %v3947_v45  ;;  %v3790_v1 = vsel %vm3164_vm3, %v2225_v37, %v3477_v44  ;;  %v2229_v50 = vpop.f32.mrb[212].mxu0  ;;  %6147 = vst.msk [vmem:[%s9077_s6 + $0x414] sm:$0xf] %vm5885_vm7, %v7573_v46 }
 0x293   : > { %v4423_v49 = vadd.f32 %v9053_v15, %v4106_v43  ;;  %v4107_v51 = vmul.f32 %v9048_v6, %v3790_v1  ;;  %v2230_v53 = vadd.f32 %v2229_v50, %v9038_v61  ;;  %v3948_v54 = vsel %vm3322_vm4, %v2857_v42, %v3635_v48  ;;  %v8002_v55 = vpop.f32.mrb[213].mxu0 }
 0x294   : > { %v4581_v52 = vadd.f32 %v9053_v15, %v4264_v47  ;;  %v2861_v56 = vpop.f32.mrb[212].mxu1  ;;  %v4265_v58 = vmul.f32 %v9048_v6, %v3948_v54  ;;  %v2232_v59 = vpop.f32.mrb[214].mxu0 }
 0x295   : > { %v7416_v57 = vpack.c.bf16 %v4423_v49, %v4423_v49  ;;  %v2862_v60 = vadd.f32 %v2861_v56, %v9038_v61  ;;  %v8318_v62 = vpop.f32.mrb[213].mxu1  ;;  %v4424_v63 = vadd.f32 %v9053_v15, %v4107_v51  ;;  %vm3165_vm5 = vcmp.ge.f32.partialorder %v2230_v53, 0.0  ;;  %v8003_v3 = vpop.f32.mrb[215].mxu0 }
 0x296   : > { %v7574_v0 = vpack.c.bf16 %v4581_v52, %v4581_v52  ;;  %v3478_v2 = vmul.f32 0.01, %v2230_v53  ;;  %v2864_v4 = vpop.f32.mrb[214].mxu1  ;;  %v4582_v5 = vadd.f32 %v9053_v15, %v4265_v58  ;;  %v2233_v7 = vadd.f32 %v2232_v59, %v9038_v61 }
 0x297   : > { %5990 = vst.msk [vmem:[%s9077_s6 + $0x1a0] sm:$0xf] %vm5885_vm7, %v7416_v57  ;;  %vm3323_vm6 = vcmp.ge.f32.partialorder %v2862_v60, 0.0  ;;  %v3636_v8 = vmul.f32 0.01, %v2862_v60  ;;  %v8319_v9 = vpop.f32.mrb[215].mxu1  ;;  %v7417_v10 = vpack.c.bf16 %v4424_v63, %v4424_v63  ;;  %v2865_v12 = vadd.f32 %v2864_v4, %v9038_v61 }
 0x298   : > { %6148 = vst.msk [vmem:[%s9077_s6 + $0x418] sm:$0xf] %vm5885_vm7, %v7574_v0  ;;  %v3791_v11 = vsel %vm3165_vm5, %v2230_v53, %v3478_v2  ;;  %v7575_v14 = vpack.c.bf16 %v4582_v5, %v4582_v5  ;;  %vm3166_vm8 = vcmp.ge.f32.partialorder %v2233_v7, 0.0  ;;  %v3479_v16 = vmul.f32 0.01, %v2233_v7 }
 0x299   : > { %v4108_v13 = vmul.f32 %v9048_v6, %v3791_v11  ;;  %5991 = vst.msk [vmem:[%s9077_s6 + $0x1a4] sm:$0xf] %vm5885_vm7, %v7417_v10  ;;  %v3949_v17 = vsel %vm3323_vm6, %v2862_v60, %v3636_v8  ;;  %vm3324_vm9 = vcmp.ge.f32.partialorder %v2865_v12, 0.0  ;;  %v3637_v18 = vmul.f32 0.01, %v2865_v12 }
 0x29a   : > { %6149 = vst.msk [vmem:[%s9077_s6 + $0x41c] sm:$0xf] %vm5885_vm7, %v7575_v14  ;;  %v3792_v20 = vsel %vm3166_vm8, %v2233_v7, %v3479_v16  ;;  %v4266_v21 = vmul.f32 %v9048_v6, %v3949_v17  ;;  %v2237_v22 = vpop.f32.mrb[216].mxu0 }
 0x29b   : > { %v4425_v19 = vadd.f32 %v9053_v15, %v4108_v13  ;;  %v4109_v23 = vmul.f32 %v9048_v6, %v3792_v20  ;;  %v2238_v24 = vadd.f32 %v2237_v22, %v9038_v61  ;;  %v3950_v25 = vsel %vm3324_vm9, %v2865_v12, %v3637_v18  ;;  %v8006_v26 = vpop.f32.mrb[217].mxu0 }
 0x29c   : > { %v2869_v27 = vpop.f32.mrb[216].mxu1  ;;  %v4583_v29 = vadd.f32 %v9053_v15, %v4266_v21  ;;  %v4267_v30 = vmul.f32 %v9048_v6, %v3950_v25  ;;  %v2240_v31 = vpop.f32.mrb[218].mxu0 }
 0x29d   : > { %v7418_v28 = vpack.c.bf16 %v4425_v19, %v4425_v19  ;;  %v2870_v32 = vadd.f32 %v2869_v27, %v9038_v61  ;;  %v8322_v33 = vpop.f32.mrb[217].mxu1  ;;  %v4426_v34 = vadd.f32 %v9053_v15, %v4109_v23  ;;  %vm3167_vm10 = vcmp.ge.f32.partialorder %v2238_v24, 0.0  ;;  %v8007_v37 = vpop.f32.mrb[219].mxu0 }
 0x29e   : > { %v3480_v35 = vmul.f32 0.01, %v2238_v24  ;;  %v2241_v36 = vadd.f32 %v2240_v31, %v9038_v61  ;;  %v2872_v38 = vpop.f32.mrb[218].mxu1  ;;  %v7576_v39 = vpack.c.bf16 %v4583_v29, %v4583_v29  ;;  %v4584_v40 = vadd.f32 %v9053_v15, %v4267_v30 }
 0x29f   : > { %5992 = vst.msk [vmem:[%s9077_s6 + $0x1a8] sm:$0xf] %vm5885_vm7, %v7418_v28  ;;  %vm3325_vm11 = vcmp.ge.f32.partialorder %v2870_v32, 0.0  ;;  %v3638_v41 = vmul.f32 0.01, %v2870_v32  ;;  %v8323_v42 = vpop.f32.mrb[219].mxu1  ;;  %v7419_v43 = vpack.c.bf16 %v4426_v34, %v4426_v34  ;;  %v2873_v49 = vadd.f32 %v2872_v38, %v9038_v61 }
 0x2a0   : > { %v3793_v44 = vsel %vm3167_vm10, %v2238_v24, %v3480_v35  ;;  %vm3168_vm12 = vcmp.ge.f32.partialorder %v2241_v36, 0.0  ;;  %v3481_v45 = vmul.f32 0.01, %v2241_v36  ;;  %6150 = vst.msk [vmem:[%s9077_s6 + $0x420] sm:$0xf] %vm5885_vm7, %v7576_v39  ;;  %v7577_v47 = vpack.c.bf16 %v4584_v40, %v4584_v40 }
 0x2a1   : > { %v4110_v46 = vmul.f32 %v9048_v6, %v3793_v44  ;;  %v3951_v48 = vsel %vm3325_vm11, %v2870_v32, %v3638_v41  ;;  %5993 = vst.msk [vmem:[%s9077_s6 + $0x1ac] sm:$0xf] %vm5885_vm7, %v7419_v43  ;;  %vm3326_vm1 = vcmp.ge.f32.partialorder %v2873_v49, 0.0  ;;  %v3639_v54 = vmul.f32 0.01, %v2873_v49 }
 0x2a2   : > { %v3794_v1 = vsel %vm3168_vm12, %v2241_v36, %v3481_v45  ;;  %v4268_v50 = vmul.f32 %v9048_v6, %v3951_v48  ;;  %6151 = vst.msk [vmem:[%s9077_s6 + $0x424] sm:$0xf] %vm5885_vm7, %v7577_v47  ;;  %v2245_v53 = vpop.f32.mrb[220].mxu0 }
 0x2a3   : > { %v4427_v51 = vadd.f32 %v9053_v15, %v4110_v46  ;;  %v4111_v52 = vmul.f32 %v9048_v6, %v3794_v1  ;;  %v2246_v56 = vadd.f32 %v2245_v53, %v9038_v61  ;;  %v8010_v57 = vpop.f32.mrb[221].mxu0  ;;  %v3952_v62 = vsel %vm3326_vm1, %v2873_v49, %v3639_v54 }
 0x2a4   : > { %v4585_v55 = vadd.f32 %v9053_v15, %v4268_v50  ;;  %v2877_v58 = vpop.f32.mrb[220].mxu1  ;;  %v2248_v63 = vpop.f32.mrb[222].mxu0  ;;  %v4269_v5 = vmul.f32 %v9048_v6, %v3952_v62 }
 0x2a5   : > { %v7420_v59 = vpack.c.bf16 %v4427_v51, %v4427_v51  ;;  %v4428_v60 = vadd.f32 %v9053_v15, %v4111_v52  ;;  %v2878_v0 = vadd.f32 %v2877_v58, %v9038_v61  ;;  %v8326_v2 = vpop.f32.mrb[221].mxu1  ;;  %vm3169_vm13 = vcmp.ge.f32.partialorder %v2246_v56, 0.0  ;;  %v8011_v7 = vpop.f32.mrb[223].mxu0 }
 0x2a6   : > { %v7578_v3 = vpack.c.bf16 %v4585_v55, %v4585_v55  ;;  %v3482_v4 = vmul.f32 0.01, %v2246_v56  ;;  %v2880_v8 = vpop.f32.mrb[222].mxu1  ;;  %v2249_v10 = vadd.f32 %v2248_v63, %v9038_v61  ;;  %v4586_v14 = vadd.f32 %v9053_v15, %v4269_v5 }
 0x2a7   : > { %5994 = vst.msk [vmem:[%s9077_s6 + $0x1b0] sm:$0xf] %vm5885_vm7, %v7420_v59  ;;  %v7421_v9 = vpack.c.bf16 %v4428_v60, %v4428_v60  ;;  %vm3327_vm14 = vcmp.ge.f32.partialorder %v2878_v0, 0.0  ;;  %v3640_v11 = vmul.f32 0.01, %v2878_v0  ;;  %v8327_v12 = vpop.f32.mrb[223].mxu1  ;;  %v2881_v16 = vadd.f32 %v2880_v8, %v9038_v61 }
 0x2a8   : > { %6152 = vst.msk [vmem:[%s9077_s6 + $0x428] sm:$0xf] %vm5885_vm7, %v7578_v3  ;;  %v3795_v13 = vsel %vm3169_vm13, %v2246_v56, %v3482_v4  ;;  %vm3170_vm2 = vcmp.ge.f32.partialorder %v2249_v10, 0.0  ;;  %v3483_v18 = vmul.f32 0.01, %v2249_v10  ;;  %v7579_v20 = vpack.c.bf16 %v4586_v14, %v4586_v14 }
 0x2a9   : > { %5995 = vst.msk [vmem:[%s9077_s6 + $0x1b4] sm:$0xf] %vm5885_vm7, %v7421_v9  ;;  %v4112_v17 = vmul.f32 %v9048_v6, %v3795_v13  ;;  %v3953_v19 = vsel %vm3327_vm14, %v2878_v0, %v3640_v11  ;;  %vm3328_vm15 = vcmp.ge.f32.partialorder %v2881_v16, 0.0  ;;  %v3641_v22 = vmul.f32 0.01, %v2881_v16 }
 0x2aa   : > { %v4270_v21 = vmul.f32 %v9048_v6, %v3953_v19  ;;  %v3796_v24 = vsel %vm3170_vm2, %v2249_v10, %v3483_v18  ;;  %v2253_v25 = vpop.f32.mrb[224].mxu0  ;;  %6153 = vst.msk [vmem:[%s9077_s6 + $0x42c] sm:$0xf] %vm5885_vm7, %v7579_v20 }
 0x2ab   : > { %v4429_v23 = vadd.f32 %v9053_v15, %v4112_v17  ;;  %v4113_v26 = vmul.f32 %v9048_v6, %v3796_v24  ;;  %v2254_v28 = vadd.f32 %v2253_v25, %v9038_v61  ;;  %v3954_v29 = vsel %vm3328_vm15, %v2881_v16, %v3641_v22  ;;  %v8014_v30 = vpop.f32.mrb[225].mxu0 }
 0x2ac   : > { %v4587_v27 = vadd.f32 %v9053_v15, %v4270_v21  ;;  %v2885_v31 = vpop.f32.mrb[224].mxu1  ;;  %v4271_v33 = vmul.f32 %v9048_v6, %v3954_v29  ;;  %v2256_v34 = vpop.f32.mrb[226].mxu0 }
 0x2ad   : > { %v7422_v32 = vpack.c.bf16 %v4429_v23, %v4429_v23  ;;  %v2886_v35 = vadd.f32 %v2885_v31, %v9038_v61  ;;  %v8330_v36 = vpop.f32.mrb[225].mxu1  ;;  %v4430_v37 = vadd.f32 %v9053_v15, %v4113_v26  ;;  %vm3171_vm0 = vcmp.ge.f32.partialorder %v2254_v28, 0.0  ;;  %v8015_v40 = vpop.f32.mrb[227].mxu0 }
 0x2ae   : > { %v7580_v38 = vpack.c.bf16 %v4587_v27, %v4587_v27  ;;  %v3484_v39 = vmul.f32 0.01, %v2254_v28  ;;  %v2888_v41 = vpop.f32.mrb[226].mxu1  ;;  %v4588_v42 = vadd.f32 %v9053_v15, %v4271_v33  ;;  %v2257_v43 = vadd.f32 %v2256_v34, %v9038_v61 }
 0x2af   : > { %5996 = vst.msk [vmem:[%s9077_s6 + $0x1b8] sm:$0xf] %vm5885_vm7, %v7422_v32  ;;  %vm3329_vm3 = vcmp.ge.f32.partialorder %v2886_v35, 0.0  ;;  %v3642_v44 = vmul.f32 0.01, %v2886_v35  ;;  %v8331_v45 = vpop.f32.mrb[227].mxu1  ;;  %v7423_v46 = vpack.c.bf16 %v4430_v37, %v4430_v37  ;;  %v2889_v48 = vadd.f32 %v2888_v41, %v9038_v61 }
 0x2b0   : > { %6154 = vst.msk [vmem:[%s9077_s6 + $0x430] sm:$0xf] %vm5885_vm7, %v7580_v38  ;;  %v3797_v47 = vsel %vm3171_vm0, %v2254_v28, %v3484_v39  ;;  %v7581_v1 = vpack.c.bf16 %v4588_v42, %v4588_v42  ;;  %vm3172_vm4 = vcmp.ge.f32.partialorder %v2257_v43, 0.0  ;;  %v3485_v50 = vmul.f32 0.01, %v2257_v43 }
 0x2b1   : > { %v4114_v49 = vmul.f32 %v9048_v6, %v3797_v47  ;;  %5997 = vst.msk [vmem:[%s9077_s6 + $0x1bc] sm:$0xf] %vm5885_vm7, %v7423_v46  ;;  %v3955_v51 = vsel %vm3329_vm3, %v2886_v35, %v3642_v44  ;;  %vm3330_vm5 = vcmp.ge.f32.partialorder %v2889_v48, 0.0  ;;  %v3643_v52 = vmul.f32 0.01, %v2889_v48 }
 0x2b2   : > { %6155 = vst.msk [vmem:[%s9077_s6 + $0x434] sm:$0xf] %vm5885_vm7, %v7581_v1  ;;  %v3798_v54 = vsel %vm3172_vm4, %v2257_v43, %v3485_v50  ;;  %v4272_v55 = vmul.f32 %v9048_v6, %v3955_v51  ;;  %v2261_v56 = vpop.f32.mrb[228].mxu0 }
 0x2b3   : > { %v4431_v53 = vadd.f32 %v9053_v15, %v4114_v49  ;;  %v4115_v57 = vmul.f32 %v9048_v6, %v3798_v54  ;;  %v2262_v58 = vadd.f32 %v2261_v56, %v9038_v61  ;;  %v3956_v59 = vsel %vm3330_vm5, %v2889_v48, %v3643_v52  ;;  %v8018_v60 = vpop.f32.mrb[229].mxu0 }
 0x2b4   : > { %v2893_v62 = vpop.f32.mrb[228].mxu1  ;;  %v4589_v0 = vadd.f32 %v9053_v15, %v4272_v55  ;;  %v4273_v2 = vmul.f32 %v9048_v6, %v3956_v59  ;;  %v2264_v3 = vpop.f32.mrb[230].mxu0 }
 0x2b5   : > { %v7424_v63 = vpack.c.bf16 %v4431_v53, %v4431_v53  ;;  %v2894_v4 = vadd.f32 %v2893_v62, %v9038_v61  ;;  %v8334_v5 = vpop.f32.mrb[229].mxu1  ;;  %v4432_v7 = vadd.f32 %v9053_v15, %v4115_v57  ;;  %vm3173_vm6 = vcmp.ge.f32.partialorder %v2262_v58, 0.0  ;;  %v8019_v10 = vpop.f32.mrb[231].mxu0 }
 0x2b6   : > { %v3486_v8 = vmul.f32 0.01, %v2262_v58  ;;  %v2265_v9 = vadd.f32 %v2264_v3, %v9038_v61  ;;  %v2896_v11 = vpop.f32.mrb[230].mxu1  ;;  %v7582_v12 = vpack.c.bf16 %v4589_v0, %v4589_v0  ;;  %v4590_v13 = vadd.f32 %v9053_v15, %v4273_v2 }
 0x2b7   : > { %5998 = vst.msk [vmem:[%s9077_s6 + $0x1c0] sm:$0xf] %vm5885_vm7, %v7424_v63  ;;  %vm3331_vm8 = vcmp.ge.f32.partialorder %v2894_v4, 0.0  ;;  %v3644_v14 = vmul.f32 0.01, %v2894_v4  ;;  %v8335_v16 = vpop.f32.mrb[231].mxu1  ;;  %v7425_v17 = vpack.c.bf16 %v4432_v7, %v4432_v7  ;;  %v2897_v23 = vadd.f32 %v2896_v11, %v9038_v61 }
 0x2b8   : > { %v3799_v18 = vsel %vm3173_vm6, %v2262_v58, %v3486_v8  ;;  %vm3174_vm9 = vcmp.ge.f32.partialorder %v2265_v9, 0.0  ;;  %v3487_v19 = vmul.f32 0.01, %v2265_v9  ;;  %6156 = vst.msk [vmem:[%s9077_s6 + $0x438] sm:$0xf] %vm5885_vm7, %v7582_v12  ;;  %v7583_v21 = vpack.c.bf16 %v4590_v13, %v4590_v13 }
 0x2b9   : > { %v4116_v20 = vmul.f32 %v9048_v6, %v3799_v18  ;;  %v3957_v22 = vsel %vm3331_vm8, %v2894_v4, %v3644_v14  ;;  %5999 = vst.msk [vmem:[%s9077_s6 + $0x1c4] sm:$0xf] %vm5885_vm7, %v7425_v17  ;;  %vm3332_vm10 = vcmp.ge.f32.partialorder %v2897_v23, 0.0  ;;  %v3645_v29 = vmul.f32 0.01, %v2897_v23 }
 0x2ba   : > { %v3800_v24 = vsel %vm3174_vm9, %v2265_v9, %v3487_v19  ;;  %v4274_v25 = vmul.f32 %v9048_v6, %v3957_v22  ;;  %6157 = vst.msk [vmem:[%s9077_s6 + $0x43c] sm:$0xf] %vm5885_vm7, %v7583_v21  ;;  %v2269_v28 = vpop.f32.mrb[232].mxu0 }
 0x2bb   : > { %v4433_v26 = vadd.f32 %v9053_v15, %v4116_v20  ;;  %v4117_v27 = vmul.f32 %v9048_v6, %v3800_v24  ;;  %v2270_v31 = vadd.f32 %v2269_v28, %v9038_v61  ;;  %v8022_v32 = vpop.f32.mrb[233].mxu0  ;;  %v3958_v36 = vsel %vm3332_vm10, %v2897_v23, %v3645_v29 }
 0x2bc   : > { %v4591_v30 = vadd.f32 %v9053_v15, %v4274_v25  ;;  %v2901_v33 = vpop.f32.mrb[232].mxu1  ;;  %v2272_v37 = vpop.f32.mrb[234].mxu0  ;;  %v4275_v42 = vmul.f32 %v9048_v6, %v3958_v36 }
 0x2bd   : > { %v7426_v34 = vpack.c.bf16 %v4433_v26, %v4433_v26  ;;  %v4434_v35 = vadd.f32 %v9053_v15, %v4117_v27  ;;  %v2902_v38 = vadd.f32 %v2901_v33, %v9038_v61  ;;  %v8338_v39 = vpop.f32.mrb[233].mxu1  ;;  %vm3175_vm11 = vcmp.ge.f32.partialorder %v2270_v31, 0.0  ;;  %v8023_v43 = vpop.f32.mrb[235].mxu0 }
 0x2be   : > { %v7584_v40 = vpack.c.bf16 %v4591_v30, %v4591_v30  ;;  %v3488_v41 = vmul.f32 0.01, %v2270_v31  ;;  %v2904_v44 = vpop.f32.mrb[234].mxu1  ;;  %v2273_v46 = vadd.f32 %v2272_v37, %v9038_v61  ;;  %v4592_v1 = vadd.f32 %v9053_v15, %v4275_v42 }
 0x2bf   : > { %6000 = vst.msk [vmem:[%s9077_s6 + $0x1c8] sm:$0xf] %vm5885_vm7, %v7426_v34  ;;  %v7427_v45 = vpack.c.bf16 %v4434_v35, %v4434_v35  ;;  %vm3333_vm12 = vcmp.ge.f32.partialorder %v2902_v38, 0.0  ;;  %v3646_v47 = vmul.f32 0.01, %v2902_v38  ;;  %v8339_v48 = vpop.f32.mrb[235].mxu1  ;;  %v2905_v50 = vadd.f32 %v2904_v44, %v9038_v61 }
 0x2c0   : > { %6158 = vst.msk [vmem:[%s9077_s6 + $0x440] sm:$0xf] %vm5885_vm7, %v7584_v40  ;;  %v3801_v49 = vsel %vm3175_vm11, %v2270_v31, %v3488_v41  ;;  %vm3176_vm1 = vcmp.ge.f32.partialorder %v2273_v46, 0.0  ;;  %v3489_v52 = vmul.f32 0.01, %v2273_v46  ;;  %v7585_v54 = vpack.c.bf16 %v4592_v1, %v4592_v1 }
 0x2c1   : > { %6001 = vst.msk [vmem:[%s9077_s6 + $0x1cc] sm:$0xf] %vm5885_vm7, %v7427_v45  ;;  %v4118_v51 = vmul.f32 %v9048_v6, %v3801_v49  ;;  %v3959_v53 = vsel %vm3333_vm12, %v2902_v38, %v3646_v47  ;;  %vm3334_vm13 = vcmp.ge.f32.partialorder %v2905_v50, 0.0  ;;  %v3647_v56 = vmul.f32 0.01, %v2905_v50 }
 0x2c2   : > { %v4276_v55 = vmul.f32 %v9048_v6, %v3959_v53  ;;  %v3802_v58 = vsel %vm3176_vm1, %v2273_v46, %v3489_v52  ;;  %v2277_v59 = vpop.f32.mrb[236].mxu0  ;;  %6159 = vst.msk [vmem:[%s9077_s6 + $0x444] sm:$0xf] %vm5885_vm7, %v7585_v54 }
 0x2c3   : > { %v4435_v57 = vadd.f32 %v9053_v15, %v4118_v51  ;;  %v4119_v60 = vmul.f32 %v9048_v6, %v3802_v58  ;;  %v2278_v63 = vadd.f32 %v2277_v59, %v9038_v61  ;;  %v3960_v0 = vsel %vm3334_vm13, %v2905_v50, %v3647_v56  ;;  %v8026_v2 = vpop.f32.mrb[237].mxu0 }
 0x2c4   : > { %v4593_v62 = vadd.f32 %v9053_v15, %v4276_v55  ;;  %v2909_v3 = vpop.f32.mrb[236].mxu1  ;;  %v4277_v5 = vmul.f32 %v9048_v6, %v3960_v0  ;;  %v2280_v7 = vpop.f32.mrb[238].mxu0 }
 0x2c5   : > { %v7428_v4 = vpack.c.bf16 %v4435_v57, %v4435_v57  ;;  %v2910_v8 = vadd.f32 %v2909_v3, %v9038_v61  ;;  %v8342_v9 = vpop.f32.mrb[237].mxu1  ;;  %v4436_v10 = vadd.f32 %v9053_v15, %v4119_v60  ;;  %vm3177_vm14 = vcmp.ge.f32.partialorder %v2278_v63, 0.0  ;;  %v8027_v13 = vpop.f32.mrb[239].mxu0 }
 0x2c6   : > { %v7586_v11 = vpack.c.bf16 %v4593_v62, %v4593_v62  ;;  %v3490_v12 = vmul.f32 0.01, %v2278_v63  ;;  %v2912_v14 = vpop.f32.mrb[238].mxu1  ;;  %v4594_v16 = vadd.f32 %v9053_v15, %v4277_v5  ;;  %v2281_v17 = vadd.f32 %v2280_v7, %v9038_v61 }
 0x2c7   : > { %6002 = vst.msk [vmem:[%s9077_s6 + $0x1d0] sm:$0xf] %vm5885_vm7, %v7428_v4  ;;  %vm3335_vm2 = vcmp.ge.f32.partialorder %v2910_v8, 0.0  ;;  %v3648_v18 = vmul.f32 0.01, %v2910_v8  ;;  %v8343_v19 = vpop.f32.mrb[239].mxu1  ;;  %v7429_v20 = vpack.c.bf16 %v4436_v10, %v4436_v10  ;;  %v2913_v22 = vadd.f32 %v2912_v14, %v9038_v61 }
 0x2c8   : > { %6160 = vst.msk [vmem:[%s9077_s6 + $0x448] sm:$0xf] %vm5885_vm7, %v7586_v11  ;;  %v3803_v21 = vsel %vm3177_vm14, %v2278_v63, %v3490_v12  ;;  %v7587_v24 = vpack.c.bf16 %v4594_v16, %v4594_v16  ;;  %vm3178_vm15 = vcmp.ge.f32.partialorder %v2281_v17, 0.0  ;;  %v3491_v25 = vmul.f32 0.01, %v2281_v17 }
 0x2c9   : > { %v4120_v23 = vmul.f32 %v9048_v6, %v3803_v21  ;;  %6003 = vst.msk [vmem:[%s9077_s6 + $0x1d4] sm:$0xf] %vm5885_vm7, %v7429_v20  ;;  %v3961_v26 = vsel %vm3335_vm2, %v2910_v8, %v3648_v18  ;;  %vm3336_vm0 = vcmp.ge.f32.partialorder %v2913_v22, 0.0  ;;  %v3649_v27 = vmul.f32 0.01, %v2913_v22 }
 0x2ca   : > { %6161 = vst.msk [vmem:[%s9077_s6 + $0x44c] sm:$0xf] %vm5885_vm7, %v7587_v24  ;;  %v3804_v29 = vsel %vm3178_vm15, %v2281_v17, %v3491_v25  ;;  %v4278_v30 = vmul.f32 %v9048_v6, %v3961_v26  ;;  %v2285_v31 = vpop.f32.mrb[240].mxu0 }
 0x2cb   : > { %v4437_v28 = vadd.f32 %v9053_v15, %v4120_v23  ;;  %v4121_v32 = vmul.f32 %v9048_v6, %v3804_v29  ;;  %v2286_v33 = vadd.f32 %v2285_v31, %v9038_v61  ;;  %v3962_v34 = vsel %vm3336_vm0, %v2913_v22, %v3649_v27  ;;  %v8030_v35 = vpop.f32.mrb[241].mxu0 }
 0x2cc   : > { %v2917_v36 = vpop.f32.mrb[240].mxu1  ;;  %v4595_v38 = vadd.f32 %v9053_v15, %v4278_v30  ;;  %v4279_v39 = vmul.f32 %v9048_v6, %v3962_v34  ;;  %v2288_v40 = vpop.f32.mrb[242].mxu0 }
 0x2cd   : > { %v7430_v37 = vpack.c.bf16 %v4437_v28, %v4437_v28  ;;  %v2918_v41 = vadd.f32 %v2917_v36, %v9038_v61  ;;  %v8346_v42 = vpop.f32.mrb[241].mxu1  ;;  %v4438_v43 = vadd.f32 %v9053_v15, %v4121_v32  ;;  %vm3179_vm3 = vcmp.ge.f32.partialorder %v2286_v33, 0.0  ;;  %v8031_v46 = vpop.f32.mrb[243].mxu0 }
 0x2ce   : > { %v3492_v44 = vmul.f32 0.01, %v2286_v33  ;;  %v2289_v45 = vadd.f32 %v2288_v40, %v9038_v61  ;;  %v2920_v47 = vpop.f32.mrb[242].mxu1  ;;  %v7588_v48 = vpack.c.bf16 %v4595_v38, %v4595_v38  ;;  %v4596_v49 = vadd.f32 %v9053_v15, %v4279_v39 }
 0x2cf   : > { %6004 = vst.msk [vmem:[%s9077_s6 + $0x1d8] sm:$0xf] %vm5885_vm7, %v7430_v37  ;;  %vm3337_vm4 = vcmp.ge.f32.partialorder %v2918_v41, 0.0  ;;  %v3650_v1 = vmul.f32 0.01, %v2918_v41  ;;  %v8347_v50 = vpop.f32.mrb[243].mxu1  ;;  %v7431_v51 = vpack.c.bf16 %v4438_v43, %v4438_v43  ;;  %v2921_v57 = vadd.f32 %v2920_v47, %v9038_v61 }
 0x2d0   : > { %v3805_v52 = vsel %vm3179_vm3, %v2286_v33, %v3492_v44  ;;  %vm3180_vm5 = vcmp.ge.f32.partialorder %v2289_v45, 0.0  ;;  %v3493_v53 = vmul.f32 0.01, %v2289_v45  ;;  %6162 = vst.msk [vmem:[%s9077_s6 + $0x450] sm:$0xf] %vm5885_vm7, %v7588_v48  ;;  %v7589_v55 = vpack.c.bf16 %v4596_v49, %v4596_v49 }
 0x2d1   : > { %v4122_v54 = vmul.f32 %v9048_v6, %v3805_v52  ;;  %v3963_v56 = vsel %vm3337_vm4, %v2918_v41, %v3650_v1  ;;  %6005 = vst.msk [vmem:[%s9077_s6 + $0x1dc] sm:$0xf] %vm5885_vm7, %v7431_v51  ;;  %vm3338_vm6 = vcmp.ge.f32.partialorder %v2921_v57, 0.0  ;;  %v3651_v0 = vmul.f32 0.01, %v2921_v57 }
 0x2d2   : > { %v3806_v58 = vsel %vm3180_vm5, %v2289_v45, %v3493_v53  ;;  %v4280_v59 = vmul.f32 %v9048_v6, %v3963_v56  ;;  %6163 = vst.msk [vmem:[%s9077_s6 + $0x454] sm:$0xf] %vm5885_vm7, %v7589_v55  ;;  %v2293_v63 = vpop.f32.mrb[244].mxu0 }
 0x2d3   : > { %v4439_v60 = vadd.f32 %v9053_v15, %v4122_v54  ;;  %v4123_v62 = vmul.f32 %v9048_v6, %v3806_v58  ;;  %v2294_v3 = vadd.f32 %v2293_v63, %v9038_v61  ;;  %v8034_v4 = vpop.f32.mrb[245].mxu0  ;;  %v3964_v9 = vsel %vm3338_vm6, %v2921_v57, %v3651_v0 }
 0x2d4   : > { %v4597_v2 = vadd.f32 %v9053_v15, %v4280_v59  ;;  %v2925_v5 = vpop.f32.mrb[244].mxu1  ;;  %v2296_v10 = vpop.f32.mrb[246].mxu0  ;;  %v4281_v16 = vmul.f32 %v9048_v6, %v3964_v9 }
 0x2d5   : > { %v7432_v7 = vpack.c.bf16 %v4439_v60, %v4439_v60  ;;  %v4440_v8 = vadd.f32 %v9053_v15, %v4123_v62  ;;  %v2926_v11 = vadd.f32 %v2925_v5, %v9038_v61  ;;  %v8350_v12 = vpop.f32.mrb[245].mxu1  ;;  %vm3181_vm8 = vcmp.ge.f32.partialorder %v2294_v3, 0.0  ;;  %v8035_v17 = vpop.f32.mrb[247].mxu0 }
 0x2d6   : > { %v7590_v13 = vpack.c.bf16 %v4597_v2, %v4597_v2  ;;  %v3494_v14 = vmul.f32 0.01, %v2294_v3  ;;  %v2928_v18 = vpop.f32.mrb[246].mxu1  ;;  %v2297_v20 = vadd.f32 %v2296_v10, %v9038_v61  ;;  %v4598_v24 = vadd.f32 %v9053_v15, %v4281_v16 }
 0x2d7   : > { %6006 = vst.msk [vmem:[%s9077_s6 + $0x1e0] sm:$0xf] %vm5885_vm7, %v7432_v7  ;;  %v7433_v19 = vpack.c.bf16 %v4440_v8, %v4440_v8  ;;  %vm3339_vm9 = vcmp.ge.f32.partialorder %v2926_v11, 0.0  ;;  %v3652_v21 = vmul.f32 0.01, %v2926_v11  ;;  %v8351_v22 = vpop.f32.mrb[247].mxu1  ;;  %v2929_v25 = vadd.f32 %v2928_v18, %v9038_v61 }
 0x2d8   : > { %6164 = vst.msk [vmem:[%s9077_s6 + $0x458] sm:$0xf] %vm5885_vm7, %v7590_v13  ;;  %v3807_v23 = vsel %vm3181_vm8, %v2294_v3, %v3494_v14  ;;  %vm3182_vm10 = vcmp.ge.f32.partialorder %v2297_v20, 0.0  ;;  %v3495_v27 = vmul.f32 0.01, %v2297_v20  ;;  %v7591_v29 = vpack.c.bf16 %v4598_v24, %v4598_v24 }
 0x2d9   : > { %6007 = vst.msk [vmem:[%s9077_s6 + $0x1e4] sm:$0xf] %vm5885_vm7, %v7433_v19  ;;  %v4124_v26 = vmul.f32 %v9048_v6, %v3807_v23  ;;  %v3965_v28 = vsel %vm3339_vm9, %v2926_v11, %v3652_v21  ;;  %vm3340_vm11 = vcmp.ge.f32.partialorder %v2929_v25, 0.0  ;;  %v3653_v31 = vmul.f32 0.01, %v2929_v25 }
 0x2da   : > { %v4282_v30 = vmul.f32 %v9048_v6, %v3965_v28  ;;  %v3808_v33 = vsel %vm3182_vm10, %v2297_v20, %v3495_v27  ;;  %v2301_v34 = vpop.f32.mrb[248].mxu0  ;;  %6165 = vst.msk [vmem:[%s9077_s6 + $0x45c] sm:$0xf] %vm5885_vm7, %v7591_v29 }
 0x2db   : > { %v4441_v32 = vadd.f32 %v9053_v15, %v4124_v26  ;;  %v4125_v35 = vmul.f32 %v9048_v6, %v3808_v33  ;;  %v2302_v37 = vadd.f32 %v2301_v34, %v9038_v61  ;;  %v3966_v38 = vsel %vm3340_vm11, %v2929_v25, %v3653_v31  ;;  %v8038_v39 = vpop.f32.mrb[249].mxu0 }
 0x2dc   : > { %v4599_v36 = vadd.f32 %v9053_v15, %v4282_v30  ;;  %v2933_v40 = vpop.f32.mrb[248].mxu1  ;;  %v4283_v42 = vmul.f32 %v9048_v6, %v3966_v38  ;;  %v2304_v43 = vpop.f32.mrb[250].mxu0 }
 0x2dd   : > { %v7434_v41 = vpack.c.bf16 %v4441_v32, %v4441_v32  ;;  %v2934_v44 = vadd.f32 %v2933_v40, %v9038_v61  ;;  %v8354_v45 = vpop.f32.mrb[249].mxu1  ;;  %v4442_v46 = vadd.f32 %v9053_v15, %v4125_v35  ;;  %vm3183_vm12 = vcmp.ge.f32.partialorder %v2302_v37, 0.0  ;;  %v8039_v49 = vpop.f32.mrb[251].mxu0 }
 0x2de   : > { %v7592_v47 = vpack.c.bf16 %v4599_v36, %v4599_v36  ;;  %v3496_v48 = vmul.f32 0.01, %v2302_v37  ;;  %v2936_v1 = vpop.f32.mrb[250].mxu1  ;;  %v4600_v50 = vadd.f32 %v9053_v15, %v4283_v42  ;;  %v2305_v51 = vadd.f32 %v2304_v43, %v9038_v61 }
 0x2df   : > { %6008 = vst.msk [vmem:[%s9077_s6 + $0x1e8] sm:$0xf] %vm5885_vm7, %v7434_v41  ;;  %vm3341_vm1 = vcmp.ge.f32.partialorder %v2934_v44, 0.0  ;;  %v3654_v52 = vmul.f32 0.01, %v2934_v44  ;;  %v8355_v53 = vpop.f32.mrb[251].mxu1  ;;  %v7435_v54 = vpack.c.bf16 %v4442_v46, %v4442_v46  ;;  %v2937_v56 = vadd.f32 %v2936_v1, %v9038_v61 }
 0x2e0   : > { %6166 = vst.msk [vmem:[%s9077_s6 + $0x460] sm:$0xf] %vm5885_vm7, %v7592_v47  ;;  %v3809_v55 = vsel %vm3183_vm12, %v2302_v37, %v3496_v48  ;;  %v7593_v58 = vpack.c.bf16 %v4600_v50, %v4600_v50  ;;  %vm3184_vm13 = vcmp.ge.f32.partialorder %v2305_v51, 0.0  ;;  %v3497_v59 = vmul.f32 0.01, %v2305_v51 }
 0x2e1   : > { %v4126_v57 = vmul.f32 %v9048_v6, %v3809_v55  ;;  %6009 = vst.msk [vmem:[%s9077_s6 + $0x1ec] sm:$0xf] %vm5885_vm7, %v7435_v54  ;;  %v3967_v60 = vsel %vm3341_vm1, %v2934_v44, %v3654_v52  ;;  %vm3342_vm14 = vcmp.ge.f32.partialorder %v2937_v56, 0.0  ;;  %v3655_v62 = vmul.f32 0.01, %v2937_v56 }
 0x2e2   : > { %6167 = vst.msk [vmem:[%s9077_s6 + $0x464] sm:$0xf] %vm5885_vm7, %v7593_v58  ;;  %v3810_v0 = vsel %vm3184_vm13, %v2305_v51, %v3497_v59  ;;  %v4284_v2 = vmul.f32 %v9048_v6, %v3967_v60  ;;  %v2309_v3 = vpop.f32.mrb[252].mxu0 }
 0x2e3   : > { %v4443_v63 = vadd.f32 %v9053_v15, %v4126_v57  ;;  %v4127_v4 = vmul.f32 %v9048_v6, %v3810_v0  ;;  %v2310_v5 = vadd.f32 %v2309_v3, %v9038_v61  ;;  %v3968_v7 = vsel %vm3342_vm14, %v2937_v56, %v3655_v62  ;;  %v8042_v8 = vpop.f32.mrb[253].mxu0 }
 0x2e4   : > { %v2941_v9 = vpop.f32.mrb[252].mxu1  ;;  %v4601_v11 = vadd.f32 %v9053_v15, %v4284_v2  ;;  %v4285_v12 = vmul.f32 %v9048_v6, %v3968_v7  ;;  %v2312_v13 = vpop.f32.mrb[254].mxu0 }
 0x2e5   : > { %v7436_v10 = vpack.c.bf16 %v4443_v63, %v4443_v63  ;;  %v2942_v14 = vadd.f32 %v2941_v9, %v9038_v61  ;;  %v8358_v16 = vpop.f32.mrb[253].mxu1  ;;  %v4444_v17 = vadd.f32 %v9053_v15, %v4127_v4  ;;  %vm3185_vm2 = vcmp.ge.f32.partialorder %v2310_v5, 0.0  ;;  %v8043_v20 = vpop.f32.mrb[255].mxu0 }
 0x2e6   : > { %v3498_v18 = vmul.f32 0.01, %v2310_v5  ;;  %v2313_v19 = vadd.f32 %v2312_v13, %v9038_v61  ;;  %v2944_v21 = vpop.f32.mrb[254].mxu1  ;;  %v7594_v22 = vpack.c.bf16 %v4601_v11, %v4601_v11  ;;  %v4602_v23 = vadd.f32 %v9053_v15, %v4285_v12 }
 0x2e7   : > { %6010 = vst.msk [vmem:[%s9077_s6 + $0x1f0] sm:$0xf] %vm5885_vm7, %v7436_v10  ;;  %vm3343_vm15 = vcmp.ge.f32.partialorder %v2942_v14, 0.0  ;;  %v3656_v24 = vmul.f32 0.01, %v2942_v14  ;;  %v8359_v25 = vpop.f32.mrb[255].mxu1  ;;  %v7437_v26 = vpack.c.bf16 %v4444_v17, %v4444_v17  ;;  %v2945_v32 = vadd.f32 %v2944_v21, %v9038_v61 }
 0x2e8   : > { %v3811_v27 = vsel %vm3185_vm2, %v2310_v5, %v3498_v18  ;;  %vm3186_vm0 = vcmp.ge.f32.partialorder %v2313_v19, 0.0  ;;  %v3499_v28 = vmul.f32 0.01, %v2313_v19  ;;  %6168 = vst.msk [vmem:[%s9077_s6 + $0x468] sm:$0xf] %vm5885_vm7, %v7594_v22  ;;  %v7595_v30 = vpack.c.bf16 %v4602_v23, %v4602_v23 }
 0x2e9   : > { %v4128_v29 = vmul.f32 %v9048_v6, %v3811_v27  ;;  %v3969_v31 = vsel %vm3343_vm15, %v2942_v14, %v3656_v24  ;;  %6011 = vst.msk [vmem:[%s9077_s6 + $0x1f4] sm:$0xf] %vm5885_vm7, %v7437_v26  ;;  %vm3344_vm3 = vcmp.ge.f32.partialorder %v2945_v32, 0.0  ;;  %v3657_v38 = vmul.f32 0.01, %v2945_v32 }
 0x2ea   : > { %v3812_v33 = vsel %vm3186_vm0, %v2313_v19, %v3499_v28  ;;  %v4286_v34 = vmul.f32 %v9048_v6, %v3969_v31  ;;  %6169 = vst.msk [vmem:[%s9077_s6 + $0x46c] sm:$0xf] %vm5885_vm7, %v7595_v30  ;;  %v2317_v37 = vpop.f32.mrb[0].mxu0 }
 0x2eb   : > { %v4445_v35 = vadd.f32 %v9053_v15, %v4128_v29  ;;  %v4129_v36 = vmul.f32 %v9048_v6, %v3812_v33  ;;  %v2318_v40 = vadd.f32 %v2317_v37, %v9038_v61  ;;  %v8046_v41 = vpop.f32.mrb[1].mxu0  ;;  %v3970_v45 = vsel %vm3344_vm3, %v2945_v32, %v3657_v38 }
 0x2ec   : > { %v4603_v39 = vadd.f32 %v9053_v15, %v4286_v34  ;;  %v2949_v42 = vpop.f32.mrb[0].mxu1  ;;  %v2320_v46 = vpop.f32.mrb[2].mxu0  ;;  %v4287_v50 = vmul.f32 %v9048_v6, %v3970_v45 }
 0x2ed   : > { %v7438_v43 = vpack.c.bf16 %v4445_v35, %v4445_v35  ;;  %v4446_v44 = vadd.f32 %v9053_v15, %v4129_v36  ;;  %v2950_v47 = vadd.f32 %v2949_v42, %v9038_v61  ;;  %v8362_v48 = vpop.f32.mrb[1].mxu1  ;;  %vm3187_vm4 = vcmp.ge.f32.partialorder %v2318_v40, 0.0  ;;  %v8047_v51 = vpop.f32.mrb[3].mxu0 }
 0x2ee   : > { %v7596_v49 = vpack.c.bf16 %v4603_v39, %v4603_v39  ;;  %v3500_v1 = vmul.f32 0.01, %v2318_v40  ;;  %v2952_v52 = vpop.f32.mrb[2].mxu1  ;;  %v2321_v54 = vadd.f32 %v2320_v46, %v9038_v61  ;;  %v4604_v58 = vadd.f32 %v9053_v15, %v4287_v50 }
 0x2ef   : > { %6012 = vst.msk [vmem:[%s9077_s6 + $0x1f8] sm:$0xf] %vm5885_vm7, %v7438_v43  ;;  %v7439_v53 = vpack.c.bf16 %v4446_v44, %v4446_v44  ;;  %vm3345_vm5 = vcmp.ge.f32.partialorder %v2950_v47, 0.0  ;;  %v3658_v55 = vmul.f32 0.01, %v2950_v47  ;;  %v8363_v56 = vpop.f32.mrb[3].mxu1  ;;  %v2953_v59 = vadd.f32 %v2952_v52, %v9038_v61 }
 0x2f0   : > { %6170 = vst.msk [vmem:[%s9077_s6 + $0x470] sm:$0xf] %vm5885_vm7, %v7596_v49  ;;  %v3813_v57 = vsel %vm3187_vm4, %v2318_v40, %v3500_v1  ;;  %vm3188_vm6 = vcmp.ge.f32.partialorder %v2321_v54, 0.0  ;;  %v3501_v62 = vmul.f32 0.01, %v2321_v54  ;;  %v7597_v0 = vpack.c.bf16 %v4604_v58, %v4604_v58 }
 0x2f1   : > { %6013 = vst.msk [vmem:[%s9077_s6 + $0x1fc] sm:$0xf] %vm5885_vm7, %v7439_v53  ;;  %v4130_v60 = vmul.f32 %v9048_v6, %v3813_v57  ;;  %v3971_v63 = vsel %vm3345_vm5, %v2950_v47, %v3658_v55  ;;  %vm3346_vm8 = vcmp.ge.f32.partialorder %v2953_v59, 0.0  ;;  %v3659_v3 = vmul.f32 0.01, %v2953_v59 }
 0x2f2   : > { %v4288_v2 = vmul.f32 %v9048_v6, %v3971_v63  ;;  %v3814_v5 = vsel %vm3188_vm6, %v2321_v54, %v3501_v62  ;;  %v2325_v7 = vpop.f32.mrb[4].mxu0  ;;  %6171 = vst.msk [vmem:[%s9077_s6 + $0x474] sm:$0xf] %vm5885_vm7, %v7597_v0 }
 0x2f3   : > { %v4447_v4 = vadd.f32 %v9053_v15, %v4130_v60  ;;  %v4131_v8 = vmul.f32 %v9048_v6, %v3814_v5  ;;  %v2326_v10 = vadd.f32 %v2325_v7, %v9038_v61  ;;  %v3972_v11 = vsel %vm3346_vm8, %v2953_v59, %v3659_v3  ;;  %v8050_v12 = vpop.f32.mrb[5].mxu0 }
 0x2f4   : > { %v4605_v9 = vadd.f32 %v9053_v15, %v4288_v2  ;;  %v2957_v13 = vpop.f32.mrb[4].mxu1  ;;  %v4289_v16 = vmul.f32 %v9048_v6, %v3972_v11  ;;  %v2328_v17 = vpop.f32.mrb[6].mxu0 }
 0x2f5   : > { %v7440_v14 = vpack.c.bf16 %v4447_v4, %v4447_v4  ;;  %v2958_v18 = vadd.f32 %v2957_v13, %v9038_v61  ;;  %v8366_v19 = vpop.f32.mrb[5].mxu1  ;;  %v4448_v20 = vadd.f32 %v9053_v15, %v4131_v8  ;;  %vm3189_vm9 = vcmp.ge.f32.partialorder %v2326_v10, 0.0  ;;  %v8051_v23 = vpop.f32.mrb[7].mxu0 }
 0x2f6   : > { %v7598_v21 = vpack.c.bf16 %v4605_v9, %v4605_v9  ;;  %v3502_v22 = vmul.f32 0.01, %v2326_v10  ;;  %v2960_v24 = vpop.f32.mrb[6].mxu1  ;;  %v4606_v25 = vadd.f32 %v9053_v15, %v4289_v16  ;;  %v2329_v26 = vadd.f32 %v2328_v17, %v9038_v61 }
 0x2f7   : > { %6014 = vst.msk [vmem:[%s9077_s6 + $0x200] sm:$0xf] %vm5885_vm7, %v7440_v14  ;;  %vm3347_vm10 = vcmp.ge.f32.partialorder %v2958_v18, 0.0  ;;  %v3660_v27 = vmul.f32 0.01, %v2958_v18  ;;  %v8367_v28 = vpop.f32.mrb[7].mxu1  ;;  %v7441_v29 = vpack.c.bf16 %v4448_v20, %v4448_v20  ;;  %v2961_v31 = vadd.f32 %v2960_v24, %v9038_v61 }
 0x2f8   : > { %6172 = vst.msk [vmem:[%s9077_s6 + $0x478] sm:$0xf] %vm5885_vm7, %v7598_v21  ;;  %v3815_v30 = vsel %vm3189_vm9, %v2326_v10, %v3502_v22  ;;  %v7599_v33 = vpack.c.bf16 %v4606_v25, %v4606_v25  ;;  %vm3190_vm11 = vcmp.ge.f32.partialorder %v2329_v26, 0.0  ;;  %v3503_v34 = vmul.f32 0.01, %v2329_v26 }
 0x2f9   : > { %v4132_v32 = vmul.f32 %v9048_v6, %v3815_v30  ;;  %6015 = vst.msk [vmem:[%s9077_s6 + $0x204] sm:$0xf] %vm5885_vm7, %v7441_v29  ;;  %v3973_v35 = vsel %vm3347_vm10, %v2958_v18, %v3660_v27  ;;  %vm3348_vm12 = vcmp.ge.f32.partialorder %v2961_v31, 0.0  ;;  %v3661_v36 = vmul.f32 0.01, %v2961_v31 }
 0x2fa   : > { %6173 = vst.msk [vmem:[%s9077_s6 + $0x47c] sm:$0xf] %vm5885_vm7, %v7599_v33  ;;  %v3816_v38 = vsel %vm3190_vm11, %v2329_v26, %v3503_v34  ;;  %v4290_v39 = vmul.f32 %v9048_v6, %v3973_v35  ;;  %v2333_v40 = vpop.f32.mrb[8].mxu0 }
 0x2fb   : > { %v4449_v37 = vadd.f32 %v9053_v15, %v4132_v32  ;;  %v4133_v41 = vmul.f32 %v9048_v6, %v3816_v38  ;;  %v2334_v42 = vadd.f32 %v2333_v40, %v9038_v61  ;;  %v3974_v43 = vsel %vm3348_vm12, %v2961_v31, %v3661_v36  ;;  %v8054_v44 = vpop.f32.mrb[9].mxu0 }
 0x2fc   : > { %v2965_v45 = vpop.f32.mrb[8].mxu1  ;;  %v4607_v47 = vadd.f32 %v9053_v15, %v4290_v39  ;;  %v4291_v48 = vmul.f32 %v9048_v6, %v3974_v43  ;;  %v2336_v49 = vpop.f32.mrb[10].mxu0 }
 0x2fd   : > { %v7442_v46 = vpack.c.bf16 %v4449_v37, %v4449_v37  ;;  %v2966_v1 = vadd.f32 %v2965_v45, %v9038_v61  ;;  %v8370_v50 = vpop.f32.mrb[9].mxu1  ;;  %v4450_v51 = vadd.f32 %v9053_v15, %v4133_v41  ;;  %vm3191_vm1 = vcmp.ge.f32.partialorder %v2334_v42, 0.0  ;;  %v8055_v54 = vpop.f32.mrb[11].mxu0 }
 0x2fe   : > { %v3504_v52 = vmul.f32 0.01, %v2334_v42  ;;  %v2337_v53 = vadd.f32 %v2336_v49, %v9038_v61  ;;  %v2968_v55 = vpop.f32.mrb[10].mxu1  ;;  %v7600_v56 = vpack.c.bf16 %v4607_v47, %v4607_v47  ;;  %v4608_v57 = vadd.f32 %v9053_v15, %v4291_v48 }
 0x2ff   : > { %6016 = vst.msk [vmem:[%s9077_s6 + $0x208] sm:$0xf] %vm5885_vm7, %v7442_v46  ;;  %vm3349_vm13 = vcmp.ge.f32.partialorder %v2966_v1, 0.0  ;;  %v3662_v58 = vmul.f32 0.01, %v2966_v1  ;;  %v8371_v59 = vpop.f32.mrb[11].mxu1  ;;  %v7443_v60 = vpack.c.bf16 %v4450_v51, %v4450_v51  ;;  %v2969_v4 = vadd.f32 %v2968_v55, %v9038_v61 }
 0x300   : > { %v3817_v62 = vsel %vm3191_vm1, %v2334_v42, %v3504_v52  ;;  %vm3192_vm14 = vcmp.ge.f32.partialorder %v2337_v53, 0.0  ;;  %v3505_v63 = vmul.f32 0.01, %v2337_v53  ;;  %6174 = vst.msk [vmem:[%s9077_s6 + $0x480] sm:$0xf] %vm5885_vm7, %v7600_v56  ;;  %v7601_v2 = vpack.c.bf16 %v4608_v57, %v4608_v57 }
 0x301   : > { %v4134_v0 = vmul.f32 %v9048_v6, %v3817_v62  ;;  %v3975_v3 = vsel %vm3349_vm13, %v2966_v1, %v3662_v58  ;;  %6017 = vst.msk [vmem:[%s9077_s6 + $0x20c] sm:$0xf] %vm5885_vm7, %v7443_v60  ;;  %vm3350_vm2 = vcmp.ge.f32.partialorder %v2969_v4, 0.0  ;;  %v3663_v11 = vmul.f32 0.01, %v2969_v4 }
 0x302   : > { %v3818_v5 = vsel %vm3192_vm14, %v2337_v53, %v3505_v63  ;;  %v4292_v7 = vmul.f32 %v9048_v6, %v3975_v3  ;;  %6175 = vst.msk [vmem:[%s9077_s6 + $0x484] sm:$0xf] %vm5885_vm7, %v7601_v2  ;;  %v2341_v10 = vpop.f32.mrb[12].mxu0 }
 0x303   : > { %v4451_v8 = vadd.f32 %v9053_v15, %v4134_v0  ;;  %v4135_v9 = vmul.f32 %v9048_v6, %v3818_v5  ;;  %v2342_v13 = vadd.f32 %v2341_v10, %v9038_v61  ;;  %v8058_v14 = vpop.f32.mrb[13].mxu0  ;;  %v3976_v19 = vsel %vm3350_vm2, %v2969_v4, %v3663_v11 }
 0x304   : > { %v4609_v12 = vadd.f32 %v9053_v15, %v4292_v7  ;;  %v2973_v16 = vpop.f32.mrb[12].mxu1  ;;  %v2344_v20 = vpop.f32.mrb[14].mxu0  ;;  %v4293_v25 = vmul.f32 %v9048_v6, %v3976_v19 }
 0x305   : > { %v7444_v17 = vpack.c.bf16 %v4451_v8, %v4451_v8  ;;  %v4452_v18 = vadd.f32 %v9053_v15, %v4135_v9  ;;  %v2974_v21 = vadd.f32 %v2973_v16, %v9038_v61  ;;  %v8374_v22 = vpop.f32.mrb[13].mxu1  ;;  %vm3193_vm15 = vcmp.ge.f32.partialorder %v2342_v13, 0.0  ;;  %v8059_v26 = vpop.f32.mrb[15].mxu0 }
 0x306   : > { %v7602_v23 = vpack.c.bf16 %v4609_v12, %v4609_v12  ;;  %v3506_v24 = vmul.f32 0.01, %v2342_v13  ;;  %v2976_v27 = vpop.f32.mrb[14].mxu1  ;;  %v2345_v29 = vadd.f32 %v2344_v20, %v9038_v61  ;;  %v4610_v33 = vadd.f32 %v9053_v15, %v4293_v25 }
 0x307   : > { %6018 = vst.msk [vmem:[%s9077_s6 + $0x210] sm:$0xf] %vm5885_vm7, %v7444_v17  ;;  %v7445_v28 = vpack.c.bf16 %v4452_v18, %v4452_v18  ;;  %vm3351_vm0 = vcmp.ge.f32.partialorder %v2974_v21, 0.0  ;;  %v3664_v30 = vmul.f32 0.01, %v2974_v21  ;;  %v8375_v31 = vpop.f32.mrb[15].mxu1  ;;  %v2977_v34 = vadd.f32 %v2976_v27, %v9038_v61 }
 0x308   : > { %6176 = vst.msk [vmem:[%s9077_s6 + $0x488] sm:$0xf] %vm5885_vm7, %v7602_v23  ;;  %v3819_v32 = vsel %vm3193_vm15, %v2342_v13, %v3506_v24  ;;  %vm3194_vm3 = vcmp.ge.f32.partialorder %v2345_v29, 0.0  ;;  %v3507_v36 = vmul.f32 0.01, %v2345_v29  ;;  %v7603_v38 = vpack.c.bf16 %v4610_v33, %v4610_v33 }
 0x309   : > { %6019 = vst.msk [vmem:[%s9077_s6 + $0x214] sm:$0xf] %vm5885_vm7, %v7445_v28  ;;  %v4136_v35 = vmul.f32 %v9048_v6, %v3819_v32  ;;  %v3977_v37 = vsel %vm3351_vm0, %v2974_v21, %v3664_v30  ;;  %vm3352_vm4 = vcmp.ge.f32.partialorder %v2977_v34, 0.0  ;;  %v3665_v40 = vmul.f32 0.01, %v2977_v34 }
 0x30a   : > { %v4294_v39 = vmul.f32 %v9048_v6, %v3977_v37  ;;  %v3820_v42 = vsel %vm3194_vm3, %v2345_v29, %v3507_v36  ;;  %v2349_v43 = vpop.f32.mrb[16].mxu0  ;;  %6177 = vst.msk [vmem:[%s9077_s6 + $0x48c] sm:$0xf] %vm5885_vm7, %v7603_v38 }
 0x30b   : > { %v4453_v41 = vadd.f32 %v9053_v15, %v4136_v35  ;;  %v4137_v44 = vmul.f32 %v9048_v6, %v3820_v42  ;;  %v2350_v46 = vadd.f32 %v2349_v43, %v9038_v61  ;;  %v3978_v47 = vsel %vm3352_vm4, %v2977_v34, %v3665_v40  ;;  %v8062_v48 = vpop.f32.mrb[17].mxu0 }
 0x30c   : > { %v4611_v45 = vadd.f32 %v9053_v15, %v4294_v39  ;;  %v2981_v49 = vpop.f32.mrb[16].mxu1  ;;  %v4295_v50 = vmul.f32 %v9048_v6, %v3978_v47  ;;  %v2352_v51 = vpop.f32.mrb[18].mxu0 }
 0x30d   : > { %v7446_v1 = vpack.c.bf16 %v4453_v41, %v4453_v41  ;;  %v2982_v52 = vadd.f32 %v2981_v49, %v9038_v61  ;;  %v8378_v53 = vpop.f32.mrb[17].mxu1  ;;  %v4454_v54 = vadd.f32 %v9053_v15, %v4137_v44  ;;  %vm3195_vm5 = vcmp.ge.f32.partialorder %v2350_v46, 0.0  ;;  %v8063_v57 = vpop.f32.mrb[19].mxu0 }
 0x30e   : > { %v7604_v55 = vpack.c.bf16 %v4611_v45, %v4611_v45  ;;  %v3508_v56 = vmul.f32 0.01, %v2350_v46  ;;  %v2984_v58 = vpop.f32.mrb[18].mxu1  ;;  %v4612_v59 = vadd.f32 %v9053_v15, %v4295_v50  ;;  %v2353_v60 = vadd.f32 %v2352_v51, %v9038_v61 }
 0x30f   : > { %6020 = vst.msk [vmem:[%s9077_s6 + $0x218] sm:$0xf] %vm5885_vm7, %v7446_v1  ;;  %vm3353_vm6 = vcmp.ge.f32.partialorder %v2982_v52, 0.0  ;;  %v3666_v62 = vmul.f32 0.01, %v2982_v52  ;;  %v8379_v63 = vpop.f32.mrb[19].mxu1  ;;  %v7447_v0 = vpack.c.bf16 %v4454_v54, %v4454_v54  ;;  %v2985_v3 = vadd.f32 %v2984_v58, %v9038_v61 }
 0x310   : > { %6178 = vst.msk [vmem:[%s9077_s6 + $0x490] sm:$0xf] %vm5885_vm7, %v7604_v55  ;;  %v3821_v2 = vsel %vm3195_vm5, %v2350_v46, %v3508_v56  ;;  %v7605_v5 = vpack.c.bf16 %v4612_v59, %v4612_v59  ;;  %vm3196_vm8 = vcmp.ge.f32.partialorder %v2353_v60, 0.0  ;;  %v3509_v7 = vmul.f32 0.01, %v2353_v60 }
 0x311   : > { %v4138_v4 = vmul.f32 %v9048_v6, %v3821_v2  ;;  %6021 = vst.msk [vmem:[%s9077_s6 + $0x21c] sm:$0xf] %vm5885_vm7, %v7447_v0  ;;  %v3979_v8 = vsel %vm3353_vm6, %v2982_v52, %v3666_v62  ;;  %vm3354_vm9 = vcmp.ge.f32.partialorder %v2985_v3, 0.0  ;;  %v3667_v9 = vmul.f32 0.01, %v2985_v3 }
 0x312   : > { %6179 = vst.msk [vmem:[%s9077_s6 + $0x494] sm:$0xf] %vm5885_vm7, %v7605_v5  ;;  %v3822_v11 = vsel %vm3196_vm8, %v2353_v60, %v3509_v7  ;;  %v4296_v12 = vmul.f32 %v9048_v6, %v3979_v8  ;;  %v2357_v13 = vpop.f32.mrb[20].mxu0 }
 0x313   : > { %v4455_v10 = vadd.f32 %v9053_v15, %v4138_v4  ;;  %v4139_v14 = vmul.f32 %v9048_v6, %v3822_v11  ;;  %v2358_v16 = vadd.f32 %v2357_v13, %v9038_v61  ;;  %v3980_v17 = vsel %vm3354_vm9, %v2985_v3, %v3667_v9  ;;  %v8066_v18 = vpop.f32.mrb[21].mxu0 }
 0x314   : > { %v2989_v19 = vpop.f32.mrb[20].mxu1  ;;  %v4613_v21 = vadd.f32 %v9053_v15, %v4296_v12  ;;  %v4297_v22 = vmul.f32 %v9048_v6, %v3980_v17  ;;  %v2360_v23 = vpop.f32.mrb[22].mxu0 }
 0x315   : > { %v7448_v20 = vpack.c.bf16 %v4455_v10, %v4455_v10  ;;  %v2990_v24 = vadd.f32 %v2989_v19, %v9038_v61  ;;  %v8382_v25 = vpop.f32.mrb[21].mxu1  ;;  %v4456_v26 = vadd.f32 %v9053_v15, %v4139_v14  ;;  %vm3197_vm10 = vcmp.ge.f32.partialorder %v2358_v16, 0.0  ;;  %v8067_v29 = vpop.f32.mrb[23].mxu0 }
 0x316   : > { %v3510_v27 = vmul.f32 0.01, %v2358_v16  ;;  %v2361_v28 = vadd.f32 %v2360_v23, %v9038_v61  ;;  %v2992_v30 = vpop.f32.mrb[22].mxu1  ;;  %v7606_v31 = vpack.c.bf16 %v4613_v21, %v4613_v21  ;;  %v4614_v32 = vadd.f32 %v9053_v15, %v4297_v22 }
 0x317   : > { %6022 = vst.msk [vmem:[%s9077_s6 + $0x220] sm:$0xf] %vm5885_vm7, %v7448_v20  ;;  %vm3355_vm11 = vcmp.ge.f32.partialorder %v2990_v24, 0.0  ;;  %v3668_v33 = vmul.f32 0.01, %v2990_v24  ;;  %v8383_v34 = vpop.f32.mrb[23].mxu1  ;;  %v7449_v35 = vpack.c.bf16 %v4456_v26, %v4456_v26  ;;  %v2993_v41 = vadd.f32 %v2992_v30, %v9038_v61 }
 0x318   : > { %v3823_v36 = vsel %vm3197_vm10, %v2358_v16, %v3510_v27  ;;  %vm3198_vm12 = vcmp.ge.f32.partialorder %v2361_v28, 0.0  ;;  %v3511_v37 = vmul.f32 0.01, %v2361_v28  ;;  %6180 = vst.msk [vmem:[%s9077_s6 + $0x498] sm:$0xf] %vm5885_vm7, %v7606_v31  ;;  %v7607_v39 = vpack.c.bf16 %v4614_v32, %v4614_v32 }
 0x319   : > { %v4140_v38 = vmul.f32 %v9048_v6, %v3823_v36  ;;  %v3981_v40 = vsel %vm3355_vm11, %v2990_v24, %v3668_v33  ;;  %6023 = vst.msk [vmem:[%s9077_s6 + $0x224] sm:$0xf] %vm5885_vm7, %v7449_v35  ;;  %vm3356_vm1 = vcmp.ge.f32.partialorder %v2993_v41, 0.0  ;;  %v3669_v47 = vmul.f32 0.01, %v2993_v41 }
 0x31a   : > { %v3824_v42 = vsel %vm3198_vm12, %v2361_v28, %v3511_v37  ;;  %v4298_v43 = vmul.f32 %v9048_v6, %v3981_v40  ;;  %6181 = vst.msk [vmem:[%s9077_s6 + $0x49c] sm:$0xf] %vm5885_vm7, %v7607_v39  ;;  %v2365_v46 = vpop.f32.mrb[24].mxu0 }
 0x31b   : > { %v4457_v44 = vadd.f32 %v9053_v15, %v4140_v38  ;;  %v4141_v45 = vmul.f32 %v9048_v6, %v3824_v42  ;;  %v2366_v49 = vadd.f32 %v2365_v46, %v9038_v61  ;;  %v8070_v1 = vpop.f32.mrb[25].mxu0  ;;  %v3982_v53 = vsel %vm3356_vm1, %v2993_v41, %v3669_v47 }
 0x31c   : > { %v4615_v48 = vadd.f32 %v9053_v15, %v4298_v43  ;;  %v2997_v50 = vpop.f32.mrb[24].mxu1  ;;  %v2368_v54 = vpop.f32.mrb[26].mxu0  ;;  %v4299_v59 = vmul.f32 %v9048_v6, %v3982_v53 }
 0x31d   : > { %v7450_v51 = vpack.c.bf16 %v4457_v44, %v4457_v44  ;;  %v4458_v52 = vadd.f32 %v9053_v15, %v4141_v45  ;;  %v2998_v55 = vadd.f32 %v2997_v50, %v9038_v61  ;;  %v8386_v56 = vpop.f32.mrb[25].mxu1  ;;  %vm3199_vm13 = vcmp.ge.f32.partialorder %v2366_v49, 0.0  ;;  %v8071_v60 = vpop.f32.mrb[27].mxu0 }
 0x31e   : > { %v7608_v57 = vpack.c.bf16 %v4615_v48, %v4615_v48  ;;  %v3512_v58 = vmul.f32 0.01, %v2366_v49  ;;  %v3000_v62 = vpop.f32.mrb[26].mxu1  ;;  %v2369_v0 = vadd.f32 %v2368_v54, %v9038_v61  ;;  %v4616_v5 = vadd.f32 %v9053_v15, %v4299_v59 }
 0x31f   : > { %6024 = vst.msk [vmem:[%s9077_s6 + $0x228] sm:$0xf] %vm5885_vm7, %v7450_v51  ;;  %v7451_v63 = vpack.c.bf16 %v4458_v52, %v4458_v52  ;;  %vm3357_vm14 = vcmp.ge.f32.partialorder %v2998_v55, 0.0  ;;  %v3670_v2 = vmul.f32 0.01, %v2998_v55  ;;  %v8387_v3 = vpop.f32.mrb[27].mxu1  ;;  %v3001_v7 = vadd.f32 %v3000_v62, %v9038_v61 }
 0x320   : > { %6182 = vst.msk [vmem:[%s9077_s6 + $0x4a0] sm:$0xf] %vm5885_vm7, %v7608_v57  ;;  %v3825_v4 = vsel %vm3199_vm13, %v2366_v49, %v3512_v58  ;;  %vm3200_vm2 = vcmp.ge.f32.partialorder %v2369_v0, 0.0  ;;  %v3513_v9 = vmul.f32 0.01, %v2369_v0  ;;  %v7609_v11 = vpack.c.bf16 %v4616_v5, %v4616_v5 }
 0x321   : > { %6025 = vst.msk [vmem:[%s9077_s6 + $0x22c] sm:$0xf] %vm5885_vm7, %v7451_v63  ;;  %v4142_v8 = vmul.f32 %v9048_v6, %v3825_v4  ;;  %v3983_v10 = vsel %vm3357_vm14, %v2998_v55, %v3670_v2  ;;  %vm3358_vm15 = vcmp.ge.f32.partialorder %v3001_v7, 0.0  ;;  %v3671_v13 = vmul.f32 0.01, %v3001_v7 }
 0x322   : > { %v4300_v12 = vmul.f32 %v9048_v6, %v3983_v10  ;;  %v3826_v16 = vsel %vm3200_vm2, %v2369_v0, %v3513_v9  ;;  %v2373_v17 = vpop.f32.mrb[28].mxu0  ;;  %6183 = vst.msk [vmem:[%s9077_s6 + $0x4a4] sm:$0xf] %vm5885_vm7, %v7609_v11 }
 0x323   : > { %v4459_v14 = vadd.f32 %v9053_v15, %v4142_v8  ;;  %v4143_v18 = vmul.f32 %v9048_v6, %v3826_v16  ;;  %v2374_v20 = vadd.f32 %v2373_v17, %v9038_v61  ;;  %v3984_v21 = vsel %vm3358_vm15, %v3001_v7, %v3671_v13  ;;  %v8074_v22 = vpop.f32.mrb[29].mxu0 }
 0x324   : > { %v4617_v19 = vadd.f32 %v9053_v15, %v4300_v12  ;;  %v3005_v23 = vpop.f32.mrb[28].mxu1  ;;  %v4301_v25 = vmul.f32 %v9048_v6, %v3984_v21  ;;  %v2376_v26 = vpop.f32.mrb[30].mxu0 }
 0x325   : > { %v7452_v24 = vpack.c.bf16 %v4459_v14, %v4459_v14  ;;  %v3006_v27 = vadd.f32 %v3005_v23, %v9038_v61  ;;  %v8390_v28 = vpop.f32.mrb[29].mxu1  ;;  %v4460_v29 = vadd.f32 %v9053_v15, %v4143_v18  ;;  %vm3201_vm0 = vcmp.ge.f32.partialorder %v2374_v20, 0.0  ;;  %v8075_v32 = vpop.f32.mrb[31].mxu0 }
 0x326   : > { %v7610_v30 = vpack.c.bf16 %v4617_v19, %v4617_v19  ;;  %v3514_v31 = vmul.f32 0.01, %v2374_v20  ;;  %v3008_v33 = vpop.f32.mrb[30].mxu1  ;;  %v4618_v34 = vadd.f32 %v9053_v15, %v4301_v25  ;;  %v2377_v35 = vadd.f32 %v2376_v26, %v9038_v61 }
 0x327   : > { %6026 = vst.msk [vmem:[%s9077_s6 + $0x230] sm:$0xf] %vm5885_vm7, %v7452_v24  ;;  %vm3359_vm3 = vcmp.ge.f32.partialorder %v3006_v27, 0.0  ;;  %v3672_v36 = vmul.f32 0.01, %v3006_v27  ;;  %v8391_v37 = vpop.f32.mrb[31].mxu1  ;;  %v7453_v38 = vpack.c.bf16 %v4460_v29, %v4460_v29  ;;  %v3009_v40 = vadd.f32 %v3008_v33, %v9038_v61 }
 0x328   : > { %6184 = vst.msk [vmem:[%s9077_s6 + $0x4a8] sm:$0xf] %vm5885_vm7, %v7610_v30  ;;  %v3827_v39 = vsel %vm3201_vm0, %v2374_v20, %v3514_v31  ;;  %v7611_v42 = vpack.c.bf16 %v4618_v34, %v4618_v34  ;;  %vm3202_vm4 = vcmp.ge.f32.partialorder %v2377_v35, 0.0  ;;  %v3515_v43 = vmul.f32 0.01, %v2377_v35 }
 0x329   : > { %v4144_v41 = vmul.f32 %v9048_v6, %v3827_v39  ;;  %6027 = vst.msk [vmem:[%s9077_s6 + $0x234] sm:$0xf] %vm5885_vm7, %v7453_v38  ;;  %v3985_v44 = vsel %vm3359_vm3, %v3006_v27, %v3672_v36  ;;  %vm3360_vm5 = vcmp.ge.f32.partialorder %v3009_v40, 0.0  ;;  %v3673_v45 = vmul.f32 0.01, %v3009_v40 }
 0x32a   : > { %6185 = vst.msk [vmem:[%s9077_s6 + $0x4ac] sm:$0xf] %vm5885_vm7, %v7611_v42  ;;  %v3828_v47 = vsel %vm3202_vm4, %v2377_v35, %v3515_v43  ;;  %v4302_v48 = vmul.f32 %v9048_v6, %v3985_v44  ;;  %v2381_v49 = vpop.f32.mrb[32].mxu0 }
 0x32b   : > { %v4461_v46 = vadd.f32 %v9053_v15, %v4144_v41  ;;  %v4145_v1 = vmul.f32 %v9048_v6, %v3828_v47  ;;  %v2382_v50 = vadd.f32 %v2381_v49, %v9038_v61  ;;  %v3986_v51 = vsel %vm3360_vm5, %v3009_v40, %v3673_v45  ;;  %v8078_v52 = vpop.f32.mrb[33].mxu0 }
 0x32c   : > { %v3013_v53 = vpop.f32.mrb[32].mxu1  ;;  %v4619_v55 = vadd.f32 %v9053_v15, %v4302_v48  ;;  %v4303_v56 = vmul.f32 %v9048_v6, %v3986_v51  ;;  %v2384_v57 = vpop.f32.mrb[34].mxu0 }
 0x32d   : > { %v7454_v54 = vpack.c.bf16 %v4461_v46, %v4461_v46  ;;  %v3014_v58 = vadd.f32 %v3013_v53, %v9038_v61  ;;  %v8394_v59 = vpop.f32.mrb[33].mxu1  ;;  %v4462_v60 = vadd.f32 %v9053_v15, %v4145_v1  ;;  %vm3203_vm6 = vcmp.ge.f32.partialorder %v2382_v50, 0.0  ;;  %v8079_v0 = vpop.f32.mrb[35].mxu0 }
 0x32e   : > { %v3516_v62 = vmul.f32 0.01, %v2382_v50  ;;  %v2385_v63 = vadd.f32 %v2384_v57, %v9038_v61  ;;  %v3016_v2 = vpop.f32.mrb[34].mxu1  ;;  %v7612_v3 = vpack.c.bf16 %v4619_v55, %v4619_v55  ;;  %v4620_v4 = vadd.f32 %v9053_v15, %v4303_v56 }
 0x32f   : > { %6028 = vst.msk [vmem:[%s9077_s6 + $0x238] sm:$0xf] %vm5885_vm7, %v7454_v54  ;;  %vm3361_vm8 = vcmp.ge.f32.partialorder %v3014_v58, 0.0  ;;  %v3674_v5 = vmul.f32 0.01, %v3014_v58  ;;  %v8395_v7 = vpop.f32.mrb[35].mxu1  ;;  %v7455_v8 = vpack.c.bf16 %v4462_v60, %v4462_v60  ;;  %v3017_v14 = vadd.f32 %v3016_v2, %v9038_v61 }
 0x330   : > { %v3829_v9 = vsel %vm3203_vm6, %v2382_v50, %v3516_v62  ;;  %vm3204_vm9 = vcmp.ge.f32.partialorder %v2385_v63, 0.0  ;;  %v3517_v10 = vmul.f32 0.01, %v2385_v63  ;;  %6186 = vst.msk [vmem:[%s9077_s6 + $0x4b0] sm:$0xf] %vm5885_vm7, %v7612_v3  ;;  %v7613_v12 = vpack.c.bf16 %v4620_v4, %v4620_v4 }
 0x331   : > { %v4146_v11 = vmul.f32 %v9048_v6, %v3829_v9  ;;  %v3987_v13 = vsel %vm3361_vm8, %v3014_v58, %v3674_v5  ;;  %6029 = vst.msk [vmem:[%s9077_s6 + $0x23c] sm:$0xf] %vm5885_vm7, %v7455_v8  ;;  %vm3362_vm10 = vcmp.ge.f32.partialorder %v3017_v14, 0.0  ;;  %v3675_v21 = vmul.f32 0.01, %v3017_v14 }
 0x332   : > { %v3830_v16 = vsel %vm3204_vm9, %v2385_v63, %v3517_v10  ;;  %v4304_v17 = vmul.f32 %v9048_v6, %v3987_v13  ;;  %6187 = vst.msk [vmem:[%s9077_s6 + $0x4b4] sm:$0xf] %vm5885_vm7, %v7613_v12  ;;  %v2389_v20 = vpop.f32.mrb[36].mxu0 }
 0x333   : > { %v4463_v18 = vadd.f32 %v9053_v15, %v4146_v11  ;;  %v4147_v19 = vmul.f32 %v9048_v6, %v3830_v16  ;;  %v2390_v23 = vadd.f32 %v2389_v20, %v9038_v61  ;;  %v8082_v24 = vpop.f32.mrb[37].mxu0  ;;  %v3988_v28 = vsel %vm3362_vm10, %v3017_v14, %v3675_v21 }
 0x334   : > { %v4621_v22 = vadd.f32 %v9053_v15, %v4304_v17  ;;  %v3021_v25 = vpop.f32.mrb[36].mxu1  ;;  %v2392_v29 = vpop.f32.mrb[38].mxu0  ;;  %v4305_v34 = vmul.f32 %v9048_v6, %v3988_v28 }
 0x335   : > { %v7456_v26 = vpack.c.bf16 %v4463_v18, %v4463_v18  ;;  %v4464_v27 = vadd.f32 %v9053_v15, %v4147_v19  ;;  %v3022_v30 = vadd.f32 %v3021_v25, %v9038_v61  ;;  %v8398_v31 = vpop.f32.mrb[37].mxu1  ;;  %vm3205_vm11 = vcmp.ge.f32.partialorder %v2390_v23, 0.0  ;;  %v8083_v35 = vpop.f32.mrb[39].mxu0 }
 0x336   : > { %v7614_v32 = vpack.c.bf16 %v4621_v22, %v4621_v22  ;;  %v3518_v33 = vmul.f32 0.01, %v2390_v23  ;;  %v3024_v36 = vpop.f32.mrb[38].mxu1  ;;  %v2393_v38 = vadd.f32 %v2392_v29, %v9038_v61  ;;  %v4622_v42 = vadd.f32 %v9053_v15, %v4305_v34 }
 0x337   : > { %6030 = vst.msk [vmem:[%s9077_s6 + $0x240] sm:$0xf] %vm5885_vm7, %v7456_v26  ;;  %v7457_v37 = vpack.c.bf16 %v4464_v27, %v4464_v27  ;;  %vm3363_vm12 = vcmp.ge.f32.partialorder %v3022_v30, 0.0  ;;  %v3676_v39 = vmul.f32 0.01, %v3022_v30  ;;  %v8399_v40 = vpop.f32.mrb[39].mxu1  ;;  %v3025_v43 = vadd.f32 %v3024_v36, %v9038_v61 }
 0x338   : > { %6188 = vst.msk [vmem:[%s9077_s6 + $0x4b8] sm:$0xf] %vm5885_vm7, %v7614_v32  ;;  %v3831_v41 = vsel %vm3205_vm11, %v2390_v23, %v3518_v33  ;;  %vm3206_vm1 = vcmp.ge.f32.partialorder %v2393_v38, 0.0  ;;  %v3519_v45 = vmul.f32 0.01, %v2393_v38  ;;  %v7615_v47 = vpack.c.bf16 %v4622_v42, %v4622_v42 }
 0x339   : > { %6031 = vst.msk [vmem:[%s9077_s6 + $0x244] sm:$0xf] %vm5885_vm7, %v7457_v37  ;;  %v4148_v44 = vmul.f32 %v9048_v6, %v3831_v41  ;;  %v3989_v46 = vsel %vm3363_vm12, %v3022_v30, %v3676_v39  ;;  %vm3364_vm13 = vcmp.ge.f32.partialorder %v3025_v43, 0.0  ;;  %v3677_v49 = vmul.f32 0.01, %v3025_v43 }
 0x33a   : > { %v4306_v48 = vmul.f32 %v9048_v6, %v3989_v46  ;;  %v3832_v50 = vsel %vm3206_vm1, %v2393_v38, %v3519_v45  ;;  %v2397_v51 = vpop.f32.mrb[40].mxu0  ;;  %6189 = vst.msk [vmem:[%s9077_s6 + $0x4bc] sm:$0xf] %vm5885_vm7, %v7615_v47 }
 0x33b   : > { %v4465_v1 = vadd.f32 %v9053_v15, %v4148_v44  ;;  %v4149_v52 = vmul.f32 %v9048_v6, %v3832_v50  ;;  %v2398_v54 = vadd.f32 %v2397_v51, %v9038_v61  ;;  %v3990_v55 = vsel %vm3364_vm13, %v3025_v43, %v3677_v49  ;;  %v8086_v56 = vpop.f32.mrb[41].mxu0 }
 0x33c   : > { %v4623_v53 = vadd.f32 %v9053_v15, %v4306_v48  ;;  %v3029_v57 = vpop.f32.mrb[40].mxu1  ;;  %v4307_v59 = vmul.f32 %v9048_v6, %v3990_v55  ;;  %v2400_v60 = vpop.f32.mrb[42].mxu0 }
 0x33d   : > { %v7458_v58 = vpack.c.bf16 %v4465_v1, %v4465_v1  ;;  %v3030_v62 = vadd.f32 %v3029_v57, %v9038_v61  ;;  %v8402_v63 = vpop.f32.mrb[41].mxu1  ;;  %v4466_v0 = vadd.f32 %v9053_v15, %v4149_v52  ;;  %vm3207_vm14 = vcmp.ge.f32.partialorder %v2398_v54, 0.0  ;;  %v8087_v4 = vpop.f32.mrb[43].mxu0 }
 0x33e   : > { %v7616_v2 = vpack.c.bf16 %v4623_v53, %v4623_v53  ;;  %v3520_v3 = vmul.f32 0.01, %v2398_v54  ;;  %v3032_v5 = vpop.f32.mrb[42].mxu1  ;;  %v4624_v7 = vadd.f32 %v9053_v15, %v4307_v59  ;;  %v2401_v8 = vadd.f32 %v2400_v60, %v9038_v61 }
 0x33f   : > { %6032 = vst.msk [vmem:[%s9077_s6 + $0x248] sm:$0xf] %vm5885_vm7, %v7458_v58  ;;  %vm3365_vm2 = vcmp.ge.f32.partialorder %v3030_v62, 0.0  ;;  %v3678_v9 = vmul.f32 0.01, %v3030_v62  ;;  %v8403_v10 = vpop.f32.mrb[43].mxu1  ;;  %v7459_v11 = vpack.c.bf16 %v4466_v0, %v4466_v0  ;;  %v3033_v13 = vadd.f32 %v3032_v5, %v9038_v61 }
 0x340   : > { %6190 = vst.msk [vmem:[%s9077_s6 + $0x4c0] sm:$0xf] %vm5885_vm7, %v7616_v2  ;;  %v3833_v12 = vsel %vm3207_vm14, %v2398_v54, %v3520_v3  ;;  %v7617_v16 = vpack.c.bf16 %v4624_v7, %v4624_v7  ;;  %vm3208_vm15 = vcmp.ge.f32.partialorder %v2401_v8, 0.0  ;;  %v3521_v17 = vmul.f32 0.01, %v2401_v8 }
 0x341   : > { %v4150_v14 = vmul.f32 %v9048_v6, %v3833_v12  ;;  %6033 = vst.msk [vmem:[%s9077_s6 + $0x24c] sm:$0xf] %vm5885_vm7, %v7459_v11  ;;  %v3991_v18 = vsel %vm3365_vm2, %v3030_v62, %v3678_v9  ;;  %vm3366_vm0 = vcmp.ge.f32.partialorder %v3033_v13, 0.0  ;;  %v3679_v19 = vmul.f32 0.01, %v3033_v13 }
 0x342   : > { %6191 = vst.msk [vmem:[%s9077_s6 + $0x4c4] sm:$0xf] %vm5885_vm7, %v7617_v16  ;;  %v3834_v21 = vsel %vm3208_vm15, %v2401_v8, %v3521_v17  ;;  %v4308_v22 = vmul.f32 %v9048_v6, %v3991_v18  ;;  %v2405_v23 = vpop.f32.mrb[44].mxu0 }
 0x343   : > { %v4467_v20 = vadd.f32 %v9053_v15, %v4150_v14  ;;  %v4151_v24 = vmul.f32 %v9048_v6, %v3834_v21  ;;  %v2406_v25 = vadd.f32 %v2405_v23, %v9038_v61  ;;  %v3992_v26 = vsel %vm3366_vm0, %v3033_v13, %v3679_v19  ;;  %v8090_v27 = vpop.f32.mrb[45].mxu0 }
 0x344   : > { %v3037_v28 = vpop.f32.mrb[44].mxu1  ;;  %v4625_v30 = vadd.f32 %v9053_v15, %v4308_v22  ;;  %v4309_v31 = vmul.f32 %v9048_v6, %v3992_v26  ;;  %v2408_v32 = vpop.f32.mrb[46].mxu0 }
 0x345   : > { %v7460_v29 = vpack.c.bf16 %v4467_v20, %v4467_v20  ;;  %v3038_v33 = vadd.f32 %v3037_v28, %v9038_v61  ;;  %v8406_v34 = vpop.f32.mrb[45].mxu1  ;;  %v4468_v35 = vadd.f32 %v9053_v15, %v4151_v24  ;;  %vm3209_vm3 = vcmp.ge.f32.partialorder %v2406_v25, 0.0  ;;  %v8091_v38 = vpop.f32.mrb[47].mxu0 }
 0x346   : > { %v3522_v36 = vmul.f32 0.01, %v2406_v25  ;;  %v2409_v37 = vadd.f32 %v2408_v32, %v9038_v61  ;;  %v3040_v39 = vpop.f32.mrb[46].mxu1  ;;  %v7618_v40 = vpack.c.bf16 %v4625_v30, %v4625_v30  ;;  %v4626_v41 = vadd.f32 %v9053_v15, %v4309_v31 }
 0x347   : > { %6034 = vst.msk [vmem:[%s9077_s6 + $0x250] sm:$0xf] %vm5885_vm7, %v7460_v29  ;;  %vm3367_vm4 = vcmp.ge.f32.partialorder %v3038_v33, 0.0  ;;  %v3680_v42 = vmul.f32 0.01, %v3038_v33  ;;  %v8407_v43 = vpop.f32.mrb[47].mxu1  ;;  %v7461_v44 = vpack.c.bf16 %v4468_v35, %v4468_v35  ;;  %v3041_v1 = vadd.f32 %v3040_v39, %v9038_v61 }
 0x348   : > { %v3835_v45 = vsel %vm3209_vm3, %v2406_v25, %v3522_v36  ;;  %vm3210_vm5 = vcmp.ge.f32.partialorder %v2409_v37, 0.0  ;;  %v3523_v46 = vmul.f32 0.01, %v2409_v37  ;;  %6192 = vst.msk [vmem:[%s9077_s6 + $0x4c8] sm:$0xf] %vm5885_vm7, %v7618_v40  ;;  %v7619_v48 = vpack.c.bf16 %v4626_v41, %v4626_v41 }
 0x349   : > { %v4152_v47 = vmul.f32 %v9048_v6, %v3835_v45  ;;  %v3993_v49 = vsel %vm3367_vm4, %v3038_v33, %v3680_v42  ;;  %6035 = vst.msk [vmem:[%s9077_s6 + $0x254] sm:$0xf] %vm5885_vm7, %v7461_v44  ;;  %vm3368_vm6 = vcmp.ge.f32.partialorder %v3041_v1, 0.0  ;;  %v3681_v55 = vmul.f32 0.01, %v3041_v1 }
 0x34a   : > { %v3836_v50 = vsel %vm3210_vm5, %v2409_v37, %v3523_v46  ;;  %v4310_v51 = vmul.f32 %v9048_v6, %v3993_v49  ;;  %6193 = vst.msk [vmem:[%s9077_s6 + $0x4cc] sm:$0xf] %vm5885_vm7, %v7619_v48  ;;  %v2413_v54 = vpop.f32.mrb[48].mxu0 }
 0x34b   : > { %v4469_v52 = vadd.f32 %v9053_v15, %v4152_v47  ;;  %v4153_v53 = vmul.f32 %v9048_v6, %v3836_v50  ;;  %v2414_v57 = vadd.f32 %v2413_v54, %v9038_v61  ;;  %v8094_v58 = vpop.f32.mrb[49].mxu0  ;;  %v3994_v63 = vsel %vm3368_vm6, %v3041_v1, %v3681_v55 }
 0x34c   : > { %v4627_v56 = vadd.f32 %v9053_v15, %v4310_v51  ;;  %v3045_v59 = vpop.f32.mrb[48].mxu1  ;;  %v2416_v0 = vpop.f32.mrb[50].mxu0  ;;  %v4311_v7 = vmul.f32 %v9048_v6, %v3994_v63 }
 0x34d   : > { %v7462_v60 = vpack.c.bf16 %v4469_v52, %v4469_v52  ;;  %v4470_v62 = vadd.f32 %v9053_v15, %v4153_v53  ;;  %v3046_v2 = vadd.f32 %v3045_v59, %v9038_v61  ;;  %v8410_v3 = vpop.f32.mrb[49].mxu1  ;;  %vm3211_vm8 = vcmp.ge.f32.partialorder %v2414_v57, 0.0  ;;  %v8095_v8 = vpop.f32.mrb[51].mxu0 }
 0x34e   : > { %v7620_v4 = vpack.c.bf16 %v4627_v56, %v4627_v56  ;;  %v3524_v5 = vmul.f32 0.01, %v2414_v57  ;;  %v3048_v9 = vpop.f32.mrb[50].mxu1  ;;  %v2417_v11 = vadd.f32 %v2416_v0, %v9038_v61  ;;  %v4628_v16 = vadd.f32 %v9053_v15, %v4311_v7 }
 0x34f   : > { %6036 = vst.msk [vmem:[%s9077_s6 + $0x258] sm:$0xf] %vm5885_vm7, %v7462_v60  ;;  %v7463_v10 = vpack.c.bf16 %v4470_v62, %v4470_v62  ;;  %vm3369_vm9 = vcmp.ge.f32.partialorder %v3046_v2, 0.0  ;;  %v3682_v12 = vmul.f32 0.01, %v3046_v2  ;;  %v8411_v13 = vpop.f32.mrb[51].mxu1  ;;  %v3049_v17 = vadd.f32 %v3048_v9, %v9038_v61 }
 0x350   : > { %6194 = vst.msk [vmem:[%s9077_s6 + $0x4d0] sm:$0xf] %vm5885_vm7, %v7620_v4  ;;  %v3837_v14 = vsel %vm3211_vm8, %v2414_v57, %v3524_v5  ;;  %vm3212_vm10 = vcmp.ge.f32.partialorder %v2417_v11, 0.0  ;;  %v3525_v19 = vmul.f32 0.01, %v2417_v11  ;;  %v7621_v21 = vpack.c.bf16 %v4628_v16, %v4628_v16 }
 0x351   : > { %6037 = vst.msk [vmem:[%s9077_s6 + $0x25c] sm:$0xf] %vm5885_vm7, %v7463_v10  ;;  %v4154_v18 = vmul.f32 %v9048_v6, %v3837_v14  ;;  %v3995_v20 = vsel %vm3369_vm9, %v3046_v2, %v3682_v12  ;;  %vm3370_vm11 = vcmp.ge.f32.partialorder %v3049_v17, 0.0  ;;  %v3683_v23 = vmul.f32 0.01, %v3049_v17 }
 0x352   : > { %v4312_v22 = vmul.f32 %v9048_v6, %v3995_v20  ;;  %v3838_v25 = vsel %vm3212_vm10, %v2417_v11, %v3525_v19  ;;  %v2421_v26 = vpop.f32.mrb[52].mxu0  ;;  %6195 = vst.msk [vmem:[%s9077_s6 + $0x4d4] sm:$0xf] %vm5885_vm7, %v7621_v21 }
 0x353   : > { %v4471_v24 = vadd.f32 %v9053_v15, %v4154_v18  ;;  %v4155_v27 = vmul.f32 %v9048_v6, %v3838_v25  ;;  %v2422_v29 = vadd.f32 %v2421_v26, %v9038_v61  ;;  %v3996_v30 = vsel %vm3370_vm11, %v3049_v17, %v3683_v23  ;;  %v8098_v31 = vpop.f32.mrb[53].mxu0 }
 0x354   : > { %v4629_v28 = vadd.f32 %v9053_v15, %v4312_v22  ;;  %v3053_v32 = vpop.f32.mrb[52].mxu1  ;;  %v4313_v34 = vmul.f32 %v9048_v6, %v3996_v30  ;;  %v2424_v35 = vpop.f32.mrb[54].mxu0 }
 0x355   : > { %v7464_v33 = vpack.c.bf16 %v4471_v24, %v4471_v24  ;;  %v3054_v36 = vadd.f32 %v3053_v32, %v9038_v61  ;;  %v8414_v37 = vpop.f32.mrb[53].mxu1  ;;  %v4472_v38 = vadd.f32 %v9053_v15, %v4155_v27  ;;  %vm3213_vm12 = vcmp.ge.f32.partialorder %v2422_v29, 0.0  ;;  %v8099_v41 = vpop.f32.mrb[55].mxu0 }
 0x356   : > { %v7622_v39 = vpack.c.bf16 %v4629_v28, %v4629_v28  ;;  %v3526_v40 = vmul.f32 0.01, %v2422_v29  ;;  %v3056_v42 = vpop.f32.mrb[54].mxu1  ;;  %v4630_v43 = vadd.f32 %v9053_v15, %v4313_v34  ;;  %v2425_v44 = vadd.f32 %v2424_v35, %v9038_v61 }
 0x357   : > { %6038 = vst.msk [vmem:[%s9077_s6 + $0x260] sm:$0xf] %vm5885_vm7, %v7464_v33  ;;  %vm3371_vm1 = vcmp.ge.f32.partialorder %v3054_v36, 0.0  ;;  %v3684_v45 = vmul.f32 0.01, %v3054_v36  ;;  %v8415_v46 = vpop.f32.mrb[55].mxu1  ;;  %v7465_v47 = vpack.c.bf16 %v4472_v38, %v4472_v38 }
 0x358   : > { %6196 = vst.msk [vmem:[%s9077_s6 + $0x4d8] sm:$0xf] %vm5885_vm7, %v7622_v39  ;;  %v3839_v48 = vsel %vm3213_vm12, %v2422_v29, %v3526_v40  ;;  %v7623_v1 = vpack.c.bf16 %v4630_v43, %v4630_v43  ;;  %vm3214_vm13 = vcmp.ge.f32.partialorder %v2425_v44, 0.0  ;;  %v3527_v50 = vmul.f32 0.01, %v2425_v44 }
 0x359   : > { %v4156_v49 = vmul.f32 %v9048_v6, %v3839_v48  ;;  %6039 = vst.msk [vmem:[%s9077_s6 + $0x264] sm:$0xf] %vm5885_vm7, %v7465_v47  ;;  %v3997_v51 = vsel %vm3371_vm1, %v3054_v36, %v3684_v45 }
 0x35a   : > { %6197 = vst.msk [vmem:[%s9077_s6 + $0x4dc] sm:$0xf] %vm5885_vm7, %v7623_v1  ;;  %v3840_v53 = vsel %vm3214_vm13, %v2425_v44, %v3527_v50  ;;  %v4314_v54 = vmul.f32 %v9048_v6, %v3997_v51  ;;  %v2429_v55 = vpop.f32.mrb[56].mxu0 }
 0x35b   : > { %v4473_v52 = vadd.f32 %v9053_v15, %v4156_v49  ;;  %v4157_v56 = vmul.f32 %v9048_v6, %v3840_v53  ;;  %v2430_v57 = vadd.f32 %v2429_v55, %v9038_v61  ;;  %v8102_v58 = vpop.f32.mrb[57].mxu0 }
 0x35c   : > { %v4631_v60 = vadd.f32 %v9053_v15, %v4314_v54  ;;  %v2432_v62 = vpop.f32.mrb[58].mxu0 }
 0x35d   : > { %v7466_v59 = vpack.c.bf16 %v4473_v52, %v4473_v52  ;;  %v4474_v63 = vadd.f32 %v9053_v15, %v4157_v56  ;;  %vm3215_vm14 = vcmp.ge.f32.partialorder %v2430_v57, 0.0  ;;  %v3528_v0 = vmul.f32 0.01, %v2430_v57  ;;  %v8103_v3 = vpop.f32.mrb[59].mxu0 }
 0x35e   : > { %v2433_v2 = vadd.f32 %v2432_v62, %v9038_v61  ;;  %v7624_v4 = vpack.c.bf16 %v4631_v60, %v4631_v60 }
 0x35f   : > { %6040 = vst.msk [vmem:[%s9077_s6 + $0x268] sm:$0xf] %vm5885_vm7, %v7466_v59  ;;  %v7467_v5 = vpack.c.bf16 %v4474_v63, %v4474_v63  ;;  %v3841_v7 = vsel %vm3215_vm14, %v2430_v57, %v3528_v0 }
 0x360   : > { %vm3216_vm2 = vcmp.ge.f32.partialorder %v2433_v2, 0.0  ;;  %v3529_v8 = vmul.f32 0.01, %v2433_v2  ;;  %6198 = vst.msk [vmem:[%s9077_s6 + $0x4e0] sm:$0xf] %vm5885_vm7, %v7624_v4  ;;  %v4158_v9 = vmul.f32 %v9048_v6, %v3841_v7 }
 0x361   : > { %6041 = vst.msk [vmem:[%s9077_s6 + $0x26c] sm:$0xf] %vm5885_vm7, %v7467_v5 }
 0x362   : > { %v3842_v10 = vsel %vm3216_vm2, %v2433_v2, %v3529_v8  ;;  %v4475_v11 = vadd.f32 %v9053_v15, %v4158_v9 }
 0x363   : > { %v4159_v61 = vmul.f32 %v9048_v6, %v3842_v10  ;;  %6205 = sbr.rel (!%p8801_p4) target bundleno = 965 (0x3c5), region = 36 }
 0x364   : > { %v7468_v12 = vpack.c.bf16 %v4475_v11, %v4475_v11 }
 0x365   : > { %v4476_v13 = vadd.f32 %v9053_v15, %v4159_v61 }
 0x366   : > { %6042 = vst.msk [vmem:[%s9077_s6 + $0x270] sm:$0xf] %vm5885_vm7, %v7468_v12 }
 0x367   : > { %v7469_v14 = vpack.c.bf16 %v4476_v13, %v4476_v13 }
 0x369   : > { %6043 = vst.msk [vmem:[%s9077_s6 + $0x274] sm:$0xf] %vm5885_vm7, %v7469_v14 }
 0x36a   : > { %s11239_s7 = smov (!%p6208_p8, %s6207_s7), 313 }
 0x36b   : > { %s7297_s12 = sshll.u32 %s11239_s7, 6 }
 0x36c   : > { %p7300_p9 = scmp.eq.s32.totalorder %s7297_s12, 0 }
 0x36d   : > { %s11041_s14 = sshrl.u32 (!%p7300_p9), %s11239_s7, 6 }
 0x36e   : > { %6216 = sbr.rel (%p7300_p9) target bundleno = 965 (0x3c5), region = 40  ;;  %p7301_p10 = scmp.le.s32.totalorder (!%p7300_p9), %s11041_s14, 0 }
 0x375   : > { %6621 = sbr.rel (%p7301_p10) target bundleno = 944 (0x3b0), region = 112  ;;  %s11232_s15 = smov (!%p7301_p10), %s11035_s11 }
 0x376   : > { %s11233_s17 = smov (!%p7301_p10), %s9077_s6  ;;  %s11050_s18 = smov (!%p7301_p10), 0  }
 0x377   : > { %s11052_s20 = smov (!%p7301_p10), 0  }
 0x37c LB: >> { %v6232_v6 = vld [vmem:[%s8728_s17] sm:$0xf]  ;;  %v6234_v15 = vld [vmem:[%s8728_s17 + $0x4] sm:$0xf]  ;;  %v6236_v16 = vld [vmem:[%s8728_s17 + $0x8] sm:$0xf]  ;;  %s8736_s20 = sphi %s11052_s20, %s6226_s20   ;;  %s8732_s18 = sphi %s11050_s18, %s11234_s18   ;;  %s8728_s17 = sphi %s11233_s17, %s6365_s17   ;;  %s8724_s15 = sphi %s11232_s15, %s6366_s15  }
 0x37d   : >> { %6233 = vst [vmem:[%s8724_s15] sm:$0xf] %v6232_v6  ;;  %6235 = vst [vmem:[%s8724_s15 + $0x4] sm:$0xf] %v6234_v15  ;;  %v6238_v17 = vld [vmem:[%s8728_s17 + $0xc] sm:$0xf]  ;;  %s6360_s21 = sadd.s32 1, %s8732_s18 }
 0x37e   : >> { %6237 = vst [vmem:[%s8724_s15 + $0x8] sm:$0xf] %v6236_v16  ;;  %v6240_v18 = vld [vmem:[%s8728_s17 + $0x10] sm:$0xf]  ;;  %v6242_v19 = vld [vmem:[%s8728_s17 + $0x14] sm:$0xf]  ;;  %p6361_p11 = scmp.ge.s32.totalorder %s6360_s21, %s11041_s14 }
 0x37f   : >> { %6239 = vst [vmem:[%s8724_s15 + $0xc] sm:$0xf] %v6238_v17  ;;  %6241 = vst [vmem:[%s8724_s15 + $0x10] sm:$0xf] %v6240_v18  ;;  %v6244_v20 = vld [vmem:[%s8728_s17 + $0x18] sm:$0xf] }
 0x380   : >> { %6243 = vst [vmem:[%s8724_s15 + $0x14] sm:$0xf] %v6242_v19  ;;  %v6246_v21 = vld [vmem:[%s8728_s17 + $0x1c] sm:$0xf]  ;;  %v6248_v22 = vld [vmem:[%s8728_s17 + $0x20] sm:$0xf] }
 0x381   : >> { %6245 = vst [vmem:[%s8724_s15 + $0x18] sm:$0xf] %v6244_v20  ;;  %6247 = vst [vmem:[%s8724_s15 + $0x1c] sm:$0xf] %v6246_v21  ;;  %v6250_v23 = vld [vmem:[%s8728_s17 + $0x24] sm:$0xf] }
 0x382   : >> { %6249 = vst [vmem:[%s8724_s15 + $0x20] sm:$0xf] %v6248_v22  ;;  %v6252_v24 = vld [vmem:[%s8728_s17 + $0x28] sm:$0xf]  ;;  %v6254_v25 = vld [vmem:[%s8728_s17 + $0x2c] sm:$0xf] }
 0x383   : >> { %6251 = vst [vmem:[%s8724_s15 + $0x24] sm:$0xf] %v6250_v23  ;;  %6253 = vst [vmem:[%s8724_s15 + $0x28] sm:$0xf] %v6252_v24  ;;  %v6256_v26 = vld [vmem:[%s8728_s17 + $0x30] sm:$0xf] }
 0x384   : >> { %6255 = vst [vmem:[%s8724_s15 + $0x2c] sm:$0xf] %v6254_v25  ;;  %v6258_v27 = vld [vmem:[%s8728_s17 + $0x34] sm:$0xf]  ;;  %v6260_v28 = vld [vmem:[%s8728_s17 + $0x38] sm:$0xf] }
 0x385   : >> { %6257 = vst [vmem:[%s8724_s15 + $0x30] sm:$0xf] %v6256_v26  ;;  %6259 = vst [vmem:[%s8724_s15 + $0x34] sm:$0xf] %v6258_v27  ;;  %v6262_v29 = vld [vmem:[%s8728_s17 + $0x3c] sm:$0xf] }
 0x386   : >> { %6261 = vst [vmem:[%s8724_s15 + $0x38] sm:$0xf] %v6260_v28  ;;  %v6264_v30 = vld [vmem:[%s8728_s17 + $0x40] sm:$0xf]  ;;  %v6266_v31 = vld [vmem:[%s8728_s17 + $0x44] sm:$0xf] }
 0x387   : >> { %6263 = vst [vmem:[%s8724_s15 + $0x3c] sm:$0xf] %v6262_v29  ;;  %6265 = vst [vmem:[%s8724_s15 + $0x40] sm:$0xf] %v6264_v30  ;;  %v6268_v32 = vld [vmem:[%s8728_s17 + $0x48] sm:$0xf] }
 0x388   : >> { %6267 = vst [vmem:[%s8724_s15 + $0x44] sm:$0xf] %v6266_v31  ;;  %v6270_v33 = vld [vmem:[%s8728_s17 + $0x4c] sm:$0xf]  ;;  %v6272_v34 = vld [vmem:[%s8728_s17 + $0x50] sm:$0xf] }
 0x389   : >> { %6269 = vst [vmem:[%s8724_s15 + $0x48] sm:$0xf] %v6268_v32  ;;  %6271 = vst [vmem:[%s8724_s15 + $0x4c] sm:$0xf] %v6270_v33  ;;  %v6274_v35 = vld [vmem:[%s8728_s17 + $0x54] sm:$0xf] }
 0x38a   : >> { %6273 = vst [vmem:[%s8724_s15 + $0x50] sm:$0xf] %v6272_v34  ;;  %v6276_v36 = vld [vmem:[%s8728_s17 + $0x58] sm:$0xf]  ;;  %v6278_v37 = vld [vmem:[%s8728_s17 + $0x5c] sm:$0xf] }
 0x38b   : >> { %6275 = vst [vmem:[%s8724_s15 + $0x54] sm:$0xf] %v6274_v35  ;;  %6277 = vst [vmem:[%s8724_s15 + $0x58] sm:$0xf] %v6276_v36  ;;  %v6280_v38 = vld [vmem:[%s8728_s17 + $0x60] sm:$0xf] }
 0x38c   : >> { %6279 = vst [vmem:[%s8724_s15 + $0x5c] sm:$0xf] %v6278_v37  ;;  %v6282_v39 = vld [vmem:[%s8728_s17 + $0x64] sm:$0xf]  ;;  %v6284_v40 = vld [vmem:[%s8728_s17 + $0x68] sm:$0xf] }
 0x38d   : >> { %6281 = vst [vmem:[%s8724_s15 + $0x60] sm:$0xf] %v6280_v38  ;;  %6283 = vst [vmem:[%s8724_s15 + $0x64] sm:$0xf] %v6282_v39  ;;  %v6286_v41 = vld [vmem:[%s8728_s17 + $0x6c] sm:$0xf] }
 0x38e   : >> { %6285 = vst [vmem:[%s8724_s15 + $0x68] sm:$0xf] %v6284_v40  ;;  %v6288_v42 = vld [vmem:[%s8728_s17 + $0x70] sm:$0xf]  ;;  %v6290_v43 = vld [vmem:[%s8728_s17 + $0x74] sm:$0xf] }
 0x38f   : >> { %6287 = vst [vmem:[%s8724_s15 + $0x6c] sm:$0xf] %v6286_v41  ;;  %6289 = vst [vmem:[%s8724_s15 + $0x70] sm:$0xf] %v6288_v42  ;;  %v6292_v44 = vld [vmem:[%s8728_s17 + $0x78] sm:$0xf] }
 0x390   : >> { %6291 = vst [vmem:[%s8724_s15 + $0x74] sm:$0xf] %v6290_v43  ;;  %v6294_v45 = vld [vmem:[%s8728_s17 + $0x7c] sm:$0xf]  ;;  %v6296_v46 = vld [vmem:[%s8728_s17 + $0x80] sm:$0xf] }
 0x391   : >> { %6293 = vst [vmem:[%s8724_s15 + $0x78] sm:$0xf] %v6292_v44  ;;  %6295 = vst [vmem:[%s8724_s15 + $0x7c] sm:$0xf] %v6294_v45  ;;  %v6298_v47 = vld [vmem:[%s8728_s17 + $0x84] sm:$0xf] }
 0x392   : >> { %6297 = vst [vmem:[%s8724_s15 + $0x80] sm:$0xf] %v6296_v46  ;;  %v6300_v48 = vld [vmem:[%s8728_s17 + $0x88] sm:$0xf]  ;;  %v6302_v49 = vld [vmem:[%s8728_s17 + $0x8c] sm:$0xf] }
 0x393   : >> { %6299 = vst [vmem:[%s8724_s15 + $0x84] sm:$0xf] %v6298_v47  ;;  %6301 = vst [vmem:[%s8724_s15 + $0x88] sm:$0xf] %v6300_v48  ;;  %v6304_v1 = vld [vmem:[%s8728_s17 + $0x90] sm:$0xf] }
 0x394   : >> { %6303 = vst [vmem:[%s8724_s15 + $0x8c] sm:$0xf] %v6302_v49  ;;  %v6306_v50 = vld [vmem:[%s8728_s17 + $0x94] sm:$0xf]  ;;  %v6308_v51 = vld [vmem:[%s8728_s17 + $0x98] sm:$0xf] }
 0x395   : >> { %6305 = vst [vmem:[%s8724_s15 + $0x90] sm:$0xf] %v6304_v1  ;;  %6307 = vst [vmem:[%s8724_s15 + $0x94] sm:$0xf] %v6306_v50  ;;  %v6310_v52 = vld [vmem:[%s8728_s17 + $0x9c] sm:$0xf] }
 0x396   : >> { %6309 = vst [vmem:[%s8724_s15 + $0x98] sm:$0xf] %v6308_v51  ;;  %v6312_v53 = vld [vmem:[%s8728_s17 + $0xa0] sm:$0xf]  ;;  %v6314_v54 = vld [vmem:[%s8728_s17 + $0xa4] sm:$0xf] }
 0x397   : >> { %6311 = vst [vmem:[%s8724_s15 + $0x9c] sm:$0xf] %v6310_v52  ;;  %6313 = vst [vmem:[%s8724_s15 + $0xa0] sm:$0xf] %v6312_v53  ;;  %v6316_v55 = vld [vmem:[%s8728_s17 + $0xa8] sm:$0xf] }
 0x398   : >> { %6315 = vst [vmem:[%s8724_s15 + $0xa4] sm:$0xf] %v6314_v54  ;;  %v6318_v56 = vld [vmem:[%s8728_s17 + $0xac] sm:$0xf]  ;;  %v6320_v57 = vld [vmem:[%s8728_s17 + $0xb0] sm:$0xf] }
 0x399   : >> { %6317 = vst [vmem:[%s8724_s15 + $0xa8] sm:$0xf] %v6316_v55  ;;  %6319 = vst [vmem:[%s8724_s15 + $0xac] sm:$0xf] %v6318_v56  ;;  %v6322_v58 = vld [vmem:[%s8728_s17 + $0xb4] sm:$0xf] }
 0x39a   : >> { %6321 = vst [vmem:[%s8724_s15 + $0xb0] sm:$0xf] %v6320_v57  ;;  %v6324_v59 = vld [vmem:[%s8728_s17 + $0xb8] sm:$0xf]  ;;  %v6326_v60 = vld [vmem:[%s8728_s17 + $0xbc] sm:$0xf] }
 0x39b   : >> { %6323 = vst [vmem:[%s8724_s15 + $0xb4] sm:$0xf] %v6322_v58  ;;  %6325 = vst [vmem:[%s8724_s15 + $0xb8] sm:$0xf] %v6324_v59  ;;  %v6328_v62 = vld [vmem:[%s8728_s17 + $0xc0] sm:$0xf] }
 0x39c   : >> { %6327 = vst [vmem:[%s8724_s15 + $0xbc] sm:$0xf] %v6326_v60  ;;  %v6330_v63 = vld [vmem:[%s8728_s17 + $0xc4] sm:$0xf]  ;;  %v6332_v0 = vld [vmem:[%s8728_s17 + $0xc8] sm:$0xf] }
 0x39d   : >> { %6329 = vst [vmem:[%s8724_s15 + $0xc0] sm:$0xf] %v6328_v62  ;;  %6331 = vst [vmem:[%s8724_s15 + $0xc4] sm:$0xf] %v6330_v63  ;;  %v6334_v2 = vld [vmem:[%s8728_s17 + $0xcc] sm:$0xf] }
 0x39e   : >> { %6333 = vst [vmem:[%s8724_s15 + $0xc8] sm:$0xf] %v6332_v0  ;;  %v6336_v3 = vld [vmem:[%s8728_s17 + $0xd0] sm:$0xf]  ;;  %v6338_v4 = vld [vmem:[%s8728_s17 + $0xd4] sm:$0xf] }
 0x39f   : >> { %6335 = vst [vmem:[%s8724_s15 + $0xcc] sm:$0xf] %v6334_v2  ;;  %6337 = vst [vmem:[%s8724_s15 + $0xd0] sm:$0xf] %v6336_v3  ;;  %v6340_v5 = vld [vmem:[%s8728_s17 + $0xd8] sm:$0xf] }
 0x3a0   : >> { %6339 = vst [vmem:[%s8724_s15 + $0xd4] sm:$0xf] %v6338_v4  ;;  %v6342_v7 = vld [vmem:[%s8728_s17 + $0xdc] sm:$0xf]  ;;  %v6344_v8 = vld [vmem:[%s8728_s17 + $0xe0] sm:$0xf] }
 0x3a1   : >> { %6341 = vst [vmem:[%s8724_s15 + $0xd8] sm:$0xf] %v6340_v5  ;;  %6343 = vst [vmem:[%s8724_s15 + $0xdc] sm:$0xf] %v6342_v7  ;;  %v6346_v9 = vld [vmem:[%s8728_s17 + $0xe4] sm:$0xf] }
 0x3a2   : >> { %6345 = vst [vmem:[%s8724_s15 + $0xe0] sm:$0xf] %v6344_v8  ;;  %v6348_v10 = vld [vmem:[%s8728_s17 + $0xe8] sm:$0xf]  ;;  %v6350_v11 = vld [vmem:[%s8728_s17 + $0xec] sm:$0xf] }
 0x3a3   : >> { %6347 = vst [vmem:[%s8724_s15 + $0xe4] sm:$0xf] %v6346_v9  ;;  %6349 = vst [vmem:[%s8724_s15 + $0xe8] sm:$0xf] %v6348_v10  ;;  %v6352_v61 = vld [vmem:[%s8728_s17 + $0xf0] sm:$0xf] }
 0x3a4   : >> { %6351 = vst [vmem:[%s8724_s15 + $0xec] sm:$0xf] %v6350_v11  ;;  %v6354_v12 = vld [vmem:[%s8728_s17 + $0xf4] sm:$0xf]  ;;  %v6356_v13 = vld [vmem:[%s8728_s17 + $0xf8] sm:$0xf] }
 0x3a5   : >> { %6353 = vst [vmem:[%s8724_s15 + $0xf0] sm:$0xf] %v6352_v61  ;;  %6355 = vst [vmem:[%s8724_s15 + $0xf4] sm:$0xf] %v6354_v12  ;;  %v6358_v14 = vld [vmem:[%s8728_s17 + $0xfc] sm:$0xf] }
 0x3a6   : >> { %6357 = vst [vmem:[%s8724_s15 + $0xf8] sm:$0xf] %v6356_v13  ;;  %6359 = vst [vmem:[%s8724_s15 + $0xfc] sm:$0xf] %v6358_v14  ;;  %s11241_s21 = smov (%p6361_p11, %s6360_s21), 0  ;;  %s6226_s20 = sadd.s32 1, %s8736_s20  }
 0x3a7   : >> { %s7302_s22 = sshll.u32 %s11241_s21, 8  ;;  %p6225_p12 = scmp.ge.s32.totalorder %s6226_s20, %s11041_s14 }
 0x3a8   : >> { %s6365_s17 = scalar_lea.vmem %s9077_s6, %s7302_s22 [#allocation2]   ;;  %s6366_s15 = scalar_lea.vmem %s11035_s11, %s7302_s22  }
 0x3a9   : >> { %s11234_s18 = smov %s11241_s21  ;;  %6228 = sbr.rel (!%p6225_p12) target bundleno = 892 (0x37c), region = 118 }
 0x3b0 PF: > { %s11209_s23 = sand.u32 63, %s11239_s7   ;;  %s7626_s24 = sshll.u32 %s11041_s14, 8 }
 0x3b1   : > { %s6371_s25 = scalar_lea.vmem %s9077_s6, %s7626_s24 [#allocation2]   ;;  %s6373_s26 = scalar_lea.vmem %s11035_s11, %s7626_s24  }
 0x3b2   : > { %p7307_p13 = scmp.le.s32.totalorder %s11209_s23, 0 }
 0x3b3   : > { %s8738_s27 = smov (!%p7307_p13), %s6373_s26   ;;  %s8742_s28 = smov (!%p7307_p13), %s6371_s25  }
 0x3b4   : > { %6635 = sbr.rel (%p7307_p13) target bundleno = 965 (0x3c5), region = 123  ;;  %s8746_s29 = smov (!%p7307_p13), 0  }
 0x3b5   : > { %s8750_s30 = smov (!%p7307_p13), 0  }
 0x3bb LB: >> { %v6383_v6 = vld [vmem:[%s8744_s28] sm:$0xf]  ;;  %s6385_s4 = sadd.s32 1, %s8748_s29  ;;  %s6377_s30 = sadd.s32 1, %s8752_s30   ;;  %s8752_s30 = sphi %s8750_s30, %s6377_s30   ;;  %s8748_s29 = sphi %s8746_s29, %s8747_s29   ;;  %s8744_s28 = sphi %s8742_s28, %s6390_s28   ;;  %s8740_s27 = sphi %s8738_s27, %s6391_s27  }
 0x3bc   : >> { %6384 = vst [vmem:[%s8740_s27] sm:$0xf] %v6383_v6  ;;  %p6386_p0 = scmp.ge.s32.totalorder %s6385_s4, %s11209_s23  ;;  %p6376_p1 = scmp.ge.s32.totalorder %s6377_s30, %s11209_s23 }
 0x3be   : >> { %s11243_s4 = smov (%p6386_p0, %s6385_s4), 0  ;;  %6379 = sbr.rel (!%p6376_p1) target bundleno = 955 (0x3bb), region = 129 }
 0x3bf   : >> { %s7308_s5 = sshll.u32 %s11243_s4, 2  ;;  %s8747_s29 = smov %s11243_s4  }
 0x3c0   : >> { %s6390_s28 = scalar_lea.vmem %s6371_s25, %s7308_s5 [#allocation2]   ;;  %s6391_s27 = scalar_lea.vmem %s6373_s26, %s7308_s5  }
 0x3c5 PF: > { %p10_p2 = scmp.ge.s32.totalorder %s8791_s16, 4   ;;  %s11235_s12 = smov %s8716_s13 }
 0x3c6   : > { %s11236_s13 = smov %s8799_s19  ;;  %s11237_s14 = smov %s8791_s16 }
 0x3c7   :  { %12 = sbr.rel (!%p10_p2) target bundleno = 2 (0x2), region = 140 }

// kernel: encoder_forward.5
= control target key start
LH: loop header
LB: loop body
LE: loop exit
PB: predicated region body
PF: predicated region fallthrough
CT: control target
= control target key end

     0   :  { %s2286_s12 = smov 0   ;;  %s2832_s0 = inlined_call_operand.vmem [shape: bf16[1152,256], index: 0, kind: input, shape index: {}]   ;;  %s2833_s1 = inlined_call_operand.vmem [shape: bf16[256,8], index: 1, kind: input, shape index: {}]   ;;  %s2834_s2 = inlined_call_operand.vmem [shape: f32[3,8], index: 2, kind: input, shape index: {}]   ;;  %s2835_s3 = inlined_call_operand.vmem [shape: bf16[1152,8], index: 3, kind: output, shape index: {}]  }
   0x1 LB: > { %s1849_s13 = sadd.s32 4294967295, %s2263_s12   ;;  %p1853_p0 = scmp.ge.s32.totalorder %s2263_s12, 1  ;;  %s2263_s12 = sphi %s2286_s12, %s13_s12  }
   0x2   : > { %p139_p1 = scmp.lt.s32.totalorder %s2263_s12, 3 }
   0x4   : > { %p140_p2 = pnand %p1853_p0, %p139_p1 }
   0x5   : > { %v2133_v0 = vld [vmem:[%s2833_s1] sm:$0xff] (!%p140_p2)   ;;  %v2265_v1 = vmov (!%p140_p2), 0   ;;  %s164_s16 = smul.u32 (!%p140_p2), 72, %s1849_s13  ;;  %v2134_v2 = vld [vmem:[%s2833_s1 + $0x8] sm:$0xff] (!%p140_p2)   ;;  %v2135_v3 = vld [vmem:[%s2833_s1 + $0x10] sm:$0xff] (!%p140_p2)   ;;  %vm1720_vm4 = vcmask (!%p140_p2), 60416  }
   0x6   : > { %143 = sbr.rel (%p140_p2) target bundleno = 435 (0x1b3), region = 32  ;;  %743 = vmatprep.subr.bf16.mxu0 (!%p140_p2), %v2265_v1  ;;  %2092 = vmatprep.subr.bf16.mxu1 (!%p140_p2), %v2265_v1  ;;  %v2136_v4 = vld [vmem:[%s2833_s1 + $0x18] sm:$0xff] (!%p140_p2)   ;;  %v2137_v5 = vld [vmem:[%s2833_s1 + $0x20] sm:$0xff] (!%p140_p2)   ;;  %v2138_v7 = vld [vmem:[%s2833_s1 + $0x28] sm:$0xff] (!%p140_p2)  }
   0x7   : > { %744 = vmatpush1.bf16.msra.mxu0 (!%p140_p2), %v2133_v0  ;;  %2108 = vmatpush1.bf16.msra.mxu1 (!%p140_p2), %v2133_v0  ;;  %p165_p3 = scmp.lt.s32.totalorder (!%p140_p2), %s164_s16, 143  ;;  %v2139_v9 = vld [vmem:[%s2833_s1 + $0x30] sm:$0xff] (!%p140_p2)   ;;  %v2140_v10 = vld [vmem:[%s2833_s1 + $0x38] sm:$0xff] (!%p140_p2)   ;;  %v2141_v11 = vld [vmem:[%s2833_s1 + $0x40] sm:$0xff] (!%p140_p2)  }
   0x8   : > { %745 = vmatprep.subr.bf16.mxu0 (!%p140_p2), %v2265_v1  ;;  %2093 = vmatprep.subr.bf16.mxu1 (!%p140_p2), %v2265_v1  ;;  %v2142_v12 = vld [vmem:[%s2833_s1 + $0x48] sm:$0xff] (!%p140_p2)   ;;  %v2143_v13 = vld [vmem:[%s2833_s1 + $0x50] sm:$0xff] (!%p140_p2)   ;;  %v2144_v14 = vld [vmem:[%s2833_s1 + $0x58] sm:$0xff] (!%p140_p2)  }
   0x9   : > { %v2145_v15 = vld [vmem:[%s2833_s1 + $0x60] sm:$0xff] (!%p140_p2)   ;;  %v2146_v16 = vld [vmem:[%s2833_s1 + $0x68] sm:$0xff] (!%p140_p2)   ;;  %v2147_v17 = vld [vmem:[%s2833_s1 + $0x70] sm:$0xff] (!%p140_p2)  }
   0xa   : > { %v2148_v18 = vld [vmem:[%s2833_s1 + $0x78] sm:$0xff] (!%p140_p2)  }
   0xb   : > { %746 = vmatpush1.bf16.msra.mxu0 (!%p140_p2), %v2134_v2  ;;  %2109 = vmatpush1.bf16.msra.mxu1 (!%p140_p2), %v2134_v2 }
   0xc   : > { %747 = vmatprep.subr.bf16.mxu0 (!%p140_p2), %v2265_v1  ;;  %2094 = vmatprep.subr.bf16.mxu1 (!%p140_p2), %v2265_v1 }
   0xd   : > { %s2837_s16 = smov (!%p165_p3, %s164_s16), 143 }
   0xe   : > { %s2019_s23 = sshll.u32 %s2837_s16, 3 }
   0xf   : > { %748 = vmatpush1.bf16.msra.mxu0 %v2135_v3  ;;  %2110 = vmatpush1.bf16.msra.mxu1 %v2135_v3  ;;  %s2323_s28 = scalar_lea.vmem %s2832_s0, %s2019_s23 }
  0x10   : > { %749 = vmatprep.subr.bf16.mxu0 %v2265_v1  ;;  %2095 = vmatprep.subr.bf16.mxu1 %v2265_v1  ;;  %v2151_v6 = vld [vmem:[%s2323_s28 + $0x4] ss:$8 sps:$4 sm:$0xff]   ;;  %v2149_v19 = vld [vmem:[%s2323_s28] ss:$8 sps:$4 sm:$0xff]   ;;  %v2155_v21 = vld [vmem:[%s2323_s28 + $0x14] ss:$8 sps:$4 sm:$0xff]  }
  0x11   : > { %v2154_v8 = vld [vmem:[%s2323_s28 + $0x124] ss:$8 sps:$4 sm:$0xff]   ;;  %775 = vmatprep.mubr.bf16.mxu0 %v2151_v6  ;;  %v2152_v20 = vld [vmem:[%s2323_s28 + $0x120] ss:$8 sps:$4 sm:$0xff]   ;;  %v2157_v22 = vld [vmem:[%s2323_s28 + $0x134] ss:$8 sps:$4 sm:$0xff]  }
  0x12   : > { %919 = vmatprep.mubr.bf16.mxu1 %v2154_v8  ;;  %v2159_v23 = vld [vmem:[%s2323_s28 + $0x10] ss:$8 sps:$4 sm:$0xff]   ;;  %v2161_v25 = vld [vmem:[%s2323_s28 + $0x24] ss:$8 sps:$4 sm:$0xff]   ;;  %v2165_v27 = vld [vmem:[%s2323_s28 + $0x20] ss:$8 sps:$4 sm:$0xff]  }
  0x13   : > { %750 = vmatpush1.bf16.msra.mxu0 %v2136_v4  ;;  %2111 = vmatpush1.bf16.msra.mxu1 %v2136_v4  ;;  %v2160_v24 = vld [vmem:[%s2323_s28 + $0x130] ss:$8 sps:$4 sm:$0xff]   ;;  %v2163_v26 = vld [vmem:[%s2323_s28 + $0x144] ss:$8 sps:$4 sm:$0xff]   ;;  %v2166_v28 = vld [vmem:[%s2323_s28 + $0x140] ss:$8 sps:$4 sm:$0xff]  }
  0x14   : > { %751 = vmatprep.subr.bf16.mxu0 %v2265_v1  ;;  %2096 = vmatprep.subr.bf16.mxu1 %v2265_v1  ;;  %v2167_v29 = vld [vmem:[%s2323_s28 + $0x34] ss:$8 sps:$4 sm:$0xff]   ;;  %v2171_v31 = vld [vmem:[%s2323_s28 + $0x30] ss:$8 sps:$4 sm:$0xff]   ;;  %v2173_v33 = vld [vmem:[%s2323_s28 + $0x44] ss:$8 sps:$4 sm:$0xff]  }
  0x15   : > { %v2169_v30 = vld [vmem:[%s2323_s28 + $0x154] ss:$8 sps:$4 sm:$0xff]   ;;  %v2172_v32 = vld [vmem:[%s2323_s28 + $0x150] ss:$8 sps:$4 sm:$0xff]   ;;  %v2175_v34 = vld [vmem:[%s2323_s28 + $0x164] ss:$8 sps:$4 sm:$0xff]  }
  0x16   : > { %v2177_v35 = vld [vmem:[%s2323_s28 + $0x40] ss:$8 sps:$4 sm:$0xff]   ;;  %v2179_v37 = vld [vmem:[%s2323_s28 + $0x54] ss:$8 sps:$4 sm:$0xff]   ;;  %v2183_v39 = vld [vmem:[%s2323_s28 + $0x50] ss:$8 sps:$4 sm:$0xff]  }
  0x17   : > { %752 = vmatpush1.bf16.msra.mxu0 %v2137_v5  ;;  %2112 = vmatpush1.bf16.msra.mxu1 %v2137_v5  ;;  %v2178_v36 = vld [vmem:[%s2323_s28 + $0x160] ss:$8 sps:$4 sm:$0xff]   ;;  %v2181_v38 = vld [vmem:[%s2323_s28 + $0x174] ss:$8 sps:$4 sm:$0xff]   ;;  %v2184_v40 = vld [vmem:[%s2323_s28 + $0x170] ss:$8 sps:$4 sm:$0xff]  }
  0x18   : > { %753 = vmatprep.subr.bf16.mxu0 %v2265_v1  ;;  %2097 = vmatprep.subr.bf16.mxu1 %v2265_v1  ;;  %v2185_v41 = vld [vmem:[%s2323_s28 + $0x64] ss:$8 sps:$4 sm:$0xff]   ;;  %v2189_v43 = vld [vmem:[%s2323_s28 + $0x60] ss:$8 sps:$4 sm:$0xff]   ;;  %v2191_v45 = vld [vmem:[%s2323_s28 + $0x74] ss:$8 sps:$4 sm:$0xff]  }
  0x19   : > { %v2187_v42 = vld [vmem:[%s2323_s28 + $0x184] ss:$8 sps:$4 sm:$0xff]   ;;  %v2190_v44 = vld [vmem:[%s2323_s28 + $0x180] ss:$8 sps:$4 sm:$0xff]   ;;  %v2193_v46 = vld [vmem:[%s2323_s28 + $0x194] ss:$8 sps:$4 sm:$0xff]  }
  0x1a   : > { %v2195_v47 = vld [vmem:[%s2323_s28 + $0x70] ss:$8 sps:$4 sm:$0xff]   ;;  %v2197_v49 = vld [vmem:[%s2323_s28 + $0x84] ss:$8 sps:$4 sm:$0xff]   ;;  %v2201_v51 = vld [vmem:[%s2323_s28 + $0x80] ss:$8 sps:$4 sm:$0xff]  }
  0x1b   : > { %754 = vmatpush1.bf16.msra.mxu0 %v2138_v7  ;;  %2113 = vmatpush1.bf16.msra.mxu1 %v2138_v7  ;;  %v2196_v48 = vld [vmem:[%s2323_s28 + $0x190] ss:$8 sps:$4 sm:$0xff]   ;;  %v2199_v50 = vld [vmem:[%s2323_s28 + $0x1a4] ss:$8 sps:$4 sm:$0xff]   ;;  %v2202_v52 = vld [vmem:[%s2323_s28 + $0x1a0] ss:$8 sps:$4 sm:$0xff]  }
  0x1c   : > { %755 = vmatprep.subr.bf16.mxu0 %v2265_v1  ;;  %2098 = vmatprep.subr.bf16.mxu1 %v2265_v1  ;;  %v2203_v53 = vld [vmem:[%s2323_s28 + $0x94] ss:$8 sps:$4 sm:$0xff]   ;;  %v2207_v55 = vld [vmem:[%s2323_s28 + $0x90] ss:$8 sps:$4 sm:$0xff]   ;;  %v2209_v57 = vld [vmem:[%s2323_s28 + $0xa4] ss:$8 sps:$4 sm:$0xff]  }
  0x1d   : > { %v2205_v54 = vld [vmem:[%s2323_s28 + $0x1b4] ss:$8 sps:$4 sm:$0xff]   ;;  %v2208_v56 = vld [vmem:[%s2323_s28 + $0x1b0] ss:$8 sps:$4 sm:$0xff]   ;;  %v2211_v58 = vld [vmem:[%s2323_s28 + $0x1c4] ss:$8 sps:$4 sm:$0xff]  }
  0x1e   : > { %v2213_v59 = vld [vmem:[%s2323_s28 + $0xa0] ss:$8 sps:$4 sm:$0xff]   ;;  %v2215_v61 = vld [vmem:[%s2323_s28 + $0xb4] ss:$8 sps:$4 sm:$0xff]   ;;  %v2219_v63 = vld [vmem:[%s2323_s28 + $0xb0] ss:$8 sps:$4 sm:$0xff]  }
  0x1f   : > { %756 = vmatpush1.bf16.msra.mxu0 %v2139_v9  ;;  %2114 = vmatpush1.bf16.msra.mxu1 %v2139_v9  ;;  %v2214_v60 = vld [vmem:[%s2323_s28 + $0x1c0] ss:$8 sps:$4 sm:$0xff]   ;;  %v2217_v62 = vld [vmem:[%s2323_s28 + $0x1d4] ss:$8 sps:$4 sm:$0xff]   ;;  %v2220_v0 = vld [vmem:[%s2323_s28 + $0x1d0] ss:$8 sps:$4 sm:$0xff]  }
  0x20   : > { %757 = vmatprep.subr.bf16.mxu0 %v2265_v1  ;;  %2099 = vmatprep.subr.bf16.mxu1 %v2265_v1  ;;  %v2223_v2 = vld [vmem:[%s2323_s28 + $0x1e4] ss:$8 sps:$4 sm:$0xff]   ;;  %v2225_v3 = vld [vmem:[%s2323_s28 + $0xc0] ss:$8 sps:$4 sm:$0xff]   ;;  %v2227_v5 = vld [vmem:[%s2323_s28 + $0xd4] ss:$8 sps:$4 sm:$0xff]  }
  0x21   : > { %v2226_v4 = vld [vmem:[%s2323_s28 + $0x1e0] ss:$8 sps:$4 sm:$0xff]   ;;  %v2229_v6 = vld [vmem:[%s2323_s28 + $0x1f4] ss:$8 sps:$4 sm:$0xff]   ;;  %v2231_v7 = vld [vmem:[%s2323_s28 + $0xd0] ss:$8 sps:$4 sm:$0xff]  }
  0x22   : > { %v2232_v8 = vld [vmem:[%s2323_s28 + $0x1f0] ss:$8 sps:$4 sm:$0xff]   ;;  %v2233_v9 = vld [vmem:[%s2323_s28 + $0xe4] ss:$8 sps:$4 sm:$0xff]  }
  0x23   : > { %758 = vmatpush1.bf16.msra.mxu0 %v2140_v10  ;;  %2115 = vmatpush1.bf16.msra.mxu1 %v2140_v10  ;;  %v2235_v10 = vld [vmem:[%s2323_s28 + $0x204] ss:$8 sps:$4 sm:$0xff]  }
  0x24   : > { %759 = vmatprep.subr.bf16.mxu0 %v2265_v1  ;;  %2100 = vmatprep.subr.bf16.mxu1 %v2265_v1 }
  0x27   : > { %760 = vmatpush1.bf16.msra.mxu0 %v2141_v11  ;;  %2116 = vmatpush1.bf16.msra.mxu1 %v2141_v11  ;;  %v2237_v11 = vld [vmem:[%s2323_s28 + $0xe0] ss:$8 sps:$4 sm:$0xff]  }
  0x28   : > { %761 = vmatprep.subr.bf16.mxu0 %v2265_v1  ;;  %2101 = vmatprep.subr.bf16.mxu1 %v2265_v1 }
  0x2b   : > { %762 = vmatpush1.bf16.msra.mxu0 %v2142_v12  ;;  %2117 = vmatpush1.bf16.msra.mxu1 %v2142_v12  ;;  %v2238_v12 = vld [vmem:[%s2323_s28 + $0x200] ss:$8 sps:$4 sm:$0xff]  }
  0x2c   : > { %763 = vmatprep.subr.bf16.mxu0 %v2265_v1  ;;  %2102 = vmatprep.subr.bf16.mxu1 %v2265_v1 }
  0x2f   : > { %764 = vmatpush1.bf16.msra.mxu0 %v2143_v13  ;;  %2118 = vmatpush1.bf16.msra.mxu1 %v2143_v13  ;;  %v2239_v13 = vld [vmem:[%s2323_s28 + $0xf4] ss:$8 sps:$4 sm:$0xff]  }
  0x30   : > { %765 = vmatprep.subr.bf16.mxu0 %v2265_v1  ;;  %2103 = vmatprep.subr.bf16.mxu1 %v2265_v1 }
  0x33   : > { %766 = vmatpush1.bf16.msra.mxu0 %v2144_v14  ;;  %2119 = vmatpush1.bf16.msra.mxu1 %v2144_v14  ;;  %v2241_v14 = vld [vmem:[%s2323_s28 + $0x214] ss:$8 sps:$4 sm:$0xff]  }
  0x34   : > { %767 = vmatprep.subr.bf16.mxu0 %v2265_v1  ;;  %2104 = vmatprep.subr.bf16.mxu1 %v2265_v1 }
  0x37   : > { %768 = vmatpush1.bf16.msra.mxu0 %v2145_v15  ;;  %2120 = vmatpush1.bf16.msra.mxu1 %v2145_v15  ;;  %v2243_v15 = vld [vmem:[%s2323_s28 + $0xf0] ss:$8 sps:$4 sm:$0xff]  }
  0x38   : > { %769 = vmatprep.subr.bf16.mxu0 %v2265_v1  ;;  %2105 = vmatprep.subr.bf16.mxu1 %v2265_v1 }
  0x3b   : > { %770 = vmatpush1.bf16.msra.mxu0 %v2146_v16  ;;  %2121 = vmatpush1.bf16.msra.mxu1 %v2146_v16  ;;  %v2244_v16 = vld [vmem:[%s2323_s28 + $0x210] ss:$8 sps:$4 sm:$0xff]  }
  0x3c   : > { %771 = vmatprep.subr.bf16.mxu0 %v2265_v1  ;;  %2106 = vmatprep.subr.bf16.mxu1 %v2265_v1 }
  0x3f   : > { %772 = vmatpush1.bf16.msra.mxu0 %v2147_v17  ;;  %2122 = vmatpush1.bf16.msra.mxu1 %v2147_v17  ;;  %v2245_v17 = vld [vmem:[%s2323_s28 + $0x104] ss:$8 sps:$4 sm:$0xff]  }
  0x40   : > { %773 = vmatprep.subr.bf16.mxu0 %v2265_v1  ;;  %2107 = vmatprep.subr.bf16.mxu1 %v2265_v1  ;;  %v2221_v1 = vld [vmem:[%s2323_s28 + $0xc4] ss:$8 sps:$4 sm:$0xff]  }
  0x43   : > { %774 = vmatpush1.bf16.msra.mxu0 %v2148_v18  ;;  %2123 = vmatpush1.bf16.msra.mxu1 %v2148_v18  ;;  %v2247_v18 = vld [vmem:[%s2323_s28 + $0x224] ss:$8 sps:$4 sm:$0xff]  }
  0x46   : > { %776 = vmatmul.mubr.bf16.vlgmr.msra.gmra.mrb[0].mxu0 %v2149_v19  ;;  %920 = vmatmul.mubr.bf16.vlgmr.msra.gmra.mrb[0].mxu1 %v2152_v20  ;;  %v2249_v19 = vld [vmem:[%s2323_s28 + $0x100] ss:$8 sps:$4 sm:$0xff]  }
  0x47   : > { %783 = vmatprep.mubr.bf16.mxu0 %v2155_v21  ;;  %927 = vmatprep.mubr.bf16.mxu1 %v2157_v22  ;;  %v2250_v20 = vld [vmem:[%s2323_s28 + $0x220] ss:$8 sps:$4 sm:$0xff]   ;;  %v2251_v21 = vld [vmem:[%s2323_s28 + $0x114] ss:$8 sps:$4 sm:$0xff]  }
  0x48   : > { %v2253_v22 = vld [vmem:[%s2323_s28 + $0x234] ss:$8 sps:$4 sm:$0xff]  }
  0x4e   : > { %784 = vmatmul.mubr.bf16.gmra.mrb[4].mxu0 %v2159_v23  ;;  %928 = vmatmul.mubr.bf16.gmra.mrb[4].mxu1 %v2160_v24  ;;  %v2255_v23 = vld [vmem:[%s2323_s28 + $0x110] ss:$8 sps:$4 sm:$0xff]  }
  0x4f   : > { %791 = vmatprep.mubr.bf16.mxu0 %v2161_v25  ;;  %935 = vmatprep.mubr.bf16.mxu1 %v2163_v26  ;;  %v2256_v24 = vld [vmem:[%s2323_s28 + $0x230] ss:$8 sps:$4 sm:$0xff]   ;;  %v283_v25 = vlaneseq  ;;  %s1856_s28 = sshll.u32 %s2837_s16, 2 }
  0x50   : > { %s2475_s16 = scalar_lea.vmem %s2835_s3, %s1856_s28 }
  0x51   : > { %v284_v26 = vshrl.u32 %v283_v25, 7 }
  0x56   : > { %792 = vmatmul.mubr.bf16.gmra.mrb[8].mxu0 %v2165_v27  ;;  %936 = vmatmul.mubr.bf16.gmra.mrb[8].mxu1 %v2166_v28  ;;  %v285_v27 = vsub.s32 0, %v284_v26  ;;  %v282_v28 = vld [vmem:[%s2834_s2] sm:$0x7] }
  0x57   : > { %799 = vmatprep.mubr.bf16.mxu0 %v2167_v29  ;;  %943 = vmatprep.mubr.bf16.mxu1 %v2169_v30  ;;  %v1282_v30 = vsub.s32 1, %v284_v26 }
  0x58   : > { %v2457_v29 = vrot.slane %v282_v28, %v285_v27 }
  0x5e   : > { %800 = vmatmul.mubr.bf16.gmra.mrb[12].mxu0 %v2171_v31  ;;  %944 = vmatmul.mubr.bf16.gmra.mrb[12].mxu1 %v2172_v32  ;;  %v1358_v32 = vsub.s32 2, %v284_v26 }
  0x5f   : > { %807 = vmatprep.mubr.bf16.mxu0 %v2173_v33  ;;  %951 = vmatprep.mubr.bf16.mxu1 %v2175_v34 }
  0x66   : > { %808 = vmatmul.mubr.bf16.gmra.mrb[16].mxu0 %v2177_v35  ;;  %952 = vmatmul.mubr.bf16.gmra.mrb[16].mxu1 %v2178_v36 }
  0x67   : > { %815 = vmatprep.mubr.bf16.mxu0 %v2179_v37  ;;  %959 = vmatprep.mubr.bf16.mxu1 %v2181_v38  ;;  %v2461_v38 = vrot.slane %v282_v28, %v1282_v30 }
  0x6e   : > { %816 = vmatmul.mubr.bf16.gmra.mrb[20].mxu0 %v2183_v39  ;;  %960 = vmatmul.mubr.bf16.gmra.mrb[20].mxu1 %v2184_v40 }
  0x6f   : > { %823 = vmatprep.mubr.bf16.mxu0 %v2185_v41  ;;  %967 = vmatprep.mubr.bf16.mxu1 %v2187_v42 }
  0x76   : > { %824 = vmatmul.mubr.bf16.gmra.mrb[24].mxu0 %v2189_v43  ;;  %968 = vmatmul.mubr.bf16.gmra.mrb[24].mxu1 %v2190_v44  ;;  %v2463_v43 = vrot.slane %v282_v28, %v1358_v32 }
  0x77   : > { %831 = vmatprep.mubr.bf16.mxu0 %v2191_v45  ;;  %975 = vmatprep.mubr.bf16.mxu1 %v2193_v46 }
  0x7e   : > { %832 = vmatmul.mubr.bf16.gmra.mrb[28].mxu0 %v2195_v47  ;;  %976 = vmatmul.mubr.bf16.gmra.mrb[28].mxu1 %v2196_v48 }
  0x7f   : > { %839 = vmatprep.mubr.bf16.mxu0 %v2197_v49  ;;  %983 = vmatprep.mubr.bf16.mxu1 %v2199_v50 }
  0x86   : > { %840 = vmatmul.mubr.bf16.gmra.mrb[32].mxu0 %v2201_v51  ;;  %984 = vmatmul.mubr.bf16.gmra.mrb[32].mxu1 %v2202_v52 }
  0x87   : > { %847 = vmatprep.mubr.bf16.mxu0 %v2203_v53  ;;  %991 = vmatprep.mubr.bf16.mxu1 %v2205_v54 }
  0x8e   : > { %848 = vmatmul.mubr.bf16.gmra.mrb[36].mxu0 %v2207_v55  ;;  %992 = vmatmul.mubr.bf16.gmra.mrb[36].mxu1 %v2208_v56 }
  0x8f   : > { %855 = vmatprep.mubr.bf16.mxu0 %v2209_v57  ;;  %999 = vmatprep.mubr.bf16.mxu1 %v2211_v58 }
  0x96   : > { %856 = vmatmul.mubr.bf16.gmra.mrb[40].mxu0 %v2213_v59  ;;  %1000 = vmatmul.mubr.bf16.gmra.mrb[40].mxu1 %v2214_v60 }
  0x97   : > { %863 = vmatprep.mubr.bf16.mxu0 %v2215_v61  ;;  %1007 = vmatprep.mubr.bf16.mxu1 %v2217_v62 }
  0x9e   : > { %864 = vmatmul.mubr.bf16.gmra.mrb[44].mxu0 %v2219_v63  ;;  %1008 = vmatmul.mubr.bf16.gmra.mrb[44].mxu1 %v2220_v0 }
  0x9f   : > { %871 = vmatprep.mubr.bf16.mxu0 %v2221_v1  ;;  %1015 = vmatprep.mubr.bf16.mxu1 %v2223_v2 }
  0xa6   : > { %872 = vmatmul.mubr.bf16.gmra.mrb[48].mxu0 %v2225_v3  ;;  %1016 = vmatmul.mubr.bf16.gmra.mrb[48].mxu1 %v2226_v4 }
  0xa7   : > { %879 = vmatprep.mubr.bf16.mxu0 %v2227_v5  ;;  %1023 = vmatprep.mubr.bf16.mxu1 %v2229_v6 }
  0xae   : > { %880 = vmatmul.mubr.bf16.gmra.mrb[52].mxu0 %v2231_v7  ;;  %1024 = vmatmul.mubr.bf16.gmra.mrb[52].mxu1 %v2232_v8 }
  0xaf   : > { %887 = vmatprep.mubr.bf16.mxu0 %v2233_v9  ;;  %1031 = vmatprep.mubr.bf16.mxu1 %v2235_v10 }
  0xb6   : > { %888 = vmatmul.mubr.bf16.gmra.mrb[56].mxu0 %v2237_v11  ;;  %1032 = vmatmul.mubr.bf16.gmra.mrb[56].mxu1 %v2238_v12 }
  0xb7   : > { %895 = vmatprep.mubr.bf16.mxu0 %v2239_v13  ;;  %1039 = vmatprep.mubr.bf16.mxu1 %v2241_v14 }
  0xbe   : > { %896 = vmatmul.mubr.bf16.gmra.mrb[60].mxu0 %v2243_v15  ;;  %1040 = vmatmul.mubr.bf16.gmra.mrb[60].mxu1 %v2244_v16 }
  0xbf   : > { %903 = vmatprep.mubr.bf16.mxu0 %v2245_v17  ;;  %1047 = vmatprep.mubr.bf16.mxu1 %v2247_v18 }
  0xc6   : > { %904 = vmatmul.mubr.bf16.gmra.mrb[64].mxu0 %v2249_v19  ;;  %1048 = vmatmul.mubr.bf16.gmra.mrb[64].mxu1 %v2250_v20 }
  0xc7   : > { %911 = vmatprep.mubr.bf16.mxu0 %v2251_v21  ;;  %1055 = vmatprep.mubr.bf16.mxu1 %v2253_v22 }
  0xce   : > { %912 = vmatmul.mubr.bf16.gmra.mrb[68].mxu0 %v2255_v23  ;;  %1056 = vmatmul.mubr.bf16.gmra.mrb[68].mxu1 %v2256_v24 }
 0x119   : > { %v777_v31 = vpop.f32.mrb[0].mxu0  ;;  %v921_v33 = vpop.f32.mrb[0].mxu1 }
 0x11a   : > { %v778_v34 = vadd.f32 %v777_v31, %v2457_v29  ;;  %v922_v35 = vadd.f32 %v921_v33, %v2457_v29  ;;  %v779_v36 = vpop.f32.mrb[1].mxu0  ;;  %v923_v37 = vpop.f32.mrb[1].mxu1 }
 0x11b   : > { %v780_v39 = vpop.f32.mrb[2].mxu0  ;;  %v924_v40 = vpop.f32.mrb[2].mxu1 }
 0x11c   : > { %vm1064_vm0 = vcmp.ge.f32.partialorder %v778_v34, 0.0  ;;  %v1136_v41 = vmul.f32 0.01, %v778_v34  ;;  %vm1100_vm1 = vcmp.ge.f32.partialorder %v922_v35, 0.0  ;;  %v1172_v42 = vmul.f32 0.01, %v922_v35 }
 0x11d   : > { %v781_v44 = vadd.f32 %v780_v39, %v2457_v29  ;;  %v925_v45 = vadd.f32 %v924_v40, %v2457_v29  ;;  %v782_v46 = vpop.f32.mrb[3].mxu0  ;;  %v926_v47 = vpop.f32.mrb[3].mxu1 }
 0x11e   : > { %v1208_v48 = vsel %vm1064_vm0, %v778_v34, %v1136_v41  ;;  %v1244_v49 = vsel %vm1100_vm1, %v922_v35, %v1172_v42 }
 0x11f   : > { %v1284_v50 = vmul.f32 %v2461_v38, %v1208_v48  ;;  %v1320_v51 = vmul.f32 %v2461_v38, %v1244_v49  ;;  %vm1065_vm2 = vcmp.ge.f32.partialorder %v781_v44, 0.0  ;;  %v1137_v52 = vmul.f32 0.01, %v781_v44 }
 0x120   : > { %vm1101_vm3 = vcmp.ge.f32.partialorder %v925_v45, 0.0  ;;  %v1173_v53 = vmul.f32 0.01, %v925_v45 }
 0x121   : > { %v1360_v54 = vadd.f32 %v2463_v43, %v1284_v50  ;;  %v1396_v55 = vadd.f32 %v2463_v43, %v1320_v51  ;;  %v1209_v56 = vsel %vm1065_vm2, %v781_v44, %v1137_v52  ;;  %v785_v57 = vpop.f32.mrb[4].mxu0  ;;  %v929_v58 = vpop.f32.mrb[4].mxu1 }
 0x122   : > { %v1285_v59 = vmul.f32 %v2461_v38, %v1209_v56  ;;  %v1245_v60 = vsel %vm1101_vm3, %v925_v45, %v1173_v53  ;;  %v786_v61 = vadd.f32 %v785_v57, %v2457_v29  ;;  %v930_v62 = vadd.f32 %v929_v58, %v2457_v29  ;;  %v787_v63 = vpop.f32.mrb[5].mxu0  ;;  %v931_v0 = vpop.f32.mrb[5].mxu1 }
 0x123   : > { %v2020_v1 = vpack.c.bf16 %v1360_v54, %v1360_v54  ;;  %v2056_v2 = vpack.c.bf16 %v1396_v55, %v1396_v55  ;;  %v1321_v3 = vmul.f32 %v2461_v38, %v1245_v60  ;;  %v788_v4 = vpop.f32.mrb[6].mxu0  ;;  %v932_v5 = vpop.f32.mrb[6].mxu1 }
 0x124   : > { %v1361_v6 = vadd.f32 %v2463_v43, %v1285_v59  ;;  %vm1066_vm5 = vcmp.ge.f32.partialorder %v786_v61, 0.0  ;;  %v1138_v7 = vmul.f32 0.01, %v786_v61  ;;  %vm1102_vm6 = vcmp.ge.f32.partialorder %v930_v62, 0.0  ;;  %v790_v8 = vpop.f32.mrb[7].mxu0  ;;  %v934_v9 = vpop.f32.mrb[7].mxu1 }
 0x125   : > { %1721 = vst.msk [vmem:[%s2475_s16] sm:$0xf] %vm1720_vm4, %v2020_v1  ;;  %1757 = vst.msk [vmem:[%s2475_s16 + $0x90] sm:$0xf] %vm1720_vm4, %v2056_v2  ;;  %v1397_v10 = vadd.f32 %v2463_v43, %v1321_v3  ;;  %v1174_v11 = vmul.f32 0.01, %v930_v62  ;;  %v789_v12 = vadd.f32 %v788_v4, %v2457_v29  ;;  %v933_v13 = vadd.f32 %v932_v5, %v2457_v29 }
 0x126   : > { %v2021_v14 = vpack.c.bf16 %v1361_v6, %v1361_v6  ;;  %v1210_v15 = vsel %vm1066_vm5, %v786_v61, %v1138_v7 }
 0x127   : > { %v2057_v16 = vpack.c.bf16 %v1397_v10, %v1397_v10  ;;  %v1286_v17 = vmul.f32 %v2461_v38, %v1210_v15  ;;  %v1246_v18 = vsel %vm1102_vm6, %v930_v62, %v1174_v11  ;;  %vm1067_vm7 = vcmp.ge.f32.partialorder %v789_v12, 0.0 }
 0x128   : > { %1722 = vst.msk [vmem:[%s2475_s16 + $0x4] sm:$0xf] %vm1720_vm4, %v2021_v14  ;;  %v1322_v19 = vmul.f32 %v2461_v38, %v1246_v18  ;;  %v1139_v20 = vmul.f32 0.01, %v789_v12  ;;  %vm1103_vm8 = vcmp.ge.f32.partialorder %v933_v13, 0.0 }
 0x129   : > { %v1175_v21 = vmul.f32 0.01, %v933_v13  ;;  %1758 = vst.msk [vmem:[%s2475_s16 + $0x94] sm:$0xf] %vm1720_vm4, %v2057_v16  ;;  %v1362_v22 = vadd.f32 %v2463_v43, %v1286_v17  ;;  %v793_v23 = vpop.f32.mrb[8].mxu0  ;;  %v937_v24 = vpop.f32.mrb[8].mxu1 }
 0x12a   : > { %v1398_v25 = vadd.f32 %v2463_v43, %v1322_v19  ;;  %v1211_v26 = vsel %vm1067_vm7, %v789_v12, %v1139_v20  ;;  %v794_v28 = vadd.f32 %v793_v23, %v2457_v29  ;;  %v795_v30 = vpop.f32.mrb[9].mxu0  ;;  %v939_v31 = vpop.f32.mrb[9].mxu1  ;;  %v938_v35 = vadd.f32 %v937_v24, %v2457_v29 }
 0x12b   : > { %v1247_v27 = vsel %vm1103_vm8, %v933_v13, %v1175_v21  ;;  %v2022_v32 = vpack.c.bf16 %v1362_v22, %v1362_v22  ;;  %v1287_v33 = vmul.f32 %v2461_v38, %v1211_v26  ;;  %v796_v36 = vpop.f32.mrb[10].mxu0  ;;  %v940_v37 = vpop.f32.mrb[10].mxu1 }
 0x12c   : > { %v1323_v34 = vmul.f32 %v2461_v38, %v1247_v27  ;;  %v2058_v39 = vpack.c.bf16 %v1398_v25, %v1398_v25  ;;  %vm1068_vm9 = vcmp.ge.f32.partialorder %v794_v28, 0.0  ;;  %v1140_v40 = vmul.f32 0.01, %v794_v28  ;;  %v798_v42 = vpop.f32.mrb[11].mxu0  ;;  %v942_v44 = vpop.f32.mrb[11].mxu1 }
 0x12d   : > { %v797_v41 = vadd.f32 %v796_v36, %v2457_v29  ;;  %1723 = vst.msk [vmem:[%s2475_s16 + $0x8] sm:$0xf] %vm1720_vm4, %v2022_v32  ;;  %v1363_v45 = vadd.f32 %v2463_v43, %v1287_v33  ;;  %vm1104_vm10 = vcmp.ge.f32.partialorder %v938_v35, 0.0  ;;  %v1176_v47 = vmul.f32 0.01, %v938_v35 }
 0x12e   : > { %v1399_v46 = vadd.f32 %v2463_v43, %v1323_v34  ;;  %1759 = vst.msk [vmem:[%s2475_s16 + $0x98] sm:$0xf] %vm1720_vm4, %v2058_v39  ;;  %v1212_v48 = vsel %vm1068_vm9, %v794_v28, %v1140_v40  ;;  %v941_v50 = vadd.f32 %v940_v37, %v2457_v29 }
 0x12f   : > { %vm1069_vm11 = vcmp.ge.f32.partialorder %v797_v41, 0.0  ;;  %v1141_v49 = vmul.f32 0.01, %v797_v41  ;;  %v2023_v51 = vpack.c.bf16 %v1363_v45, %v1363_v45  ;;  %v1288_v53 = vmul.f32 %v2461_v38, %v1212_v48 }
 0x130   : > { %v2059_v52 = vpack.c.bf16 %v1399_v46, %v1399_v46  ;;  %v1248_v54 = vsel %vm1104_vm10, %v938_v35, %v1176_v47  ;;  %vm1105_vm12 = vcmp.ge.f32.partialorder %v941_v50, 0.0  ;;  %v1177_v57 = vmul.f32 0.01, %v941_v50 }
 0x131   : > { %v1324_v55 = vmul.f32 %v2461_v38, %v1248_v54  ;;  %v1213_v56 = vsel %vm1069_vm11, %v797_v41, %v1141_v49  ;;  %1724 = vst.msk [vmem:[%s2475_s16 + $0xc] sm:$0xf] %vm1720_vm4, %v2023_v51  ;;  %v1364_v58 = vadd.f32 %v2463_v43, %v1288_v53  ;;  %v801_v60 = vpop.f32.mrb[12].mxu0  ;;  %v945_v61 = vpop.f32.mrb[12].mxu1 }
 0x132   : > { %1760 = vst.msk [vmem:[%s2475_s16 + $0x9c] sm:$0xf] %vm1720_vm4, %v2059_v52  ;;  %v1289_v59 = vmul.f32 %v2461_v38, %v1213_v56  ;;  %v1249_v63 = vsel %vm1105_vm12, %v941_v50, %v1177_v57  ;;  %v802_v0 = vadd.f32 %v801_v60, %v2457_v29  ;;  %v946_v1 = vadd.f32 %v945_v61, %v2457_v29  ;;  %v803_v2 = vpop.f32.mrb[13].mxu0  ;;  %v947_v3 = vpop.f32.mrb[13].mxu1 }
 0x133   : > { %v1400_v62 = vadd.f32 %v2463_v43, %v1324_v55  ;;  %v2024_v4 = vpack.c.bf16 %v1364_v58, %v1364_v58  ;;  %v1325_v6 = vmul.f32 %v2461_v38, %v1249_v63  ;;  %v804_v7 = vpop.f32.mrb[14].mxu0  ;;  %v948_v8 = vpop.f32.mrb[14].mxu1 }
 0x134   : > { %v1365_v5 = vadd.f32 %v2463_v43, %v1289_v59  ;;  %vm1070_vm13 = vcmp.ge.f32.partialorder %v802_v0, 0.0  ;;  %v1142_v10 = vmul.f32 0.01, %v802_v0  ;;  %vm1106_vm14 = vcmp.ge.f32.partialorder %v946_v1, 0.0  ;;  %v806_v11 = vpop.f32.mrb[15].mxu0  ;;  %v950_v12 = vpop.f32.mrb[15].mxu1 }
 0x135   : > { %v2060_v9 = vpack.c.bf16 %v1400_v62, %v1400_v62  ;;  %1725 = vst.msk [vmem:[%s2475_s16 + $0x10] sm:$0xf] %vm1720_vm4, %v2024_v4  ;;  %v1401_v14 = vadd.f32 %v2463_v43, %v1325_v6  ;;  %v1178_v15 = vmul.f32 0.01, %v946_v1  ;;  %v805_v16 = vadd.f32 %v804_v7, %v2457_v29 }
 0x136   : > { %v2025_v13 = vpack.c.bf16 %v1365_v5, %v1365_v5  ;;  %v1214_v17 = vsel %vm1070_vm13, %v802_v0, %v1142_v10  ;;  %v949_v18 = vadd.f32 %v948_v8, %v2457_v29 }
 0x137   : > { %1761 = vst.msk [vmem:[%s2475_s16 + $0xa0] sm:$0xf] %vm1720_vm4, %v2060_v9  ;;  %v2061_v19 = vpack.c.bf16 %v1401_v14, %v1401_v14  ;;  %v1290_v20 = vmul.f32 %v2461_v38, %v1214_v17  ;;  %v1250_v21 = vsel %vm1106_vm14, %v946_v1, %v1178_v15  ;;  %vm1071_vm15 = vcmp.ge.f32.partialorder %v805_v16, 0.0 }
 0x138   : > { %1726 = vst.msk [vmem:[%s2475_s16 + $0x14] sm:$0xf] %vm1720_vm4, %v2025_v13  ;;  %v1326_v22 = vmul.f32 %v2461_v38, %v1250_v21  ;;  %v1143_v23 = vmul.f32 0.01, %v805_v16  ;;  %vm1107_vm0 = vcmp.ge.f32.partialorder %v949_v18, 0.0 }
 0x139   : > { %v1179_v24 = vmul.f32 0.01, %v949_v18  ;;  %1762 = vst.msk [vmem:[%s2475_s16 + $0xa4] sm:$0xf] %vm1720_vm4, %v2061_v19  ;;  %v1366_v25 = vadd.f32 %v2463_v43, %v1290_v20  ;;  %v809_v26 = vpop.f32.mrb[16].mxu0  ;;  %v953_v27 = vpop.f32.mrb[16].mxu1 }
 0x13a   : > { %v1402_v28 = vadd.f32 %v2463_v43, %v1326_v22  ;;  %v1215_v30 = vsel %vm1071_vm15, %v805_v16, %v1143_v23  ;;  %v810_v32 = vadd.f32 %v809_v26, %v2457_v29  ;;  %v811_v33 = vpop.f32.mrb[17].mxu0  ;;  %v955_v34 = vpop.f32.mrb[17].mxu1  ;;  %v954_v39 = vadd.f32 %v953_v27, %v2457_v29 }
 0x13b   : > { %v1251_v31 = vsel %vm1107_vm0, %v949_v18, %v1179_v24  ;;  %v2026_v35 = vpack.c.bf16 %v1366_v25, %v1366_v25  ;;  %v1291_v36 = vmul.f32 %v2461_v38, %v1215_v30  ;;  %v812_v40 = vpop.f32.mrb[18].mxu0  ;;  %v956_v41 = vpop.f32.mrb[18].mxu1 }
 0x13c   : > { %v1327_v37 = vmul.f32 %v2461_v38, %v1251_v31  ;;  %v2062_v42 = vpack.c.bf16 %v1402_v28, %v1402_v28  ;;  %vm1072_vm1 = vcmp.ge.f32.partialorder %v810_v32, 0.0  ;;  %v1144_v44 = vmul.f32 0.01, %v810_v32  ;;  %v814_v46 = vpop.f32.mrb[19].mxu0  ;;  %v958_v47 = vpop.f32.mrb[19].mxu1 }
 0x13d   : > { %v813_v45 = vadd.f32 %v812_v40, %v2457_v29  ;;  %1727 = vst.msk [vmem:[%s2475_s16 + $0x18] sm:$0xf] %vm1720_vm4, %v2026_v35  ;;  %v1367_v48 = vadd.f32 %v2463_v43, %v1291_v36  ;;  %vm1108_vm2 = vcmp.ge.f32.partialorder %v954_v39, 0.0  ;;  %v1180_v50 = vmul.f32 0.01, %v954_v39 }
 0x13e   : > { %v1403_v49 = vadd.f32 %v2463_v43, %v1327_v37  ;;  %1763 = vst.msk [vmem:[%s2475_s16 + $0xa8] sm:$0xf] %vm1720_vm4, %v2062_v42  ;;  %v1216_v51 = vsel %vm1072_vm1, %v810_v32, %v1144_v44  ;;  %v957_v53 = vadd.f32 %v956_v41, %v2457_v29 }
 0x13f   : > { %vm1073_vm3 = vcmp.ge.f32.partialorder %v813_v45, 0.0  ;;  %v1145_v52 = vmul.f32 0.01, %v813_v45  ;;  %v2027_v54 = vpack.c.bf16 %v1367_v48, %v1367_v48  ;;  %v1292_v56 = vmul.f32 %v2461_v38, %v1216_v51 }
 0x140   : > { %v2063_v55 = vpack.c.bf16 %v1403_v49, %v1403_v49  ;;  %v1252_v57 = vsel %vm1108_vm2, %v954_v39, %v1180_v50  ;;  %vm1109_vm5 = vcmp.ge.f32.partialorder %v957_v53, 0.0  ;;  %v1181_v60 = vmul.f32 0.01, %v957_v53 }
 0x141   : > { %v1328_v58 = vmul.f32 %v2461_v38, %v1252_v57  ;;  %v1217_v59 = vsel %vm1073_vm3, %v813_v45, %v1145_v52  ;;  %1728 = vst.msk [vmem:[%s2475_s16 + $0x1c] sm:$0xf] %vm1720_vm4, %v2027_v54  ;;  %v1368_v61 = vadd.f32 %v2463_v43, %v1292_v56  ;;  %v817_v63 = vpop.f32.mrb[20].mxu0  ;;  %v961_v0 = vpop.f32.mrb[20].mxu1 }
 0x142   : > { %1764 = vst.msk [vmem:[%s2475_s16 + $0xac] sm:$0xf] %vm1720_vm4, %v2063_v55  ;;  %v1293_v62 = vmul.f32 %v2461_v38, %v1217_v59  ;;  %v1253_v2 = vsel %vm1109_vm5, %v957_v53, %v1181_v60  ;;  %v818_v3 = vadd.f32 %v817_v63, %v2457_v29  ;;  %v962_v4 = vadd.f32 %v961_v0, %v2457_v29  ;;  %v819_v5 = vpop.f32.mrb[21].mxu0  ;;  %v963_v6 = vpop.f32.mrb[21].mxu1 }
 0x143   : > { %v1404_v1 = vadd.f32 %v2463_v43, %v1328_v58  ;;  %v2028_v7 = vpack.c.bf16 %v1368_v61, %v1368_v61  ;;  %v1329_v9 = vmul.f32 %v2461_v38, %v1253_v2  ;;  %v820_v10 = vpop.f32.mrb[22].mxu0  ;;  %v964_v11 = vpop.f32.mrb[22].mxu1 }
 0x144   : > { %v1369_v8 = vadd.f32 %v2463_v43, %v1293_v62  ;;  %vm1074_vm6 = vcmp.ge.f32.partialorder %v818_v3, 0.0  ;;  %v1146_v13 = vmul.f32 0.01, %v818_v3  ;;  %vm1110_vm7 = vcmp.ge.f32.partialorder %v962_v4, 0.0  ;;  %v822_v14 = vpop.f32.mrb[23].mxu0  ;;  %v966_v15 = vpop.f32.mrb[23].mxu1 }
 0x145   : > { %v2064_v12 = vpack.c.bf16 %v1404_v1, %v1404_v1  ;;  %1729 = vst.msk [vmem:[%s2475_s16 + $0x20] sm:$0xf] %vm1720_vm4, %v2028_v7  ;;  %v1405_v17 = vadd.f32 %v2463_v43, %v1329_v9  ;;  %v1182_v18 = vmul.f32 0.01, %v962_v4  ;;  %v821_v19 = vadd.f32 %v820_v10, %v2457_v29 }
 0x146   : > { %v2029_v16 = vpack.c.bf16 %v1369_v8, %v1369_v8  ;;  %v1218_v20 = vsel %vm1074_vm6, %v818_v3, %v1146_v13  ;;  %v965_v21 = vadd.f32 %v964_v11, %v2457_v29 }
 0x147   : > { %1765 = vst.msk [vmem:[%s2475_s16 + $0xb0] sm:$0xf] %vm1720_vm4, %v2064_v12  ;;  %v2065_v22 = vpack.c.bf16 %v1405_v17, %v1405_v17  ;;  %v1294_v23 = vmul.f32 %v2461_v38, %v1218_v20  ;;  %v1254_v24 = vsel %vm1110_vm7, %v962_v4, %v1182_v18  ;;  %vm1075_vm8 = vcmp.ge.f32.partialorder %v821_v19, 0.0 }
 0x148   : > { %1730 = vst.msk [vmem:[%s2475_s16 + $0x24] sm:$0xf] %vm1720_vm4, %v2029_v16  ;;  %v1330_v25 = vmul.f32 %v2461_v38, %v1254_v24  ;;  %v1147_v26 = vmul.f32 0.01, %v821_v19  ;;  %vm1111_vm9 = vcmp.ge.f32.partialorder %v965_v21, 0.0 }
 0x149   : > { %v1183_v27 = vmul.f32 0.01, %v965_v21  ;;  %1766 = vst.msk [vmem:[%s2475_s16 + $0xb4] sm:$0xf] %vm1720_vm4, %v2065_v22  ;;  %v1370_v28 = vadd.f32 %v2463_v43, %v1294_v23  ;;  %v825_v30 = vpop.f32.mrb[24].mxu0  ;;  %v969_v31 = vpop.f32.mrb[24].mxu1 }
 0x14a   : > { %v1406_v32 = vadd.f32 %v2463_v43, %v1330_v25  ;;  %v1219_v33 = vsel %vm1075_vm8, %v821_v19, %v1147_v26  ;;  %v826_v35 = vadd.f32 %v825_v30, %v2457_v29  ;;  %v827_v36 = vpop.f32.mrb[25].mxu0  ;;  %v971_v37 = vpop.f32.mrb[25].mxu1  ;;  %v970_v42 = vadd.f32 %v969_v31, %v2457_v29 }
 0x14b   : > { %v1255_v34 = vsel %vm1111_vm9, %v965_v21, %v1183_v27  ;;  %v2030_v39 = vpack.c.bf16 %v1370_v28, %v1370_v28  ;;  %v1295_v40 = vmul.f32 %v2461_v38, %v1219_v33  ;;  %v828_v44 = vpop.f32.mrb[26].mxu0  ;;  %v972_v45 = vpop.f32.mrb[26].mxu1 }
 0x14c   : > { %v1331_v41 = vmul.f32 %v2461_v38, %v1255_v34  ;;  %v2066_v46 = vpack.c.bf16 %v1406_v32, %v1406_v32  ;;  %vm1076_vm10 = vcmp.ge.f32.partialorder %v826_v35, 0.0  ;;  %v1148_v47 = vmul.f32 0.01, %v826_v35  ;;  %v830_v49 = vpop.f32.mrb[27].mxu0  ;;  %v974_v50 = vpop.f32.mrb[27].mxu1 }
 0x14d   : > { %v829_v48 = vadd.f32 %v828_v44, %v2457_v29  ;;  %1731 = vst.msk [vmem:[%s2475_s16 + $0x28] sm:$0xf] %vm1720_vm4, %v2030_v39  ;;  %v1371_v51 = vadd.f32 %v2463_v43, %v1295_v40  ;;  %vm1112_vm11 = vcmp.ge.f32.partialorder %v970_v42, 0.0  ;;  %v1184_v53 = vmul.f32 0.01, %v970_v42 }
 0x14e   : > { %v1407_v52 = vadd.f32 %v2463_v43, %v1331_v41  ;;  %1767 = vst.msk [vmem:[%s2475_s16 + $0xb8] sm:$0xf] %vm1720_vm4, %v2066_v46  ;;  %v1220_v54 = vsel %vm1076_vm10, %v826_v35, %v1148_v47  ;;  %v973_v56 = vadd.f32 %v972_v45, %v2457_v29 }
 0x14f   : > { %vm1077_vm12 = vcmp.ge.f32.partialorder %v829_v48, 0.0  ;;  %v1149_v55 = vmul.f32 0.01, %v829_v48  ;;  %v2031_v57 = vpack.c.bf16 %v1371_v51, %v1371_v51  ;;  %v1296_v59 = vmul.f32 %v2461_v38, %v1220_v54 }
 0x150   : > { %v2067_v58 = vpack.c.bf16 %v1407_v52, %v1407_v52  ;;  %v1256_v60 = vsel %vm1112_vm11, %v970_v42, %v1184_v53  ;;  %vm1113_vm13 = vcmp.ge.f32.partialorder %v973_v56, 0.0  ;;  %v1185_v63 = vmul.f32 0.01, %v973_v56 }
 0x151   : > { %v1332_v61 = vmul.f32 %v2461_v38, %v1256_v60  ;;  %v1221_v62 = vsel %vm1077_vm12, %v829_v48, %v1149_v55  ;;  %1732 = vst.msk [vmem:[%s2475_s16 + $0x2c] sm:$0xf] %vm1720_vm4, %v2031_v57  ;;  %v1372_v0 = vadd.f32 %v2463_v43, %v1296_v59  ;;  %v833_v2 = vpop.f32.mrb[28].mxu0  ;;  %v977_v3 = vpop.f32.mrb[28].mxu1 }
 0x152   : > { %1768 = vst.msk [vmem:[%s2475_s16 + $0xbc] sm:$0xf] %vm1720_vm4, %v2067_v58  ;;  %v1297_v1 = vmul.f32 %v2461_v38, %v1221_v62  ;;  %v1257_v5 = vsel %vm1113_vm13, %v973_v56, %v1185_v63  ;;  %v834_v6 = vadd.f32 %v833_v2, %v2457_v29  ;;  %v978_v7 = vadd.f32 %v977_v3, %v2457_v29  ;;  %v835_v8 = vpop.f32.mrb[29].mxu0  ;;  %v979_v9 = vpop.f32.mrb[29].mxu1 }
 0x153   : > { %v1408_v4 = vadd.f32 %v2463_v43, %v1332_v61  ;;  %v2032_v10 = vpack.c.bf16 %v1372_v0, %v1372_v0  ;;  %v1333_v12 = vmul.f32 %v2461_v38, %v1257_v5  ;;  %v836_v13 = vpop.f32.mrb[30].mxu0  ;;  %v980_v14 = vpop.f32.mrb[30].mxu1 }
 0x154   : > { %v1373_v11 = vadd.f32 %v2463_v43, %v1297_v1  ;;  %vm1078_vm14 = vcmp.ge.f32.partialorder %v834_v6, 0.0  ;;  %v1150_v16 = vmul.f32 0.01, %v834_v6  ;;  %vm1114_vm15 = vcmp.ge.f32.partialorder %v978_v7, 0.0  ;;  %v838_v17 = vpop.f32.mrb[31].mxu0  ;;  %v982_v18 = vpop.f32.mrb[31].mxu1 }
 0x155   : > { %v2068_v15 = vpack.c.bf16 %v1408_v4, %v1408_v4  ;;  %1733 = vst.msk [vmem:[%s2475_s16 + $0x30] sm:$0xf] %vm1720_vm4, %v2032_v10  ;;  %v1409_v20 = vadd.f32 %v2463_v43, %v1333_v12  ;;  %v1186_v21 = vmul.f32 0.01, %v978_v7  ;;  %v837_v22 = vadd.f32 %v836_v13, %v2457_v29 }
 0x156   : > { %v2033_v19 = vpack.c.bf16 %v1373_v11, %v1373_v11  ;;  %v1222_v23 = vsel %vm1078_vm14, %v834_v6, %v1150_v16  ;;  %v981_v24 = vadd.f32 %v980_v14, %v2457_v29 }
 0x157   : > { %1769 = vst.msk [vmem:[%s2475_s16 + $0xc0] sm:$0xf] %vm1720_vm4, %v2068_v15  ;;  %v2069_v25 = vpack.c.bf16 %v1409_v20, %v1409_v20  ;;  %v1298_v26 = vmul.f32 %v2461_v38, %v1222_v23  ;;  %v1258_v27 = vsel %vm1114_vm15, %v978_v7, %v1186_v21  ;;  %vm1079_vm0 = vcmp.ge.f32.partialorder %v837_v22, 0.0 }
 0x158   : > { %1734 = vst.msk [vmem:[%s2475_s16 + $0x34] sm:$0xf] %vm1720_vm4, %v2033_v19  ;;  %v1334_v28 = vmul.f32 %v2461_v38, %v1258_v27  ;;  %v1151_v30 = vmul.f32 0.01, %v837_v22  ;;  %vm1115_vm1 = vcmp.ge.f32.partialorder %v981_v24, 0.0 }
 0x159   : > { %v1187_v31 = vmul.f32 0.01, %v981_v24  ;;  %1770 = vst.msk [vmem:[%s2475_s16 + $0xc4] sm:$0xf] %vm1720_vm4, %v2069_v25  ;;  %v1374_v32 = vadd.f32 %v2463_v43, %v1298_v26  ;;  %v841_v33 = vpop.f32.mrb[32].mxu0  ;;  %v985_v34 = vpop.f32.mrb[32].mxu1 }
 0x15a   : > { %v1410_v35 = vadd.f32 %v2463_v43, %v1334_v28  ;;  %v1223_v36 = vsel %vm1079_vm0, %v837_v22, %v1151_v30  ;;  %v842_v39 = vadd.f32 %v841_v33, %v2457_v29  ;;  %v843_v40 = vpop.f32.mrb[33].mxu0  ;;  %v987_v41 = vpop.f32.mrb[33].mxu1  ;;  %v986_v46 = vadd.f32 %v985_v34, %v2457_v29 }
 0x15b   : > { %v1259_v37 = vsel %vm1115_vm1, %v981_v24, %v1187_v31  ;;  %v2034_v42 = vpack.c.bf16 %v1374_v32, %v1374_v32  ;;  %v1299_v44 = vmul.f32 %v2461_v38, %v1223_v36  ;;  %v844_v47 = vpop.f32.mrb[34].mxu0  ;;  %v988_v48 = vpop.f32.mrb[34].mxu1 }
 0x15c   : > { %v1335_v45 = vmul.f32 %v2461_v38, %v1259_v37  ;;  %v2070_v49 = vpack.c.bf16 %v1410_v35, %v1410_v35  ;;  %vm1080_vm2 = vcmp.ge.f32.partialorder %v842_v39, 0.0  ;;  %v1152_v50 = vmul.f32 0.01, %v842_v39  ;;  %v846_v52 = vpop.f32.mrb[35].mxu0  ;;  %v990_v53 = vpop.f32.mrb[35].mxu1 }
 0x15d   : > { %v845_v51 = vadd.f32 %v844_v47, %v2457_v29  ;;  %1735 = vst.msk [vmem:[%s2475_s16 + $0x38] sm:$0xf] %vm1720_vm4, %v2034_v42  ;;  %v1375_v54 = vadd.f32 %v2463_v43, %v1299_v44  ;;  %vm1116_vm3 = vcmp.ge.f32.partialorder %v986_v46, 0.0  ;;  %v1188_v56 = vmul.f32 0.01, %v986_v46 }
 0x15e   : > { %v1411_v55 = vadd.f32 %v2463_v43, %v1335_v45  ;;  %1771 = vst.msk [vmem:[%s2475_s16 + $0xc8] sm:$0xf] %vm1720_vm4, %v2070_v49  ;;  %v1224_v57 = vsel %vm1080_vm2, %v842_v39, %v1152_v50  ;;  %v989_v59 = vadd.f32 %v988_v48, %v2457_v29 }
 0x15f   : > { %vm1081_vm5 = vcmp.ge.f32.partialorder %v845_v51, 0.0  ;;  %v1153_v58 = vmul.f32 0.01, %v845_v51  ;;  %v2035_v60 = vpack.c.bf16 %v1375_v54, %v1375_v54  ;;  %v1300_v62 = vmul.f32 %v2461_v38, %v1224_v57 }
 0x160   : > { %v2071_v61 = vpack.c.bf16 %v1411_v55, %v1411_v55  ;;  %v1260_v63 = vsel %vm1116_vm3, %v986_v46, %v1188_v56  ;;  %vm1117_vm6 = vcmp.ge.f32.partialorder %v989_v59, 0.0  ;;  %v1189_v2 = vmul.f32 0.01, %v989_v59 }
 0x161   : > { %v1336_v0 = vmul.f32 %v2461_v38, %v1260_v63  ;;  %v1225_v1 = vsel %vm1081_vm5, %v845_v51, %v1153_v58  ;;  %1736 = vst.msk [vmem:[%s2475_s16 + $0x3c] sm:$0xf] %vm1720_vm4, %v2035_v60  ;;  %v1376_v3 = vadd.f32 %v2463_v43, %v1300_v62  ;;  %v849_v5 = vpop.f32.mrb[36].mxu0  ;;  %v993_v6 = vpop.f32.mrb[36].mxu1 }
 0x162   : > { %1772 = vst.msk [vmem:[%s2475_s16 + $0xcc] sm:$0xf] %vm1720_vm4, %v2071_v61  ;;  %v1301_v4 = vmul.f32 %v2461_v38, %v1225_v1  ;;  %v1261_v8 = vsel %vm1117_vm6, %v989_v59, %v1189_v2  ;;  %v850_v9 = vadd.f32 %v849_v5, %v2457_v29  ;;  %v994_v10 = vadd.f32 %v993_v6, %v2457_v29  ;;  %v851_v11 = vpop.f32.mrb[37].mxu0  ;;  %v995_v12 = vpop.f32.mrb[37].mxu1 }
 0x163   : > { %v1412_v7 = vadd.f32 %v2463_v43, %v1336_v0  ;;  %v2036_v13 = vpack.c.bf16 %v1376_v3, %v1376_v3  ;;  %v1337_v15 = vmul.f32 %v2461_v38, %v1261_v8  ;;  %v852_v16 = vpop.f32.mrb[38].mxu0  ;;  %v996_v17 = vpop.f32.mrb[38].mxu1 }
 0x164   : > { %v1377_v14 = vadd.f32 %v2463_v43, %v1301_v4  ;;  %vm1082_vm7 = vcmp.ge.f32.partialorder %v850_v9, 0.0  ;;  %v1154_v19 = vmul.f32 0.01, %v850_v9  ;;  %vm1118_vm8 = vcmp.ge.f32.partialorder %v994_v10, 0.0  ;;  %v854_v20 = vpop.f32.mrb[39].mxu0  ;;  %v998_v21 = vpop.f32.mrb[39].mxu1 }
 0x165   : > { %v2072_v18 = vpack.c.bf16 %v1412_v7, %v1412_v7  ;;  %1737 = vst.msk [vmem:[%s2475_s16 + $0x40] sm:$0xf] %vm1720_vm4, %v2036_v13  ;;  %v1413_v23 = vadd.f32 %v2463_v43, %v1337_v15  ;;  %v1190_v24 = vmul.f32 0.01, %v994_v10  ;;  %v853_v25 = vadd.f32 %v852_v16, %v2457_v29 }
 0x166   : > { %v2037_v22 = vpack.c.bf16 %v1377_v14, %v1377_v14  ;;  %v1226_v26 = vsel %vm1082_vm7, %v850_v9, %v1154_v19  ;;  %v997_v27 = vadd.f32 %v996_v17, %v2457_v29 }
 0x167   : > { %1773 = vst.msk [vmem:[%s2475_s16 + $0xd0] sm:$0xf] %vm1720_vm4, %v2072_v18  ;;  %v2073_v28 = vpack.c.bf16 %v1413_v23, %v1413_v23  ;;  %v1302_v30 = vmul.f32 %v2461_v38, %v1226_v26  ;;  %v1262_v31 = vsel %vm1118_vm8, %v994_v10, %v1190_v24  ;;  %vm1083_vm9 = vcmp.ge.f32.partialorder %v853_v25, 0.0 }
 0x168   : > { %1738 = vst.msk [vmem:[%s2475_s16 + $0x44] sm:$0xf] %vm1720_vm4, %v2037_v22  ;;  %v1338_v32 = vmul.f32 %v2461_v38, %v1262_v31  ;;  %v1155_v33 = vmul.f32 0.01, %v853_v25  ;;  %vm1119_vm10 = vcmp.ge.f32.partialorder %v997_v27, 0.0 }
 0x169   : > { %v1191_v34 = vmul.f32 0.01, %v997_v27  ;;  %1774 = vst.msk [vmem:[%s2475_s16 + $0xd4] sm:$0xf] %vm1720_vm4, %v2073_v28  ;;  %v1378_v35 = vadd.f32 %v2463_v43, %v1302_v30  ;;  %v857_v36 = vpop.f32.mrb[40].mxu0  ;;  %v1001_v37 = vpop.f32.mrb[40].mxu1 }
 0x16a   : > { %v1414_v39 = vadd.f32 %v2463_v43, %v1338_v32  ;;  %v1227_v40 = vsel %vm1083_vm9, %v853_v25, %v1155_v33  ;;  %v858_v42 = vadd.f32 %v857_v36, %v2457_v29  ;;  %v859_v44 = vpop.f32.mrb[41].mxu0  ;;  %v1003_v45 = vpop.f32.mrb[41].mxu1  ;;  %v1002_v49 = vadd.f32 %v1001_v37, %v2457_v29 }
 0x16b   : > { %v1263_v41 = vsel %vm1119_vm10, %v997_v27, %v1191_v34  ;;  %v2038_v46 = vpack.c.bf16 %v1378_v35, %v1378_v35  ;;  %v1303_v47 = vmul.f32 %v2461_v38, %v1227_v40  ;;  %v860_v50 = vpop.f32.mrb[42].mxu0  ;;  %v1004_v51 = vpop.f32.mrb[42].mxu1 }
 0x16c   : > { %v1339_v48 = vmul.f32 %v2461_v38, %v1263_v41  ;;  %v2074_v52 = vpack.c.bf16 %v1414_v39, %v1414_v39  ;;  %vm1084_vm11 = vcmp.ge.f32.partialorder %v858_v42, 0.0  ;;  %v1156_v53 = vmul.f32 0.01, %v858_v42  ;;  %v862_v55 = vpop.f32.mrb[43].mxu0  ;;  %v1006_v56 = vpop.f32.mrb[43].mxu1 }
 0x16d   : > { %v861_v54 = vadd.f32 %v860_v50, %v2457_v29  ;;  %1739 = vst.msk [vmem:[%s2475_s16 + $0x48] sm:$0xf] %vm1720_vm4, %v2038_v46  ;;  %v1379_v57 = vadd.f32 %v2463_v43, %v1303_v47  ;;  %vm1120_vm12 = vcmp.ge.f32.partialorder %v1002_v49, 0.0  ;;  %v1192_v59 = vmul.f32 0.01, %v1002_v49 }
 0x16e   : > { %v1415_v58 = vadd.f32 %v2463_v43, %v1339_v48  ;;  %1775 = vst.msk [vmem:[%s2475_s16 + $0xd8] sm:$0xf] %vm1720_vm4, %v2074_v52  ;;  %v1228_v60 = vsel %vm1084_vm11, %v858_v42, %v1156_v53  ;;  %v1005_v62 = vadd.f32 %v1004_v51, %v2457_v29 }
 0x16f   : > { %vm1085_vm13 = vcmp.ge.f32.partialorder %v861_v54, 0.0  ;;  %v1157_v61 = vmul.f32 0.01, %v861_v54  ;;  %v2039_v63 = vpack.c.bf16 %v1379_v57, %v1379_v57  ;;  %v1304_v1 = vmul.f32 %v2461_v38, %v1228_v60 }
 0x170   : > { %v2075_v0 = vpack.c.bf16 %v1415_v58, %v1415_v58  ;;  %v1264_v2 = vsel %vm1120_vm12, %v1002_v49, %v1192_v59  ;;  %vm1121_vm14 = vcmp.ge.f32.partialorder %v1005_v62, 0.0  ;;  %v1193_v5 = vmul.f32 0.01, %v1005_v62 }
 0x171   : > { %v1340_v3 = vmul.f32 %v2461_v38, %v1264_v2  ;;  %v1229_v4 = vsel %vm1085_vm13, %v861_v54, %v1157_v61  ;;  %1740 = vst.msk [vmem:[%s2475_s16 + $0x4c] sm:$0xf] %vm1720_vm4, %v2039_v63  ;;  %v1380_v6 = vadd.f32 %v2463_v43, %v1304_v1  ;;  %v865_v8 = vpop.f32.mrb[44].mxu0  ;;  %v1009_v9 = vpop.f32.mrb[44].mxu1 }
 0x172   : > { %1776 = vst.msk [vmem:[%s2475_s16 + $0xdc] sm:$0xf] %vm1720_vm4, %v2075_v0  ;;  %v1305_v7 = vmul.f32 %v2461_v38, %v1229_v4  ;;  %v1265_v11 = vsel %vm1121_vm14, %v1005_v62, %v1193_v5  ;;  %v866_v12 = vadd.f32 %v865_v8, %v2457_v29  ;;  %v1010_v13 = vadd.f32 %v1009_v9, %v2457_v29  ;;  %v867_v14 = vpop.f32.mrb[45].mxu0  ;;  %v1011_v15 = vpop.f32.mrb[45].mxu1 }
 0x173   : > { %v1416_v10 = vadd.f32 %v2463_v43, %v1340_v3  ;;  %v2040_v16 = vpack.c.bf16 %v1380_v6, %v1380_v6  ;;  %v1341_v18 = vmul.f32 %v2461_v38, %v1265_v11  ;;  %v868_v19 = vpop.f32.mrb[46].mxu0  ;;  %v1012_v20 = vpop.f32.mrb[46].mxu1 }
 0x174   : > { %v1381_v17 = vadd.f32 %v2463_v43, %v1305_v7  ;;  %vm1086_vm15 = vcmp.ge.f32.partialorder %v866_v12, 0.0  ;;  %v1158_v22 = vmul.f32 0.01, %v866_v12  ;;  %vm1122_vm0 = vcmp.ge.f32.partialorder %v1010_v13, 0.0  ;;  %v870_v23 = vpop.f32.mrb[47].mxu0  ;;  %v1014_v24 = vpop.f32.mrb[47].mxu1 }
 0x175   : > { %v2076_v21 = vpack.c.bf16 %v1416_v10, %v1416_v10  ;;  %1741 = vst.msk [vmem:[%s2475_s16 + $0x50] sm:$0xf] %vm1720_vm4, %v2040_v16  ;;  %v1417_v26 = vadd.f32 %v2463_v43, %v1341_v18  ;;  %v1194_v27 = vmul.f32 0.01, %v1010_v13  ;;  %v869_v28 = vadd.f32 %v868_v19, %v2457_v29 }
 0x176   : > { %v2041_v25 = vpack.c.bf16 %v1381_v17, %v1381_v17  ;;  %v1230_v30 = vsel %vm1086_vm15, %v866_v12, %v1158_v22  ;;  %v1013_v31 = vadd.f32 %v1012_v20, %v2457_v29 }
 0x177   : > { %1777 = vst.msk [vmem:[%s2475_s16 + $0xe0] sm:$0xf] %vm1720_vm4, %v2076_v21  ;;  %v2077_v32 = vpack.c.bf16 %v1417_v26, %v1417_v26  ;;  %v1306_v33 = vmul.f32 %v2461_v38, %v1230_v30  ;;  %v1266_v34 = vsel %vm1122_vm0, %v1010_v13, %v1194_v27  ;;  %vm1087_vm1 = vcmp.ge.f32.partialorder %v869_v28, 0.0 }
 0x178   : > { %1742 = vst.msk [vmem:[%s2475_s16 + $0x54] sm:$0xf] %vm1720_vm4, %v2041_v25  ;;  %v1342_v35 = vmul.f32 %v2461_v38, %v1266_v34  ;;  %v1159_v36 = vmul.f32 0.01, %v869_v28  ;;  %vm1123_vm2 = vcmp.ge.f32.partialorder %v1013_v31, 0.0 }
 0x179   : > { %v1195_v37 = vmul.f32 0.01, %v1013_v31  ;;  %1778 = vst.msk [vmem:[%s2475_s16 + $0xe4] sm:$0xf] %vm1720_vm4, %v2077_v32  ;;  %v1382_v39 = vadd.f32 %v2463_v43, %v1306_v33  ;;  %v873_v40 = vpop.f32.mrb[48].mxu0  ;;  %v1017_v41 = vpop.f32.mrb[48].mxu1 }
 0x17a   : > { %v1418_v42 = vadd.f32 %v2463_v43, %v1342_v35  ;;  %v1231_v44 = vsel %vm1087_vm1, %v869_v28, %v1159_v36  ;;  %v874_v46 = vadd.f32 %v873_v40, %v2457_v29  ;;  %v875_v47 = vpop.f32.mrb[49].mxu0  ;;  %v1019_v48 = vpop.f32.mrb[49].mxu1  ;;  %v1018_v52 = vadd.f32 %v1017_v41, %v2457_v29 }
 0x17b   : > { %v1267_v45 = vsel %vm1123_vm2, %v1013_v31, %v1195_v37  ;;  %v2042_v49 = vpack.c.bf16 %v1382_v39, %v1382_v39  ;;  %v1307_v50 = vmul.f32 %v2461_v38, %v1231_v44  ;;  %v876_v53 = vpop.f32.mrb[50].mxu0  ;;  %v1020_v54 = vpop.f32.mrb[50].mxu1 }
 0x17c   : > { %v1343_v51 = vmul.f32 %v2461_v38, %v1267_v45  ;;  %v2078_v55 = vpack.c.bf16 %v1418_v42, %v1418_v42  ;;  %vm1088_vm3 = vcmp.ge.f32.partialorder %v874_v46, 0.0  ;;  %v1160_v56 = vmul.f32 0.01, %v874_v46  ;;  %v878_v58 = vpop.f32.mrb[51].mxu0  ;;  %v1022_v59 = vpop.f32.mrb[51].mxu1 }
 0x17d   : > { %v877_v57 = vadd.f32 %v876_v53, %v2457_v29  ;;  %1743 = vst.msk [vmem:[%s2475_s16 + $0x58] sm:$0xf] %vm1720_vm4, %v2042_v49  ;;  %v1383_v60 = vadd.f32 %v2463_v43, %v1307_v50  ;;  %vm1124_vm5 = vcmp.ge.f32.partialorder %v1018_v52, 0.0  ;;  %v1196_v62 = vmul.f32 0.01, %v1018_v52 }
 0x17e   : > { %v1419_v61 = vadd.f32 %v2463_v43, %v1343_v51  ;;  %1779 = vst.msk [vmem:[%s2475_s16 + $0xe8] sm:$0xf] %vm1720_vm4, %v2078_v55  ;;  %v1232_v63 = vsel %vm1088_vm3, %v874_v46, %v1160_v56  ;;  %v1021_v1 = vadd.f32 %v1020_v54, %v2457_v29 }
 0x17f   : > { %vm1089_vm6 = vcmp.ge.f32.partialorder %v877_v57, 0.0  ;;  %v1161_v0 = vmul.f32 0.01, %v877_v57  ;;  %v2043_v2 = vpack.c.bf16 %v1383_v60, %v1383_v60  ;;  %v1308_v4 = vmul.f32 %v2461_v38, %v1232_v63 }
 0x180   : > { %v2079_v3 = vpack.c.bf16 %v1419_v61, %v1419_v61  ;;  %v1268_v5 = vsel %vm1124_vm5, %v1018_v52, %v1196_v62  ;;  %vm1125_vm7 = vcmp.ge.f32.partialorder %v1021_v1, 0.0  ;;  %v1197_v8 = vmul.f32 0.01, %v1021_v1 }
 0x181   : > { %v1344_v6 = vmul.f32 %v2461_v38, %v1268_v5  ;;  %v1233_v7 = vsel %vm1089_vm6, %v877_v57, %v1161_v0  ;;  %1744 = vst.msk [vmem:[%s2475_s16 + $0x5c] sm:$0xf] %vm1720_vm4, %v2043_v2  ;;  %v1384_v9 = vadd.f32 %v2463_v43, %v1308_v4  ;;  %v881_v11 = vpop.f32.mrb[52].mxu0  ;;  %v1025_v12 = vpop.f32.mrb[52].mxu1 }
 0x182   : > { %1780 = vst.msk [vmem:[%s2475_s16 + $0xec] sm:$0xf] %vm1720_vm4, %v2079_v3  ;;  %v1309_v10 = vmul.f32 %v2461_v38, %v1233_v7  ;;  %v1269_v14 = vsel %vm1125_vm7, %v1021_v1, %v1197_v8  ;;  %v882_v15 = vadd.f32 %v881_v11, %v2457_v29  ;;  %v1026_v16 = vadd.f32 %v1025_v12, %v2457_v29  ;;  %v883_v17 = vpop.f32.mrb[53].mxu0  ;;  %v1027_v18 = vpop.f32.mrb[53].mxu1 }
 0x183   : > { %v1420_v13 = vadd.f32 %v2463_v43, %v1344_v6  ;;  %v2044_v19 = vpack.c.bf16 %v1384_v9, %v1384_v9  ;;  %v1345_v21 = vmul.f32 %v2461_v38, %v1269_v14  ;;  %v884_v22 = vpop.f32.mrb[54].mxu0  ;;  %v1028_v23 = vpop.f32.mrb[54].mxu1 }
 0x184   : > { %v1385_v20 = vadd.f32 %v2463_v43, %v1309_v10  ;;  %vm1090_vm8 = vcmp.ge.f32.partialorder %v882_v15, 0.0  ;;  %v1162_v25 = vmul.f32 0.01, %v882_v15  ;;  %vm1126_vm9 = vcmp.ge.f32.partialorder %v1026_v16, 0.0  ;;  %v886_v26 = vpop.f32.mrb[55].mxu0  ;;  %v1030_v27 = vpop.f32.mrb[55].mxu1 }
 0x185   : > { %v2080_v24 = vpack.c.bf16 %v1420_v13, %v1420_v13  ;;  %1745 = vst.msk [vmem:[%s2475_s16 + $0x60] sm:$0xf] %vm1720_vm4, %v2044_v19  ;;  %v1421_v30 = vadd.f32 %v2463_v43, %v1345_v21  ;;  %v1198_v31 = vmul.f32 0.01, %v1026_v16  ;;  %v885_v32 = vadd.f32 %v884_v22, %v2457_v29 }
 0x186   : > { %v2045_v28 = vpack.c.bf16 %v1385_v20, %v1385_v20  ;;  %v1234_v33 = vsel %vm1090_vm8, %v882_v15, %v1162_v25  ;;  %v1029_v34 = vadd.f32 %v1028_v23, %v2457_v29 }
 0x187   : > { %1781 = vst.msk [vmem:[%s2475_s16 + $0xf0] sm:$0xf] %vm1720_vm4, %v2080_v24  ;;  %v2081_v35 = vpack.c.bf16 %v1421_v30, %v1421_v30  ;;  %v1310_v36 = vmul.f32 %v2461_v38, %v1234_v33  ;;  %v1270_v37 = vsel %vm1126_vm9, %v1026_v16, %v1198_v31  ;;  %vm1091_vm10 = vcmp.ge.f32.partialorder %v885_v32, 0.0 }
 0x188   : > { %1746 = vst.msk [vmem:[%s2475_s16 + $0x64] sm:$0xf] %vm1720_vm4, %v2045_v28  ;;  %v1346_v39 = vmul.f32 %v2461_v38, %v1270_v37  ;;  %v1163_v40 = vmul.f32 0.01, %v885_v32  ;;  %vm1127_vm11 = vcmp.ge.f32.partialorder %v1029_v34, 0.0 }
 0x189   : > { %v1199_v41 = vmul.f32 0.01, %v1029_v34  ;;  %1782 = vst.msk [vmem:[%s2475_s16 + $0xf4] sm:$0xf] %vm1720_vm4, %v2081_v35  ;;  %v1386_v42 = vadd.f32 %v2463_v43, %v1310_v36  ;;  %v889_v44 = vpop.f32.mrb[56].mxu0  ;;  %v1033_v45 = vpop.f32.mrb[56].mxu1 }
 0x18a   : > { %v1422_v46 = vadd.f32 %v2463_v43, %v1346_v39  ;;  %v1235_v47 = vsel %vm1091_vm10, %v885_v32, %v1163_v40  ;;  %v890_v49 = vadd.f32 %v889_v44, %v2457_v29  ;;  %v891_v50 = vpop.f32.mrb[57].mxu0  ;;  %v1035_v51 = vpop.f32.mrb[57].mxu1  ;;  %v1034_v55 = vadd.f32 %v1033_v45, %v2457_v29 }
 0x18b   : > { %v1271_v48 = vsel %vm1127_vm11, %v1029_v34, %v1199_v41  ;;  %v2046_v52 = vpack.c.bf16 %v1386_v42, %v1386_v42  ;;  %v1311_v53 = vmul.f32 %v2461_v38, %v1235_v47  ;;  %v892_v56 = vpop.f32.mrb[58].mxu0  ;;  %v1036_v57 = vpop.f32.mrb[58].mxu1 }
 0x18c   : > { %v1347_v54 = vmul.f32 %v2461_v38, %v1271_v48  ;;  %v2082_v58 = vpack.c.bf16 %v1422_v46, %v1422_v46  ;;  %vm1092_vm12 = vcmp.ge.f32.partialorder %v890_v49, 0.0  ;;  %v1164_v59 = vmul.f32 0.01, %v890_v49  ;;  %v894_v61 = vpop.f32.mrb[59].mxu0  ;;  %v1038_v62 = vpop.f32.mrb[59].mxu1 }
 0x18d   : > { %v893_v60 = vadd.f32 %v892_v56, %v2457_v29  ;;  %1747 = vst.msk [vmem:[%s2475_s16 + $0x68] sm:$0xf] %vm1720_vm4, %v2046_v52  ;;  %v1387_v63 = vadd.f32 %v2463_v43, %v1311_v53  ;;  %vm1128_vm13 = vcmp.ge.f32.partialorder %v1034_v55, 0.0  ;;  %v1200_v1 = vmul.f32 0.01, %v1034_v55 }
 0x18e   : > { %v1423_v0 = vadd.f32 %v2463_v43, %v1347_v54  ;;  %1783 = vst.msk [vmem:[%s2475_s16 + $0xf8] sm:$0xf] %vm1720_vm4, %v2082_v58  ;;  %v1236_v2 = vsel %vm1092_vm12, %v890_v49, %v1164_v59  ;;  %v1037_v4 = vadd.f32 %v1036_v57, %v2457_v29 }
 0x18f   : > { %vm1093_vm14 = vcmp.ge.f32.partialorder %v893_v60, 0.0  ;;  %v1165_v3 = vmul.f32 0.01, %v893_v60  ;;  %v2047_v5 = vpack.c.bf16 %v1387_v63, %v1387_v63  ;;  %v1312_v7 = vmul.f32 %v2461_v38, %v1236_v2 }
 0x190   : > { %v2083_v6 = vpack.c.bf16 %v1423_v0, %v1423_v0  ;;  %v1272_v8 = vsel %vm1128_vm13, %v1034_v55, %v1200_v1  ;;  %vm1129_vm15 = vcmp.ge.f32.partialorder %v1037_v4, 0.0  ;;  %v1201_v11 = vmul.f32 0.01, %v1037_v4 }
 0x191   : > { %v1348_v9 = vmul.f32 %v2461_v38, %v1272_v8  ;;  %v1237_v10 = vsel %vm1093_vm14, %v893_v60, %v1165_v3  ;;  %1748 = vst.msk [vmem:[%s2475_s16 + $0x6c] sm:$0xf] %vm1720_vm4, %v2047_v5  ;;  %v1388_v12 = vadd.f32 %v2463_v43, %v1312_v7  ;;  %v897_v14 = vpop.f32.mrb[60].mxu0  ;;  %v1041_v15 = vpop.f32.mrb[60].mxu1 }
 0x192   : > { %1784 = vst.msk [vmem:[%s2475_s16 + $0xfc] sm:$0xf] %vm1720_vm4, %v2083_v6  ;;  %v1313_v13 = vmul.f32 %v2461_v38, %v1237_v10  ;;  %v1273_v17 = vsel %vm1129_vm15, %v1037_v4, %v1201_v11  ;;  %v898_v18 = vadd.f32 %v897_v14, %v2457_v29  ;;  %v1042_v19 = vadd.f32 %v1041_v15, %v2457_v29  ;;  %v899_v20 = vpop.f32.mrb[61].mxu0  ;;  %v1043_v21 = vpop.f32.mrb[61].mxu1 }
 0x193   : > { %v1424_v16 = vadd.f32 %v2463_v43, %v1348_v9  ;;  %v2048_v22 = vpack.c.bf16 %v1388_v12, %v1388_v12  ;;  %v1349_v24 = vmul.f32 %v2461_v38, %v1273_v17  ;;  %v900_v25 = vpop.f32.mrb[62].mxu0  ;;  %v1044_v26 = vpop.f32.mrb[62].mxu1 }
 0x194   : > { %v1389_v23 = vadd.f32 %v2463_v43, %v1313_v13  ;;  %vm1094_vm0 = vcmp.ge.f32.partialorder %v898_v18, 0.0  ;;  %v1166_v28 = vmul.f32 0.01, %v898_v18  ;;  %vm1130_vm1 = vcmp.ge.f32.partialorder %v1042_v19, 0.0  ;;  %v902_v30 = vpop.f32.mrb[63].mxu0  ;;  %v1046_v31 = vpop.f32.mrb[63].mxu1 }
 0x195   : > { %v2084_v27 = vpack.c.bf16 %v1424_v16, %v1424_v16  ;;  %1749 = vst.msk [vmem:[%s2475_s16 + $0x70] sm:$0xf] %vm1720_vm4, %v2048_v22  ;;  %v1425_v33 = vadd.f32 %v2463_v43, %v1349_v24  ;;  %v1202_v34 = vmul.f32 0.01, %v1042_v19  ;;  %v901_v35 = vadd.f32 %v900_v25, %v2457_v29 }
 0x196   : > { %v2049_v32 = vpack.c.bf16 %v1389_v23, %v1389_v23  ;;  %v1238_v36 = vsel %vm1094_vm0, %v898_v18, %v1166_v28  ;;  %v1045_v37 = vadd.f32 %v1044_v26, %v2457_v29 }
 0x197   : > { %1785 = vst.msk [vmem:[%s2475_s16 + $0x100] sm:$0xf] %vm1720_vm4, %v2084_v27  ;;  %v2085_v39 = vpack.c.bf16 %v1425_v33, %v1425_v33  ;;  %v1314_v40 = vmul.f32 %v2461_v38, %v1238_v36  ;;  %v1274_v41 = vsel %vm1130_vm1, %v1042_v19, %v1202_v34  ;;  %vm1095_vm2 = vcmp.ge.f32.partialorder %v901_v35, 0.0 }
 0x198   : > { %1750 = vst.msk [vmem:[%s2475_s16 + $0x74] sm:$0xf] %vm1720_vm4, %v2049_v32  ;;  %v1350_v42 = vmul.f32 %v2461_v38, %v1274_v41  ;;  %v1167_v44 = vmul.f32 0.01, %v901_v35  ;;  %vm1131_vm3 = vcmp.ge.f32.partialorder %v1045_v37, 0.0 }
 0x199   : > { %v1203_v45 = vmul.f32 0.01, %v1045_v37  ;;  %1786 = vst.msk [vmem:[%s2475_s16 + $0x104] sm:$0xf] %vm1720_vm4, %v2085_v39  ;;  %v1390_v46 = vadd.f32 %v2463_v43, %v1314_v40  ;;  %v905_v47 = vpop.f32.mrb[64].mxu0  ;;  %v1049_v48 = vpop.f32.mrb[64].mxu1 }
 0x19a   : > { %v1426_v49 = vadd.f32 %v2463_v43, %v1350_v42  ;;  %v1239_v50 = vsel %vm1095_vm2, %v901_v35, %v1167_v44  ;;  %v906_v52 = vadd.f32 %v905_v47, %v2457_v29  ;;  %v907_v53 = vpop.f32.mrb[65].mxu0  ;;  %v1051_v54 = vpop.f32.mrb[65].mxu1  ;;  %v1050_v58 = vadd.f32 %v1049_v48, %v2457_v29 }
 0x19b   : > { %v1275_v51 = vsel %vm1131_vm3, %v1045_v37, %v1203_v45  ;;  %v2050_v55 = vpack.c.bf16 %v1390_v46, %v1390_v46  ;;  %v1315_v56 = vmul.f32 %v2461_v38, %v1239_v50  ;;  %v908_v59 = vpop.f32.mrb[66].mxu0  ;;  %v1052_v60 = vpop.f32.mrb[66].mxu1 }
 0x19c   : > { %v1351_v57 = vmul.f32 %v2461_v38, %v1275_v51  ;;  %v2086_v61 = vpack.c.bf16 %v1426_v49, %v1426_v49  ;;  %vm1096_vm5 = vcmp.ge.f32.partialorder %v906_v52, 0.0  ;;  %v1168_v62 = vmul.f32 0.01, %v906_v52  ;;  %v910_v0 = vpop.f32.mrb[67].mxu0  ;;  %v1054_v1 = vpop.f32.mrb[67].mxu1 }
 0x19d   : > { %v909_v63 = vadd.f32 %v908_v59, %v2457_v29  ;;  %1751 = vst.msk [vmem:[%s2475_s16 + $0x78] sm:$0xf] %vm1720_vm4, %v2050_v55  ;;  %v1391_v2 = vadd.f32 %v2463_v43, %v1315_v56  ;;  %vm1132_vm6 = vcmp.ge.f32.partialorder %v1050_v58, 0.0  ;;  %v1204_v4 = vmul.f32 0.01, %v1050_v58 }
 0x19e   : > { %v1427_v3 = vadd.f32 %v2463_v43, %v1351_v57  ;;  %1787 = vst.msk [vmem:[%s2475_s16 + $0x108] sm:$0xf] %vm1720_vm4, %v2086_v61  ;;  %v1240_v5 = vsel %vm1096_vm5, %v906_v52, %v1168_v62  ;;  %v1053_v7 = vadd.f32 %v1052_v60, %v2457_v29 }
 0x19f   : > { %vm1097_vm7 = vcmp.ge.f32.partialorder %v909_v63, 0.0  ;;  %v1169_v6 = vmul.f32 0.01, %v909_v63  ;;  %v2051_v8 = vpack.c.bf16 %v1391_v2, %v1391_v2  ;;  %v1316_v10 = vmul.f32 %v2461_v38, %v1240_v5 }
 0x1a0   : > { %v2087_v9 = vpack.c.bf16 %v1427_v3, %v1427_v3  ;;  %v1276_v11 = vsel %vm1132_vm6, %v1050_v58, %v1204_v4  ;;  %vm1133_vm8 = vcmp.ge.f32.partialorder %v1053_v7, 0.0  ;;  %v1205_v14 = vmul.f32 0.01, %v1053_v7 }
 0x1a1   : > { %v1352_v12 = vmul.f32 %v2461_v38, %v1276_v11  ;;  %v1241_v13 = vsel %vm1097_vm7, %v909_v63, %v1169_v6  ;;  %1752 = vst.msk [vmem:[%s2475_s16 + $0x7c] sm:$0xf] %vm1720_vm4, %v2051_v8  ;;  %v1392_v15 = vadd.f32 %v2463_v43, %v1316_v10  ;;  %v913_v17 = vpop.f32.mrb[68].mxu0  ;;  %v1057_v18 = vpop.f32.mrb[68].mxu1 }
 0x1a2   : > { %1788 = vst.msk [vmem:[%s2475_s16 + $0x10c] sm:$0xf] %vm1720_vm4, %v2087_v9  ;;  %v1317_v16 = vmul.f32 %v2461_v38, %v1241_v13  ;;  %v1277_v20 = vsel %vm1133_vm8, %v1053_v7, %v1205_v14  ;;  %v914_v21 = vadd.f32 %v913_v17, %v2457_v29  ;;  %v1058_v22 = vadd.f32 %v1057_v18, %v2457_v29  ;;  %v915_v23 = vpop.f32.mrb[69].mxu0  ;;  %v1059_v24 = vpop.f32.mrb[69].mxu1 }
 0x1a3   : > { %v1428_v19 = vadd.f32 %v2463_v43, %v1352_v12  ;;  %v2052_v25 = vpack.c.bf16 %v1392_v15, %v1392_v15  ;;  %v1353_v27 = vmul.f32 %v2461_v38, %v1277_v20  ;;  %v916_v28 = vpop.f32.mrb[70].mxu0  ;;  %v1060_v30 = vpop.f32.mrb[70].mxu1 }
 0x1a4   : > { %v1393_v26 = vadd.f32 %v2463_v43, %v1317_v16  ;;  %vm1098_vm9 = vcmp.ge.f32.partialorder %v914_v21, 0.0  ;;  %v1170_v32 = vmul.f32 0.01, %v914_v21  ;;  %vm1134_vm10 = vcmp.ge.f32.partialorder %v1058_v22, 0.0  ;;  %v918_v33 = vpop.f32.mrb[71].mxu0  ;;  %v1062_v34 = vpop.f32.mrb[71].mxu1 }
 0x1a5   : > { %v2088_v31 = vpack.c.bf16 %v1428_v19, %v1428_v19  ;;  %1753 = vst.msk [vmem:[%s2475_s16 + $0x80] sm:$0xf] %vm1720_vm4, %v2052_v25  ;;  %v1429_v36 = vadd.f32 %v2463_v43, %v1353_v27  ;;  %v1206_v37 = vmul.f32 0.01, %v1058_v22  ;;  %v917_v39 = vadd.f32 %v916_v28, %v2457_v29 }
 0x1a6   : > { %v2053_v35 = vpack.c.bf16 %v1393_v26, %v1393_v26  ;;  %v1242_v40 = vsel %vm1098_vm9, %v914_v21, %v1170_v32  ;;  %v1061_v41 = vadd.f32 %v1060_v30, %v2457_v29 }
 0x1a7   : > { %1789 = vst.msk [vmem:[%s2475_s16 + $0x110] sm:$0xf] %vm1720_vm4, %v2088_v31  ;;  %v2089_v42 = vpack.c.bf16 %v1429_v36, %v1429_v36  ;;  %v1318_v44 = vmul.f32 %v2461_v38, %v1242_v40  ;;  %v1278_v45 = vsel %vm1134_vm10, %v1058_v22, %v1206_v37  ;;  %vm1099_vm11 = vcmp.ge.f32.partialorder %v917_v39, 0.0 }
 0x1a8   : > { %1754 = vst.msk [vmem:[%s2475_s16 + $0x84] sm:$0xf] %vm1720_vm4, %v2053_v35  ;;  %v1354_v46 = vmul.f32 %v2461_v38, %v1278_v45  ;;  %v1171_v47 = vmul.f32 0.01, %v917_v39  ;;  %vm1135_vm12 = vcmp.ge.f32.partialorder %v1061_v41, 0.0 }
 0x1a9   : > { %v1207_v48 = vmul.f32 0.01, %v1061_v41  ;;  %1790 = vst.msk [vmem:[%s2475_s16 + $0x114] sm:$0xf] %vm1720_vm4, %v2089_v42  ;;  %v1394_v29 = vadd.f32 %v2463_v43, %v1318_v44 }
 0x1aa   : > { %v1430_v49 = vadd.f32 %v2463_v43, %v1354_v46  ;;  %v1243_v50 = vsel %vm1099_vm11, %v917_v39, %v1171_v47 }
 0x1ab   : > { %v1279_v51 = vsel %vm1135_vm12, %v1061_v41, %v1207_v48  ;;  %v2054_v52 = vpack.c.bf16 %v1394_v29, %v1394_v29  ;;  %v1319_v53 = vmul.f32 %v2461_v38, %v1243_v50 }
 0x1ac   : > { %v1355_v54 = vmul.f32 %v2461_v38, %v1279_v51  ;;  %v2090_v55 = vpack.c.bf16 %v1430_v49, %v1430_v49 }
 0x1ad   : > { %1755 = vst.msk [vmem:[%s2475_s16 + $0x88] sm:$0xf] %vm1720_vm4, %v2054_v52  ;;  %v1395_v56 = vadd.f32 %v2463_v43, %v1319_v53 }
 0x1ae   : > { %v1431_v57 = vadd.f32 %v2463_v43, %v1355_v54  ;;  %1791 = vst.msk [vmem:[%s2475_s16 + $0x118] sm:$0xf] %vm1720_vm4, %v2090_v55 }
 0x1af   : > { %v2055_v58 = vpack.c.bf16 %v1395_v56, %v1395_v56 }
 0x1b0   : > { %v2091_v59 = vpack.c.bf16 %v1431_v57, %v1431_v57 }
 0x1b1   : > { %1756 = vst.msk [vmem:[%s2475_s16 + $0x8c] sm:$0xf] %vm1720_vm4, %v2055_v58 }
 0x1b2   : > { %1792 = vst.msk [vmem:[%s2475_s16 + $0x11c] sm:$0xf] %vm1720_vm4, %v2091_v59 }
 0x1b3 PF: > { %s13_s12 = sadd.s32 1, %s2263_s12  }
 0x1b4   : > { %p10_p4 = scmp.ge.s32.totalorder %s13_s12, 4  }
 0x1b6   :  { %12 = sbr.rel (!%p10_p4) target bundleno = 1 (0x1), region = 62 }

// kernel: encoder_forward.6
= control target key start
LH: loop header
LB: loop body
LE: loop exit
PB: predicated region body
PF: predicated region fallthrough
CT: control target
= control target key end

     0   :  { %v94_v50 = vlaneseq  ;;  %vm564_vm2 = vcmask 60416   ;;  %vm571_vm8 = vcmask 57344   ;;  %s988_s1 = inlined_call_operand.vmem [shape: bf16[512,8], index: 1, kind: input, shape index: {}]   ;;  %s989_s0 = inlined_call_operand.vmem [shape: bf16[50,512], index: 0, kind: input, shape index: {}]   ;;  %s990_s2 = inlined_call_operand.vmem [shape: f32[3,8], index: 2, kind: input, shape index: {}]   ;;  %s991_s3 = inlined_call_operand.vmem [shape: bf16[50,8], index: 3, kind: output, shape index: {}]  }
   0x1   :  { %v719_v0 = vld [vmem:[%s988_s1 + $0x40] sm:$0xff]   ;;  %v723_v4 = vld [vmem:[%s988_s1 + $0x48] sm:$0xff]   ;;  %v727_v8 = vld [vmem:[%s988_s1 + $0x50] sm:$0xff]  }
   0x2   :  { %v720_v1 = vld [vmem:[%s988_s1 + $0xc0] sm:$0xff]   ;;  %639 = vmatprep.subr.bf16.mxu0 %v719_v0  ;;  %v724_v5 = vld [vmem:[%s988_s1 + $0xc8] sm:$0xff]   ;;  %v728_v9 = vld [vmem:[%s988_s1 + $0xd0] sm:$0xff]   ;;  %v95_v51 = vshrl.u32 %v94_v50, 7 }
   0x3   :  { %v721_v2 = vld [vmem:[%s988_s1] sm:$0xff]   ;;  %679 = vmatprep.subr.bf16.mxu1 %v720_v1  ;;  %v725_v6 = vld [vmem:[%s988_s1 + $0x8] sm:$0xff]   ;;  %v729_v10 = vld [vmem:[%s988_s1 + $0x10] sm:$0xff]  }
   0x4   :  { %v722_v3 = vld [vmem:[%s988_s1 + $0x80] sm:$0xff]   ;;  %640 = vmatpush3.bf16.msra.mxu0 %v721_v2  ;;  %v726_v7 = vld [vmem:[%s988_s1 + $0x88] sm:$0xff]   ;;  %v730_v11 = vld [vmem:[%s988_s1 + $0x90] sm:$0xff]   ;;  %v96_v52 = vsub.s32 0, %v95_v51  ;;  %v515_v61 = vsub.s32 1, %v95_v51 }
   0x5   :  { %680 = vmatpush3.bf16.msra.mxu1 %v722_v3  ;;  %641 = vmatprep.subr.bf16.mxu0 %v723_v4  ;;  %v731_v12 = vld [vmem:[%s988_s1 + $0x58] sm:$0xff]   ;;  %v735_v16 = vld [vmem:[%s988_s1 + $0x60] sm:$0xff]   ;;  %v739_v20 = vld [vmem:[%s988_s1 + $0x68] sm:$0xff]   ;;  %v526_v4 = vsub.s32 2, %v95_v51 }
   0x6   :  { %681 = vmatprep.subr.bf16.mxu1 %v724_v5  ;;  %v732_v13 = vld [vmem:[%s988_s1 + $0xd8] sm:$0xff]   ;;  %v736_v17 = vld [vmem:[%s988_s1 + $0xe0] sm:$0xff]   ;;  %v740_v21 = vld [vmem:[%s988_s1 + $0xe8] sm:$0xff]  }
   0x7   :  { %v733_v14 = vld [vmem:[%s988_s1 + $0x18] sm:$0xff]   ;;  %v737_v18 = vld [vmem:[%s988_s1 + $0x20] sm:$0xff]   ;;  %v741_v22 = vld [vmem:[%s988_s1 + $0x28] sm:$0xff]  }
   0x8   :  { %642 = vmatpush3.bf16.msra.mxu0 %v725_v6  ;;  %v734_v15 = vld [vmem:[%s988_s1 + $0x98] sm:$0xff]   ;;  %v738_v19 = vld [vmem:[%s988_s1 + $0xa0] sm:$0xff]   ;;  %v742_v23 = vld [vmem:[%s988_s1 + $0xa8] sm:$0xff]  }
   0x9   :  { %682 = vmatpush3.bf16.msra.mxu1 %v726_v7  ;;  %643 = vmatprep.subr.bf16.mxu0 %v727_v8  ;;  %v743_v24 = vld [vmem:[%s988_s1 + $0x70] sm:$0xff]   ;;  %v747_v28 = vld [vmem:[%s988_s1 + $0x78] sm:$0xff]   ;;  %v27_v42 = vld [vmem:[%s989_s0 + $0x60] sm:$0x11] }
   0xa   :  { %683 = vmatprep.subr.bf16.mxu1 %v728_v9  ;;  %v744_v25 = vld [vmem:[%s988_s1 + $0xf0] sm:$0xff]   ;;  %v748_v29 = vld [vmem:[%s988_s1 + $0xf8] sm:$0xff]   ;;  %v28_v43 = vld [vmem:[%s989_s0 + $0x68] sm:$0x11]  ;;  %v590_v46 = vcombine.high %v27_v42, %v27_v42  ;;  %v589_v48 = vcombine.low %v27_v42, %v27_v42 }
   0xb   :  { %v745_v26 = vld [vmem:[%s988_s1 + $0x30] sm:$0xff]   ;;  %v749_v30 = vld [vmem:[%s988_s1 + $0x38] sm:$0xff]   ;;  %v592_v47 = vcombine.high %v28_v43, %v28_v43  ;;  %v591_v49 = vcombine.low %v28_v43, %v28_v43  ;;  %v93_v53 = vld [vmem:[%s990_s2] sm:$0x7] }
   0xc   :  { %644 = vmatpush3.bf16.msra.mxu0 %v729_v10  ;;  %v746_v27 = vld [vmem:[%s988_s1 + $0xb0] sm:$0xff]   ;;  %v750_v31 = vld [vmem:[%s988_s1 + $0xb8] sm:$0xff]   ;;  %v934_v55 = vrot.slane %v93_v53, %v96_v52  ;;  %v938_v8 = vrot.slane %v93_v53, %v515_v61 }
   0xd   :  { %684 = vmatpush3.bf16.msra.mxu1 %v730_v11  ;;  %645 = vmatprep.subr.bf16.mxu0 %v731_v12  ;;  %v751_v32 = vld [vmem:[%s989_s0] ss:$16 sps:$4 sm:$0xff]   ;;  %v753_v33 = vld [vmem:[%s989_s0 + $0x4] ss:$16 sps:$4 sm:$0xff]   ;;  %v754_v34 = vld [vmem:[%s989_s0 + $0x8] ss:$16 sps:$4 sm:$0xff]   ;;  %v940_v12 = vrot.slane %v93_v53, %v526_v4 }
   0xe   :  { %685 = vmatprep.subr.bf16.mxu1 %v732_v13  ;;  %v756_v35 = vld [vmem:[%s989_s0 + $0xc] ss:$16 sps:$4 sm:$0xff]   ;;  %396 = vmatprep.mubr.bf16.mxu0 %v753_v33  ;;  %v757_v36 = vld [vmem:[%s989_s0 + $0x24] ss:$16 sps:$4 sm:$0xff]   ;;  %v761_v38 = vld [vmem:[%s989_s0 + $0x20] ss:$16 sps:$4 sm:$0xff]  }
   0xf   :  { %460 = vmatprep.mubr.bf16.mxu1 %v756_v35  ;;  %v759_v37 = vld [vmem:[%s989_s0 + $0x2c] ss:$16 sps:$4 sm:$0xff]   ;;  %v762_v39 = vld [vmem:[%s989_s0 + $0x28] ss:$16 sps:$4 sm:$0xff]   ;;  %v763_v40 = vld [vmem:[%s989_s0 + $0x44] ss:$16 sps:$4 sm:$0xff]  }
  0x10   :  { %646 = vmatpush3.bf16.msra.mxu0 %v733_v14  ;;  %v765_v41 = vld [vmem:[%s989_s0 + $0x4c] ss:$16 sps:$4 sm:$0xff]   ;;  %v767_v44 = vld [vmem:[%s989_s0 + $0x40] ss:$16 sps:$4 sm:$0xff]   ;;  %v768_v45 = vld [vmem:[%s989_s0 + $0x48] ss:$16 sps:$4 sm:$0xff]  }
  0x11   :  { %686 = vmatpush3.bf16.msra.mxu1 %v734_v15  ;;  %647 = vmatprep.subr.bf16.mxu0 %v735_v16 }
  0x12   :  { %687 = vmatprep.subr.bf16.mxu1 %v736_v17 }
  0x14   :  { %648 = vmatpush3.bf16.msra.mxu0 %v737_v18 }
  0x15   :  { %688 = vmatpush3.bf16.msra.mxu1 %v738_v19  ;;  %649 = vmatprep.subr.bf16.mxu0 %v739_v20 }
  0x16   :  { %689 = vmatprep.subr.bf16.mxu1 %v740_v21 }
  0x18   :  { %650 = vmatpush3.bf16.msra.mxu0 %v741_v22 }
  0x19   :  { %690 = vmatpush3.bf16.msra.mxu1 %v742_v23  ;;  %651 = vmatprep.subr.bf16.mxu0 %v743_v24 }
  0x1a   :  { %691 = vmatprep.subr.bf16.mxu1 %v744_v25 }
  0x1c   :  { %652 = vmatpush3.bf16.msra.mxu0 %v745_v26 }
  0x1d   :  { %692 = vmatpush3.bf16.msra.mxu1 %v746_v27  ;;  %653 = vmatprep.subr.bf16.mxu0 %v747_v28 }
  0x1e   :  { %693 = vmatprep.subr.bf16.mxu1 %v748_v29 }
  0x20   :  { %654 = vmatpush3.bf16.msra.mxu0 %v749_v30 }
  0x21   :  { %694 = vmatpush3.bf16.msra.mxu1 %v750_v31 }
  0x23   :  { %397 = vmatmul.mubr.bf16.vlgmr.msra.gmra.mrb[0].mxu0 %v751_v32 }
  0x24   :  { %461 = vmatmul.mubr.bf16.vlgmr.msra.gmra.mrb[0].mxu1 %v754_v34  ;;  %404 = vmatprep.mubr.bf16.mxu0 %v757_v36 }
  0x25   :  { %468 = vmatprep.mubr.bf16.mxu1 %v759_v37 }
  0x2b   :  { %405 = vmatmul.mubr.bf16.gmra.mrb[4].mxu0 %v761_v38 }
  0x2c   :  { %469 = vmatmul.mubr.bf16.gmra.mrb[4].mxu1 %v762_v39  ;;  %412 = vmatprep.mubr.bf16.mxu0 %v763_v40 }
  0x2d   :  { %476 = vmatprep.mubr.bf16.mxu1 %v765_v41 }
  0x33   :  { %413 = vmatmul.mubr.bf16.gmra.mrb[8].mxu0 %v767_v44 }
  0x34   :  { %477 = vmatmul.mubr.bf16.gmra.mrb[8].mxu1 %v768_v45  ;;  %420 = vmatprep.mubr.bf16.mxu0 %v590_v46 }
  0x35   :  { %484 = vmatprep.mubr.bf16.mxu1 %v592_v47 }
  0x3b   :  { %421 = vmatmul.mubr.bf16.gmra.mrb[12].mxu0 %v589_v48 }
  0x3c   :  { %485 = vmatmul.mubr.bf16.gmra.mrb[12].mxu1 %v591_v49 }
  0xf6   :  { %v655_v54 = vpop.f32.mrb[0].mxu0 }
  0xf7   :  { %v695_v56 = vpop.f32.mrb[0].mxu1  ;;  %v656_v57 = vpop.f32.mrb[1].mxu0 }
  0xf8   :  { %v657_v58 = vadd.f32 %v656_v57, %v655_v54  ;;  %v696_v59 = vpop.f32.mrb[1].mxu1  ;;  %v658_v60 = vpop.f32.mrb[2].mxu0 }
  0xf9   :  { %v697_v62 = vadd.f32 %v696_v59, %v695_v56  ;;  %v698_v63 = vpop.f32.mrb[2].mxu1  ;;  %v659_v0 = vpop.f32.mrb[3].mxu0 }
  0xfa   :  { %v399_v1 = vadd.f32 %v657_v58, %v934_v55  ;;  %v660_v2 = vadd.f32 %v659_v0, %v658_v60  ;;  %v699_v3 = vpop.f32.mrb[3].mxu1 }
  0xfb   :  { %v700_v5 = vadd.f32 %v699_v3, %v698_v63 }
  0xfc   :  { %v463_v6 = vadd.f32 %v697_v62, %v399_v1  ;;  %v402_v7 = vadd.f32 %v660_v2, %v934_v55 }
  0xfe   :  { %vm492_vm0 = vcmp.ge.f32.partialorder %v463_v6, 0.0  ;;  %v499_v9 = vmul.f32 0.01, %v463_v6  ;;  %v466_v10 = vadd.f32 %v700_v5, %v402_v7  ;;  %v661_v11 = vpop.f32.mrb[4].mxu0 }
  0xff   :  { %v701_v13 = vpop.f32.mrb[4].mxu1  ;;  %v662_v14 = vpop.f32.mrb[5].mxu0 }
 0x100   :  { %v506_v15 = vsel %vm492_vm0, %v463_v6, %v499_v9  ;;  %vm493_vm1 = vcmp.ge.f32.partialorder %v466_v10, 0.0  ;;  %v500_v16 = vmul.f32 0.01, %v466_v10  ;;  %v663_v17 = vadd.f32 %v662_v14, %v661_v11  ;;  %v702_v18 = vpop.f32.mrb[5].mxu1  ;;  %v664_v19 = vpop.f32.mrb[6].mxu0 }
 0x101   :  { %v517_v20 = vmul.f32 %v938_v8, %v506_v15  ;;  %v703_v21 = vadd.f32 %v702_v18, %v701_v13  ;;  %v704_v22 = vpop.f32.mrb[6].mxu1  ;;  %v665_v23 = vpop.f32.mrb[7].mxu0 }
 0x102   :  { %v507_v24 = vsel %vm493_vm1, %v466_v10, %v500_v16  ;;  %v407_v25 = vadd.f32 %v663_v17, %v934_v55  ;;  %v666_v26 = vadd.f32 %v665_v23, %v664_v19  ;;  %v705_v27 = vpop.f32.mrb[7].mxu1 }
 0x103   :  { %v528_v28 = vadd.f32 %v940_v12, %v517_v20  ;;  %v518_v29 = vmul.f32 %v938_v8, %v507_v24  ;;  %v706_v30 = vadd.f32 %v705_v27, %v704_v22 }
 0x104   :  { %v471_v31 = vadd.f32 %v703_v21, %v407_v25  ;;  %v410_v32 = vadd.f32 %v666_v26, %v934_v55 }
 0x105   :  { %v632_v33 = vpack.c.bf16 %v528_v28, %v528_v28  ;;  %v529_v34 = vadd.f32 %v940_v12, %v518_v29 }
 0x106   :  { %vm494_vm3 = vcmp.ge.f32.partialorder %v471_v31, 0.0  ;;  %v501_v35 = vmul.f32 0.01, %v471_v31  ;;  %v474_v36 = vadd.f32 %v706_v30, %v410_v32  ;;  %v667_v37 = vpop.f32.mrb[8].mxu0 }
 0x107   :  { %565 = vst.msk [vmem:[%s991_s3] sm:$0xf] %vm564_vm2, %v632_v33  ;;  %v633_v38 = vpack.c.bf16 %v529_v34, %v529_v34  ;;  %v707_v39 = vpop.f32.mrb[8].mxu1  ;;  %v668_v40 = vpop.f32.mrb[9].mxu0 }
 0x108   :  { %v508_v41 = vsel %vm494_vm3, %v471_v31, %v501_v35  ;;  %vm495_vm4 = vcmp.ge.f32.partialorder %v474_v36, 0.0  ;;  %v502_v42 = vmul.f32 0.01, %v474_v36  ;;  %v669_v43 = vadd.f32 %v668_v40, %v667_v37  ;;  %v708_v44 = vpop.f32.mrb[9].mxu1  ;;  %v670_v45 = vpop.f32.mrb[10].mxu0 }
 0x109   :  { %566 = vst.msk [vmem:[%s991_s3 + $0x4] sm:$0xf] %vm564_vm2, %v633_v38  ;;  %v519_v46 = vmul.f32 %v938_v8, %v508_v41  ;;  %v709_v47 = vadd.f32 %v708_v44, %v707_v39  ;;  %v710_v48 = vpop.f32.mrb[10].mxu1  ;;  %v671_v49 = vpop.f32.mrb[11].mxu0 }
 0x10a   :  { %v509_v50 = vsel %vm495_vm4, %v474_v36, %v502_v42  ;;  %v415_v51 = vadd.f32 %v669_v43, %v934_v55  ;;  %v672_v52 = vadd.f32 %v671_v49, %v670_v45  ;;  %v711_v53 = vpop.f32.mrb[11].mxu1 }
 0x10b   :  { %v530_v54 = vadd.f32 %v940_v12, %v519_v46  ;;  %v520_v56 = vmul.f32 %v938_v8, %v509_v50  ;;  %v712_v57 = vadd.f32 %v711_v53, %v710_v48 }
 0x10c   :  { %v479_v58 = vadd.f32 %v709_v47, %v415_v51  ;;  %v418_v59 = vadd.f32 %v672_v52, %v934_v55 }
 0x10d   :  { %v634_v60 = vpack.c.bf16 %v530_v54, %v530_v54  ;;  %v531_v61 = vadd.f32 %v940_v12, %v520_v56 }
 0x10e   :  { %vm496_vm5 = vcmp.ge.f32.partialorder %v479_v58, 0.0  ;;  %v503_v62 = vmul.f32 0.01, %v479_v58  ;;  %v482_v63 = vadd.f32 %v712_v57, %v418_v59  ;;  %v673_v0 = vpop.f32.mrb[12].mxu0 }
 0x10f   :  { %567 = vst.msk [vmem:[%s991_s3 + $0x8] sm:$0xf] %vm564_vm2, %v634_v60  ;;  %v635_v1 = vpack.c.bf16 %v531_v61, %v531_v61  ;;  %v713_v2 = vpop.f32.mrb[12].mxu1  ;;  %v674_v3 = vpop.f32.mrb[13].mxu0 }
 0x110   :  { %v510_v4 = vsel %vm496_vm5, %v479_v58, %v503_v62  ;;  %vm497_vm6 = vcmp.ge.f32.partialorder %v482_v63, 0.0  ;;  %v504_v5 = vmul.f32 0.01, %v482_v63  ;;  %v675_v6 = vadd.f32 %v674_v3, %v673_v0  ;;  %v714_v7 = vpop.f32.mrb[13].mxu1  ;;  %v676_v9 = vpop.f32.mrb[14].mxu0 }
 0x111   :  { %568 = vst.msk [vmem:[%s991_s3 + $0xc] sm:$0xf] %vm564_vm2, %v635_v1  ;;  %v521_v10 = vmul.f32 %v938_v8, %v510_v4  ;;  %v715_v11 = vadd.f32 %v714_v7, %v713_v2  ;;  %v716_v13 = vpop.f32.mrb[14].mxu1  ;;  %v677_v14 = vpop.f32.mrb[15].mxu0 }
 0x112   :  { %v511_v15 = vsel %vm497_vm6, %v482_v63, %v504_v5  ;;  %v423_v16 = vadd.f32 %v675_v6, %v934_v55  ;;  %v717_v17 = vpop.f32.mrb[15].mxu1 }
 0x113   :  { %v532_v18 = vadd.f32 %v940_v12, %v521_v10  ;;  %v522_v19 = vmul.f32 %v938_v8, %v511_v15 }
 0x114   :  { %v487_v20 = vadd.f32 %v715_v11, %v423_v16 }
 0x115   :  { %v636_v21 = vpack.c.bf16 %v532_v18, %v532_v18  ;;  %v533_v22 = vadd.f32 %v940_v12, %v522_v19 }
 0x116   :  { %vm498_vm7 = vcmp.ge.f32.partialorder %v487_v20, 0.0  ;;  %v505_v23 = vmul.f32 0.01, %v487_v20 }
 0x117   :  { %569 = vst.msk [vmem:[%s991_s3 + $0x10] sm:$0xf] %vm564_vm2, %v636_v21  ;;  %v637_v24 = vpack.c.bf16 %v533_v22, %v533_v22 }
 0x118   :  { %v512_v25 = vsel %vm498_vm7, %v487_v20, %v505_v23 }
 0x119   :  { %570 = vst.msk [vmem:[%s991_s3 + $0x14] sm:$0xf] %vm564_vm2, %v637_v24  ;;  %v523_v55 = vmul.f32 %v938_v8, %v512_v25 }
 0x11b   :  { %v534_v26 = vadd.f32 %v940_v12, %v523_v55 }
 0x11d   :  { %v638_v27 = vpack.c.bf16 %v534_v26, %v534_v26 }
 0x11f   :  { %572 = vst.msk [vmem:[%s991_s3 + $0x18] sm:$0x1] %vm571_vm8, %v638_v27 }

// kernel: encoder_forward.7
= control target key start
LH: loop header
LB: loop body
LE: loop exit
PB: predicated region body
PF: predicated region fallthrough
CT: control target
= control target key end

     0   :  { %v76_v29 = vlaneseq  ;;  %v1126_v30 = vmov 1966171168   ;;  %vm386_vm0 = vcmask 588800   ;;  %vm390_vm1 = vcmask 1043456   ;;  %s1434_s1 = inlined_call_operand.vmem [shape: bf16[200,450], index: 1, kind: input, shape index: {}]   ;;  %s1435_s0 = inlined_call_operand.vmem [shape: bf16[2,200], index: 0, kind: input, shape index: {}]   ;;  %s1436_s3 = inlined_call_operand.vmem [shape: bf16[450,128], index: 3, kind: input, shape index: {}]   ;;  %s1437_s2 = inlined_call_operand.vmem [shape: f32[3,450], index: 2, kind: input, shape index: {}]   ;;  %s1438_s4 = inlined_call_operand.vmem [shape: f32[1,128], index: 4, kind: input, shape index: {}]   ;;  %s1439_s5 = inlined_call_operand.vmem [shape: f32[2,128], index: 5, kind: output, shape index: {}]  }
   0x1   :  { %v1021_v0 = vld [vmem:[%s1434_s1 + $0x4] ss:$16 sps:$4 sm:$0xff]   ;;  %v1023_v1 = vld [vmem:[%s1434_s1 + $0xc] ss:$16 sps:$4 sm:$0xff]   ;;  %v1025_v2 = vld [vmem:[%s1434_s1] ss:$16 sps:$4 sm:$0xff]   ;;  %v122_v31 = vunpack.c.l.s4 %v1126_v30 }
   0x2   :  { %403 = vmatprep.subr.bf16.mxu0 %v1021_v0  ;;  %v1026_v3 = vld [vmem:[%s1434_s1 + $0x8] ss:$16 sps:$4 sm:$0xff]   ;;  %444 = vmatprep.subr.bf16.mxu1 %v1023_v1  ;;  %v1027_v4 = vld [vmem:[%s1434_s1 + $0x24] ss:$16 sps:$4 sm:$0xff]   ;;  %v1029_v5 = vld [vmem:[%s1434_s1 + $0x2c] ss:$16 sps:$4 sm:$0xff]  }
   0x3   :  { %404 = vmatpush1.bf16.msra.mxu0 %v1025_v2  ;;  %445 = vmatpush1.bf16.msra.mxu1 %v1026_v3  ;;  %v1031_v6 = vld [vmem:[%s1434_s1 + $0x20] ss:$16 sps:$4 sm:$0xff]   ;;  %v1032_v7 = vld [vmem:[%s1434_s1 + $0x28] ss:$16 sps:$4 sm:$0xff]   ;;  %v1033_v8 = vld [vmem:[%s1434_s1 + $0x44] ss:$16 sps:$4 sm:$0xff]   ;;  %v123_v37 = vunpack.c.0.s8 %v122_v31 }
   0x4   :  { %405 = vmatprep.subr.bf16.mxu0 %v1027_v4  ;;  %446 = vmatprep.subr.bf16.mxu1 %v1029_v5  ;;  %v1035_v9 = vld [vmem:[%s1434_s1 + $0x4c] ss:$16 sps:$4 sm:$0xff]   ;;  %v1037_v10 = vld [vmem:[%s1434_s1 + $0x40] ss:$16 sps:$4 sm:$0xff]   ;;  %v1038_v11 = vld [vmem:[%s1434_s1 + $0x48] ss:$16 sps:$4 sm:$0xff]  }
   0x5   :  { %v1039_v12 = vld [vmem:[%s1434_s1 + $0x64] ss:$16 sps:$4 sm:$0xff]   ;;  %v1041_v13 = vld [vmem:[%s1434_s1 + $0x6c] ss:$16 sps:$4 sm:$0xff]   ;;  %v1043_v14 = vld [vmem:[%s1434_s1 + $0x60] ss:$16 sps:$4 sm:$0xff]  }
   0x6   :  { %v1044_v15 = vld [vmem:[%s1434_s1 + $0x68] ss:$16 sps:$4 sm:$0xff]   ;;  %v1045_v16 = vld [vmem:[%s1434_s1 + $0x84] ss:$16 sps:$4 sm:$0xff]   ;;  %v1047_v17 = vld [vmem:[%s1434_s1 + $0x8c] ss:$16 sps:$4 sm:$0xff]  }
   0x7   :  { %406 = vmatpush1.bf16.msra.mxu0 %v1031_v6  ;;  %447 = vmatpush1.bf16.msra.mxu1 %v1032_v7  ;;  %v1049_v18 = vld [vmem:[%s1434_s1 + $0x80] ss:$16 sps:$4 sm:$0xff]   ;;  %v1050_v19 = vld [vmem:[%s1434_s1 + $0x88] ss:$16 sps:$4 sm:$0xff]   ;;  %v1051_v20 = vld [vmem:[%s1434_s1 + $0xa4] ss:$16 sps:$4 sm:$0xff]  }
   0x8   :  { %407 = vmatprep.subr.bf16.mxu0 %v1033_v8  ;;  %448 = vmatprep.subr.bf16.mxu1 %v1035_v9  ;;  %v1053_v21 = vld [vmem:[%s1434_s1 + $0xac] ss:$16 sps:$4 sm:$0xff]   ;;  %v1055_v22 = vld [vmem:[%s1434_s1 + $0xa0] ss:$16 sps:$4 sm:$0xff]   ;;  %v1056_v23 = vld [vmem:[%s1434_s1 + $0xa8] ss:$16 sps:$4 sm:$0xff]  }
   0x9   :  { %v1057_v24 = vld [vmem:[%s1434_s1 + $0xc4] ss:$16 sps:$4 sm:$0xff]   ;;  %v1059_v25 = vld [vmem:[%s1434_s1 + $0xcc] ss:$16 sps:$4 sm:$0xff]   ;;  %v1061_v26 = vld [vmem:[%s1434_s1 + $0xc0] ss:$16 sps:$4 sm:$0xff]  }
   0xa   :  { %v1062_v27 = vld [vmem:[%s1434_s1 + $0xc8] ss:$16 sps:$4 sm:$0xff]   ;;  %v1063_v28 = vld [vmem:[%s1434_s1 + $0xe4] ss:$16 sps:$4 sm:$0xff]   ;;  %v1065_v32 = vld [vmem:[%s1434_s1 + $0xec] ss:$16 sps:$4 sm:$0xff]  }
   0xb   :  { %408 = vmatpush1.bf16.msra.mxu0 %v1037_v10  ;;  %449 = vmatpush1.bf16.msra.mxu1 %v1038_v11  ;;  %v1067_v33 = vld [vmem:[%s1434_s1 + $0xe0] ss:$16 sps:$4 sm:$0xff]   ;;  %v1068_v34 = vld [vmem:[%s1434_s1 + $0xe8] ss:$16 sps:$4 sm:$0xff]   ;;  %v1069_v35 = vld [vmem:[%s1434_s1 + $0x104] ss:$16 sps:$4 sm:$0xff]  }
   0xc   :  { %409 = vmatprep.subr.bf16.mxu0 %v1039_v12  ;;  %450 = vmatprep.subr.bf16.mxu1 %v1041_v13  ;;  %v1257_v36 = vshrl.u32 %v76_v29, 7  ;;  %v1071_v38 = vld [vmem:[%s1434_s1 + $0x10c] ss:$16 sps:$4 sm:$0xff]   ;;  %v1073_v39 = vld [vmem:[%s1434_s1 + $0x100] ss:$16 sps:$4 sm:$0xff]   ;;  %v1127_v5 = vmov 0  }
   0xd   :  { %v1074_v40 = vld [vmem:[%s1434_s1 + $0x108] ss:$16 sps:$4 sm:$0xff]   ;;  %v1075_v41 = vld [vmem:[%s1434_s1 + $0x124] ss:$16 sps:$4 sm:$0xff]   ;;  %v1077_v44 = vld [vmem:[%s1434_s1 + $0x12c] ss:$16 sps:$4 sm:$0xff]  }
   0xe   :  { %v909_v42 = vld.sshfl [vmem:[%s1435_s0] sm:$0x11 pattern:$0x75316420]  ;;  %v126_v43 = vsub.s32 %v123_v37, %v1257_v36  ;;  %v1080_v47 = vld [vmem:[%s1434_s1 + $0x128] ss:$16 sps:$4 sm:$0xff]  }
   0xf   :  { %410 = vmatpush1.bf16.msra.mxu0 %v1043_v14  ;;  %451 = vmatpush1.bf16.msra.mxu1 %v1044_v15  ;;  %v1079_v45 = vld [vmem:[%s1434_s1 + $0x120] ss:$16 sps:$4 sm:$0xff]   ;;  %v120_v46 = vcombine.high %v909_v42, %v909_v42  ;;  %v1081_v48 = vld [vmem:[%s1434_s1 + $0x144] ss:$16 sps:$4 sm:$0xff]   ;;  %v1083_v50 = vld [vmem:[%s1434_s1 + $0x14c] ss:$16 sps:$4 sm:$0xff]  }
  0x10   :  { %411 = vmatprep.subr.bf16.mxu0 %v1045_v16  ;;  %452 = vmatprep.subr.bf16.mxu1 %v1047_v17  ;;  %v1085_v51 = vld [vmem:[%s1434_s1 + $0x140] ss:$16 sps:$4 sm:$0xff]   ;;  %v1086_v52 = vld [vmem:[%s1434_s1 + $0x148] ss:$16 sps:$4 sm:$0xff]   ;;  %v1087_v53 = vld [vmem:[%s1434_s1 + $0x164] ss:$16 sps:$4 sm:$0xff]   ;;  %v127_v2 = vrot.slane %v909_v42, %v126_v43 }
  0x11   :  { %v134_v49 = vrot.slane %v120_v46, %v126_v43  ;;  %v1089_v54 = vld [vmem:[%s1434_s1 + $0x16c] ss:$16 sps:$4 sm:$0xff]   ;;  %v70_v55 = vld [vmem:[%s1434_s1 + $0x180] sm:$0xff]  ;;  %v1092_v58 = vld [vmem:[%s1434_s1 + $0x168] ss:$16 sps:$4 sm:$0xff]   ;;  %vm820_vm2 = vcmask 1040384  }
  0x12   :  { %v71_v56 = vld [vmem:[%s1434_s1 + $0x188] sm:$0xff]  ;;  %v1091_v57 = vld [vmem:[%s1434_s1 + $0x160] ss:$16 sps:$4 sm:$0xff]   ;;  %v958_v59 = vcombine.low %v70_v55, %v70_v55  ;;  %v959_v60 = vcombine.high %v70_v55, %v70_v55  ;;  %v1111_v12 = vld [vmem:[%s1436_s3 + $0x58] sm:$0xff]   ;;  %v82_v37 = vsub.s32 4, %v1257_v36  ;;  %vm816_vm7 = vcmask 539648  }
  0x13   :  { %412 = vmatpush1.bf16.msra.mxu0 %v1049_v18  ;;  %453 = vmatpush1.bf16.msra.mxu1 %v1050_v19  ;;  %v961_v61 = vcombine.high %v71_v56, %v71_v56  ;;  %v960_v62 = vcombine.low %v71_v56, %v71_v56  ;;  %v1102_v1 = vld [vmem:[%s1436_s3 + $0x40] sm:$0xff]   ;;  %v1105_v6 = vld [vmem:[%s1436_s3 + $0x48] sm:$0xff]   ;;  %v1108_v9 = vld [vmem:[%s1436_s3 + $0x50] sm:$0xff]  }
  0x14   :  { %413 = vmatprep.subr.bf16.mxu0 %v1051_v20  ;;  %454 = vmatprep.subr.bf16.mxu1 %v1053_v21  ;;  %v392_v63 = vsel %vm390_vm1, %v958_v59, 0  ;;  %v1097_v3 = vld [vmem:[%s1436_s3 + $0x80] sm:$0xff]   ;;  %v1098_v7 = vld [vmem:[%s1436_s3 + $0x88] sm:$0xff]   ;;  %v1099_v10 = vld [vmem:[%s1436_s3 + $0x90] sm:$0xff]  }
  0x15   :  { %963 = vmatprep.mubr.msk.bf16.mxu0 %vm386_vm0, %v134_v49  ;;  %965 = vmatprep.mubr.msk.bf16.mxu1 %vm386_vm0, %v134_v49  ;;  %v398_v0 = vsel %vm390_vm1, %v960_v62, 0  ;;  %v1103_v4 = vld [vmem:[%s1436_s3] sm:$0xff]   ;;  %v1106_v8 = vld [vmem:[%s1436_s3 + $0x8] sm:$0xff]   ;;  %v1109_v11 = vld [vmem:[%s1436_s3 + $0x10] sm:$0xff]  }
  0x16   :  { %v1100_v13 = vld [vmem:[%s1436_s3 + $0x98] sm:$0xff]   ;;  %v1114_v15 = vld [vmem:[%s1436_s3 + $0x60] sm:$0xff]   ;;  %v1104_v18 = vld [vmem:[%s1436_s3 + $0xa8] sm:$0xff]  }
  0x17   :  { %414 = vmatpush1.bf16.msra.mxu0 %v1055_v22  ;;  %455 = vmatpush1.bf16.msra.mxu1 %v1056_v23  ;;  %v1112_v14 = vld [vmem:[%s1436_s3 + $0x18] sm:$0xff]   ;;  %v1101_v16 = vld [vmem:[%s1436_s3 + $0xa0] sm:$0xff]   ;;  %v1107_v19 = vld [vmem:[%s1436_s3 + $0xb0] sm:$0xff]  }
  0x18   :  { %415 = vmatprep.subr.bf16.mxu0 %v1057_v24  ;;  %456 = vmatprep.subr.bf16.mxu1 %v1059_v25  ;;  %v1115_v17 = vld [vmem:[%s1436_s3 + $0x20] sm:$0xff]   ;;  %v1110_v20 = vld [vmem:[%s1436_s3 + $0xb8] sm:$0xff]   ;;  %v1116_v22 = vld [vmem:[%s1436_s3 + $0xc8] sm:$0xff]  }
  0x19   :  { %v1113_v21 = vld [vmem:[%s1436_s3 + $0xc0] sm:$0xff]   ;;  %v1117_v23 = vld [vmem:[%s1436_s3 + $0x68] sm:$0xff]   ;;  %v1119_v25 = vld [vmem:[%s1436_s3 + $0xd0] sm:$0xff]  }
  0x1a   :  { %v1118_v24 = vld [vmem:[%s1436_s3 + $0x28] sm:$0xff]   ;;  %v1123_v29 = vld [vmem:[%s1436_s3 + $0x78] sm:$0xff]   ;;  %v1125_v30 = vld [vmem:[%s1436_s3 + $0xe0] ss:$0 sps:$4 sm:$0x11]  }
  0x1b   :  { %416 = vmatpush1.bf16.msra.mxu0 %v1061_v26  ;;  %457 = vmatpush1.bf16.msra.mxu1 %v1062_v27  ;;  %v1120_v26 = vld [vmem:[%s1436_s3 + $0x70] sm:$0xff]   ;;  %v1124_v31 = vld [vmem:[%s1436_s3 + $0x38] sm:$0xff]  }
  0x1c   :  { %417 = vmatprep.subr.bf16.mxu0 %v1063_v28  ;;  %458 = vmatprep.subr.bf16.mxu1 %v1065_v32  ;;  %v1121_v27 = vld [vmem:[%s1436_s3 + $0x30] sm:$0xff]   ;;  %v1122_v28 = vld [vmem:[%s1436_s3 + $0xd8] sm:$0xff]   ;;  %v822_v32 = vsel %vm820_vm2, %v1125_v30, 0 }
  0x1f   :  { %418 = vmatpush1.bf16.msra.mxu0 %v1067_v33  ;;  %459 = vmatpush1.bf16.msra.mxu1 %v1068_v34  ;;  %v78_v33 = vsub.s32 0, %v1257_v36  ;;  %v72_v34 = vld [vmem:[%s1437_s2] sm:$0x77] }
  0x20   :  { %419 = vmatprep.subr.bf16.mxu0 %v1069_v35  ;;  %460 = vmatprep.subr.bf16.mxu1 %v1071_v38  ;;  %v73_v35 = vld [vmem:[%s1437_s2 + $0x8] sm:$0x77]  ;;  %v499_v38 = vsub.s32 1, %v1257_v36  ;;  %v83_v42 = vrot.slane %v72_v34, %v82_v37 }
  0x21   :  { %v91_v43 = vrot.slane %v73_v35, %v82_v37 }
  0x22   :  { %v508_v46 = vrot.slane %v73_v35, %v499_v38 }
  0x23   :  { %420 = vmatpush1.bf16.msra.mxu0 %v1073_v39  ;;  %461 = vmatpush1.bf16.msra.mxu1 %v1074_v40  ;;  %v503_v39 = vsub.s32 5, %v1257_v36  ;;  %v79_v40 = vrot.slane %v72_v34, %v78_v33 }
  0x24   :  { %421 = vmatprep.subr.bf16.mxu0 %v1075_v41  ;;  %462 = vmatprep.subr.bf16.mxu1 %v1077_v44  ;;  %v87_v41 = vrot.slane %v73_v35, %v78_v33  ;;  %v539_v44 = vsub.s32 2, %v1257_v36  ;;  %v528_v59 = vrot.slane %v508_v46, %v499_v38 }
  0x25   :  { %v99_v49 = vrot.slane %v79_v40, %v78_v33 }
  0x26   :  { %v548_v55 = vrot.slane %v73_v35, %v539_v44 }
  0x27   :  { %422 = vmatpush1.bf16.msra.mxu0 %v1079_v45  ;;  %463 = vmatpush1.bf16.msra.mxu1 %v1080_v47  ;;  %v500_v45 = vrot.slane %v72_v34, %v499_v38  ;;  %v504_v47 = vrot.slane %v72_v34, %v503_v39 }
  0x28   :  { %423 = vmatprep.subr.bf16.mxu0 %v1081_v48  ;;  %464 = vmatprep.subr.bf16.mxu1 %v1083_v50  ;;  %v512_v48 = vrot.slane %v73_v35, %v503_v39  ;;  %v107_v50 = vrot.slane %v87_v41, %v78_v33 }
  0x2b   :  { %424 = vmatpush1.bf16.msra.mxu0 %v1085_v51  ;;  %465 = vmatpush1.bf16.msra.mxu1 %v1086_v52  ;;  %v543_v51 = vsub.s32 6, %v1257_v36  ;;  %v103_v52 = vrot.slane %v83_v42, %v78_v33 }
  0x2c   :  { %425 = vmatprep.subr.bf16.mxu0 %v1087_v53  ;;  %466 = vmatprep.subr.bf16.mxu1 %v1089_v54  ;;  %v111_v53 = vrot.slane %v91_v43, %v78_v33  ;;  %v540_v54 = vrot.slane %v72_v34, %v539_v44 }
  0x2f   :  { %426 = vmatpush1.bf16.msra.mxu0 %v1091_v57  ;;  %467 = vmatpush1.bf16.msra.mxu1 %v1092_v58  ;;  %v520_v57 = vrot.slane %v500_v45, %v499_v38 }
  0x30   :  { %962 = vmatprep.subr.msk.bf16.mxu0 %vm390_vm1, %v959_v60  ;;  %964 = vmatprep.subr.msk.bf16.mxu1 %vm390_vm1, %v961_v61  ;;  %v524_v60 = vrot.slane %v504_v47, %v499_v38  ;;  %v532_v61 = vrot.slane %v512_v48, %v499_v38 }
  0x33   :  { %428 = vmatpush1.bf16.msra.mxu0 %v392_v63  ;;  %469 = vmatpush1.bf16.msra.mxu1 %v398_v0 }
  0x34   :  { %864 = vmatprep.subr.bf16.mxu1 %v1127_v5  ;;  %997 = vmatprep.subr.bf16.mxu0 %v1102_v1 }
  0x36   :  { %436 = vmatmul.mubr.bf16.vlgmr.msra.gmra.mrb[0].mxu0 %v127_v2  ;;  %477 = vmatmul.mubr.bf16.vlgmr.msra.gmra.mrb[0].mxu1 %v127_v2  ;;  %v544_v2 = vrot.slane %v72_v34, %v543_v51 }
  0x37   :  { %865 = vmatpush1.bf16.msra.mxu1 %v1097_v3  ;;  %998 = vmatpush3.bf16.msra.mxu0 %v1103_v4  ;;  %v552_v3 = vrot.slane %v73_v35, %v543_v51  ;;  %v966_v35 = vld [vmem:[%s1438_s4] ss:$0 sm:$0xff] }
  0x38   :  { %866 = vmatprep.subr.bf16.mxu1 %v1127_v5  ;;  %999 = vmatprep.subr.bf16.mxu0 %v1105_v6 }
  0x3b   :  { %867 = vmatpush1.bf16.msra.mxu1 %v1098_v7  ;;  %1000 = vmatpush3.bf16.msra.mxu0 %v1106_v8  ;;  %v560_v7 = vrot.slane %v540_v54, %v539_v44  ;;  %v568_v8 = vrot.slane %v548_v55, %v539_v44 }
  0x3c   :  { %868 = vmatprep.subr.bf16.mxu1 %v1127_v5  ;;  %1001 = vmatprep.subr.bf16.mxu0 %v1108_v9 }
  0x3f   :  { %869 = vmatpush1.bf16.msra.mxu1 %v1099_v10  ;;  %1002 = vmatpush3.bf16.msra.mxu0 %v1109_v11 }
  0x40   :  { %870 = vmatprep.subr.bf16.mxu1 %v1127_v5  ;;  %1003 = vmatprep.subr.bf16.mxu0 %v1111_v12 }
  0x43   :  { %871 = vmatpush1.bf16.msra.mxu1 %v1100_v13  ;;  %1004 = vmatpush3.bf16.msra.mxu0 %v1112_v14 }
  0x44   :  { %872 = vmatprep.subr.bf16.mxu1 %v1127_v5  ;;  %1005 = vmatprep.subr.bf16.mxu0 %v1114_v15 }
  0x47   :  { %873 = vmatpush1.bf16.msra.mxu1 %v1101_v16  ;;  %1006 = vmatpush3.bf16.msra.mxu0 %v1115_v17  ;;  %v564_v17 = vrot.slane %v544_v2, %v539_v44 }
  0x48   :  { %874 = vmatprep.subr.bf16.mxu1 %v1127_v5  ;;  %1007 = vmatprep.subr.bf16.mxu0 %v1117_v23 }
  0x4b   :  { %875 = vmatpush1.bf16.msra.mxu1 %v1104_v18  ;;  %1008 = vmatpush3.bf16.msra.mxu0 %v1118_v24  ;;  %v572_v18 = vrot.slane %v552_v3, %v539_v44 }
  0x4c   :  { %876 = vmatprep.subr.bf16.mxu1 %v1127_v5  ;;  %1009 = vmatprep.subr.bf16.mxu0 %v1120_v26 }
  0x4f   :  { %877 = vmatpush1.bf16.msra.mxu1 %v1107_v19  ;;  %1010 = vmatpush3.bf16.msra.mxu0 %v1121_v27 }
  0x50   :  { %878 = vmatprep.subr.bf16.mxu1 %v1127_v5  ;;  %1011 = vmatprep.subr.bf16.mxu0 %v1123_v29 }
  0x53   :  { %879 = vmatpush1.bf16.msra.mxu1 %v1110_v20  ;;  %1012 = vmatpush3.bf16.msra.mxu0 %v1124_v31 }
  0x54   :  { %880 = vmatprep.subr.bf16.mxu1 %v1127_v5 }
  0x57   :  { %881 = vmatpush1.bf16.msra.mxu1 %v1113_v21 }
  0x58   :  { %882 = vmatprep.subr.bf16.mxu1 %v1127_v5 }
  0x5b   :  { %883 = vmatpush1.bf16.msra.mxu1 %v1116_v22 }
  0x5c   :  { %884 = vmatprep.subr.bf16.mxu1 %v1127_v5 }
  0x5f   :  { %885 = vmatpush1.bf16.msra.mxu1 %v1119_v25 }
  0x60   :  { %886 = vmatprep.subr.bf16.mxu1 %v1127_v5 }
  0x63   :  { %887 = vmatpush1.bf16.msra.mxu1 %v1122_v28 }
  0x64   :  { %888 = vmatprep.subr.bf16.mxu1 %v1127_v5 }
  0x67   :  { %889 = vmatpush1.bf16.msra.mxu1 %v822_v32 }
 0x109   :  { %v437_v56 = vpop.f32.mrb[0].mxu0  ;;  %v478_v58 = vpop.f32.mrb[0].mxu1 }
 0x10a   :  { %v438_v62 = vadd.f32 %v437_v56, %v99_v49  ;;  %v479_v63 = vadd.f32 %v478_v58, %v107_v50  ;;  %v439_v0 = vpop.f32.mrb[1].mxu0  ;;  %v480_v1 = vpop.f32.mrb[1].mxu1 }
 0x10b   :  { %v440_v4 = vadd.f32 %v439_v0, %v103_v52  ;;  %v481_v5 = vadd.f32 %v480_v1, %v111_v53  ;;  %v441_v6 = vpop.f32.mrb[2].mxu0  ;;  %v482_v36 = vpop.f32.mrb[2].mxu1 }
 0x10c   :  { %vm485_vm3 = vcmp.ge.f32.partialorder %v438_v62, 0.0  ;;  %v489_v9 = vmul.f32 0.01, %v438_v62  ;;  %vm487_vm4 = vcmp.ge.f32.partialorder %v479_v63, 0.0  ;;  %v491_v10 = vmul.f32 0.01, %v479_v63 }
 0x10d   :  { %vm486_vm5 = vcmp.ge.f32.partialorder %v440_v4, 0.0  ;;  %v490_v11 = vmul.f32 0.01, %v440_v4  ;;  %vm488_vm6 = vcmp.ge.f32.partialorder %v481_v5, 0.0  ;;  %v492_v12 = vmul.f32 0.01, %v481_v5 }
 0x10e   :  { %v493_v13 = vsel %vm485_vm3, %v438_v62, %v489_v9  ;;  %v495_v14 = vsel %vm487_vm4, %v479_v63, %v491_v10  ;;  %v442_v15 = vpop.f32.mrb[3].mxu0  ;;  %v483_v16 = vpop.f32.mrb[3].mxu1 }
 0x10f   :  { %v533_v19 = vmul.f32 %v520_v57, %v493_v13  ;;  %v535_v20 = vmul.f32 %v528_v59, %v495_v14  ;;  %v494_v21 = vsel %vm486_vm5, %v440_v4, %v490_v11  ;;  %v496_v22 = vsel %vm488_vm6, %v481_v5, %v492_v12 }
 0x110   :  { %v534_v23 = vmul.f32 %v524_v60, %v494_v21  ;;  %v536_v24 = vmul.f32 %v532_v61, %v496_v22 }
 0x111   :  { %v573_v25 = vadd.f32 %v560_v7, %v533_v19  ;;  %v575_v26 = vadd.f32 %v568_v8, %v535_v20 }
 0x112   :  { %v574_v27 = vadd.f32 %v564_v17, %v534_v23  ;;  %v576_v28 = vadd.f32 %v572_v18, %v536_v24 }
 0x113   :  { %v579_v29 = vpack.c.bf16 %v575_v26, %v575_v26  ;;  %v577_v32 = vpack.c.bf16 %v573_v25, %v573_v25 }
 0x114   :  { %v578_v30 = vpack.c.bf16 %v574_v27, %v574_v27  ;;  %v580_v31 = vpack.c.bf16 %v576_v28, %v576_v28 }
 0x116   :  { %856 = vmatprep.mubr.bf16.mxu0 %v578_v30  ;;  %996 = vmatprep.mubr.msk.bf16.mxu1 %vm816_vm7, %v580_v31 }
 0x117   :  { %857 = vmatmul.mubr.bf16.vlgmr.msra.gmra.mrb[4].mxu0 %v577_v32  ;;  %897 = vmatmul.mubr.bf16.vlgmr.msra.gmra.mrb[4].mxu1 %v579_v29 }
 0x1ea   :  { %v1013_v33 = vpop.f32.mrb[4].mxu0  ;;  %v898_v34 = vpop.f32.mrb[4].mxu1 }
 0x1eb   :  { %v1014_v37 = vpop.f32.mrb[5].mxu0  ;;  %v900_v38 = vpop.f32.mrb[5].mxu1 }
 0x1ec   :  { %v1015_v39 = vadd.f32 %v1014_v37, %v1013_v33  ;;  %v1016_v40 = vpop.f32.mrb[6].mxu0  ;;  %v901_v41 = vpop.f32.mrb[6].mxu1 }
 0x1ed   :  { %v1017_v42 = vpop.f32.mrb[7].mxu0  ;;  %v902_v43 = vpop.f32.mrb[7].mxu1 }
 0x1ee   :  { %v859_v44 = vadd.f32 %v1015_v39, %v966_v35 }
 0x1f0   :  { %v899_v45 = vadd.f32 %v898_v34, %v859_v44 }
 0x1f2   :  { %904 = vst [vmem:[%s1439_s5] sm:$0x3] %v899_v45 }

</bundles_post_ra>
